<compile_context>
chip_gen: v7x
topology: tpu7x:2x2x1
jax: 0.10.0
libtpu: 0.0.40
codegen_flags: <defaults>
</compile_context>

<pallas_src>
import jax
import jax.numpy as jnp
from jax.experimental import pallas as pl
from jax.experimental.pallas import tpu as pltpu


# ---------------------------------------------------------------------------
# Kernels
# ---------------------------------------------------------------------------
def _ffn_resident_kernel(x_ref, w1_ref, b1_ref, w2_ref, b2_ref, o_ref):
    """Weights fully VMEM-resident; one grid axis over row tiles."""
    # (tm, d_model) @ (d_model, d_ff) -> f32 (tm, d_ff)
    h = jnp.dot(x_ref[...], w1_ref[...], preferred_element_type=jnp.float32)
    h = jnp.maximum(h + b1_ref[...], 0.0)  # bias + ReLU
    # (tm, d_ff) @ (d_ff, d_model) -> f32 (tm, d_model)
    o = jnp.dot(h.astype(w2_ref.dtype), w2_ref[...],
                preferred_element_type=jnp.float32)
    o_ref[...] = (o + b2_ref[...]).astype(o_ref.dtype)


def _ffn_streamed_kernel(x_ref, w1_ref, b1_ref, w2_ref, b2_ref, o_ref, acc_ref):
    """Fallback: weights streamed per d_ff tile, f32 accumulation in scratch."""
    j = pl.program_id(1)

    @pl.when(j == 0)
    def _():
        acc_ref[...] = jnp.zeros_like(acc_ref)

    h = jnp.dot(x_ref[...], w1_ref[...], preferred_element_type=jnp.float32)
    h = jnp.maximum(h + b1_ref[...], 0.0)
    acc_ref[...] += jnp.dot(h.astype(w2_ref.dtype), w2_ref[...],
                            preferred_element_type=jnp.float32)

    @pl.when(j == pl.num_programs(1) - 1)
    def _():
        o_ref[...] = (acc_ref[...] + b2_ref[...]).astype(o_ref.dtype)


# ---------------------------------------------------------------------------
# Wrapper
# ---------------------------------------------------------------------------
def _vmem_budget_bytes():
    """~75% of physical VMEM; conservative 64 MiB (v7x per-TC) if unknown."""
    try:
        phys = pltpu.get_tpu_info().vmem_capacity_bytes
    except Exception:
        phys = 64 * 1024 * 1024
    return int(phys * 0.75)


def _pick_row_tile(M, tm):
    """Sublane-aligned row tile; prefer >=2 row tiles for megacore sharding."""
    tm = min(tm, max(8, pl.next_power_of_2(M)))
    if M > 8 and pl.cdiv(M, tm) < 2:
        tm = max(8, tm // 2)
    return tm


def feed_forward_network(x, w1, b1, w2, b2, *, tm=256, tf=1024):
    """Pallas port of FeedForwardNetwork.forward.

    x : (B, L, d_model)
    w1: (d_model, d_ff)   b1: (d_ff,)     (math layout, i.e. PyTorch weight.T)
    w2: (d_ff, d_model)   b2: (d_model,)
    returns (B, L, d_model)
    """
    B, L, d_model = x.shape
    d_ff = w1.shape[1]
    assert w1.shape == (d_model, d_ff)
    assert w2.shape == (d_ff, d_model)
    assert b1.shape == (d_ff,) and b2.shape == (d_model,)

    M = B * L
    x2 = x.reshape(M, d_model)

    tm = _pick_row_tile(M, tm)
    Mp = pl.cdiv(M, tm) * tm
    if Mp != M:  # rare with the tile picker above; pad only when needed
        x2 = jnp.pad(x2, ((0, Mp - M), (0, 0)))

    b1_2d = b1.reshape(1, d_ff)
    b2_2d = b2.reshape(1, d_model)

    x_item = x.dtype.itemsize
    w_item = w1.dtype.itemsize
    budget = _vmem_budget_bytes()

    # Estimated VMEM need for the weight-resident path (weights/biases counted
    # double-buffered, plus x/out tiles double-buffered, f32 intermediate h).
    resident_need = (
        2 * (d_model * d_ff + d_ff + d_ff * d_model + d_model) * w_item
        + 4 * tm * d_model * x_item
        + tm * d_ff * 4
        + tm * d_model * 4
    )

    cost = pl.CostEstimate(
        flops=4 * M * d_model * d_ff,
        transcendentals=0,
        bytes_accessed=(2 * M * d_model * x_item
                        + 2 * d_model * d_ff * w_item
                        + (d_ff + d_model) * w_item),
    )

    if resident_need <= budget:
        # ------------------ weight-resident fast path ------------------
        grid = (Mp // tm,)
        out = pl.pallas_call(
            _ffn_resident_kernel,
            out_shape=jax.ShapeDtypeStruct((Mp, d_model), x.dtype),
            grid=grid,
            in_specs=[
                pl.BlockSpec((tm, d_model), lambda i: (i, 0)),     # x rows
                pl.BlockSpec((d_model, d_ff), lambda i: (0, 0)),   # W1 (resident)
                pl.BlockSpec((1, d_ff), lambda i: (0, 0)),         # b1
                pl.BlockSpec((d_ff, d_model), lambda i: (0, 0)),   # W2 (resident)
                pl.BlockSpec((1, d_model), lambda i: (0, 0)),      # b2
            ],
            out_specs=pl.BlockSpec((tm, d_model), lambda i: (i, 0)),
            compiler_params=pltpu.CompilerParams(
                dimension_semantics=("parallel",),
                vmem_limit_bytes=budget,
            ),
            cost_estimate=cost,
        )(x2, w1, b1_2d, w2, b2_2d)
    else:
        # ------------------ streamed-weight fallback --------------------
        if d_ff % tf != 0:
            tf = d_ff  # single d_ff tile (full-dim block, layout-exempt)
        grid = (Mp // tm, d_ff // tf)  # rows: parallel, d_ff: reduction
        out = pl.pallas_call(
            _ffn_streamed_kernel,
            out_shape=jax.ShapeDtypeStruct((Mp, d_model), x.dtype),
            grid=grid,
            in_specs=[
                pl.BlockSpec((tm, d_model), lambda i, j: (i, 0)),   # x rows
                pl.BlockSpec((d_model, tf), lambda i, j: (0, j)),   # W1 slice
                pl.BlockSpec((1, tf), lambda i, j: (0, j)),         # b1 slice
                pl.BlockSpec((tf, d_model), lambda i, j: (j, 0)),   # W2 slice
                pl.BlockSpec((1, d_model), lambda i, j: (0, 0)),    # b2
            ],
            out_specs=pl.BlockSpec((tm, d_model), lambda i, j: (i, 0)),
            scratch_shapes=[pltpu.VMEM((tm, d_model), jnp.float32)],
            compiler_params=pltpu.CompilerParams(
                dimension_semantics=("parallel", "arbitrary"),
                vmem_limit_bytes=budget,
            ),
            cost_estimate=cost,
        )(x2, w1, b1_2d, w2, b2_2d)

    if Mp != M:
        out = out[:M]
    return out.reshape(B, L, d_model)


# ---------------------------------------------------------------------------
# Reference + self-test
# ---------------------------------------------------------------------------
def _reference(x, w1, b1, w2, b2):
    h = jnp.maximum(x @ w1 + b1, 0.0)
    return h @ w2 + b2


if __name__ == "__main__":
    key = jax.random.PRNGKey(0)
    kx, k1, kb1, k2, kb2 = jax.random.split(key, 5)

    # Module defaults: d_model=512, d_ff=2048.  Small batch/seq.
    B, L, d_model, d_ff = 2, 64, 512, 2048

    x = jax.random.normal(kx, (B, L, d_model), dtype=jnp.float32)
    # PyTorch-like init scale (1/sqrt(fan_in)) keeps values O(1).
    w1 = jax.random.normal(k1, (d_model, d_ff), dtype=jnp.float32) / (d_model ** 0.5)
    b1 = jax.random.normal(kb1, (d_ff,), dtype=jnp.float32) / (d_model ** 0.5)
    w2 = jax.random.normal(k2, (d_ff, d_model), dtype=jnp.float32) / (d_ff ** 0.5)
    b2 = jax.random.normal(kb2, (d_model,), dtype=jnp.float32) / (d_ff ** 0.5)

    out = feed_forward_network(x, w1, b1, w2, b2)
    out = jax.block_until_ready(out)

    ref = _reference(x, w1, b1, w2, b2)
    assert out.shape == (B, L, d_model)
    assert jnp.allclose(out, ref, atol=1e-3, rtol=1e-3), "mismatch vs reference"

    # Also exercise a small-M shape (row tile picker + no-pad path).
    xs = jax.random.normal(kx, (2, 8, d_model), dtype=jnp.float32)
    outs = jax.block_until_ready(feed_forward_network(xs, w1, b1, w2, b2))
    assert jnp.allclose(outs, _reference(xs, w1, b1, w2, b2), atol=1e-3, rtol=1e-3)

    print("KERNEL_OK")
</pallas_src>

<mosaic_0001>
module attributes {stable_mosaic.version = 11 : i64} {
  func.func @_ffn_resident_kernel(%arg0: i32, %arg1: memref<64x512xf32, #tpu.memory_space<vmem>>, %arg2: memref<512x2048xf32, #tpu.memory_space<vmem>>, %arg3: memref<1x2048xf32, #tpu.memory_space<vmem>>, %arg4: memref<2048x512xf32, #tpu.memory_space<vmem>>, %arg5: memref<1x512xf32, #tpu.memory_space<vmem>>, %arg6: memref<64x512xf32, #tpu.memory_space<vmem>>) attributes {dimension_semantics = [#tpu.dimension_semantics<parallel>], iteration_bounds = array<i64: 2>, scalar_prefetch = 0 : i64, scratch_operands = 0 : i64, tpu.core_type = #tpu.core_type<tc>, window_params = [{transform_indices = @transform_0, window_bounds = array<i64: 64, 512>}, {pipeline_mode = #tpu.pipeline_mode<synchronous>, transform_indices = @transform_1, window_bounds = array<i64: 512, 2048>}, {pipeline_mode = #tpu.pipeline_mode<synchronous>, transform_indices = @transform_2, window_bounds = array<i64: 1, 2048>}, {pipeline_mode = #tpu.pipeline_mode<synchronous>, transform_indices = @transform_3, window_bounds = array<i64: 2048, 512>}, {pipeline_mode = #tpu.pipeline_mode<synchronous>, transform_indices = @transform_4, window_bounds = array<i64: 1, 512>}, {transform_indices = @transform_5, window_bounds = array<i64: 64, 512>}]} {
    %c0 = arith.constant 0 : index
    %c0_0 = arith.constant 0 : index
    %0 = vector.load %arg1[%c0, %c0_0] : memref<64x512xf32, #tpu.memory_space<vmem>>, vector<64x512xf32>
    %c0_1 = arith.constant 0 : index
    %c0_2 = arith.constant 0 : index
    %1 = vector.load %arg2[%c0_1, %c0_2] : memref<512x2048xf32, #tpu.memory_space<vmem>>, vector<512x2048xf32>
    %cst = arith.constant dense<0.000000e+00> : vector<64x2048xf32>
    %2 = tpu.matmul %0, %1, %cst {dimension_numbers = #tpu.dot_dimension_numbers<[1], [0], [0], [1], [0, 0, 1, 1], [], []>} : vector<64x512xf32>, vector<512x2048xf32>, vector<64x2048xf32> -> vector<64x2048xf32>
    %c0_3 = arith.constant 0 : index
    %c0_4 = arith.constant 0 : index
    %3 = vector.load %arg3[%c0_3, %c0_4] : memref<1x2048xf32, #tpu.memory_space<vmem>>, vector<1x2048xf32>
    %4 = vector.broadcast %3 : vector<1x2048xf32> to vector<64x2048xf32>
    %5 = arith.addf %2, %4 : vector<64x2048xf32>
    %cst_5 = arith.constant 0.000000e+00 : f32
    %6 = vector.broadcast %cst_5 : f32 to vector<64x2048xf32>
    %7 = arith.maximumf %5, %6 : vector<64x2048xf32>
    %c0_6 = arith.constant 0 : index
    %c0_7 = arith.constant 0 : index
    %8 = vector.load %arg4[%c0_6, %c0_7] : memref<2048x512xf32, #tpu.memory_space<vmem>>, vector<2048x512xf32>
    %cst_8 = arith.constant dense<0.000000e+00> : vector<64x512xf32>
    %9 = tpu.matmul %7, %8, %cst_8 {dimension_numbers = #tpu.dot_dimension_numbers<[1], [0], [0], [1], [0, 0, 1, 1], [], []>} : vector<64x2048xf32>, vector<2048x512xf32>, vector<64x512xf32> -> vector<64x512xf32>
    %c0_9 = arith.constant 0 : index
    %c0_10 = arith.constant 0 : index
    %10 = vector.load %arg5[%c0_9, %c0_10] : memref<1x512xf32, #tpu.memory_space<vmem>>, vector<1x512xf32>
    %11 = vector.broadcast %10 : vector<1x512xf32> to vector<64x512xf32>
    %12 = arith.addf %9, %11 : vector<64x512xf32>
    %c0_11 = arith.constant 0 : index
    %c0_12 = arith.constant 0 : index
    %13 = vector.load %arg6[%c0_11, %c0_12] : memref<64x512xf32, #tpu.memory_space<vmem>>, vector<64x512xf32>
    tpu.vector_store %arg6[%c0_11, %c0_12], %12 {strides = array<i32>} : memref<64x512xf32, #tpu.memory_space<vmem>>, vector<64x512xf32>,
    return
  }
  func.func @transform_0(%arg0: i32) -> (i32, i32) {
    %c0_i32 = arith.constant 0 : i32
    %c0_i32_0 = arith.constant 0 : i32
    return %arg0, %c0_i32 : i32, i32
  }
  func.func @transform_1(%arg0: i32) -> (i32, i32) {
    %c0_i32 = arith.constant 0 : i32
    %c0_i32_0 = arith.constant 0 : i32
    %c0_i32_1 = arith.constant 0 : i32
    return %c0_i32, %c0_i32_0 : i32, i32
  }
  func.func @transform_2(%arg0: i32) -> (i32, i32) {
    %c0_i32 = arith.constant 0 : i32
    %c0_i32_0 = arith.constant 0 : i32
    %c0_i32_1 = arith.constant 0 : i32
    return %c0_i32, %c0_i32_0 : i32, i32
  }
  func.func @transform_3(%arg0: i32) -> (i32, i32) {
    %c0_i32 = arith.constant 0 : i32
    %c0_i32_0 = arith.constant 0 : i32
    %c0_i32_1 = arith.constant 0 : i32
    return %c0_i32, %c0_i32_0 : i32, i32
  }
  func.func @transform_4(%arg0: i32) -> (i32, i32) {
    %c0_i32 = arith.constant 0 : i32
    %c0_i32_0 = arith.constant 0 : i32
    %c0_i32_1 = arith.constant 0 : i32
    return %c0_i32, %c0_i32_0 : i32, i32
  }
  func.func @transform_5(%arg0: i32) -> (i32, i32) {
    %c0_i32 = arith.constant 0 : i32
    %c0_i32_0 = arith.constant 0 : i32
    return %arg0, %c0_i32 : i32, i32
  }
}

</mosaic_0001>

<bundles_post_ra>
// kernel: tpu_custom_call.1
= control target key start
LH: loop header
LB: loop body
LE: loop exit
PB: predicated region body
PF: predicated region fallthrough
CT: control target
= control target key end

     0   :  { %10 = vsyncpa [#allocation3], 0  ;;  %s10537_s0 = inlined_call_operand.hbm [shape: f32[128,512], index: 0, kind: input, shape index: {}]   ;;  %s10538_s1 = inlined_call_operand.hbm [shape: f32[512,2048], index: 1, kind: input, shape index: {}]   ;;  %s10539_s2 = inlined_call_operand.hbm [shape: f32[1,2048], index: 2, kind: input, shape index: {}]   ;;  %s10540_s3 = inlined_call_operand.hbm [shape: f32[2048,512], index: 3, kind: input, shape index: {}]   ;;  %s10541_s4 = inlined_call_operand.hbm [shape: f32[1,512], index: 4, kind: input, shape index: {}]   ;;  %s10542_s5 = inlined_call_operand.hbm [shape: f32[128,512], index: 5, kind: output, shape index: {}]  }
   0x1   :  { %12 = vsyncpa [#allocation3 + $0x1], 0 }
   0x2   :  { %13 = vsyncpa [#allocation6], 0 }
   0x3   :  { %14 = vsyncpa [#allocation9], 0 }
   0x4   :  { %15 = vsyncpa [#allocation4], 0 }
   0x5   :  { %17 = vsyncpa [#allocation4 + $0x1], 0  ;;  %s9429_s18 = smov 0   ;;  %s9431_s19 = smov 0  }
   0x6   :  { %s9433_s20 = smov 0   ;;  %s9435_s21 = smov 0  }
   0x7 LB: > { %s9450_s22 = sadd.s32 4294967295, %s9385_s21   ;;  %s6388_s23 = sadd.s32 4294967294, %s9385_s21   ;;  %s9385_s21 = sphi %s9435_s21, %s10712_s21   ;;  %s9381_s20 = sphi %s9433_s20, %s10711_s20   ;;  %s9377_s19 = sphi %s9431_s19, %s10710_s19   ;;  %s9373_s18 = sphi %s9429_s18, %s10709_s18  }
   0x8   : > { %p43_p0 = scmp.ne.s32.totalorder %s9377_s19, %s9373_s18  ;;  %p10543_p1 = scmp.eq.s32.totalorder %s9450_s22, 0 }
   0x9   : > { %p157_p3 = scmp.eq.s32.totalorder %s6388_s23, 1  ;;  %p6389_p5 = scmp.ge.s32.totalorder %s9385_s21, 1 }
   0xa   : > { %p9459_p4 = por %p10543_p1, %p43_p0  ;;  %p164_p7 = scmp.lt.s32.totalorder %s9385_s21, 3 }
   0xb   : > { %p9464_p6 = por %p157_p3, %p43_p0  ;;  %s9387_s27 = smov [#allocation5]  }
   0xc   : > { %s10554_s24 = scalar_select %p9459_p4, 1, 0 }
   0xd   : > { %s10555_s25 = scalar_select %p9464_p6, 1, 0 }
   0xe   : > { %p9469_p8 = pnand %p6389_p5, %p164_p7  ;;  %s176_s28 = sshll.u32 %s9387_s27, 4  ;;  %s9473_s28 = int_to_ptr.vmem [resolvable:$true] %s176_s28 }
   0xf   : > { %s9388_s30 = smov [#allocation8]   ;;  %s9169_s9 = scalar_lea.hbm %s10538_s1, 131072 }
  0x10   : > { %s10556_s26 = scalar_select %p9469_p8, 1, 0 }
  0x11   : > { %p8996_p9 = pneg %p9469_p8  ;;  %s200_s6 = sshll.u32 %s9388_s30, 4  ;;  %s9484_s6 = int_to_ptr.vmem [resolvable:$true] %s200_s6 }
  0x12   : > { %p9170_p12 = scmp.ne.s32.totalorder %s10538_s1, %s9169_s9  ;;  %p9176_p5 = scmp.lt.u32.totalorder %s9169_s9, %s10538_s1 }
  0x13   : > { %p9480_p11 = pnand %p8996_p9, %p10543_p1 }
  0x15   : > { %p9494_p13 = pneg %p9480_p11 }
  0x17   : > { %p9172_p0 = pnand %p9494_p13, %p9170_p12 }
  0x19   : > { %p9173_p3 = pneg %p9172_p0 }
  0x1b   : > { %p9178_p7 = pnand %p9176_p5, %p9173_p3 }
  0x1d   : > { %9181 = shalt.err (!%p9178_p7)
}
  0x1e   : > { %s9182_s15 = scalar_lea.vmem %s9473_s28, 131072  ;;  %p9190_p2 = scmp.lt.s32.totalorder %s9473_s28, %s9473_s28 }
  0x1f   : > { %p9183_p9 = scmp.ne.s32.totalorder %s9473_s28, %s9182_s15  ;;  %p9191_p6 = scmp.lt.s32.totalorder %s9182_s15, %s9182_s15 }
  0x21   : > { %p9185_p10 = pnand %p9183_p9, %p9494_p13  ;;  %p9192_p12 = por %p9191_p6, %p9190_p2 }
  0x23   : > { %p9186_p1 = pneg %p9185_p10 }
  0x25   : > { %p9193_p0 = pnand %p9192_p12, %p9186_p1 }
  0x27   : > { %9196 = shalt.err (!%p9193_p0)
}
  0x28   : > { %s9389_s16 = smov 2048   ;;  %s9390_s17 = smov 128  }
  0x29   : > { %8999 = dma.hbm_to_vmem [thread:$0]  (!%p9480_p11), %s10538_s1, 131072, %s9473_s28, [#allocation6], %s9389_s16, %s9389_s16, %s9390_s17  }
  0x2a   : > { %s9197_s8 = scalar_lea.hbm %s10540_s3, 131072 }
  0x2b   : > { %p9198_p2 = scmp.ne.s32.totalorder %s10540_s3, %s9197_s8  ;;  %p9204_p10 = scmp.lt.u32.totalorder %s9197_s8, %s10540_s3 }
  0x2d   : > { %p9200_p1 = pnand %p9198_p2, %p9494_p13 }
  0x2f   : > { %p9201_p6 = pneg %p9200_p1 }
  0x31   : > { %p9206_p3 = pnand %p9204_p10, %p9201_p6 }
  0x33   : > { %9209 = shalt.err (!%p9206_p3)
}
  0x34   : > { %s9210_s28 = scalar_lea.vmem %s9484_s6, 131072  ;;  %p9218_p12 = scmp.lt.s32.totalorder %s9484_s6, %s9484_s6 }
  0x35   : > { %p9211_p5 = scmp.ne.s32.totalorder %s9484_s6, %s9210_s28  ;;  %p9219_p0 = scmp.lt.s32.totalorder %s9210_s28, %s9210_s28 }
  0x37   : > { %p9213_p7 = pnand %p9211_p5, %p9494_p13  ;;  %p9220_p2 = por %p9219_p0, %p9218_p12 }
  0x39   : > { %p9214_p9 = pneg %p9213_p7 }
  0x3b   : > { %p9221_p1 = pnand %p9220_p2, %p9214_p9 }
  0x3d   : > { %9224 = shalt.err (!%p9221_p1)
}
  0x3e   : > { %s9391_s14 = smov 512   ;;  %s9392_s15 = smov 32  }
  0x3f   : > { %9005 = dma.hbm_to_vmem [thread:$0]  (!%p9480_p11), %s10540_s3, 131072, %s9484_s6, [#allocation9], %s9391_s14, %s9391_s14, %s9392_s15  }
  0x40   : > { %s9393_s23 = smov [#allocation7]   ;;  %s9394_s30 = smov [#allocation10]  }
  0x41   : > { %s190_s27 = sshll.u32 %s9393_s23, 4  ;;  %s214_s7 = sshll.u32 %s9394_s30, 4  ;;  %s191_s27 = int_to_ptr.vmem [resolvable:$true] %s190_s27  ;;  %s9541_s7 = int_to_ptr.vmem [resolvable:$true] %s214_s7 }
  0x42   : > { %s9225_s10 = scalar_lea.hbm %s10539_s2, 256 }
  0x43   : > { %p9226_p6 = scmp.ne.s32.totalorder %s10539_s2, %s9225_s10  ;;  %p9232_p5 = scmp.lt.u32.totalorder %s9225_s10, %s10539_s2 }
  0x45   : > { %p9228_p10 = pnand %p9226_p6, %p9494_p13 }
  0x47   : > { %p9229_p3 = pneg %p9228_p10 }
  0x49   : > { %p9234_p7 = pnand %p9232_p5, %p9229_p3 }
  0x4b   : > { %9237 = shalt.err (!%p9234_p7)
}
  0x4c   : > { %s9238_s16 = scalar_lea.vmem %s191_s27, 256  ;;  %p9246_p2 = scmp.lt.s32.totalorder %s191_s27, %s191_s27 }
  0x4d   : > { %p9239_p9 = scmp.ne.s32.totalorder %s191_s27, %s9238_s16  ;;  %p9247_p1 = scmp.lt.s32.totalorder %s9238_s16, %s9238_s16 }
  0x4f   : > { %p9241_p12 = pnand %p9239_p9, %p9494_p13  ;;  %p9248_p4 = por %p9247_p1, %p9246_p2 }
  0x51   : > { %p9242_p0 = pneg %p9241_p12 }
  0x53   : > { %p9249_p8 = pnand %p9248_p4, %p9242_p0 }
  0x55   : > { %9252 = shalt.err (!%p9249_p8)
}
  0x56   : > { %9002 = dma.hbm_to_vmem [thread:$0]  (!%p9480_p11), %s10539_s2, 256, %s191_s27, [#allocation6]  }
  0x57   : > { %s9253_s9 = scalar_lea.hbm %s10541_s4, 64 }
  0x58   : > { %p9254_p6 = scmp.ne.s32.totalorder %s10541_s4, %s9253_s9  ;;  %p9260_p4 = scmp.lt.u32.totalorder %s9253_s9, %s10541_s4 }
  0x5a   : > { %p9256_p10 = pnand %p9254_p6, %p9494_p13 }
  0x5c   : > { %p9257_p3 = pneg %p9256_p10 }
  0x5e   : > { %p9262_p8 = pnand %p9260_p4, %p9257_p3 }
  0x60   : > { %9265 = shalt.err (!%p9262_p8)
}
  0x61   : > { %s9266_s27 = scalar_lea.vmem %s9541_s7, 64  ;;  %p9274_p12 = scmp.lt.s32.totalorder %s9541_s7, %s9541_s7 }
  0x62   : > { %p9267_p5 = scmp.ne.s32.totalorder %s9541_s7, %s9266_s27  ;;  %p9275_p0 = scmp.lt.s32.totalorder %s9266_s27, %s9266_s27 }
  0x64   : > { %p9269_p7 = pnand %p9267_p5, %p9494_p13  ;;  %p9276_p2 = por %p9275_p0, %p9274_p12 }
  0x66   : > { %p9270_p9 = pneg %p9269_p7 }
  0x68   : > { %p9277_p1 = pnand %p9276_p2, %p9270_p9 }
  0x6a   : > { %9280 = shalt.err (!%p9277_p1)
}
  0x6b   : > { %9008 = dma.hbm_to_vmem [thread:$0]  (!%p9480_p11), %s10541_s4, 64, %s9541_s7, [#allocation9]  }
  0x6c   : > { %s9585_s12 = sadd.s32 1, %s9385_s21   ;;  %s30_s17 = sadd.s32 1, %s9381_s20 }
  0x6d   : > { %s27_s29 = ssub.s32 %s9385_s21, %s9585_s12  ;;  %p37_p6 = scmp.ne.s32.totalorder %s9381_s20, %s9377_s19 }
  0x6e   : > { %p28_p13 = scmp.eq.s32.totalorder %s27_s29, 0  ;;  %p38_p10 = scmp.eq.s32.totalorder %s9385_s21, 0 }
  0x6f   : > { %p10559_p4 = scmp.eq.s32.totalorder %s9450_s22, 1  ;;  %p9021_p5 = scmp.lt.s32.totalorder %s9385_s21, 2 }
  0x70   : > { %s9594_s23 = scalar_select %p28_p13, %s9381_s20, %s30_s17  }
  0x71   : > { %p39_p3 = por %p38_p10, %p37_p6  ;;  %p9598_p8 = por %p10559_p4, %p37_p6 }
  0x72   : > { %s225_s8 = sand.u32 1, %s9381_s20   ;;  %s6413_s7 = sshll.u32 %s9385_s21, 12 }
  0x73   : > { %s6395_s9 = sshll.u32 %s225_s8, 8  ;;  %s9608_s13 = scalar_lea.hbm %s10537_s0, %s6413_s7 }
  0x74   : > { %s229_s28 = scalar_lea.vmem [#allocation2], %s6395_s9  ;;  %p9612_p11 = pnand %p9021_p5, %p39_p3 }
  0x75   : > { %s237_s27 = sshll.u32 %s229_s28, 4  ;;  %s9616_s16 = scalar_lea.sflag [#allocation3], %s225_s8  ;;  %s9610_s27 = int_to_ptr.vmem [resolvable:$true] %s237_s27 }
  0x76   : > { %s9281_s29 = scalar_lea.hbm %s9608_s13, 4096  ;;  %p9283_p9 = pneg %p9612_p11 }
  0x77   : > { %p9282_p7 = scmp.ne.s32.totalorder %s9608_s13, %s9281_s29  ;;  %s9286_s7 = scalar_lea.hbm %s10537_s0, 8192 }
  0x78   : > { %p9287_p2 = scmp.lt.u32.totalorder %s9608_s13, %s10537_s0  ;;  %p9288_p1 = scmp.lt.u32.totalorder %s9286_s7, %s9281_s29 }
  0x79   : > { %p9284_p12 = pnand %p9283_p9, %p9282_p7  ;;  %p9290_p6 = scmp.lt.u32.totalorder %s9281_s29, %s9608_s13 }
  0x7a   : > { %p9289_p13 = por %p9288_p1, %p9287_p2 }
  0x7b   : > { %p9285_p0 = pneg %p9284_p12 }
  0x7c   : > { %p9291_p10 = por %p9290_p6, %p9289_p13 }
  0x7e   : > { %p9292_p3 = pnand %p9291_p10, %p9285_p0 }
  0x80   : > { %9295 = shalt.err (!%p9292_p3)
}
  0x81   : > { %s9296_s8 = scalar_lea.vmem %s9610_s27, 4096  ;;  %s9395_s28 = smov [#allocation2]  }
  0x82   : > { %p9297_p4 = scmp.ne.s32.totalorder %s9610_s27, %s9296_s8  ;;  %s9301_s17 = sshll.u32 %s9395_s28, 4  ;;  %s9302_s17 = int_to_ptr.vmem [resolvable:$false] %s9301_s17 }
  0x83   : > { %s9303_s9 = scalar_lea.vmem %s9302_s17, 8192  ;;  %p9304_p12 = scmp.lt.s32.totalorder %s9610_s27, %s9302_s17 }
  0x84   : > { %p9299_p5 = pnand %p9297_p4, %p9283_p9  ;;  %p9305_p2 = scmp.lt.s32.totalorder %s9303_s9, %s9296_s8 }
  0x86   : > { %p9300_p7 = pneg %p9299_p5  ;;  %p9306_p1 = por %p9305_p2, %p9304_p12 }
  0x88   : > { %p9307_p13 = pnand %p9306_p1, %p9300_p7 }
  0x8a   : > { %9310 = shalt.err (!%p9307_p13)
}
  0x8b   : > { %9012 = dma.hbm_to_vmem [thread:$0]  (!%p9612_p11), %s9608_s13, 4096, %s9610_s27, %s9616_s16, %s9391_s14, %s9391_s14, %s9392_s15  }
  0x8c   : > { %p10562_p9 = scmp.ne.s32.totalorder %s10556_s26, 0 }
  0x8e   : > { %249 = sbr.rel (%p10562_p9) target bundleno = 1454 (0x5ae), region = 40 }
  0x95   : > { %s9650_s29 = sand.u32 1, %s9377_s19   ;;  %p10563_p0 = scmp.ne.s32.totalorder %s10554_s24, 0 }
  0x96   : > { %s6400_s7 = sshll.u32 %s9650_s29, 8  ;;  %s252_s10 = scalar_lea.sflag [#allocation3], %s9650_s29 }
  0x97   : > { %s9656_s6 = scalar_lea.vmem [#allocation2], %s6400_s7 }
  0x98   : > { %9356 = dma.done.wait (%p10563_p0), %s252_s10, 4096  }
  0x99   : > { %9358 = vsyncadd (%p10563_p0), %s252_s10, 4294963200  ;;  %p10564_p11 = scmp.eq.s32.totalorder %s9450_s22, 0 }
  0x9b   : > { %9360 = dma.done.wait (%p10564_p11), [#allocation6], 131328   ;;  %p10565_p6 = pmov %p10564_p11 }
  0x9d   : > { %9362 = vsyncadd (%p10565_p6), [#allocation6], 4294835968  ;;  %p10566_p10 = pmov %p10565_p6 }
  0x9e   : > { %p10567_p3 = pmov %p10565_p6 }
  0x9f   : > { %9364 = dma.done.wait (%p10566_p10), [#allocation9], 131136  }
  0xa0   : > { %9366 = vsyncadd (%p10567_p3), [#allocation9], 4294836160  ;;  %v333_v0 = vld [vmem:[#allocation5 + $0x8] sm:$0xff]  ;;  %v335_v2 = vld [vmem:[#allocation5 + $0x18] sm:$0xff]  ;;  %s10423_s24 = scalar_lea.vmem [#allocation11], %s6400_s7  ;;  %s6415_s26 = sshll.u32 %s9450_s22, 12 }
  0xa1   : > { %v349_v1 = vld [vmem:[#allocation5 + $0x88] sm:$0xff]  ;;  %v351_v4 = vld [vmem:[#allocation5 + $0x98] sm:$0xff]  ;;  %v332_v5 = vld [vmem:[#allocation5] sm:$0xff]  ;;  %s6277_s14 = sshll.u32 %s10423_s24, 4  ;;  %s10486_s13 = scalar_lea.hbm %s10542_s5, %s6415_s26  ;;  %s10488_s14 = int_to_ptr.vmem [resolvable:$true] %s6277_s14 }
  0xa2   : > { %v6416_v3 = vpack.c.bf16 %v349_v1, %v333_v0  ;;  %v348_v6 = vld [vmem:[#allocation5 + $0x80] sm:$0xff]  ;;  %v6544_v7 = vpack.c.bf16 %v351_v4, %v335_v2  ;;  %v334_v9 = vld [vmem:[#allocation5 + $0x10] sm:$0xff]  ;;  %v365_v11 = vld [vmem:[#allocation5 + $0x108] sm:$0xff]  ;;  %s6263_s27 = scalar_lea.sflag [#allocation4], %s9650_s29  ;;  %s9311_s16 = scalar_lea.vmem %s10488_s14, 4096 }
  0xa3   : > { %v6418_v8 = vpack.c.bf16 %v348_v6, %v332_v5  ;;  %v350_v10 = vld [vmem:[#allocation5 + $0x90] sm:$0xff]  ;;  %v381_v13 = vld [vmem:[#allocation5 + $0x188] sm:$0xff]  ;;  %v367_v14 = vld [vmem:[#allocation5 + $0x118] sm:$0xff]  ;;  %p9312_p4 = scmp.ne.s32.totalorder %s10488_s14, %s9311_s16  ;;  %s9396_s11 = smov [#allocation11]  }
  0xa4   : > { %6417 = vmatprep.subr.bf16.mxu0 %v6416_v3  ;;  %v6546_v12 = vpack.c.bf16 %v350_v10, %v334_v9  ;;  %v383_v15 = vld [vmem:[#allocation5 + $0x198] sm:$0xff]  ;;  %6545 = vmatprep.subr.bf16.mxu1 %v6544_v7  ;;  %v6420_v16 = vpack.c.bf16 %v381_v13, %v365_v11  ;;  %v364_v18 = vld [vmem:[#allocation5 + $0x100] sm:$0xff]  ;;  %v366_v20 = vld [vmem:[#allocation5 + $0x110] sm:$0xff]  ;;  %s9315_s8 = sshll.u32 %s9396_s11, 4  ;;  %s9316_s8 = int_to_ptr.vmem [resolvable:$false] %s9315_s8 }
  0xa5   : > { %6419 = vmatpush1.bf16.msra.mxu0 %v6418_v8  ;;  %v6548_v17 = vpack.c.bf16 %v383_v15, %v367_v14  ;;  %v380_v19 = vld [vmem:[#allocation5 + $0x180] sm:$0xff]  ;;  %v382_v22 = vld [vmem:[#allocation5 + $0x190] sm:$0xff]  ;;  %v397_v23 = vld [vmem:[#allocation5 + $0x208] sm:$0xff]  ;;  %p9313_p5 = pnand %p9312_p4, %p9598_p8  ;;  %s9317_s28 = scalar_lea.vmem %s9316_s8, 8192 }
  0xa6   : > { %6547 = vmatpush1.bf16.msra.mxu1 %v6546_v12  ;;  %v6422_v21 = vpack.c.bf16 %v380_v19, %v364_v18  ;;  %v413_v24 = vld [vmem:[#allocation5 + $0x288] sm:$0xff]  ;;  %6421 = vmatprep.subr.bf16.mxu0 %v6420_v16  ;;  %v6550_v25 = vpack.c.bf16 %v382_v22, %v366_v20  ;;  %v399_v27 = vld [vmem:[#allocation5 + $0x218] sm:$0xff]  ;;  %v396_v29 = vld [vmem:[#allocation5 + $0x200] sm:$0xff]  ;;  %p9318_p12 = scmp.lt.s32.totalorder %s10488_s14, %s9316_s8  ;;  %p9319_p2 = scmp.lt.s32.totalorder %s9317_s28, %s9311_s16 }
  0xa7   : > { %6549 = vmatprep.subr.bf16.mxu1 %v6548_v17  ;;  %v6424_v26 = vpack.c.bf16 %v413_v24, %v397_v23  ;;  %v415_v28 = vld [vmem:[#allocation5 + $0x298] sm:$0xff]  ;;  %v412_v31 = vld [vmem:[#allocation5 + $0x280] sm:$0xff]  ;;  %v398_v32 = vld [vmem:[#allocation5 + $0x210] sm:$0xff]  ;;  %p9314_p7 = pneg %p9313_p5 }
  0xa8   : > { %v6552_v30 = vpack.c.bf16 %v415_v28, %v399_v27  ;;  %v414_v33 = vld [vmem:[#allocation5 + $0x290] sm:$0xff]  ;;  %v6426_v34 = vpack.c.bf16 %v412_v31, %v396_v29  ;;  %v429_v35 = vld [vmem:[#allocation5 + $0x308] sm:$0xff]  ;;  %v431_v37 = vld [vmem:[#allocation5 + $0x318] sm:$0xff]  ;;  %p9320_p1 = por %p9319_p2, %p9318_p12 }
  0xa9   : > { %6423 = vmatpush1.bf16.msra.mxu0 %v6422_v21  ;;  %v445_v36 = vld [vmem:[#allocation5 + $0x388] sm:$0xff]  ;;  %v6554_v38 = vpack.c.bf16 %v414_v33, %v398_v32  ;;  %v447_v40 = vld [vmem:[#allocation5 + $0x398] sm:$0xff]  ;;  %v428_v41 = vld [vmem:[#allocation5 + $0x300] sm:$0xff] }
  0xaa   : > { %6551 = vmatpush1.bf16.msra.mxu1 %v6550_v25  ;;  %6425 = vmatprep.subr.bf16.mxu0 %v6424_v26  ;;  %v6428_v39 = vpack.c.bf16 %v445_v36, %v429_v35  ;;  %v444_v42 = vld [vmem:[#allocation5 + $0x380] sm:$0xff]  ;;  %v6556_v43 = vpack.c.bf16 %v447_v40, %v431_v37  ;;  %v430_v44 = vld [vmem:[#allocation5 + $0x310] sm:$0xff]  ;;  %v461_v46 = vld [vmem:[#allocation5 + $0x408] sm:$0xff]  ;;  %p9321_p13 = pnand %p9320_p1, %p9314_p7 }
  0xab   : > { %6553 = vmatprep.subr.bf16.mxu1 %v6552_v30  ;;  %v446_v45 = vld [vmem:[#allocation5 + $0x390] sm:$0xff]  ;;  %v477_v47 = vld [vmem:[#allocation5 + $0x488] sm:$0xff]  ;;  %v463_v48 = vld [vmem:[#allocation5 + $0x418] sm:$0xff]  ;;  %v6430_v50 = vpack.c.bf16 %v444_v42, %v428_v41 }
  0xac   : > { %v479_v49 = vld [vmem:[#allocation5 + $0x498] sm:$0xff]  ;;  %v6558_v51 = vpack.c.bf16 %v446_v45, %v430_v44  ;;  %v6432_v52 = vpack.c.bf16 %v477_v47, %v461_v46  ;;  %v460_v53 = vld [vmem:[#allocation5 + $0x400] sm:$0xff]  ;;  %v462_v55 = vld [vmem:[#allocation5 + $0x410] sm:$0xff] }
  0xad   : > { %6427 = vmatpush1.bf16.msra.mxu0 %v6426_v34  ;;  %v476_v54 = vld [vmem:[#allocation5 + $0x480] sm:$0xff]  ;;  %v6560_v56 = vpack.c.bf16 %v479_v49, %v463_v48  ;;  %v478_v57 = vld [vmem:[#allocation5 + $0x490] sm:$0xff]  ;;  %v493_v58 = vld [vmem:[#allocation5 + $0x508] sm:$0xff] }
  0xae   : > { %6555 = vmatpush1.bf16.msra.mxu1 %v6554_v38  ;;  %6429 = vmatprep.subr.bf16.mxu0 %v6428_v39  ;;  %v509_v59 = vld [vmem:[#allocation5 + $0x588] sm:$0xff]  ;;  %v495_v60 = vld [vmem:[#allocation5 + $0x518] sm:$0xff]  ;;  %v6434_v62 = vpack.c.bf16 %v476_v54, %v460_v53  ;;  %v6562_v63 = vpack.c.bf16 %v478_v57, %v462_v55  ;;  %v492_v1 = vld [vmem:[#allocation5 + $0x500] sm:$0xff] }
  0xaf   : > { %6557 = vmatprep.subr.bf16.mxu1 %v6556_v43  ;;  %v511_v61 = vld [vmem:[#allocation5 + $0x598] sm:$0xff]  ;;  %v6436_v0 = vpack.c.bf16 %v509_v59, %v493_v58  ;;  %v508_v2 = vld [vmem:[#allocation5 + $0x580] sm:$0xff]  ;;  %v494_v3 = vld [vmem:[#allocation5 + $0x510] sm:$0xff] }
  0xb0   : > { %v6564_v4 = vpack.c.bf16 %v511_v61, %v495_v60  ;;  %v510_v5 = vld [vmem:[#allocation5 + $0x590] sm:$0xff]  ;;  %v525_v6 = vld [vmem:[#allocation5 + $0x608] sm:$0xff]  ;;  %v527_v8 = vld [vmem:[#allocation5 + $0x618] sm:$0xff]  ;;  %v6438_v10 = vpack.c.bf16 %v508_v2, %v492_v1 }
  0xb1   : > { %6431 = vmatpush1.bf16.msra.mxu0 %v6430_v50  ;;  %v541_v7 = vld [vmem:[#allocation5 + $0x688] sm:$0xff]  ;;  %v543_v9 = vld [vmem:[#allocation5 + $0x698] sm:$0xff]  ;;  %v6566_v11 = vpack.c.bf16 %v510_v5, %v494_v3  ;;  %v524_v13 = vld [vmem:[#allocation5 + $0x600] sm:$0xff] }
  0xb2   : > { %6559 = vmatpush1.bf16.msra.mxu1 %v6558_v51  ;;  %6433 = vmatprep.subr.bf16.mxu0 %v6432_v52  ;;  %v6440_v12 = vpack.c.bf16 %v541_v7, %v525_v6  ;;  %v540_v14 = vld [vmem:[#allocation5 + $0x680] sm:$0xff]  ;;  %v526_v15 = vld [vmem:[#allocation5 + $0x610] sm:$0xff]  ;;  %v6568_v16 = vpack.c.bf16 %v543_v9, %v527_v8  ;;  %v557_v18 = vld [vmem:[#allocation5 + $0x708] sm:$0xff] }
  0xb3   : > { %6561 = vmatprep.subr.bf16.mxu1 %v6560_v56  ;;  %v542_v17 = vld [vmem:[#allocation5 + $0x690] sm:$0xff]  ;;  %v573_v19 = vld [vmem:[#allocation5 + $0x788] sm:$0xff]  ;;  %v559_v20 = vld [vmem:[#allocation5 + $0x718] sm:$0xff]  ;;  %v6442_v22 = vpack.c.bf16 %v540_v14, %v524_v13 }
  0xb4   : > { %v575_v21 = vld [vmem:[#allocation5 + $0x798] sm:$0xff]  ;;  %v6570_v23 = vpack.c.bf16 %v542_v17, %v526_v15  ;;  %v6444_v24 = vpack.c.bf16 %v573_v19, %v557_v18  ;;  %v556_v25 = vld [vmem:[#allocation5 + $0x700] sm:$0xff]  ;;  %v558_v27 = vld [vmem:[#allocation5 + $0x710] sm:$0xff] }
  0xb5   : > { %6435 = vmatpush1.bf16.msra.mxu0 %v6434_v62  ;;  %v572_v26 = vld [vmem:[#allocation5 + $0x780] sm:$0xff]  ;;  %v6572_v28 = vpack.c.bf16 %v575_v21, %v559_v20  ;;  %v574_v29 = vld [vmem:[#allocation5 + $0x790] sm:$0xff]  ;;  %v589_v30 = vld [vmem:[#allocation5 + $0x808] sm:$0xff] }
  0xb6   : > { %6563 = vmatpush1.bf16.msra.mxu1 %v6562_v63  ;;  %6437 = vmatprep.subr.bf16.mxu0 %v6436_v0  ;;  %v605_v31 = vld [vmem:[#allocation5 + $0x888] sm:$0xff]  ;;  %v591_v32 = vld [vmem:[#allocation5 + $0x818] sm:$0xff]  ;;  %v6446_v34 = vpack.c.bf16 %v572_v26, %v556_v25  ;;  %v6574_v35 = vpack.c.bf16 %v574_v29, %v558_v27  ;;  %v588_v37 = vld [vmem:[#allocation5 + $0x800] sm:$0xff] }
  0xb7   : > { %6565 = vmatprep.subr.bf16.mxu1 %v6564_v4  ;;  %v607_v33 = vld [vmem:[#allocation5 + $0x898] sm:$0xff]  ;;  %v6448_v36 = vpack.c.bf16 %v605_v31, %v589_v30  ;;  %v604_v38 = vld [vmem:[#allocation5 + $0x880] sm:$0xff]  ;;  %v590_v39 = vld [vmem:[#allocation5 + $0x810] sm:$0xff] }
  0xb8   : > { %v6576_v40 = vpack.c.bf16 %v607_v33, %v591_v32  ;;  %v606_v41 = vld [vmem:[#allocation5 + $0x890] sm:$0xff]  ;;  %v621_v42 = vld [vmem:[#allocation5 + $0x908] sm:$0xff]  ;;  %v623_v44 = vld [vmem:[#allocation5 + $0x918] sm:$0xff]  ;;  %v6450_v46 = vpack.c.bf16 %v604_v38, %v588_v37 }
  0xb9   : > { %6439 = vmatpush1.bf16.msra.mxu0 %v6438_v10  ;;  %v637_v43 = vld [vmem:[#allocation5 + $0x988] sm:$0xff]  ;;  %v639_v45 = vld [vmem:[#allocation5 + $0x998] sm:$0xff]  ;;  %v6578_v47 = vpack.c.bf16 %v606_v41, %v590_v39  ;;  %v620_v49 = vld [vmem:[#allocation5 + $0x900] sm:$0xff] }
  0xba   : > { %6567 = vmatpush1.bf16.msra.mxu1 %v6566_v11  ;;  %6441 = vmatprep.subr.bf16.mxu0 %v6440_v12  ;;  %v6452_v48 = vpack.c.bf16 %v637_v43, %v621_v42  ;;  %v636_v50 = vld [vmem:[#allocation5 + $0x980] sm:$0xff]  ;;  %v622_v51 = vld [vmem:[#allocation5 + $0x910] sm:$0xff]  ;;  %v6580_v52 = vpack.c.bf16 %v639_v45, %v623_v44  ;;  %v653_v54 = vld [vmem:[#allocation5 + $0xa08] sm:$0xff] }
  0xbb   : > { %6569 = vmatprep.subr.bf16.mxu1 %v6568_v16  ;;  %v638_v53 = vld [vmem:[#allocation5 + $0x990] sm:$0xff]  ;;  %v669_v55 = vld [vmem:[#allocation5 + $0xa88] sm:$0xff]  ;;  %v655_v56 = vld [vmem:[#allocation5 + $0xa18] sm:$0xff]  ;;  %v6454_v58 = vpack.c.bf16 %v636_v50, %v620_v49 }
  0xbc   : > { %v671_v57 = vld [vmem:[#allocation5 + $0xa98] sm:$0xff]  ;;  %v6582_v59 = vpack.c.bf16 %v638_v53, %v622_v51  ;;  %v6456_v60 = vpack.c.bf16 %v669_v55, %v653_v54  ;;  %v652_v61 = vld [vmem:[#allocation5 + $0xa00] sm:$0xff]  ;;  %v654_v63 = vld [vmem:[#allocation5 + $0xa10] sm:$0xff] }
  0xbd   : > { %6443 = vmatpush1.bf16.msra.mxu0 %v6442_v22  ;;  %v668_v62 = vld [vmem:[#allocation5 + $0xa80] sm:$0xff]  ;;  %v6584_v0 = vpack.c.bf16 %v671_v57, %v655_v56  ;;  %v670_v1 = vld [vmem:[#allocation5 + $0xa90] sm:$0xff]  ;;  %v685_v2 = vld [vmem:[#allocation5 + $0xb08] sm:$0xff] }
  0xbe   : > { %6571 = vmatpush1.bf16.msra.mxu1 %v6570_v23  ;;  %6445 = vmatprep.subr.bf16.mxu0 %v6444_v24  ;;  %v701_v3 = vld [vmem:[#allocation5 + $0xb88] sm:$0xff]  ;;  %v687_v4 = vld [vmem:[#allocation5 + $0xb18] sm:$0xff]  ;;  %v6458_v6 = vpack.c.bf16 %v668_v62, %v652_v61  ;;  %v684_v7 = vld [vmem:[#allocation5 + $0xb00] sm:$0xff]  ;;  %v6586_v8 = vpack.c.bf16 %v670_v1, %v654_v63 }
  0xbf   : > { %6573 = vmatprep.subr.bf16.mxu1 %v6572_v28  ;;  %v703_v5 = vld [vmem:[#allocation5 + $0xb98] sm:$0xff]  ;;  %v6460_v9 = vpack.c.bf16 %v701_v3, %v685_v2  ;;  %v700_v10 = vld [vmem:[#allocation5 + $0xb80] sm:$0xff]  ;;  %v686_v11 = vld [vmem:[#allocation5 + $0xb10] sm:$0xff] }
  0xc0   : > { %v702_v12 = vld [vmem:[#allocation5 + $0xb90] sm:$0xff]  ;;  %v6588_v13 = vpack.c.bf16 %v703_v5, %v687_v4  ;;  %v717_v14 = vld [vmem:[#allocation5 + $0xc08] sm:$0xff]  ;;  %v719_v17 = vld [vmem:[#allocation5 + $0xc18] sm:$0xff]  ;;  %v6462_v19 = vpack.c.bf16 %v700_v10, %v684_v7 }
  0xc1   : > { %6447 = vmatpush1.bf16.msra.mxu0 %v6446_v34  ;;  %v733_v15 = vld [vmem:[#allocation5 + $0xc88] sm:$0xff]  ;;  %v735_v18 = vld [vmem:[#allocation5 + $0xc98] sm:$0xff]  ;;  %v6590_v20 = vpack.c.bf16 %v702_v12, %v686_v11  ;;  %v716_v22 = vld [vmem:[#allocation5 + $0xc00] sm:$0xff] }
  0xc2   : > { %6575 = vmatpush1.bf16.msra.mxu1 %v6574_v35  ;;  %6449 = vmatprep.subr.bf16.mxu0 %v6448_v36  ;;  %v301_v16 = vld [vmem:[%s9656_s6 + $0x8] sm:$0xff]  ;;  %v6464_v21 = vpack.c.bf16 %v733_v15, %v717_v14  ;;  %v732_v23 = vld [vmem:[#allocation5 + $0xc80] sm:$0xff]  ;;  %v718_v24 = vld [vmem:[#allocation5 + $0xc10] sm:$0xff]  ;;  %v6592_v25 = vpack.c.bf16 %v735_v18, %v719_v17 }
  0xc3   : > { %6577 = vmatprep.subr.bf16.mxu1 %v6576_v40  ;;  %1504 = vmatprep.mubr.f32.mxu0 %v301_v16  ;;  %v734_v26 = vld [vmem:[#allocation5 + $0xc90] sm:$0xff]  ;;  %v749_v27 = vld [vmem:[#allocation5 + $0xd08] sm:$0xff]  ;;  %v751_v29 = vld [vmem:[#allocation5 + $0xd18] sm:$0xff]  ;;  %v6466_v31 = vpack.c.bf16 %v732_v23, %v716_v22 }
  0xc4   : > { %1730 = vmatprep.mubr.f32.mxu1 %v301_v16  ;;  %v765_v28 = vld [vmem:[#allocation5 + $0xd88] sm:$0xff]  ;;  %v767_v30 = vld [vmem:[#allocation5 + $0xd98] sm:$0xff]  ;;  %v6594_v32 = vpack.c.bf16 %v734_v26, %v718_v24  ;;  %v748_v34 = vld [vmem:[#allocation5 + $0xd00] sm:$0xff] }
  0xc5   : > { %6451 = vmatpush1.bf16.msra.mxu0 %v6450_v46  ;;  %v6468_v33 = vpack.c.bf16 %v765_v28, %v749_v27  ;;  %v764_v35 = vld [vmem:[#allocation5 + $0xd80] sm:$0xff]  ;;  %v750_v36 = vld [vmem:[#allocation5 + $0xd10] sm:$0xff]  ;;  %v6596_v37 = vpack.c.bf16 %v767_v30, %v751_v29  ;;  %v781_v39 = vld [vmem:[#allocation5 + $0xe08] sm:$0xff] }
  0xc6   : > { %6579 = vmatpush1.bf16.msra.mxu1 %v6578_v47  ;;  %6453 = vmatprep.subr.bf16.mxu0 %v6452_v48  ;;  %v766_v38 = vld [vmem:[#allocation5 + $0xd90] sm:$0xff]  ;;  %v797_v40 = vld [vmem:[#allocation5 + $0xe88] sm:$0xff]  ;;  %v783_v41 = vld [vmem:[#allocation5 + $0xe18] sm:$0xff]  ;;  %v6470_v43 = vpack.c.bf16 %v764_v35, %v748_v34 }
  0xc7   : > { %6581 = vmatprep.subr.bf16.mxu1 %v6580_v52  ;;  %v799_v42 = vld [vmem:[#allocation5 + $0xe98] sm:$0xff]  ;;  %v6598_v44 = vpack.c.bf16 %v766_v38, %v750_v36  ;;  %v6472_v45 = vpack.c.bf16 %v797_v40, %v781_v39  ;;  %v780_v46 = vld [vmem:[#allocation5 + $0xe00] sm:$0xff]  ;;  %v782_v48 = vld [vmem:[#allocation5 + $0xe10] sm:$0xff] }
  0xc8   : > { %v796_v47 = vld [vmem:[#allocation5 + $0xe80] sm:$0xff]  ;;  %v6600_v49 = vpack.c.bf16 %v799_v42, %v783_v41  ;;  %v798_v50 = vld [vmem:[#allocation5 + $0xe90] sm:$0xff]  ;;  %v813_v51 = vld [vmem:[#allocation5 + $0xf08] sm:$0xff] }
  0xc9   : > { %6455 = vmatpush1.bf16.msra.mxu0 %v6454_v58  ;;  %v829_v52 = vld [vmem:[#allocation5 + $0xf88] sm:$0xff]  ;;  %v815_v53 = vld [vmem:[#allocation5 + $0xf18] sm:$0xff]  ;;  %v6474_v55 = vpack.c.bf16 %v796_v47, %v780_v46  ;;  %v6602_v56 = vpack.c.bf16 %v798_v50, %v782_v48  ;;  %v812_v58 = vld [vmem:[#allocation5 + $0xf00] sm:$0xff] }
  0xca   : > { %6583 = vmatpush1.bf16.msra.mxu1 %v6582_v59  ;;  %6457 = vmatprep.subr.bf16.mxu0 %v6456_v60  ;;  %v831_v54 = vld [vmem:[#allocation5 + $0xf98] sm:$0xff]  ;;  %v6476_v57 = vpack.c.bf16 %v829_v52, %v813_v51  ;;  %v828_v59 = vld [vmem:[#allocation5 + $0xf80] sm:$0xff]  ;;  %v814_v60 = vld [vmem:[#allocation5 + $0xf10] sm:$0xff] }
  0xcb   : > { %6585 = vmatprep.subr.bf16.mxu1 %v6584_v0  ;;  %v6604_v61 = vpack.c.bf16 %v831_v54, %v815_v53  ;;  %v830_v62 = vld [vmem:[#allocation5 + $0xf90] sm:$0xff]  ;;  %v845_v63 = vld [vmem:[#allocation5 + $0x1008] sm:$0xff]  ;;  %v847_v1 = vld [vmem:[#allocation5 + $0x1018] sm:$0xff]  ;;  %v6478_v3 = vpack.c.bf16 %v828_v59, %v812_v58 }
  0xcc   : > { %v861_v0 = vld [vmem:[#allocation5 + $0x1088] sm:$0xff]  ;;  %v863_v2 = vld [vmem:[#allocation5 + $0x1098] sm:$0xff]  ;;  %v6606_v4 = vpack.c.bf16 %v830_v62, %v814_v60  ;;  %v860_v7 = vld [vmem:[#allocation5 + $0x1080] sm:$0xff] }
  0xcd   : > { %6459 = vmatpush1.bf16.msra.mxu0 %v6458_v6  ;;  %v6480_v5 = vpack.c.bf16 %v861_v0, %v845_v63  ;;  %v844_v6 = vld [vmem:[#allocation5 + $0x1000] sm:$0xff]  ;;  %v862_v10 = vld [vmem:[#allocation5 + $0x1090] sm:$0xff]  ;;  %v877_v11 = vld [vmem:[#allocation5 + $0x1108] sm:$0xff] }
  0xce   : > { %6587 = vmatpush1.bf16.msra.mxu1 %v6586_v8  ;;  %6461 = vmatprep.subr.bf16.mxu0 %v6460_v9  ;;  %v846_v8 = vld [vmem:[#allocation5 + $0x1010] sm:$0xff]  ;;  %v6608_v9 = vpack.c.bf16 %v863_v2, %v847_v1  ;;  %v893_v12 = vld [vmem:[#allocation5 + $0x1188] sm:$0xff]  ;;  %v895_v14 = vld [vmem:[#allocation5 + $0x1198] sm:$0xff]  ;;  %v6482_v16 = vpack.c.bf16 %v860_v7, %v844_v6 }
  0xcf   : > { %6589 = vmatprep.subr.bf16.mxu1 %v6588_v13  ;;  %v879_v13 = vld [vmem:[#allocation5 + $0x1118] sm:$0xff]  ;;  %v300_v15 = vld [vmem:[%s9656_s6] sm:$0xff]  ;;  %v6610_v17 = vpack.c.bf16 %v862_v10, %v846_v8  ;;  %v6484_v18 = vpack.c.bf16 %v893_v12, %v877_v11  ;;  %v894_v23 = vld [vmem:[#allocation5 + $0x1190] sm:$0xff] }
  0xd0   : > { %v6612_v22 = vpack.c.bf16 %v895_v14, %v879_v13  ;;  %v909_v24 = vld [vmem:[#allocation5 + $0x1208] sm:$0xff]  ;;  %v911_v26 = vld [vmem:[#allocation5 + $0x1218] sm:$0xff]  ;;  %v304_v30 = vld [vmem:[%s9656_s6 + $0x20] sm:$0xff] }
  0xd1   : > { %6463 = vmatpush1.bf16.msra.mxu0 %v6462_v19  ;;  %v876_v19 = vld [vmem:[#allocation5 + $0x1100] sm:$0xff]  ;;  %v927_v27 = vld [vmem:[#allocation5 + $0x1298] sm:$0xff]  ;;  %v305_v28 = vld [vmem:[%s9656_s6 + $0x28] sm:$0xff] }
  0xd2   : > { %6591 = vmatpush1.bf16.msra.mxu1 %v6590_v20  ;;  %6465 = vmatprep.subr.bf16.mxu0 %v6464_v21  ;;  %v892_v20 = vld [vmem:[#allocation5 + $0x1180] sm:$0xff]  ;;  %v878_v21 = vld [vmem:[#allocation5 + $0x1110] sm:$0xff]  ;;  %v6616_v36 = vpack.c.bf16 %v927_v27, %v911_v26  ;;  %v941_v38 = vld [vmem:[#allocation5 + $0x1308] sm:$0xff] }
  0xd3   : > { %6593 = vmatprep.subr.bf16.mxu1 %v6592_v25  ;;  %v925_v25 = vld [vmem:[#allocation5 + $0x1288] sm:$0xff]  ;;  %v6486_v29 = vpack.c.bf16 %v892_v20, %v876_v19  ;;  %v924_v34 = vld [vmem:[#allocation5 + $0x1280] sm:$0xff]  ;;  %v910_v35 = vld [vmem:[#allocation5 + $0x1210] sm:$0xff] }
  0xd4   : > { %v957_v39 = vld [vmem:[#allocation5 + $0x1388] sm:$0xff]  ;;  %v943_v40 = vld [vmem:[#allocation5 + $0x1318] sm:$0xff]  ;;  %v940_v47 = vld [vmem:[#allocation5 + $0x1300] sm:$0xff] }
  0xd5   : > { %6467 = vmatpush1.bf16.msra.mxu0 %v6466_v31  ;;  %v6614_v31 = vpack.c.bf16 %v894_v23, %v878_v21  ;;  %v959_v41 = vld [vmem:[#allocation5 + $0x1398] sm:$0xff]  ;;  %v309_v42 = vld [vmem:[%s9656_s6 + $0x48] sm:$0xff]  ;;  %v6492_v46 = vpack.c.bf16 %v957_v39, %v941_v38  ;;  %v956_v48 = vld [vmem:[#allocation5 + $0x1380] sm:$0xff] }
  0xd6   : > { %6595 = vmatpush1.bf16.msra.mxu1 %v6594_v32  ;;  %6469 = vmatprep.subr.bf16.mxu0 %v6468_v33  ;;  %v6488_v32 = vpack.c.bf16 %v925_v25, %v909_v24  ;;  %v908_v33 = vld [vmem:[#allocation5 + $0x1200] sm:$0xff]  ;;  %v6620_v50 = vpack.c.bf16 %v959_v41, %v943_v40  ;;  %v958_v51 = vld [vmem:[#allocation5 + $0x1390] sm:$0xff]  ;;  %v973_v52 = vld [vmem:[#allocation5 + $0x1408] sm:$0xff] }
  0xd7   : > { %6597 = vmatprep.subr.bf16.mxu1 %v6596_v37  ;;  %v926_v37 = vld [vmem:[#allocation5 + $0x1290] sm:$0xff]  ;;  %v989_v53 = vld [vmem:[#allocation5 + $0x1488] sm:$0xff]  ;;  %v975_v54 = vld [vmem:[#allocation5 + $0x1418] sm:$0xff] }
  0xd8   : > { %v312_v58 = vld [vmem:[%s9656_s6 + $0x60] sm:$0xff]  ;;  %v6496_v60 = vpack.c.bf16 %v989_v53, %v973_v52  ;;  %v974_v63 = vld [vmem:[#allocation5 + $0x1410] sm:$0xff]  ;;  %v1005_v2 = vld [vmem:[#allocation5 + $0x1508] sm:$0xff] }
  0xd9   : > { %6471 = vmatpush1.bf16.msra.mxu0 %v6470_v43  ;;  %v6490_v43 = vpack.c.bf16 %v924_v34, %v908_v33  ;;  %v988_v62 = vld [vmem:[#allocation5 + $0x1480] sm:$0xff]  ;;  %v990_v1 = vld [vmem:[#allocation5 + $0x1490] sm:$0xff]  ;;  %v317_v6 = vld [vmem:[%s9656_s6 + $0x88] sm:$0xff] }
  0xda   : > { %6599 = vmatpush1.bf16.msra.mxu1 %v6598_v44  ;;  %6473 = vmatprep.subr.bf16.mxu0 %v6472_v45  ;;  %v308_v44 = vld [vmem:[%s9656_s6 + $0x40] sm:$0xff]  ;;  %v6618_v45 = vpack.c.bf16 %v926_v37, %v910_v35  ;;  %v1006_v13 = vld [vmem:[#allocation5 + $0x1510] sm:$0xff]  ;;  %v1055_v19 = vld [vmem:[#allocation5 + $0x1698] sm:$0xff] }
  0xdb   : > { %6601 = vmatprep.subr.bf16.mxu1 %v6600_v49  ;;  %v942_v49 = vld [vmem:[#allocation5 + $0x1310] sm:$0xff]  ;;  %v316_v8 = vld [vmem:[%s9656_s6 + $0x80] sm:$0xff]  ;;  %v321_v20 = vld [vmem:[%s9656_s6 + $0xa8] sm:$0xff] }
  0xdc   : > { %v6622_v59 = vpack.c.bf16 %v958_v51, %v942_v49  ;;  %v1004_v11 = vld [vmem:[#allocation5 + $0x1500] sm:$0xff]  ;;  %v1038_v27 = vld [vmem:[#allocation5 + $0x1610] sm:$0xff]  ;;  %v1087_v33 = vld [vmem:[#allocation5 + $0x1798] sm:$0xff] }
  0xdd   : > { %6475 = vmatpush1.bf16.msra.mxu0 %v6474_v55  ;;  %v991_v55 = vld [vmem:[#allocation5 + $0x1498] sm:$0xff]  ;;  %v1020_v12 = vld [vmem:[#allocation5 + $0x1580] sm:$0xff]  ;;  %v325_v34 = vld [vmem:[%s9656_s6 + $0xc8] sm:$0xff] }
  0xde   : > { %6603 = vmatpush1.bf16.msra.mxu1 %v6602_v56  ;;  %6477 = vmatprep.subr.bf16.mxu0 %v6476_v57  ;;  %v313_v56 = vld [vmem:[%s9656_s6 + $0x68] sm:$0xff]  ;;  %v6494_v57 = vpack.c.bf16 %v956_v48, %v940_v47  ;;  %v6624_v0 = vpack.c.bf16 %v991_v55, %v975_v54  ;;  %v6502_v21 = vpack.c.bf16 %v1020_v12, %v1004_v11  ;;  %v1036_v25 = vld [vmem:[#allocation5 + $0x1600] sm:$0xff]  ;;  %v1070_v41 = vld [vmem:[#allocation5 + $0x1710] sm:$0xff] }
  0xdf   : > { %6605 = vmatprep.subr.bf16.mxu1 %v6604_v61  ;;  %v972_v61 = vld [vmem:[#allocation5 + $0x1400] sm:$0xff]  ;;  %v1119_v47 = vld [vmem:[#allocation5 + $0x1898] sm:$0xff]  ;;  %v329_v48 = vld [vmem:[%s9656_s6 + $0xe8] sm:$0xff] }
  0xe0   : > { %v6498_v7 = vpack.c.bf16 %v988_v62, %v972_v61  ;;  %v1052_v26 = vld [vmem:[#allocation5 + $0x1680] sm:$0xff]  ;;  %v1102_v55 = vld [vmem:[#allocation5 + $0x1810] sm:$0xff]  ;;  %v1151_v61 = vld [vmem:[#allocation5 + $0x1998] sm:$0xff] }
  0xe1   : > { %6479 = vmatpush1.bf16.msra.mxu0 %v6478_v3  ;;  %v1021_v3 = vld [vmem:[#allocation5 + $0x1588] sm:$0xff]  ;;  %v6506_v35 = vpack.c.bf16 %v1052_v26, %v1036_v25  ;;  %v1068_v39 = vld [vmem:[#allocation5 + $0x1700] sm:$0xff]  ;;  %v303_v62 = vld [vmem:[%s9656_s6 + $0x18] sm:$0xff] }
  0xe2   : > { %6607 = vmatpush1.bf16.msra.mxu1 %v6606_v4  ;;  %6481 = vmatprep.subr.bf16.mxu0 %v6480_v5  ;;  %v1007_v4 = vld [vmem:[#allocation5 + $0x1518] sm:$0xff]  ;;  %v6500_v10 = vpack.c.bf16 %v1021_v3, %v1005_v2  ;;  %v1084_v40 = vld [vmem:[#allocation5 + $0x1780] sm:$0xff] }
  0xe3   : > { %6609 = vmatprep.subr.bf16.mxu1 %v6608_v9  ;;  %v1023_v5 = vld [vmem:[#allocation5 + $0x1598] sm:$0xff]  ;;  %v6626_v9 = vpack.c.bf16 %v990_v1, %v974_v63  ;;  %v6510_v49 = vpack.c.bf16 %v1084_v40, %v1068_v39  ;;  %v1100_v53 = vld [vmem:[#allocation5 + $0x1800] sm:$0xff]  ;;  %v1230_v40 = vld [vmem:[#allocation5 + $0x1c10] sm:$0xff] }
  0xe4   : > { %1505 = vmatmul.mubr.f32.vlgmr.msra.gmra.mrb[0].mxu0 %v300_v15  ;;  %v6628_v14 = vpack.c.bf16 %v1023_v5, %v1007_v4  ;;  %v1116_v54 = vld [vmem:[#allocation5 + $0x1880] sm:$0xff]  ;;  %v1134_v4 = vld [vmem:[#allocation5 + $0x1910] sm:$0xff] }
  0xe5   : > { %6483 = vmatpush1.bf16.msra.mxu0 %v6482_v16  ;;  %1731 = vmatmul.mubr.f32.vlgmr.msra.gmra.mrb[0].mxu1 %v300_v15  ;;  %v1022_v15 = vld [vmem:[#allocation5 + $0x1590] sm:$0xff]  ;;  %v1037_v16 = vld [vmem:[#allocation5 + $0x1608] sm:$0xff]  ;;  %v6514_v63 = vpack.c.bf16 %v1116_v54, %v1100_v53  ;;  %v1132_v2 = vld [vmem:[#allocation5 + $0x1900] sm:$0xff] }
  0xe6   : > { %6611 = vmatpush1.bf16.msra.mxu1 %v6610_v17  ;;  %6485 = vmatprep.subr.bf16.mxu0 %v6484_v18  ;;  %v1053_v17 = vld [vmem:[#allocation5 + $0x1688] sm:$0xff]  ;;  %v1039_v18 = vld [vmem:[#allocation5 + $0x1618] sm:$0xff]  ;;  %v6630_v23 = vpack.c.bf16 %v1022_v15, %v1006_v13  ;;  %v1148_v3 = vld [vmem:[#allocation5 + $0x1980] sm:$0xff] }
  0xe7   : > { %6613 = vmatprep.subr.bf16.mxu1 %v6612_v22  ;;  %1510 = vmatprep.mubr.f32.mxu0 %v305_v28  ;;  %v320_v22 = vld [vmem:[%s9656_s6 + $0xa0] sm:$0xff]  ;;  %v6504_v24 = vpack.c.bf16 %v1053_v17, %v1037_v16  ;;  %v6518_v11 = vpack.c.bf16 %v1148_v3, %v1132_v2  ;;  %v1166_v16 = vld [vmem:[#allocation5 + $0x1a10] sm:$0xff]  ;;  %v1325_v3 = vld [vmem:[#allocation5 + $0x1f08] sm:$0xff] }
  0xe8   : > { %1736 = vmatprep.mubr.f32.mxu1 %v305_v28  ;;  %1511 = vmatmul.mubr.f32.gmra.mrb[2].mxu0 %v304_v30  ;;  %v6632_v28 = vpack.c.bf16 %v1055_v19, %v1039_v18  ;;  %v1180_v15 = vld [vmem:[#allocation5 + $0x1a80] sm:$0xff]  ;;  %v1182_v18 = vld [vmem:[#allocation5 + $0x1a90] sm:$0xff]  ;;  %v1197_v19 = vld [vmem:[#allocation5 + $0x1b08] sm:$0xff] }
  0xe9   : > { %6487 = vmatpush1.bf16.msra.mxu0 %v6486_v29  ;;  %1737 = vmatmul.mubr.f32.gmra.mrb[2].mxu1 %v304_v30  ;;  %v1054_v29 = vld [vmem:[#allocation5 + $0x1690] sm:$0xff]  ;;  %v1069_v30 = vld [vmem:[#allocation5 + $0x1708] sm:$0xff]  ;;  %v1196_v26 = vld [vmem:[#allocation5 + $0x1b00] sm:$0xff] }
  0xea   : > { %6615 = vmatpush1.bf16.msra.mxu1 %v6614_v31  ;;  %6489 = vmatprep.subr.bf16.mxu0 %v6488_v32  ;;  %v1085_v31 = vld [vmem:[#allocation5 + $0x1788] sm:$0xff]  ;;  %v1071_v32 = vld [vmem:[#allocation5 + $0x1718] sm:$0xff]  ;;  %v6634_v37 = vpack.c.bf16 %v1054_v29, %v1038_v27  ;;  %v1212_v27 = vld [vmem:[#allocation5 + $0x1b80] sm:$0xff] }
  0xeb   : > { %6617 = vmatprep.subr.bf16.mxu1 %v6616_v36  ;;  %1516 = vmatprep.mubr.f32.mxu0 %v309_v42  ;;  %v324_v36 = vld [vmem:[%s9656_s6 + $0xc0] sm:$0xff]  ;;  %v6508_v38 = vpack.c.bf16 %v1085_v31, %v1069_v30  ;;  %v1214_v30 = vld [vmem:[#allocation5 + $0x1b90] sm:$0xff]  ;;  %v1229_v31 = vld [vmem:[#allocation5 + $0x1c08] sm:$0xff] }
  0xec   : > { %1742 = vmatprep.mubr.f32.mxu1 %v309_v42  ;;  %1517 = vmatmul.mubr.f32.gmra.mrb[4].mxu0 %v308_v44  ;;  %v6636_v42 = vpack.c.bf16 %v1087_v33, %v1071_v32  ;;  %v1245_v32 = vld [vmem:[#allocation5 + $0x1c88] sm:$0xff]  ;;  %v1231_v33 = vld [vmem:[#allocation5 + $0x1c18] sm:$0xff]  ;;  %v1244_v39 = vld [vmem:[#allocation5 + $0x1c80] sm:$0xff] }
  0xed   : > { %6491 = vmatpush1.bf16.msra.mxu0 %v6490_v43  ;;  %1743 = vmatmul.mubr.f32.gmra.mrb[4].mxu1 %v308_v44  ;;  %v1086_v43 = vld [vmem:[#allocation5 + $0x1790] sm:$0xff]  ;;  %v1101_v44 = vld [vmem:[#allocation5 + $0x1808] sm:$0xff] }
  0xee   : > { %6619 = vmatpush1.bf16.msra.mxu1 %v6618_v45  ;;  %6493 = vmatprep.subr.bf16.mxu0 %v6492_v46  ;;  %v1117_v45 = vld [vmem:[#allocation5 + $0x1888] sm:$0xff]  ;;  %v1103_v46 = vld [vmem:[#allocation5 + $0x1818] sm:$0xff]  ;;  %v6638_v51 = vpack.c.bf16 %v1086_v43, %v1070_v41  ;;  %v1278_v54 = vld [vmem:[#allocation5 + $0x1d90] sm:$0xff] }
  0xef   : > { %6621 = vmatprep.subr.bf16.mxu1 %v6620_v50  ;;  %1522 = vmatprep.mubr.f32.mxu0 %v313_v56  ;;  %v328_v50 = vld [vmem:[%s9656_s6 + $0xe0] sm:$0xff]  ;;  %v6512_v52 = vpack.c.bf16 %v1117_v45, %v1101_v44  ;;  %v1261_v43 = vld [vmem:[#allocation5 + $0x1d08] sm:$0xff]  ;;  %v1263_v45 = vld [vmem:[#allocation5 + $0x1d18] sm:$0xff] }
  0xf0   : > { %1748 = vmatprep.mubr.f32.mxu1 %v313_v56  ;;  %1523 = vmatmul.mubr.f32.gmra.mrb[6].mxu0 %v312_v58  ;;  %v6640_v56 = vpack.c.bf16 %v1119_v47, %v1103_v46  ;;  %v1277_v44 = vld [vmem:[#allocation5 + $0x1d88] sm:$0xff]  ;;  %v1279_v46 = vld [vmem:[#allocation5 + $0x1d98] sm:$0xff]  ;;  %v1310_v2 = vld [vmem:[#allocation5 + $0x1e90] sm:$0xff] }
  0xf1   : > { %6495 = vmatpush1.bf16.msra.mxu0 %v6494_v57  ;;  %1749 = vmatmul.mubr.f32.gmra.mrb[6].mxu1 %v312_v58  ;;  %v1118_v57 = vld [vmem:[#allocation5 + $0x1890] sm:$0xff]  ;;  %v1133_v58 = vld [vmem:[#allocation5 + $0x1908] sm:$0xff]  ;;  %v6660_v53 = vpack.c.bf16 %v1279_v46, %v1263_v45  ;;  %v403_v45 = vld [vmem:[#allocation5 + $0x238] sm:$0xff] }
  0xf2   : > { %6623 = vmatpush1.bf16.msra.mxu1 %v6622_v59  ;;  %6497 = vmatprep.subr.bf16.mxu0 %v6496_v60  ;;  %v1149_v59 = vld [vmem:[#allocation5 + $0x1988] sm:$0xff]  ;;  %v1135_v60 = vld [vmem:[#allocation5 + $0x1918] sm:$0xff] }
  0xf3   : > { %6625 = vmatprep.subr.bf16.mxu1 %v6624_v0  ;;  %1528 = vmatprep.mubr.f32.mxu0 %v317_v6  ;;  %v6642_v0 = vpack.c.bf16 %v1118_v57, %v1102_v55  ;;  %v6516_v1 = vpack.c.bf16 %v1149_v59, %v1133_v58  ;;  %v6644_v5 = vpack.c.bf16 %v1151_v61, %v1135_v60  ;;  %v1293_v55 = vld [vmem:[#allocation5 + $0x1e08] sm:$0xff]  ;;  %v1295_v57 = vld [vmem:[#allocation5 + $0x1e18] sm:$0xff] }
  0xf4   : > { %1754 = vmatprep.mubr.f32.mxu1 %v317_v6  ;;  %1529 = vmatmul.mubr.f32.gmra.mrb[8].mxu0 %v316_v8  ;;  %v1150_v6 = vld [vmem:[#allocation5 + $0x1990] sm:$0xff]  ;;  %v1311_v58 = vld [vmem:[#allocation5 + $0x1e98] sm:$0xff] }
  0xf5   : > { %6499 = vmatpush1.bf16.msra.mxu0 %v6498_v7  ;;  %1755 = vmatmul.mubr.f32.gmra.mrb[8].mxu1 %v316_v8  ;;  %v1165_v7 = vld [vmem:[#allocation5 + $0x1a08] sm:$0xff]  ;;  %v6646_v12 = vpack.c.bf16 %v1150_v6, %v1134_v4  ;;  %v1343_v6 = vld [vmem:[#allocation5 + $0x1f98] sm:$0xff] }
  0xf6   : > { %6627 = vmatpush1.bf16.msra.mxu1 %v6626_v9  ;;  %6501 = vmatprep.subr.bf16.mxu0 %v6500_v10  ;;  %v1181_v8 = vld [vmem:[#allocation5 + $0x1a88] sm:$0xff]  ;;  %v1167_v9 = vld [vmem:[#allocation5 + $0x1a18] sm:$0xff] }
  0xf7   : > { %6629 = vmatprep.subr.bf16.mxu1 %v6628_v14  ;;  %1534 = vmatprep.mubr.f32.mxu0 %v321_v20  ;;  %v1183_v10 = vld [vmem:[#allocation5 + $0x1a98] sm:$0xff]  ;;  %v6520_v13 = vpack.c.bf16 %v1181_v8, %v1165_v7  ;;  %v1164_v14 = vld [vmem:[#allocation5 + $0x1a00] sm:$0xff]  ;;  %v1341_v4 = vld [vmem:[#allocation5 + $0x1f88] sm:$0xff] }
  0xf8   : > { %1760 = vmatprep.mubr.f32.mxu1 %v321_v20  ;;  %1535 = vmatmul.mubr.f32.gmra.mrb[10].mxu0 %v320_v22  ;;  %v6648_v17 = vpack.c.bf16 %v1183_v10, %v1167_v9  ;;  %v1213_v20 = vld [vmem:[#allocation5 + $0x1b88] sm:$0xff]  ;;  %v6540_v9 = vpack.c.bf16 %v1341_v4, %v1325_v3  ;;  %v1324_v10 = vld [vmem:[#allocation5 + $0x1f00] sm:$0xff]  ;;  %v419_v46 = vld [vmem:[#allocation5 + $0x2b8] sm:$0xff] }
  0xf9   : > { %6503 = vmatpush1.bf16.msra.mxu0 %v6502_v21  ;;  %1761 = vmatmul.mubr.f32.gmra.mrb[10].mxu1 %v320_v22  ;;  %v1199_v21 = vld [vmem:[#allocation5 + $0x1b18] sm:$0xff]  ;;  %v6524_v25 = vpack.c.bf16 %v1213_v20, %v1197_v19  ;;  %v450_v3 = vld [vmem:[#allocation5 + $0x3b0] sm:$0xff] }
  0xfa   : > { %6631 = vmatpush1.bf16.msra.mxu1 %v6630_v23  ;;  %6505 = vmatprep.subr.bf16.mxu0 %v6504_v24  ;;  %v1215_v22 = vld [vmem:[#allocation5 + $0x1b98] sm:$0xff]  ;;  %v6522_v23 = vpack.c.bf16 %v1180_v15, %v1164_v14  ;;  %v6650_v24 = vpack.c.bf16 %v1182_v18, %v1166_v16  ;;  %v1342_v14 = vld [vmem:[#allocation5 + $0x1f90] sm:$0xff]  ;;  %v337_v15 = vld [vmem:[#allocation5 + $0x28] sm:$0xff] }
  0xfb   : > { %6633 = vmatprep.subr.bf16.mxu1 %v6632_v28  ;;  %1540 = vmatprep.mubr.f32.mxu0 %v325_v34  ;;  %v1198_v28 = vld [vmem:[#allocation5 + $0x1b10] sm:$0xff]  ;;  %v6652_v29 = vpack.c.bf16 %v1215_v22, %v1199_v21  ;;  %v353_v16 = vld [vmem:[#allocation5 + $0xa8] sm:$0xff]  ;;  %v355_v18 = vld [vmem:[#allocation5 + $0xb8] sm:$0xff] }
  0xfc   : > { %1766 = vmatprep.mubr.f32.mxu1 %v325_v34  ;;  %1541 = vmatmul.mubr.f32.gmra.mrb[12].mxu0 %v324_v36  ;;  %v1247_v34 = vld [vmem:[#allocation5 + $0x1c98] sm:$0xff]  ;;  %v6672_v21 = vpack.c.bf16 %v353_v16, %v337_v15  ;;  %v336_v22 = vld [vmem:[#allocation5 + $0x20] sm:$0xff]  ;;  %v466_v16 = vld [vmem:[#allocation5 + $0x430] sm:$0xff] }
  0xfd   : > { %6507 = vmatpush1.bf16.msra.mxu0 %v6506_v35  ;;  %1767 = vmatmul.mubr.f32.gmra.mrb[12].mxu1 %v324_v36  ;;  %v6526_v35 = vpack.c.bf16 %v1212_v27, %v1196_v26  ;;  %v6654_v36 = vpack.c.bf16 %v1214_v30, %v1198_v28  ;;  %v6656_v41 = vpack.c.bf16 %v1247_v34, %v1231_v33  ;;  %v354_v26 = vld [vmem:[#allocation5 + $0xb0] sm:$0xff]  ;;  %v369_v27 = vld [vmem:[#allocation5 + $0x128] sm:$0xff]  ;;  %v368_v34 = vld [vmem:[#allocation5 + $0x120] sm:$0xff] }
  0xfe   : > { %6635 = vmatpush1.bf16.msra.mxu1 %v6634_v37  ;;  %6509 = vmatprep.subr.bf16.mxu0 %v6508_v38  ;;  %v6528_v37 = vpack.c.bf16 %v1245_v32, %v1229_v31  ;;  %v1228_v38 = vld [vmem:[#allocation5 + $0x1c00] sm:$0xff]  ;;  %v385_v28 = vld [vmem:[#allocation5 + $0x1a8] sm:$0xff]  ;;  %v371_v31 = vld [vmem:[#allocation5 + $0x138] sm:$0xff] }
  0xff   : > { %6637 = vmatprep.subr.bf16.mxu1 %v6636_v42  ;;  %1546 = vmatprep.mubr.f32.mxu0 %v329_v48  ;;  %v1246_v42 = vld [vmem:[#allocation5 + $0x1c90] sm:$0xff]  ;;  %v6530_v47 = vpack.c.bf16 %v1244_v39, %v1228_v38  ;;  %v387_v32 = vld [vmem:[#allocation5 + $0x1b8] sm:$0xff] }
 0x100   : > { %1772 = vmatprep.mubr.f32.mxu1 %v329_v48  ;;  %1547 = vmatmul.mubr.f32.gmra.mrb[14].mxu0 %v328_v50  ;;  %v6658_v48 = vpack.c.bf16 %v1246_v42, %v1230_v40  ;;  %v370_v38 = vld [vmem:[#allocation5 + $0x130] sm:$0xff]  ;;  %v6804_v40 = vpack.c.bf16 %v387_v32, %v371_v31  ;;  %v417_v42 = vld [vmem:[#allocation5 + $0x2a8] sm:$0xff] }
 0x101   : > { %6511 = vmatpush1.bf16.msra.mxu0 %v6510_v49  ;;  %1773 = vmatmul.mubr.f32.gmra.mrb[14].mxu1 %v328_v50  ;;  %v6532_v49 = vpack.c.bf16 %v1277_v44, %v1261_v43  ;;  %v1260_v50 = vld [vmem:[#allocation5 + $0x1d00] sm:$0xff]  ;;  %v386_v39 = vld [vmem:[#allocation5 + $0x1b0] sm:$0xff] }
 0x102   : > { %6639 = vmatpush1.bf16.msra.mxu1 %v6638_v51  ;;  %6513 = vmatprep.subr.bf16.mxu0 %v6512_v52  ;;  %v1276_v51 = vld [vmem:[#allocation5 + $0x1d80] sm:$0xff]  ;;  %v1262_v52 = vld [vmem:[#allocation5 + $0x1d10] sm:$0xff] }
 0x103   : > { %6641 = vmatprep.subr.bf16.mxu1 %v6640_v56  ;;  %1617 = vmatprep.mubr.f32.mxu0 %v303_v62  ;;  %v1309_v56 = vld [vmem:[#allocation5 + $0x1e88] sm:$0xff]  ;;  %v6534_v59 = vpack.c.bf16 %v1276_v51, %v1260_v50  ;;  %v6662_v60 = vpack.c.bf16 %v1278_v54, %v1262_v52  ;;  %v306_v43 = vld [vmem:[%s9656_s6 + $0x30] sm:$0xff]  ;;  %v311_v50 = vld [vmem:[%s9656_s6 + $0x58] sm:$0xff]  ;;  %v6808_v54 = vpack.c.bf16 %v419_v46, %v403_v45 }
 0x104   : > { %1843 = vmatprep.mubr.f32.mxu1 %v303_v62  ;;  %v6536_v61 = vpack.c.bf16 %v1309_v56, %v1293_v55  ;;  %v1292_v62 = vld [vmem:[#allocation5 + $0x1e00] sm:$0xff]  ;;  %v402_v52 = vld [vmem:[#allocation5 + $0x230] sm:$0xff]  ;;  %v433_v55 = vld [vmem:[#allocation5 + $0x328] sm:$0xff] }
 0x105   : > { %6515 = vmatpush1.bf16.msra.mxu0 %v6514_v63  ;;  %v1308_v63 = vld [vmem:[#allocation5 + $0x1e80] sm:$0xff]  ;;  %v449_v56 = vld [vmem:[#allocation5 + $0x3a8] sm:$0xff]  ;;  %v514_v31 = vld [vmem:[#allocation5 + $0x5b0] sm:$0xff] }
 0x106   : > { %6643 = vmatpush1.bf16.msra.mxu1 %v6642_v0  ;;  %6517 = vmatprep.subr.bf16.mxu0 %v6516_v1  ;;  %v1294_v0 = vld [vmem:[#allocation5 + $0x1e10] sm:$0xff]  ;;  %v6664_v1 = vpack.c.bf16 %v1311_v58, %v1295_v57  ;;  %v6538_v7 = vpack.c.bf16 %v1308_v63, %v1292_v62  ;;  %v432_v62 = vld [vmem:[#allocation5 + $0x320] sm:$0xff] }
 0x107   : > { %6645 = vmatprep.subr.bf16.mxu1 %v6644_v5  ;;  %v1327_v5 = vld [vmem:[#allocation5 + $0x1f18] sm:$0xff]  ;;  %v6666_v8 = vpack.c.bf16 %v1310_v2, %v1294_v0  ;;  %v310_v57 = vld [vmem:[%s9656_s6 + $0x50] sm:$0xff]  ;;  %v448_v63 = vld [vmem:[#allocation5 + $0x3a0] sm:$0xff] }
 0x108   : > { %v315_v0 = vld [vmem:[%s9656_s6 + $0x78] sm:$0xff]  ;;  %v434_v2 = vld [vmem:[#allocation5 + $0x330] sm:$0xff] }
 0x109   : > { %6519 = vmatpush1.bf16.msra.mxu0 %v6518_v11  ;;  %v1340_v11 = vld [vmem:[#allocation5 + $0x1f80] sm:$0xff]  ;;  %v546_v45 = vld [vmem:[#allocation5 + $0x6b0] sm:$0xff] }
 0x10a   : > { %6647 = vmatpush1.bf16.msra.mxu1 %v6646_v12  ;;  %6521 = vmatprep.subr.bf16.mxu0 %v6520_v13  ;;  %v1326_v12 = vld [vmem:[#allocation5 + $0x1f10] sm:$0xff]  ;;  %v6668_v13 = vpack.c.bf16 %v1343_v6, %v1327_v5  ;;  %v6542_v19 = vpack.c.bf16 %v1340_v11, %v1324_v10  ;;  %v465_v5 = vld [vmem:[#allocation5 + $0x428] sm:$0xff]  ;;  %v483_v10 = vld [vmem:[#allocation5 + $0x4b8] sm:$0xff]  ;;  %v6814_v11 = vpack.c.bf16 %v450_v3, %v434_v2 }
 0x10b   : > { %6649 = vmatprep.subr.bf16.mxu1 %v6648_v17  ;;  %v339_v17 = vld [vmem:[#allocation5 + $0x38] sm:$0xff]  ;;  %v6670_v20 = vpack.c.bf16 %v1342_v14, %v1326_v12  ;;  %v481_v6 = vld [vmem:[#allocation5 + $0x4a8] sm:$0xff]  ;;  %v464_v12 = vld [vmem:[#allocation5 + $0x420] sm:$0xff] }
 0x10c   : > { %v319_v14 = vld [vmem:[%s9656_s6 + $0x98] sm:$0xff]  ;;  %v6688_v15 = vpack.c.bf16 %v481_v6, %v465_v5  ;;  %v326_v46 = vld [vmem:[%s9656_s6 + $0xd0] sm:$0xff]  ;;  %v592_v5 = vld [vmem:[#allocation5 + $0x820] sm:$0xff] }
 0x10d   : > { %6523 = vmatpush1.bf16.msra.mxu0 %v6522_v23  ;;  %v352_v23 = vld [vmem:[#allocation5 + $0xa0] sm:$0xff] }
 0x10e   : > { %6651 = vmatpush1.bf16.msra.mxu1 %v6650_v24  ;;  %6525 = vmatprep.subr.bf16.mxu0 %v6524_v25  ;;  %v6800_v24 = vpack.c.bf16 %v355_v18, %v339_v17  ;;  %v338_v25 = vld [vmem:[#allocation5 + $0x30] sm:$0xff]  ;;  %v6674_v30 = vpack.c.bf16 %v352_v23, %v336_v22  ;;  %v499_v23 = vld [vmem:[#allocation5 + $0x538] sm:$0xff]  ;;  %v608_v6 = vld [vmem:[#allocation5 + $0x8a0] sm:$0xff] }
 0x10f   : > { %6653 = vmatprep.subr.bf16.mxu1 %v6652_v29  ;;  %v302_v29 = vld [vmem:[%s9656_s6 + $0x10] sm:$0xff]  ;;  %v6802_v33 = vpack.c.bf16 %v354_v26, %v338_v25  ;;  %v496_v26 = vld [vmem:[#allocation5 + $0x520] sm:$0xff] }
 0x110   : > { %v482_v17 = vld [vmem:[#allocation5 + $0x4b0] sm:$0xff] }
 0x111   : > { %6527 = vmatpush1.bf16.msra.mxu0 %v6526_v35  ;;  %v384_v35 = vld [vmem:[#allocation5 + $0x1a0] sm:$0xff]  ;;  %v6818_v25 = vpack.c.bf16 %v482_v17, %v466_v16 }
 0x112   : > { %6655 = vmatpush1.bf16.msra.mxu1 %v6654_v36  ;;  %6529 = vmatprep.subr.bf16.mxu0 %v6528_v37  ;;  %v307_v36 = vld [vmem:[%s9656_s6 + $0x38] sm:$0xff]  ;;  %v6676_v37 = vpack.c.bf16 %v385_v28, %v369_v27  ;;  %v6678_v44 = vpack.c.bf16 %v384_v35, %v368_v34  ;;  %v512_v27 = vld [vmem:[#allocation5 + $0x5a0] sm:$0xff]  ;;  %v545_v34 = vld [vmem:[#allocation5 + $0x6a8] sm:$0xff] }
 0x113   : > { %6657 = vmatprep.subr.bf16.mxu1 %v6656_v41  ;;  %v401_v41 = vld [vmem:[#allocation5 + $0x228] sm:$0xff]  ;;  %v323_v28 = vld [vmem:[%s9656_s6 + $0xb8] sm:$0xff]  ;;  %v322_v35 = vld [vmem:[%s9656_s6 + $0xb0] sm:$0xff] }
 0x114   : > { %v6680_v51 = vpack.c.bf16 %v417_v42, %v401_v41  ;;  %v544_v41 = vld [vmem:[#allocation5 + $0x6a0] sm:$0xff]  ;;  %v327_v42 = vld [vmem:[%s9656_s6 + $0xd8] sm:$0xff] }
 0x115   : > { %6531 = vmatpush1.bf16.msra.mxu0 %v6530_v47  ;;  %v6806_v47 = vpack.c.bf16 %v386_v39, %v370_v38  ;;  %v547_v38 = vld [vmem:[#allocation5 + $0x6b8] sm:$0xff]  ;;  %v624_v17 = vld [vmem:[#allocation5 + $0x920] sm:$0xff] }
 0x116   : > { %6659 = vmatpush1.bf16.msra.mxu1 %v6658_v48  ;;  %6533 = vmatprep.subr.bf16.mxu0 %v6532_v49  ;;  %v400_v48 = vld [vmem:[#allocation5 + $0x220] sm:$0xff] }
 0x117   : > { %6661 = vmatprep.subr.bf16.mxu1 %v6660_v53  ;;  %v416_v49 = vld [vmem:[#allocation5 + $0x2a0] sm:$0xff]  ;;  %v418_v53 = vld [vmem:[#allocation5 + $0x2b0] sm:$0xff] }
 0x118   : > { %v6682_v58 = vpack.c.bf16 %v416_v49, %v400_v48  ;;  %v561_v48 = vld [vmem:[#allocation5 + $0x728] sm:$0xff] }
 0x119   : > { %6535 = vmatpush1.bf16.msra.mxu0 %v6534_v59  ;;  %v435_v59 = vld [vmem:[#allocation5 + $0x338] sm:$0xff]  ;;  %v577_v49 = vld [vmem:[#allocation5 + $0x7a8] sm:$0xff] }
 0x11a   : > { %6663 = vmatpush1.bf16.msra.mxu1 %v6662_v60  ;;  %6537 = vmatprep.subr.bf16.mxu0 %v6536_v61  ;;  %v451_v60 = vld [vmem:[#allocation5 + $0x3b8] sm:$0xff]  ;;  %v6810_v61 = vpack.c.bf16 %v418_v53, %v402_v52 }
 0x11b   : > { %6665 = vmatprep.subr.bf16.mxu1 %v6664_v1  ;;  %v6684_v1 = vpack.c.bf16 %v449_v56, %v433_v55  ;;  %v6812_v4 = vpack.c.bf16 %v451_v60, %v435_v59  ;;  %v563_v52 = vld [vmem:[#allocation5 + $0x738] sm:$0xff]  ;;  %v560_v55 = vld [vmem:[#allocation5 + $0x720] sm:$0xff]  ;;  %v578_v59 = vld [vmem:[#allocation5 + $0x7b0] sm:$0xff] }
 0x11c   : > { %v579_v53 = vld [vmem:[#allocation5 + $0x7b8] sm:$0xff]  ;;  %v576_v56 = vld [vmem:[#allocation5 + $0x7a0] sm:$0xff]  ;;  %v593_v60 = vld [vmem:[#allocation5 + $0x828] sm:$0xff] }
 0x11d   : > { %6539 = vmatpush1.bf16.msra.mxu0 %v6538_v7  ;;  %v314_v7 = vld [vmem:[%s9656_s6 + $0x70] sm:$0xff]  ;;  %v6702_v2 = vpack.c.bf16 %v576_v56, %v560_v55  ;;  %v736_v55 = vld [vmem:[#allocation5 + $0xca0] sm:$0xff] }
 0x11e   : > { %6667 = vmatpush1.bf16.msra.mxu1 %v6666_v8  ;;  %6541 = vmatprep.subr.bf16.mxu0 %v6540_v9  ;;  %v6686_v8 = vpack.c.bf16 %v448_v63, %v432_v62  ;;  %v467_v9 = vld [vmem:[#allocation5 + $0x438] sm:$0xff]  ;;  %v6828_v62 = vpack.c.bf16 %v579_v53, %v563_v52  ;;  %v722_v56 = vld [vmem:[#allocation5 + $0xc30] sm:$0xff] }
 0x11f   : > { %6669 = vmatprep.subr.bf16.mxu1 %v6668_v13  ;;  %v480_v13 = vld [vmem:[#allocation5 + $0x4a0] sm:$0xff]  ;;  %v6816_v18 = vpack.c.bf16 %v483_v10, %v467_v9  ;;  %v595_v63 = vld [vmem:[#allocation5 + $0x838] sm:$0xff]  ;;  %v610_v9 = vld [vmem:[#allocation5 + $0x8b0] sm:$0xff] }
 0x120   : > { %v6690_v22 = vpack.c.bf16 %v480_v13, %v464_v12  ;;  %v625_v10 = vld [vmem:[#allocation5 + $0x928] sm:$0xff]  ;;  %v627_v12 = vld [vmem:[#allocation5 + $0x938] sm:$0xff] }
 0x121   : > { %6543 = vmatpush1.bf16.msra.mxu0 %v6542_v19  ;;  %v497_v19 = vld [vmem:[#allocation5 + $0x528] sm:$0xff]  ;;  %v643_v13 = vld [vmem:[#allocation5 + $0x9b8] sm:$0xff] }
 0x122   : > { %6671 = vmatpush1.bf16.msra.mxu1 %v6670_v20  ;;  %6673 = vmatprep.subr.bf16.mxu0 %v6672_v21  ;;  %v513_v20 = vld [vmem:[#allocation5 + $0x5a8] sm:$0xff]  ;;  %v318_v21 = vld [vmem:[%s9656_s6 + $0x90] sm:$0xff] }
 0x123   : > { %6801 = vmatprep.subr.bf16.mxu1 %v6800_v24  ;;  %v515_v24 = vld [vmem:[#allocation5 + $0x5b8] sm:$0xff] }
 0x124   : > { %1618 = vmatmul.mubr.f32.vlgmr.msra.gmra.mrb[0].mxu0 %v302_v29  ;;  %v6820_v32 = vpack.c.bf16 %v515_v24, %v499_v23  ;;  %v673_v23 = vld [vmem:[#allocation5 + $0xaa8] sm:$0xff] }
 0x125   : > { %1844 = vmatmul.mubr.f32.vlgmr.msra.gmra.mrb[0].mxu1 %v302_v29  ;;  %6675 = vmatpush1.bf16.msra.mxu0 %v6674_v30  ;;  %v6692_v29 = vpack.c.bf16 %v513_v20, %v497_v19  ;;  %v498_v30 = vld [vmem:[#allocation5 + $0x530] sm:$0xff]  ;;  %v6836_v20 = vpack.c.bf16 %v643_v13, %v627_v12  ;;  %v9069_v24 = vld [vmem:[%s9656_s6 + $0x8] sm:$0xff] }
 0x126   : > { %6803 = vmatpush1.bf16.msra.mxu1 %v6802_v33  ;;  %1623 = vmatprep.mubr.f32.mxu0 %v307_v36  ;;  %v529_v33 = vld [vmem:[#allocation5 + $0x628] sm:$0xff]  ;;  %v6822_v39 = vpack.c.bf16 %v514_v31, %v498_v30  ;;  %v626_v19 = vld [vmem:[#allocation5 + $0x930] sm:$0xff]  ;;  %v656_v30 = vld [vmem:[#allocation5 + $0xa20] sm:$0xff] }
 0x127   : > { %1849 = vmatprep.mubr.f32.mxu1 %v307_v36  ;;  %6677 = vmatprep.subr.bf16.mxu0 %v6676_v37  ;;  %v6694_v36 = vpack.c.bf16 %v512_v27, %v496_v26  ;;  %v531_v37 = vld [vmem:[#allocation5 + $0x638] sm:$0xff]  ;;  %v672_v31 = vld [vmem:[#allocation5 + $0xaa0] sm:$0xff] }
 0x128   : > { %1624 = vmatmul.mubr.f32.gmra.mrb[2].mxu0 %v306_v43  ;;  %6805 = vmatprep.subr.bf16.mxu1 %v6804_v40  ;;  %v528_v40 = vld [vmem:[#allocation5 + $0x620] sm:$0xff]  ;;  %v675_v26 = vld [vmem:[#allocation5 + $0xab8] sm:$0xff] }
 0x129   : > { %1850 = vmatmul.mubr.f32.gmra.mrb[2].mxu1 %v306_v43  ;;  %6679 = vmatpush1.bf16.msra.mxu0 %v6678_v44  ;;  %v6696_v43 = vpack.c.bf16 %v545_v34, %v529_v33  ;;  %v530_v44 = vld [vmem:[#allocation5 + $0x630] sm:$0xff] }
 0x12a   : > { %6807 = vmatpush1.bf16.msra.mxu1 %v6806_v47  ;;  %1629 = vmatprep.mubr.f32.mxu0 %v311_v50  ;;  %v6824_v47 = vpack.c.bf16 %v547_v38, %v531_v37  ;;  %v674_v34 = vld [vmem:[#allocation5 + $0xab0] sm:$0xff]  ;;  %v691_v37 = vld [vmem:[#allocation5 + $0xb38] sm:$0xff] }
 0x12b   : > { %1855 = vmatprep.mubr.f32.mxu1 %v311_v50  ;;  %6681 = vmatprep.subr.bf16.mxu0 %v6680_v51  ;;  %v6698_v50 = vpack.c.bf16 %v544_v41, %v528_v40  ;;  %v331_v51 = vld [vmem:[%s9656_s6 + $0xf8] sm:$0xff] }
 0x12c   : > { %1630 = vmatmul.mubr.f32.gmra.mrb[4].mxu0 %v310_v57  ;;  %6809 = vmatprep.subr.bf16.mxu1 %v6808_v54  ;;  %v6826_v54 = vpack.c.bf16 %v546_v45, %v530_v44  ;;  %v707_v38 = vld [vmem:[#allocation5 + $0xbb8] sm:$0xff]  ;;  %v690_v44 = vld [vmem:[#allocation5 + $0xb30] sm:$0xff] }
 0x12d   : > { %1856 = vmatmul.mubr.f32.gmra.mrb[4].mxu1 %v310_v57  ;;  %6683 = vmatpush1.bf16.msra.mxu0 %v6682_v58  ;;  %v562_v57 = vld [vmem:[#allocation5 + $0x730] sm:$0xff]  ;;  %v6700_v58 = vpack.c.bf16 %v577_v49, %v561_v48  ;;  %v6844_v45 = vpack.c.bf16 %v707_v38, %v691_v37  ;;  %v737_v48 = vld [vmem:[#allocation5 + $0xca8] sm:$0xff]  ;;  %v723_v49 = vld [vmem:[#allocation5 + $0xc38] sm:$0xff] }
 0x12e   : > { %6811 = vmatpush1.bf16.msra.mxu1 %v6810_v61  ;;  %1635 = vmatprep.mubr.f32.mxu0 %v315_v0  ;;  %v609_v61 = vld [vmem:[#allocation5 + $0x8a8] sm:$0xff]  ;;  %v6830_v3 = vpack.c.bf16 %v578_v59, %v562_v57  ;;  %v848_v38 = vld [vmem:[#allocation5 + $0x1020] sm:$0xff] }
 0x12f   : > { %1861 = vmatprep.mubr.f32.mxu1 %v315_v0  ;;  %6685 = vmatprep.subr.bf16.mxu0 %v6684_v1  ;;  %v611_v0 = vld [vmem:[#allocation5 + $0x8b8] sm:$0xff]  ;;  %v330_v1 = vld [vmem:[%s9656_s6 + $0xf0] sm:$0xff]  ;;  %v753_v59 = vld [vmem:[#allocation5 + $0xd28] sm:$0xff] }
 0x130   : > { %1636 = vmatmul.mubr.f32.gmra.mrb[6].mxu0 %v314_v7  ;;  %6813 = vmatprep.subr.bf16.mxu1 %v6812_v4  ;;  %v6704_v4 = vpack.c.bf16 %v609_v61, %v593_v60  ;;  %v769_v60 = vld [vmem:[#allocation5 + $0xda8] sm:$0xff]  ;;  %v755_v61 = vld [vmem:[#allocation5 + $0xd38] sm:$0xff] }
 0x131   : > { %1862 = vmatmul.mubr.f32.gmra.mrb[6].mxu1 %v314_v7  ;;  %6687 = vmatpush1.bf16.msra.mxu0 %v6686_v8  ;;  %v594_v7 = vld [vmem:[#allocation5 + $0x830] sm:$0xff]  ;;  %v6832_v8 = vpack.c.bf16 %v611_v0, %v595_v63 }
 0x132   : > { %6815 = vmatpush1.bf16.msra.mxu1 %v6814_v11  ;;  %1641 = vmatprep.mubr.f32.mxu0 %v319_v14  ;;  %v641_v11 = vld [vmem:[#allocation5 + $0x9a8] sm:$0xff] }
 0x133   : > { %1867 = vmatprep.mubr.f32.mxu1 %v319_v14  ;;  %6689 = vmatprep.subr.bf16.mxu0 %v6688_v15  ;;  %v6706_v14 = vpack.c.bf16 %v608_v6, %v592_v5  ;;  %v6834_v15 = vpack.c.bf16 %v610_v9, %v594_v7  ;;  %v6708_v16 = vpack.c.bf16 %v641_v11, %v625_v10  ;;  %v770_v6 = vld [vmem:[#allocation5 + $0xdb0] sm:$0xff]  ;;  %v785_v7 = vld [vmem:[#allocation5 + $0xe28] sm:$0xff]  ;;  %v787_v9 = vld [vmem:[#allocation5 + $0xe38] sm:$0xff] }
 0x134   : > { %1642 = vmatmul.mubr.f32.gmra.mrb[8].mxu0 %v318_v21  ;;  %6817 = vmatprep.subr.bf16.mxu1 %v6816_v18  ;;  %v640_v18 = vld [vmem:[#allocation5 + $0x9a0] sm:$0xff]  ;;  %v803_v10 = vld [vmem:[#allocation5 + $0xeb8] sm:$0xff] }
 0x135   : > { %1868 = vmatmul.mubr.f32.gmra.mrb[8].mxu1 %v318_v21  ;;  %6691 = vmatpush1.bf16.msra.mxu0 %v6690_v22  ;;  %v642_v21 = vld [vmem:[#allocation5 + $0x9b0] sm:$0xff]  ;;  %v657_v22 = vld [vmem:[#allocation5 + $0xa28] sm:$0xff]  ;;  %v6710_v27 = vpack.c.bf16 %v640_v18, %v624_v17  ;;  %v6856_v17 = vpack.c.bf16 %v803_v10, %v787_v9  ;;  %v9072_v9 = vld [vmem:[%s9656_s6 + $0x20] sm:$0xff] }
 0x136   : > { %6819 = vmatpush1.bf16.msra.mxu1 %v6818_v25  ;;  %1647 = vmatprep.mubr.f32.mxu0 %v323_v28  ;;  %v659_v25 = vld [vmem:[#allocation5 + $0xa38] sm:$0xff]  ;;  %v802_v18 = vld [vmem:[#allocation5 + $0xeb0] sm:$0xff] }
 0x137   : > { %1873 = vmatprep.mubr.f32.mxu1 %v323_v28  ;;  %6693 = vmatprep.subr.bf16.mxu0 %v6692_v29  ;;  %v6838_v28 = vpack.c.bf16 %v642_v21, %v626_v19  ;;  %v6712_v29 = vpack.c.bf16 %v673_v23, %v657_v22  ;;  %v6840_v33 = vpack.c.bf16 %v675_v26, %v659_v25  ;;  %v817_v19 = vld [vmem:[#allocation5 + $0xf28] sm:$0xff]  ;;  %v819_v21 = vld [vmem:[#allocation5 + $0xf38] sm:$0xff]  ;;  %v816_v26 = vld [vmem:[#allocation5 + $0xf20] sm:$0xff] }
 0x138   : > { %1648 = vmatmul.mubr.f32.gmra.mrb[10].mxu0 %v322_v35  ;;  %6821 = vmatprep.subr.bf16.mxu1 %v6820_v32  ;;  %v658_v32 = vld [vmem:[#allocation5 + $0xa30] sm:$0xff]  ;;  %v835_v22 = vld [vmem:[#allocation5 + $0xfb8] sm:$0xff] }
 0x139   : > { %1874 = vmatmul.mubr.f32.gmra.mrb[10].mxu1 %v322_v35  ;;  %6695 = vmatpush1.bf16.msra.mxu0 %v6694_v36  ;;  %v689_v35 = vld [vmem:[#allocation5 + $0xb28] sm:$0xff]  ;;  %v6842_v40 = vpack.c.bf16 %v674_v34, %v658_v32  ;;  %v867_v34 = vld [vmem:[#allocation5 + $0x10b8] sm:$0xff] }
 0x13a   : > { %6823 = vmatpush1.bf16.msra.mxu1 %v6822_v39  ;;  %1653 = vmatprep.mubr.f32.mxu0 %v327_v42  ;;  %v705_v36 = vld [vmem:[#allocation5 + $0xba8] sm:$0xff]  ;;  %v6714_v39 = vpack.c.bf16 %v672_v31, %v656_v30  ;;  %v834_v30 = vld [vmem:[#allocation5 + $0xfb0] sm:$0xff] }
 0x13b   : > { %1879 = vmatprep.mubr.f32.mxu1 %v327_v42  ;;  %6697 = vmatprep.subr.bf16.mxu0 %v6696_v43  ;;  %v6716_v41 = vpack.c.bf16 %v705_v36, %v689_v35  ;;  %v688_v42 = vld [vmem:[#allocation5 + $0xb20] sm:$0xff]  ;;  %v849_v31 = vld [vmem:[#allocation5 + $0x1028] sm:$0xff] }
 0x13c   : > { %1654 = vmatmul.mubr.f32.gmra.mrb[12].mxu0 %v326_v46  ;;  %6825 = vmatprep.subr.bf16.mxu1 %v6824_v47  ;;  %v704_v43 = vld [vmem:[#allocation5 + $0xba0] sm:$0xff]  ;;  %v721_v47 = vld [vmem:[#allocation5 + $0xc28] sm:$0xff] }
 0x13d   : > { %1880 = vmatmul.mubr.f32.gmra.mrb[12].mxu1 %v326_v46  ;;  %6699 = vmatpush1.bf16.msra.mxu0 %v6698_v50  ;;  %v706_v46 = vld [vmem:[#allocation5 + $0xbb0] sm:$0xff]  ;;  %v739_v50 = vld [vmem:[#allocation5 + $0xcb8] sm:$0xff]  ;;  %v6720_v53 = vpack.c.bf16 %v737_v48, %v721_v47  ;;  %v865_v32 = vld [vmem:[#allocation5 + $0x10a8] sm:$0xff] }
 0x13e   : > { %6827 = vmatpush1.bf16.msra.mxu1 %v6826_v54  ;;  %1659 = vmatprep.mubr.f32.mxu0 %v331_v51  ;;  %v6846_v52 = vpack.c.bf16 %v706_v46, %v690_v44  ;;  %v720_v54 = vld [vmem:[#allocation5 + $0xc20] sm:$0xff]  ;;  %v6848_v57 = vpack.c.bf16 %v739_v50, %v723_v49  ;;  %v6736_v37 = vpack.c.bf16 %v865_v32, %v849_v31  ;;  %v897_v44 = vld [vmem:[#allocation5 + $0x11a8] sm:$0xff]  ;;  %v899_v46 = vld [vmem:[#allocation5 + $0x11b8] sm:$0xff] }
 0x13f   : > { %1885 = vmatprep.mubr.f32.mxu1 %v331_v51  ;;  %6701 = vmatprep.subr.bf16.mxu0 %v6700_v58  ;;  %v6718_v51 = vpack.c.bf16 %v704_v43, %v688_v42  ;;  %v738_v58 = vld [vmem:[#allocation5 + $0xcb0] sm:$0xff]  ;;  %v6722_v63 = vpack.c.bf16 %v736_v55, %v720_v54  ;;  %v881_v43 = vld [vmem:[#allocation5 + $0x1128] sm:$0xff]  ;;  %v880_v50 = vld [vmem:[#allocation5 + $0x1120] sm:$0xff] }
 0x140   : > { %1660 = vmatmul.mubr.f32.gmra.mrb[14].mxu0 %v330_v1  ;;  %6829 = vmatprep.subr.bf16.mxu1 %v6828_v62  ;;  %v771_v62 = vld [vmem:[#allocation5 + $0xdb8] sm:$0xff]  ;;  %v6850_v0 = vpack.c.bf16 %v738_v58, %v722_v56  ;;  %v866_v42 = vld [vmem:[#allocation5 + $0x10b0] sm:$0xff]  ;;  %v6740_v49 = vpack.c.bf16 %v897_v44, %v881_v43  ;;  %v913_v55 = vld [vmem:[#allocation5 + $0x1228] sm:$0xff] }
 0x141   : > { %1886 = vmatmul.mubr.f32.gmra.mrb[14].mxu1 %v330_v1  ;;  %6703 = vmatpush1.bf16.msra.mxu0 %v6702_v2  ;;  %v6724_v1 = vpack.c.bf16 %v769_v60, %v753_v59  ;;  %v752_v2 = vld [vmem:[#allocation5 + $0xd20] sm:$0xff]  ;;  %v6852_v5 = vpack.c.bf16 %v771_v62, %v755_v61  ;;  %v898_v54 = vld [vmem:[#allocation5 + $0x11b0] sm:$0xff]  ;;  %v929_v56 = vld [vmem:[#allocation5 + $0x12a8] sm:$0xff] }
 0x142   : > { %6831 = vmatpush1.bf16.msra.mxu1 %v6830_v3  ;;  %6705 = vmatprep.subr.bf16.mxu0 %v6704_v4  ;;  %v768_v3 = vld [vmem:[#allocation5 + $0xda0] sm:$0xff]  ;;  %v754_v4 = vld [vmem:[#allocation5 + $0xd30] sm:$0xff]  ;;  %v915_v58 = vld [vmem:[#allocation5 + $0x1238] sm:$0xff]  ;;  %v6744_v62 = vpack.c.bf16 %v929_v56, %v913_v55 }
 0x143   : > { %6833 = vmatprep.subr.bf16.mxu1 %v6832_v8  ;;  %1956 = vmatprep.mubr.f32.mxu0 %v9069_v24  ;;  %v801_v8 = vld [vmem:[#allocation5 + $0xea8] sm:$0xff]  ;;  %v6726_v11 = vpack.c.bf16 %v768_v3, %v752_v2  ;;  %v6854_v12 = vpack.c.bf16 %v770_v6, %v754_v4  ;;  %v931_v59 = vld [vmem:[#allocation5 + $0x12b8] sm:$0xff]  ;;  %v930_v3 = vld [vmem:[#allocation5 + $0x12b0] sm:$0xff] }
 0x144   : > { %2182 = vmatprep.mubr.f32.mxu1 %v9069_v24  ;;  %v6728_v13 = vpack.c.bf16 %v801_v8, %v785_v7  ;;  %v6872_v2 = vpack.c.bf16 %v931_v59, %v915_v58  ;;  %v945_v4 = vld [vmem:[#allocation5 + $0x1328] sm:$0xff]  ;;  %v947_v7 = vld [vmem:[#allocation5 + $0x1338] sm:$0xff]  ;;  %v994_v31 = vld [vmem:[#allocation5 + $0x14b0] sm:$0xff] }
 0x145   : > { %6707 = vmatpush1.bf16.msra.mxu0 %v6706_v14  ;;  %v784_v14 = vld [vmem:[#allocation5 + $0xe20] sm:$0xff]  ;;  %v9071_v6 = vld [vmem:[%s9656_s6 + $0x28] sm:$0xff]  ;;  %v963_v8 = vld [vmem:[#allocation5 + $0x13b8] sm:$0xff] }
 0x146   : > { %6835 = vmatpush1.bf16.msra.mxu1 %v6834_v15  ;;  %6709 = vmatprep.subr.bf16.mxu0 %v6708_v16  ;;  %v800_v15 = vld [vmem:[#allocation5 + $0xea0] sm:$0xff]  ;;  %v786_v16 = vld [vmem:[#allocation5 + $0xe30] sm:$0xff]  ;;  %v1009_v32 = vld [vmem:[#allocation5 + $0x1528] sm:$0xff] }
 0x147   : > { %6837 = vmatprep.subr.bf16.mxu1 %v6836_v20  ;;  %v833_v20 = vld [vmem:[#allocation5 + $0xfa8] sm:$0xff]  ;;  %v6730_v23 = vpack.c.bf16 %v800_v15, %v784_v14  ;;  %v6858_v24 = vpack.c.bf16 %v802_v18, %v786_v16  ;;  %v960_v14 = vld [vmem:[#allocation5 + $0x13a0] sm:$0xff]  ;;  %v946_v15 = vld [vmem:[#allocation5 + $0x1330] sm:$0xff]  ;;  %v6876_v16 = vpack.c.bf16 %v963_v8, %v947_v7 }
 0x148   : > { %v6732_v25 = vpack.c.bf16 %v833_v20, %v817_v19  ;;  %v977_v18 = vld [vmem:[#allocation5 + $0x1428] sm:$0xff]  ;;  %v1010_v43 = vld [vmem:[#allocation5 + $0x1530] sm:$0xff]  ;;  %v1040_v55 = vld [vmem:[#allocation5 + $0x1620] sm:$0xff] }
 0x149   : > { %6711 = vmatpush1.bf16.msra.mxu0 %v6710_v27  ;;  %v832_v27 = vld [vmem:[#allocation5 + $0xfa0] sm:$0xff]  ;;  %v993_v19 = vld [vmem:[#allocation5 + $0x14a8] sm:$0xff]  ;;  %v1058_v59 = vld [vmem:[#allocation5 + $0x16b0] sm:$0xff] }
 0x14a   : > { %6839 = vmatpush1.bf16.msra.mxu1 %v6838_v28  ;;  %6713 = vmatprep.subr.bf16.mxu0 %v6712_v29  ;;  %v818_v28 = vld [vmem:[#allocation5 + $0xf30] sm:$0xff]  ;;  %v6860_v29 = vpack.c.bf16 %v835_v22, %v819_v21  ;;  %v6734_v35 = vpack.c.bf16 %v832_v27, %v816_v26  ;;  %v9073_v20 = vld [vmem:[%s9656_s6 + $0x48] sm:$0xff]  ;;  %v979_v21 = vld [vmem:[#allocation5 + $0x1438] sm:$0xff]  ;;  %v6752_v26 = vpack.c.bf16 %v993_v19, %v977_v18 }
 0x14b   : > { %6841 = vmatprep.subr.bf16.mxu1 %v6840_v33  ;;  %v851_v33 = vld [vmem:[#allocation5 + $0x1038] sm:$0xff]  ;;  %v6862_v36 = vpack.c.bf16 %v834_v30, %v818_v28  ;;  %v976_v27 = vld [vmem:[#allocation5 + $0x1420] sm:$0xff]  ;;  %v1074_v7 = vld [vmem:[#allocation5 + $0x1730] sm:$0xff] }
 0x14c   : > { %v995_v22 = vld [vmem:[#allocation5 + $0x14b8] sm:$0xff]  ;;  %v992_v28 = vld [vmem:[#allocation5 + $0x14a0] sm:$0xff] }
 0x14d   : > { %6715 = vmatpush1.bf16.msra.mxu0 %v6714_v39  ;;  %v864_v39 = vld [vmem:[#allocation5 + $0x10a0] sm:$0xff]  ;;  %v6880_v30 = vpack.c.bf16 %v995_v22, %v979_v21  ;;  %v1106_v21 = vld [vmem:[#allocation5 + $0x1830] sm:$0xff] }
 0x14e   : > { %6843 = vmatpush1.bf16.msra.mxu1 %v6842_v40  ;;  %6717 = vmatprep.subr.bf16.mxu0 %v6716_v41  ;;  %v850_v40 = vld [vmem:[#allocation5 + $0x1030] sm:$0xff]  ;;  %v6864_v41 = vpack.c.bf16 %v867_v34, %v851_v33  ;;  %v6738_v47 = vpack.c.bf16 %v864_v39, %v848_v38  ;;  %v1025_v33 = vld [vmem:[#allocation5 + $0x15a8] sm:$0xff]  ;;  %v6754_v38 = vpack.c.bf16 %v992_v28, %v976_v27  ;;  %v1056_v56 = vld [vmem:[#allocation5 + $0x16a0] sm:$0xff] }
 0x14f   : > { %6845 = vmatprep.subr.bf16.mxu1 %v6844_v45  ;;  %v883_v45 = vld [vmem:[#allocation5 + $0x1138] sm:$0xff]  ;;  %v6866_v48 = vpack.c.bf16 %v866_v42, %v850_v40  ;;  %v9075_v34 = vld [vmem:[%s9656_s6 + $0x68] sm:$0xff]  ;;  %v6756_v40 = vpack.c.bf16 %v1025_v33, %v1009_v32  ;;  %v1024_v42 = vld [vmem:[#allocation5 + $0x15a0] sm:$0xff] }
 0x150   : > { %v1104_v19 = vld [vmem:[#allocation5 + $0x1820] sm:$0xff]  ;;  %v1139_v27 = vld [vmem:[#allocation5 + $0x1938] sm:$0xff] }
 0x151   : > { %6719 = vmatpush1.bf16.msra.mxu0 %v6718_v51  ;;  %v896_v51 = vld [vmem:[#allocation5 + $0x11a0] sm:$0xff]  ;;  %v1155_v28 = vld [vmem:[#allocation5 + $0x19b8] sm:$0xff] }
 0x152   : > { %6847 = vmatpush1.bf16.msra.mxu1 %v6846_v52  ;;  %6721 = vmatprep.subr.bf16.mxu0 %v6720_v53  ;;  %v882_v52 = vld [vmem:[#allocation5 + $0x1130] sm:$0xff]  ;;  %v6868_v53 = vpack.c.bf16 %v899_v46, %v883_v45  ;;  %v6742_v60 = vpack.c.bf16 %v896_v51, %v880_v50  ;;  %v1041_v46 = vld [vmem:[#allocation5 + $0x1628] sm:$0xff]  ;;  %v1059_v50 = vld [vmem:[#allocation5 + $0x16b8] sm:$0xff] }
 0x153   : > { %6849 = vmatprep.subr.bf16.mxu1 %v6848_v57  ;;  %v9070_v57 = vld [vmem:[%s9656_s6] sm:$0xff]  ;;  %v6870_v61 = vpack.c.bf16 %v898_v54, %v882_v52  ;;  %v1026_v45 = vld [vmem:[#allocation5 + $0x15b0] sm:$0xff] }
 0x154   : > { %v9078_v51 = vld [vmem:[%s9656_s6 + $0x80] sm:$0xff] }
 0x155   : > { %6723 = vmatpush1.bf16.msra.mxu0 %v6722_v63  ;;  %v912_v63 = vld [vmem:[#allocation5 + $0x1220] sm:$0xff] }
 0x156   : > { %6851 = vmatpush1.bf16.msra.mxu1 %v6850_v0  ;;  %6725 = vmatprep.subr.bf16.mxu0 %v6724_v1  ;;  %v928_v0 = vld [vmem:[#allocation5 + $0x12a0] sm:$0xff]  ;;  %v914_v1 = vld [vmem:[#allocation5 + $0x1230] sm:$0xff] }
 0x157   : > { %6853 = vmatprep.subr.bf16.mxu1 %v6852_v5  ;;  %v961_v5 = vld [vmem:[#allocation5 + $0x13a8] sm:$0xff]  ;;  %v6746_v10 = vpack.c.bf16 %v928_v0, %v912_v63  ;;  %v1075_v63 = vld [vmem:[#allocation5 + $0x1738] sm:$0xff]  ;;  %v1136_v33 = vld [vmem:[#allocation5 + $0x1920] sm:$0xff] }
 0x158   : > { %v1091_v0 = vld [vmem:[#allocation5 + $0x17b8] sm:$0xff] }
 0x159   : > { %6727 = vmatpush1.bf16.msra.mxu0 %v6726_v11  ;;  %v6874_v11 = vpack.c.bf16 %v930_v3, %v914_v1  ;;  %v9080_v1 = vld [vmem:[%s9656_s6 + $0xa0] sm:$0xff]  ;;  %v6892_v8 = vpack.c.bf16 %v1091_v0, %v1075_v63  ;;  %v1233_v63 = vld [vmem:[#allocation5 + $0x1c28] sm:$0xff] }
 0x15a   : > { %6855 = vmatpush1.bf16.msra.mxu1 %v6854_v12  ;;  %6729 = vmatprep.subr.bf16.mxu0 %v6728_v13  ;;  %v6748_v12 = vpack.c.bf16 %v961_v5, %v945_v4  ;;  %v944_v13 = vld [vmem:[#allocation5 + $0x1320] sm:$0xff]  ;;  %v1249_v0 = vld [vmem:[#allocation5 + $0x1ca8] sm:$0xff] }
 0x15b   : > { %6857 = vmatprep.subr.bf16.mxu1 %v6856_v17  ;;  %v962_v17 = vld [vmem:[#allocation5 + $0x13b0] sm:$0xff]  ;;  %v1072_v5 = vld [vmem:[#allocation5 + $0x1720] sm:$0xff] }
 0x15d   : > { %6731 = vmatpush1.bf16.msra.mxu0 %v6730_v23  ;;  %v9074_v23 = vld [vmem:[%s9656_s6 + $0x40] sm:$0xff] }
 0x15e   : > { %6859 = vmatpush1.bf16.msra.mxu1 %v6858_v24  ;;  %6733 = vmatprep.subr.bf16.mxu0 %v6732_v25  ;;  %v6750_v24 = vpack.c.bf16 %v960_v14, %v944_v13  ;;  %v6878_v25 = vpack.c.bf16 %v962_v17, %v946_v15  ;;  %v1107_v13 = vld [vmem:[#allocation5 + $0x1838] sm:$0xff]  ;;  %v9082_v15 = vld [vmem:[%s9656_s6 + $0xc0] sm:$0xff] }
 0x15f   : > { %6861 = vmatprep.subr.bf16.mxu1 %v6860_v29  ;;  %v978_v29 = vld [vmem:[#allocation5 + $0x1430] sm:$0xff]  ;;  %v1123_v14 = vld [vmem:[#allocation5 + $0x18b8] sm:$0xff] }
 0x160   : > { %v6882_v39 = vpack.c.bf16 %v994_v31, %v978_v29  ;;  %v6896_v22 = vpack.c.bf16 %v1123_v14, %v1107_v13  ;;  %v9084_v29 = vld [vmem:[%s9656_s6 + $0xe0] sm:$0xff]  ;;  %v1267_v13 = vld [vmem:[#allocation5 + $0x1d38] sm:$0xff] }
 0x161   : > { %6735 = vmatpush1.bf16.msra.mxu0 %v6734_v35  ;;  %v1011_v35 = vld [vmem:[#allocation5 + $0x1538] sm:$0xff] }
 0x162   : > { %6863 = vmatpush1.bf16.msra.mxu1 %v6862_v36  ;;  %6737 = vmatprep.subr.bf16.mxu0 %v6736_v37  ;;  %v1027_v36 = vld [vmem:[#allocation5 + $0x15b8] sm:$0xff]  ;;  %v9076_v37 = vld [vmem:[%s9656_s6 + $0x60] sm:$0xff] }
 0x163   : > { %6865 = vmatprep.subr.bf16.mxu1 %v6864_v41  ;;  %v1008_v41 = vld [vmem:[#allocation5 + $0x1520] sm:$0xff]  ;;  %v6884_v44 = vpack.c.bf16 %v1027_v36, %v1011_v35  ;;  %v1138_v35 = vld [vmem:[#allocation5 + $0x1930] sm:$0xff]  ;;  %v6900_v36 = vpack.c.bf16 %v1155_v28, %v1139_v27  ;;  %v1283_v14 = vld [vmem:[#allocation5 + $0x1db8] sm:$0xff] }
 0x164   : > { %1957 = vmatmul.mubr.f32.vlgmr.msra.gmra.mrb[16].mxu0 %v9070_v57  ;;  %v6758_v52 = vpack.c.bf16 %v1024_v42, %v1008_v41  ;;  %v1171_v41 = vld [vmem:[#allocation5 + $0x1a38] sm:$0xff] }
 0x165   : > { %6739 = vmatpush1.bf16.msra.mxu0 %v6738_v47  ;;  %2183 = vmatmul.mubr.f32.vlgmr.msra.gmra.mrb[16].mxu1 %v9070_v57  ;;  %v1057_v47 = vld [vmem:[#allocation5 + $0x16a8] sm:$0xff]  ;;  %v1042_v57 = vld [vmem:[#allocation5 + $0x1630] sm:$0xff]  ;;  %v1187_v42 = vld [vmem:[#allocation5 + $0x1ab8] sm:$0xff] }
 0x166   : > { %6867 = vmatpush1.bf16.msra.mxu1 %v6866_v48  ;;  %6741 = vmatprep.subr.bf16.mxu0 %v6740_v49  ;;  %v9077_v48 = vld [vmem:[%s9656_s6 + $0x88] sm:$0xff]  ;;  %v1043_v49 = vld [vmem:[#allocation5 + $0x1638] sm:$0xff]  ;;  %v6760_v54 = vpack.c.bf16 %v1057_v47, %v1041_v46  ;;  %v6890_v3 = vpack.c.bf16 %v1058_v59, %v1042_v57  ;;  %v1168_v46 = vld [vmem:[#allocation5 + $0x1a20] sm:$0xff] }
 0x167   : > { %6869 = vmatprep.subr.bf16.mxu1 %v6868_v53  ;;  %1962 = vmatprep.mubr.f32.mxu0 %v9071_v6  ;;  %v6886_v53 = vpack.c.bf16 %v1026_v45, %v1010_v43  ;;  %v6888_v58 = vpack.c.bf16 %v1059_v50, %v1043_v49  ;;  %v1184_v47 = vld [vmem:[#allocation5 + $0x1aa0] sm:$0xff]  ;;  %v6904_v49 = vpack.c.bf16 %v1187_v42, %v1171_v41  ;;  %v1186_v50 = vld [vmem:[#allocation5 + $0x1ab0] sm:$0xff] }
 0x168   : > { %2188 = vmatprep.mubr.f32.mxu1 %v9071_v6  ;;  %1963 = vmatmul.mubr.f32.gmra.mrb[18].mxu0 %v9072_v9  ;;  %v1088_v6 = vld [vmem:[#allocation5 + $0x17a0] sm:$0xff] }
 0x169   : > { %6743 = vmatpush1.bf16.msra.mxu0 %v6742_v60  ;;  %2189 = vmatmul.mubr.f32.gmra.mrb[18].mxu1 %v9072_v9  ;;  %v1073_v60 = vld [vmem:[#allocation5 + $0x1728] sm:$0xff]  ;;  %v1090_v9 = vld [vmem:[#allocation5 + $0x17b0] sm:$0xff]  ;;  %v1216_v59 = vld [vmem:[#allocation5 + $0x1ba0] sm:$0xff] }
 0x16a   : > { %6871 = vmatpush1.bf16.msra.mxu1 %v6870_v61  ;;  %6745 = vmatprep.subr.bf16.mxu0 %v6744_v62  ;;  %v1089_v61 = vld [vmem:[#allocation5 + $0x17a8] sm:$0xff]  ;;  %v6894_v17 = vpack.c.bf16 %v1090_v9, %v1074_v7  ;;  %v1248_v7 = vld [vmem:[#allocation5 + $0x1ca0] sm:$0xff] }
 0x16b   : > { %6873 = vmatprep.subr.bf16.mxu1 %v6872_v2  ;;  %1968 = vmatprep.mubr.f32.mxu0 %v9073_v20  ;;  %v9079_v62 = vld [vmem:[%s9656_s6 + $0xa8] sm:$0xff]  ;;  %v6762_v2 = vpack.c.bf16 %v1056_v56, %v1040_v55  ;;  %v6764_v4 = vpack.c.bf16 %v1089_v61, %v1073_v60  ;;  %v6778_v55 = vpack.c.bf16 %v1184_v47, %v1168_v46  ;;  %v1202_v60 = vld [vmem:[#allocation5 + $0x1b30] sm:$0xff]  ;;  %v1328_v42 = vld [vmem:[#allocation5 + $0x1f20] sm:$0xff] }
 0x16c   : > { %2194 = vmatprep.mubr.f32.mxu1 %v9073_v20  ;;  %1969 = vmatmul.mubr.f32.gmra.mrb[20].mxu0 %v9074_v23  ;;  %v1120_v20 = vld [vmem:[#allocation5 + $0x18a0] sm:$0xff]  ;;  %v1346_v46 = vld [vmem:[#allocation5 + $0x1fb0] sm:$0xff]  ;;  %v341_v47 = vld [vmem:[#allocation5 + $0x48] sm:$0xff] }
 0x16d   : > { %6747 = vmatpush1.bf16.msra.mxu0 %v6746_v10  ;;  %2195 = vmatmul.mubr.f32.gmra.mrb[20].mxu1 %v9074_v23  ;;  %v1105_v10 = vld [vmem:[#allocation5 + $0x1828] sm:$0xff]  ;;  %v1122_v23 = vld [vmem:[#allocation5 + $0x18b0] sm:$0xff] }
 0x16e   : > { %6875 = vmatpush1.bf16.msra.mxu1 %v6874_v11  ;;  %6749 = vmatprep.subr.bf16.mxu0 %v6748_v12  ;;  %v1121_v11 = vld [vmem:[#allocation5 + $0x18a8] sm:$0xff]  ;;  %v6898_v31 = vpack.c.bf16 %v1122_v23, %v1106_v21  ;;  %v6916_v21 = vpack.c.bf16 %v1283_v14, %v1267_v13  ;;  %v9087_v13 = vld [vmem:[%s9656_s6 + $0x38] sm:$0xff] }
 0x16f   : > { %6877 = vmatprep.subr.bf16.mxu1 %v6876_v16  ;;  %1974 = vmatprep.mubr.f32.mxu0 %v9075_v34  ;;  %v9081_v12 = vld [vmem:[%s9656_s6 + $0xc8] sm:$0xff]  ;;  %v6766_v16 = vpack.c.bf16 %v1088_v6, %v1072_v5  ;;  %v6768_v18 = vpack.c.bf16 %v1121_v11, %v1105_v10  ;;  %v6784_v5 = vpack.c.bf16 %v1249_v0, %v1233_v63  ;;  %v1232_v6 = vld [vmem:[#allocation5 + $0x1c20] sm:$0xff]  ;;  %v1250_v10 = vld [vmem:[#allocation5 + $0x1cb0] sm:$0xff] }
 0x170   : > { %2200 = vmatprep.mubr.f32.mxu1 %v9075_v34  ;;  %1975 = vmatmul.mubr.f32.gmra.mrb[22].mxu0 %v9076_v37  ;;  %v1152_v34 = vld [vmem:[#allocation5 + $0x19a0] sm:$0xff]  ;;  %v1265_v11 = vld [vmem:[#allocation5 + $0x1d28] sm:$0xff]  ;;  %v391_v63 = vld [vmem:[#allocation5 + $0x1d8] sm:$0xff] }
 0x171   : > { %6751 = vmatpush1.bf16.msra.mxu0 %v6750_v24  ;;  %2201 = vmatmul.mubr.f32.gmra.mrb[22].mxu1 %v9076_v37  ;;  %v1137_v24 = vld [vmem:[#allocation5 + $0x1928] sm:$0xff]  ;;  %v1154_v37 = vld [vmem:[#allocation5 + $0x19b0] sm:$0xff]  ;;  %v6774_v43 = vpack.c.bf16 %v1152_v34, %v1136_v33 }
 0x172   : > { %6879 = vmatpush1.bf16.msra.mxu1 %v6878_v25  ;;  %6753 = vmatprep.subr.bf16.mxu0 %v6752_v26  ;;  %v1153_v25 = vld [vmem:[#allocation5 + $0x19a8] sm:$0xff]  ;;  %v1314_v34 = vld [vmem:[#allocation5 + $0x1eb0] sm:$0xff] }
 0x173   : > { %6881 = vmatprep.subr.bf16.mxu1 %v6880_v30  ;;  %1980 = vmatprep.mubr.f32.mxu0 %v9077_v48  ;;  %v9083_v26 = vld [vmem:[%s9656_s6 + $0xe8] sm:$0xff]  ;;  %v6770_v30 = vpack.c.bf16 %v1120_v20, %v1104_v19  ;;  %v6772_v32 = vpack.c.bf16 %v1153_v25, %v1137_v24  ;;  %v1280_v19 = vld [vmem:[#allocation5 + $0x1da0] sm:$0xff]  ;;  %v1266_v20 = vld [vmem:[#allocation5 + $0x1d30] sm:$0xff] }
 0x174   : > { %2206 = vmatprep.mubr.f32.mxu1 %v9077_v48  ;;  %1981 = vmatmul.mubr.f32.gmra.mrb[24].mxu0 %v9078_v51  ;;  %v1170_v48 = vld [vmem:[#allocation5 + $0x1a30] sm:$0xff]  ;;  %v1297_v23 = vld [vmem:[#allocation5 + $0x1e28] sm:$0xff]  ;;  %v1299_v25 = vld [vmem:[#allocation5 + $0x1e38] sm:$0xff] }
 0x175   : > { %6755 = vmatpush1.bf16.msra.mxu0 %v6754_v38  ;;  %2207 = vmatmul.mubr.f32.gmra.mrb[24].mxu1 %v9078_v51  ;;  %v1169_v38 = vld [vmem:[#allocation5 + $0x1a28] sm:$0xff]  ;;  %v6906_v56 = vpack.c.bf16 %v1186_v50, %v1170_v48  ;;  %v359_v50 = vld [vmem:[#allocation5 + $0xd8] sm:$0xff] }
 0x176   : > { %6883 = vmatpush1.bf16.msra.mxu1 %v6882_v39  ;;  %6757 = vmatprep.subr.bf16.mxu0 %v6756_v40  ;;  %v1185_v39 = vld [vmem:[#allocation5 + $0x1aa8] sm:$0xff]  ;;  %v9085_v40 = vld [vmem:[%s9656_s6 + $0x18] sm:$0xff] }
 0x177   : > { %6885 = vmatprep.subr.bf16.mxu1 %v6884_v44  ;;  %1986 = vmatprep.mubr.f32.mxu0 %v9079_v62  ;;  %v6902_v44 = vpack.c.bf16 %v1154_v37, %v1138_v35  ;;  %v6776_v45 = vpack.c.bf16 %v1185_v39, %v1169_v38  ;;  %v1201_v51 = vld [vmem:[#allocation5 + $0x1b28] sm:$0xff]  ;;  %v1331_v37 = vld [vmem:[#allocation5 + $0x1f38] sm:$0xff] }
 0x178   : > { %2212 = vmatprep.mubr.f32.mxu1 %v9079_v62  ;;  %1987 = vmatmul.mubr.f32.gmra.mrb[26].mxu0 %v9080_v1  ;;  %v1218_v62 = vld [vmem:[#allocation5 + $0x1bb0] sm:$0xff]  ;;  %v1313_v24 = vld [vmem:[#allocation5 + $0x1ea8] sm:$0xff]  ;;  %v1347_v38 = vld [vmem:[#allocation5 + $0x1fb8] sm:$0xff] }
 0x179   : > { %6759 = vmatpush1.bf16.msra.mxu0 %v6758_v52  ;;  %2213 = vmatmul.mubr.f32.gmra.mrb[26].mxu1 %v9080_v1  ;;  %v1217_v52 = vld [vmem:[#allocation5 + $0x1ba8] sm:$0xff]  ;;  %v1235_v1 = vld [vmem:[#allocation5 + $0x1c38] sm:$0xff] }
 0x17a   : > { %6887 = vmatpush1.bf16.msra.mxu1 %v6886_v53  ;;  %6761 = vmatprep.subr.bf16.mxu0 %v6760_v54  ;;  %v1203_v53 = vld [vmem:[#allocation5 + $0x1b38] sm:$0xff]  ;;  %v6780_v57 = vpack.c.bf16 %v1217_v52, %v1201_v51  ;;  %v1329_v35 = vld [vmem:[#allocation5 + $0x1f28] sm:$0xff] }
 0x17b   : > { %6889 = vmatprep.subr.bf16.mxu1 %v6888_v58  ;;  %1992 = vmatprep.mubr.f32.mxu0 %v9081_v12  ;;  %v1219_v54 = vld [vmem:[#allocation5 + $0x1bb8] sm:$0xff]  ;;  %v1200_v58 = vld [vmem:[#allocation5 + $0x1b20] sm:$0xff]  ;;  %v357_v48 = vld [vmem:[#allocation5 + $0xc8] sm:$0xff] }
 0x17c   : > { %2218 = vmatprep.mubr.f32.mxu1 %v9081_v12  ;;  %1993 = vmatmul.mubr.f32.gmra.mrb[28].mxu0 %v9082_v15  ;;  %v6908_v61 = vpack.c.bf16 %v1219_v54, %v1203_v53  ;;  %v1281_v12 = vld [vmem:[#allocation5 + $0x1da8] sm:$0xff]  ;;  %v6928_v53 = vpack.c.bf16 %v357_v48, %v341_v47  ;;  %v340_v54 = vld [vmem:[#allocation5 + $0x40] sm:$0xff]  ;;  %v486_v47 = vld [vmem:[#allocation5 + $0x4d0] sm:$0xff] }
 0x17d   : > { %6763 = vmatpush1.bf16.msra.mxu0 %v6762_v2  ;;  %2219 = vmatmul.mubr.f32.gmra.mrb[28].mxu1 %v9082_v15  ;;  %v1251_v2 = vld [vmem:[#allocation5 + $0x1cb8] sm:$0xff]  ;;  %v6786_v15 = vpack.c.bf16 %v1248_v7, %v1232_v6  ;;  %v9086_v6 = vld [vmem:[%s9656_s6 + $0x10] sm:$0xff] }
 0x17e   : > { %6891 = vmatpush1.bf16.msra.mxu1 %v6890_v3  ;;  %6765 = vmatprep.subr.bf16.mxu0 %v6764_v4  ;;  %v6782_v3 = vpack.c.bf16 %v1216_v59, %v1200_v58  ;;  %v6910_v4 = vpack.c.bf16 %v1218_v62, %v1202_v60  ;;  %v6912_v9 = vpack.c.bf16 %v1251_v2, %v1235_v1  ;;  %v358_v58 = vld [vmem:[#allocation5 + $0xd0] sm:$0xff]  ;;  %v373_v59 = vld [vmem:[#allocation5 + $0x148] sm:$0xff]  ;;  %v375_v62 = vld [vmem:[#allocation5 + $0x158] sm:$0xff] }
 0x17f   : > { %6893 = vmatprep.subr.bf16.mxu1 %v6892_v8  ;;  %1998 = vmatprep.mubr.f32.mxu0 %v9083_v26  ;;  %v1234_v8 = vld [vmem:[#allocation5 + $0x1c30] sm:$0xff]  ;;  %v389_v60 = vld [vmem:[#allocation5 + $0x1c8] sm:$0xff]  ;;  %v372_v1 = vld [vmem:[#allocation5 + $0x140] sm:$0xff]  ;;  %v7060_v7 = vpack.c.bf16 %v391_v63, %v375_v62 }
 0x180   : > { %2224 = vmatprep.mubr.f32.mxu1 %v9083_v26  ;;  %1999 = vmatmul.mubr.f32.gmra.mrb[30].mxu0 %v9084_v29  ;;  %v1315_v26 = vld [vmem:[#allocation5 + $0x1eb8] sm:$0xff]  ;;  %v388_v2 = vld [vmem:[#allocation5 + $0x1c0] sm:$0xff]  ;;  %v9092_v48 = vld [vmem:[%s9656_s6 + $0x70] sm:$0xff] }
 0x181   : > { %6767 = vmatpush1.bf16.msra.mxu0 %v6766_v16  ;;  %2225 = vmatmul.mubr.f32.gmra.mrb[30].mxu1 %v9084_v29  ;;  %v6914_v16 = vpack.c.bf16 %v1250_v10, %v1234_v8  ;;  %v6792_v29 = vpack.c.bf16 %v1313_v24, %v1297_v23  ;;  %v6920_v33 = vpack.c.bf16 %v1315_v26, %v1299_v25  ;;  %v405_v8 = vld [vmem:[#allocation5 + $0x248] sm:$0xff]  ;;  %v439_v25 = vld [vmem:[#allocation5 + $0x358] sm:$0xff]  ;;  %v9094_v62 = vld [vmem:[%s9656_s6 + $0x90] sm:$0xff] }
 0x182   : > { %6895 = vmatpush1.bf16.msra.mxu1 %v6894_v17  ;;  %6769 = vmatprep.subr.bf16.mxu0 %v6768_v18  ;;  %v6788_v17 = vpack.c.bf16 %v1281_v12, %v1265_v11  ;;  %v1264_v18 = vld [vmem:[#allocation5 + $0x1d20] sm:$0xff]  ;;  %v6934_v10 = vpack.c.bf16 %v388_v2, %v372_v1  ;;  %v407_v11 = vld [vmem:[#allocation5 + $0x258] sm:$0xff]  ;;  %v453_v23 = vld [vmem:[#allocation5 + $0x3c8] sm:$0xff] }
 0x183   : > { %6897 = vmatprep.subr.bf16.mxu1 %v6896_v22  ;;  %2069 = vmatprep.mubr.f32.mxu0 %v9085_v40  ;;  %v1282_v22 = vld [vmem:[#allocation5 + $0x1db0] sm:$0xff]  ;;  %v6790_v27 = vpack.c.bf16 %v1280_v19, %v1264_v18  ;;  %v423_v12 = vld [vmem:[#allocation5 + $0x2d8] sm:$0xff]  ;;  %v549_v1 = vld [vmem:[#allocation5 + $0x6c8] sm:$0xff] }
 0x184   : > { %2295 = vmatprep.mubr.f32.mxu1 %v9085_v40  ;;  %v6918_v28 = vpack.c.bf16 %v1282_v22, %v1266_v20  ;;  %v406_v18 = vld [vmem:[#allocation5 + $0x250] sm:$0xff]  ;;  %v437_v22 = vld [vmem:[#allocation5 + $0x348] sm:$0xff]  ;;  %v455_v26 = vld [vmem:[#allocation5 + $0x3d8] sm:$0xff] }
 0x185   : > { %6771 = vmatpush1.bf16.msra.mxu0 %v6770_v30  ;;  %v1296_v30 = vld [vmem:[#allocation5 + $0x1e20] sm:$0xff]  ;;  %v422_v19 = vld [vmem:[#allocation5 + $0x2d0] sm:$0xff] }
 0x186   : > { %6899 = vmatpush1.bf16.msra.mxu1 %v6898_v31  ;;  %6773 = vmatprep.subr.bf16.mxu0 %v6772_v32  ;;  %v1312_v31 = vld [vmem:[#allocation5 + $0x1ea0] sm:$0xff]  ;;  %v1298_v32 = vld [vmem:[#allocation5 + $0x1e30] sm:$0xff] }
 0x187   : > { %6901 = vmatprep.subr.bf16.mxu1 %v6900_v36  ;;  %v1345_v36 = vld [vmem:[#allocation5 + $0x1fa8] sm:$0xff]  ;;  %v6794_v39 = vpack.c.bf16 %v1312_v31, %v1296_v30  ;;  %v6922_v40 = vpack.c.bf16 %v1314_v34, %v1298_v32  ;;  %v9088_v20 = vld [vmem:[%s9656_s6 + $0x30] sm:$0xff]  ;;  %v452_v30 = vld [vmem:[#allocation5 + $0x3c0] sm:$0xff]  ;;  %v6940_v31 = vpack.c.bf16 %v453_v23, %v437_v22 }
 0x188   : > { %v6796_v41 = vpack.c.bf16 %v1345_v36, %v1329_v35  ;;  %v438_v32 = vld [vmem:[#allocation5 + $0x350] sm:$0xff]  ;;  %v7068_v35 = vpack.c.bf16 %v455_v26, %v439_v25  ;;  %v469_v36 = vld [vmem:[#allocation5 + $0x448] sm:$0xff]  ;;  %v580_v22 = vld [vmem:[#allocation5 + $0x7c0] sm:$0xff] }
 0x189   : > { %6775 = vmatpush1.bf16.msra.mxu0 %v6774_v43  ;;  %v1344_v43 = vld [vmem:[#allocation5 + $0x1fa0] sm:$0xff]  ;;  %v9090_v34 = vld [vmem:[%s9656_s6 + $0x50] sm:$0xff]  ;;  %v597_v26 = vld [vmem:[#allocation5 + $0x848] sm:$0xff] }
 0x18a   : > { %6903 = vmatpush1.bf16.msra.mxu1 %v6902_v44  ;;  %6777 = vmatprep.subr.bf16.mxu0 %v6776_v45  ;;  %v1330_v44 = vld [vmem:[#allocation5 + $0x1f30] sm:$0xff]  ;;  %v6924_v45 = vpack.c.bf16 %v1347_v38, %v1331_v37  ;;  %v6798_v51 = vpack.c.bf16 %v1344_v43, %v1328_v42  ;;  %v485_v37 = vld [vmem:[#allocation5 + $0x4c8] sm:$0xff]  ;;  %v468_v43 = vld [vmem:[#allocation5 + $0x440] sm:$0xff] }
 0x18b   : > { %6905 = vmatprep.subr.bf16.mxu1 %v6904_v49  ;;  %v343_v49 = vld [vmem:[#allocation5 + $0x58] sm:$0xff]  ;;  %v6926_v52 = vpack.c.bf16 %v1346_v46, %v1330_v44  ;;  %v484_v44 = vld [vmem:[#allocation5 + $0x4c0] sm:$0xff]  ;;  %v470_v46 = vld [vmem:[#allocation5 + $0x450] sm:$0xff] }
 0x18c   : > { %v566_v23 = vld [vmem:[#allocation5 + $0x750] sm:$0xff] }
 0x18d   : > { %6779 = vmatpush1.bf16.msra.mxu0 %v6778_v55  ;;  %v356_v55 = vld [vmem:[#allocation5 + $0xc0] sm:$0xff]  ;;  %v582_v25 = vld [vmem:[#allocation5 + $0x7d0] sm:$0xff] }
 0x18e   : > { %6907 = vmatpush1.bf16.msra.mxu1 %v6906_v56  ;;  %6781 = vmatprep.subr.bf16.mxu0 %v6780_v57  ;;  %v7056_v56 = vpack.c.bf16 %v359_v50, %v343_v49  ;;  %v342_v57 = vld [vmem:[#allocation5 + $0x50] sm:$0xff]  ;;  %v501_v50 = vld [vmem:[#allocation5 + $0x548] sm:$0xff] }
 0x18f   : > { %6909 = vmatprep.subr.bf16.mxu1 %v6908_v61  ;;  %v6930_v61 = vpack.c.bf16 %v356_v55, %v340_v54  ;;  %v7058_v0 = vpack.c.bf16 %v358_v58, %v342_v57  ;;  %v519_v54 = vld [vmem:[#allocation5 + $0x5d8] sm:$0xff]  ;;  %v500_v57 = vld [vmem:[#allocation5 + $0x540] sm:$0xff] }
 0x190   : > { %v9093_v55 = vld [vmem:[%s9656_s6 + $0x98] sm:$0xff]  ;;  %v516_v58 = vld [vmem:[#allocation5 + $0x5c0] sm:$0xff] }
 0x191   : > { %6783 = vmatpush1.bf16.msra.mxu0 %v6782_v3  ;;  %v6932_v3 = vpack.c.bf16 %v389_v60, %v373_v59  ;;  %v502_v60 = vld [vmem:[#allocation5 + $0x550] sm:$0xff]  ;;  %v6950_v2 = vpack.c.bf16 %v516_v58, %v500_v57  ;;  %v663_v57 = vld [vmem:[#allocation5 + $0xa58] sm:$0xff] }
 0x192   : > { %6911 = vmatpush1.bf16.msra.mxu1 %v6910_v4  ;;  %6785 = vmatprep.subr.bf16.mxu0 %v6784_v5  ;;  %v374_v4 = vld [vmem:[#allocation5 + $0x150] sm:$0xff]  ;;  %v679_v58 = vld [vmem:[#allocation5 + $0xad8] sm:$0xff] }
 0x193   : > { %6913 = vmatprep.subr.bf16.mxu1 %v6912_v9  ;;  %v390_v5 = vld [vmem:[#allocation5 + $0x1d0] sm:$0xff]  ;;  %v421_v9 = vld [vmem:[#allocation5 + $0x2c8] sm:$0xff] }
 0x194   : > { %v7062_v14 = vpack.c.bf16 %v390_v5, %v374_v4  ;;  %v551_v4 = vld [vmem:[#allocation5 + $0x6d8] sm:$0xff] }
 0x195   : > { %6787 = vmatpush1.bf16.msra.mxu0 %v6786_v15  ;;  %v404_v15 = vld [vmem:[#allocation5 + $0x240] sm:$0xff]  ;;  %v9095_v5 = vld [vmem:[%s9656_s6 + $0xb8] sm:$0xff] }
 0x196   : > { %6915 = vmatpush1.bf16.msra.mxu1 %v6914_v16  ;;  %6789 = vmatprep.subr.bf16.mxu0 %v6788_v17  ;;  %v420_v16 = vld [vmem:[#allocation5 + $0x2c0] sm:$0xff]  ;;  %v6936_v17 = vpack.c.bf16 %v421_v9, %v405_v8 }
 0x197   : > { %6917 = vmatprep.subr.bf16.mxu1 %v6916_v21  ;;  %v7064_v21 = vpack.c.bf16 %v423_v12, %v407_v11  ;;  %v6938_v24 = vpack.c.bf16 %v420_v16, %v404_v15  ;;  %v548_v8 = vld [vmem:[#allocation5 + $0x6c0] sm:$0xff]  ;;  %v550_v11 = vld [vmem:[#allocation5 + $0x6d0] sm:$0xff]  ;;  %v581_v15 = vld [vmem:[#allocation5 + $0x7c8] sm:$0xff] }
 0x198   : > { %v9096_v12 = vld [vmem:[%s9656_s6 + $0xb0] sm:$0xff] }
 0x199   : > { %6791 = vmatpush1.bf16.msra.mxu0 %v6790_v27  ;;  %v9089_v27 = vld [vmem:[%s9656_s6 + $0x58] sm:$0xff] }
 0x19a   : > { %6919 = vmatpush1.bf16.msra.mxu1 %v6918_v28  ;;  %6793 = vmatprep.subr.bf16.mxu0 %v6792_v29  ;;  %v7066_v28 = vpack.c.bf16 %v422_v19, %v406_v18  ;;  %v436_v29 = vld [vmem:[#allocation5 + $0x340] sm:$0xff]  ;;  %v583_v18 = vld [vmem:[#allocation5 + $0x7d8] sm:$0xff] }
 0x19b   : > { %6921 = vmatprep.subr.bf16.mxu1 %v6920_v33  ;;  %v454_v33 = vld [vmem:[#allocation5 + $0x3d0] sm:$0xff]  ;;  %v6942_v38 = vpack.c.bf16 %v452_v30, %v436_v29  ;;  %v9097_v19 = vld [vmem:[%s9656_s6 + $0xd8] sm:$0xff] }
 0x19c   : > { %v7070_v42 = vpack.c.bf16 %v454_v33, %v438_v32  ;;  %v599_v30 = vld [vmem:[#allocation5 + $0x858] sm:$0xff] }
 0x19d   : > { %6795 = vmatpush1.bf16.msra.mxu0 %v6794_v39  ;;  %v471_v39 = vld [vmem:[#allocation5 + $0x458] sm:$0xff] }
 0x19e   : > { %6923 = vmatpush1.bf16.msra.mxu1 %v6922_v40  ;;  %6797 = vmatprep.subr.bf16.mxu0 %v6796_v41  ;;  %v487_v40 = vld [vmem:[#allocation5 + $0x4d8] sm:$0xff] }
 0x19f   : > { %6925 = vmatprep.subr.bf16.mxu1 %v6924_v45  ;;  %v9091_v41 = vld [vmem:[%s9656_s6 + $0x78] sm:$0xff]  ;;  %v6944_v45 = vpack.c.bf16 %v485_v37, %v469_v36  ;;  %v7072_v49 = vpack.c.bf16 %v487_v40, %v471_v39  ;;  %v596_v36 = vld [vmem:[#allocation5 + $0x840] sm:$0xff]  ;;  %v614_v40 = vld [vmem:[#allocation5 + $0x8d0] sm:$0xff] }
 0x1a0   : > { %v9099_v33 = vld [vmem:[%s9656_s6 + $0xf8] sm:$0xff]  ;;  %v612_v37 = vld [vmem:[#allocation5 + $0x8c0] sm:$0xff] }
 0x1a1   : > { %6799 = vmatpush1.bf16.msra.mxu0 %v6798_v51  ;;  %v517_v51 = vld [vmem:[#allocation5 + $0x5c8] sm:$0xff] }
 0x1a2   : > { %6927 = vmatpush1.bf16.msra.mxu1 %v6926_v52  ;;  %6929 = vmatprep.subr.bf16.mxu0 %v6928_v53  ;;  %v6946_v52 = vpack.c.bf16 %v484_v44, %v468_v43  ;;  %v503_v53 = vld [vmem:[#allocation5 + $0x558] sm:$0xff]  ;;  %v6948_v59 = vpack.c.bf16 %v517_v51, %v501_v50  ;;  %v9100_v43 = vld [vmem:[%s9656_s6 + $0xf0] sm:$0xff]  ;;  %v644_v50 = vld [vmem:[#allocation5 + $0x9c0] sm:$0xff] }
 0x1a3   : > { %7057 = vmatprep.subr.bf16.mxu1 %v7056_v56  ;;  %v7074_v56 = vpack.c.bf16 %v486_v47, %v470_v46  ;;  %v7076_v63 = vpack.c.bf16 %v519_v54, %v503_v53  ;;  %v631_v44 = vld [vmem:[#allocation5 + $0x958] sm:$0xff]  ;;  %v6962_v46 = vpack.c.bf16 %v612_v37, %v596_v36  ;;  %v630_v51 = vld [vmem:[#allocation5 + $0x950] sm:$0xff]  ;;  %v661_v54 = vld [vmem:[#allocation5 + $0xa48] sm:$0xff] }
 0x1a4   : > { %2070 = vmatmul.mubr.f32.vlgmr.msra.gmra.mrb[16].mxu0 %v9086_v6  ;;  %v646_v53 = vld [vmem:[#allocation5 + $0x9d0] sm:$0xff] }
 0x1a5   : > { %2296 = vmatmul.mubr.f32.vlgmr.msra.gmra.mrb[16].mxu1 %v9086_v6  ;;  %6931 = vmatpush1.bf16.msra.mxu0 %v6930_v61  ;;  %v518_v61 = vld [vmem:[#allocation5 + $0x5d0] sm:$0xff] }
 0x1a6   : > { %7059 = vmatpush1.bf16.msra.mxu1 %v7058_v0  ;;  %2075 = vmatprep.mubr.f32.mxu0 %v9087_v13  ;;  %v533_v0 = vld [vmem:[#allocation5 + $0x648] sm:$0xff]  ;;  %v7078_v6 = vpack.c.bf16 %v518_v61, %v502_v60  ;;  %v7094_v60 = vpack.c.bf16 %v646_v53, %v630_v51  ;;  %v758_v36 = vld [vmem:[#allocation5 + $0xd50] sm:$0xff]  ;;  %v823_v53 = vld [vmem:[#allocation5 + $0xf58] sm:$0xff] }
 0x1a7   : > { %2301 = vmatprep.mubr.f32.mxu1 %v9087_v13  ;;  %6933 = vmatprep.subr.bf16.mxu0 %v6932_v3  ;;  %v535_v3 = vld [vmem:[#allocation5 + $0x658] sm:$0xff]  ;;  %v6952_v9 = vpack.c.bf16 %v549_v1, %v533_v0  ;;  %v662_v0 = vld [vmem:[#allocation5 + $0xa50] sm:$0xff]  ;;  %v7096_v1 = vpack.c.bf16 %v679_v58, %v663_v57  ;;  %v821_v51 = vld [vmem:[#allocation5 + $0xf48] sm:$0xff] }
 0x1a8   : > { %2076 = vmatmul.mubr.f32.gmra.mrb[18].mxu0 %v9088_v20  ;;  %7061 = vmatprep.subr.bf16.mxu1 %v7060_v7  ;;  %v532_v7 = vld [vmem:[#allocation5 + $0x640] sm:$0xff]  ;;  %v7080_v13 = vpack.c.bf16 %v551_v4, %v535_v3  ;;  %v693_v3 = vld [vmem:[#allocation5 + $0xb48] sm:$0xff] }
 0x1a9   : > { %2302 = vmatmul.mubr.f32.gmra.mrb[18].mxu1 %v9088_v20  ;;  %6935 = vmatpush1.bf16.msra.mxu0 %v6934_v10  ;;  %v534_v10 = vld [vmem:[#allocation5 + $0x650] sm:$0xff]  ;;  %v6954_v16 = vpack.c.bf16 %v548_v8, %v532_v7  ;;  %v709_v4 = vld [vmem:[#allocation5 + $0xbc8] sm:$0xff]  ;;  %v820_v58 = vld [vmem:[#allocation5 + $0xf40] sm:$0xff] }
 0x1aa   : > { %7063 = vmatpush1.bf16.msra.mxu1 %v7062_v14  ;;  %2081 = vmatprep.mubr.f32.mxu0 %v9089_v27  ;;  %v565_v14 = vld [vmem:[#allocation5 + $0x748] sm:$0xff]  ;;  %v7082_v20 = vpack.c.bf16 %v550_v11, %v534_v10  ;;  %v692_v10 = vld [vmem:[#allocation5 + $0xb40] sm:$0xff] }
 0x1ab   : > { %2307 = vmatprep.mubr.f32.mxu1 %v9089_v27  ;;  %6937 = vmatprep.subr.bf16.mxu0 %v6936_v17  ;;  %v567_v17 = vld [vmem:[#allocation5 + $0x758] sm:$0xff]  ;;  %v613_v27 = vld [vmem:[#allocation5 + $0x8c8] sm:$0xff]  ;;  %v708_v11 = vld [vmem:[#allocation5 + $0xbc0] sm:$0xff] }
 0x1ac   : > { %2082 = vmatmul.mubr.f32.gmra.mrb[20].mxu0 %v9090_v34  ;;  %7065 = vmatprep.subr.bf16.mxu1 %v7064_v21  ;;  %v564_v21 = vld [vmem:[#allocation5 + $0x740] sm:$0xff]  ;;  %v7084_v29 = vpack.c.bf16 %v583_v18, %v567_v17  ;;  %v727_v17 = vld [vmem:[#allocation5 + $0xc58] sm:$0xff] }
 0x1ad   : > { %2308 = vmatmul.mubr.f32.gmra.mrb[20].mxu1 %v9090_v34  ;;  %6939 = vmatpush1.bf16.msra.mxu0 %v6938_v24  ;;  %v6956_v24 = vpack.c.bf16 %v581_v15, %v565_v14  ;;  %v6958_v32 = vpack.c.bf16 %v580_v22, %v564_v21  ;;  %v7086_v34 = vpack.c.bf16 %v582_v25, %v566_v23  ;;  %v710_v14 = vld [vmem:[#allocation5 + $0xbd0] sm:$0xff]  ;;  %v725_v15 = vld [vmem:[#allocation5 + $0xc48] sm:$0xff]  ;;  %v743_v18 = vld [vmem:[#allocation5 + $0xcd8] sm:$0xff] }
 0x1ae   : > { %7067 = vmatpush1.bf16.msra.mxu1 %v7066_v28  ;;  %2087 = vmatprep.mubr.f32.mxu0 %v9091_v41  ;;  %v9098_v28 = vld [vmem:[%s9656_s6 + $0xd0] sm:$0xff]  ;;  %v724_v22 = vld [vmem:[#allocation5 + $0xc40] sm:$0xff]  ;;  %v7104_v25 = vpack.c.bf16 %v743_v18, %v727_v17 }
 0x1af   : > { %2313 = vmatprep.mubr.f32.mxu1 %v9091_v41  ;;  %6941 = vmatprep.subr.bf16.mxu0 %v6940_v31  ;;  %v615_v31 = vld [vmem:[#allocation5 + $0x8d8] sm:$0xff]  ;;  %v629_v41 = vld [vmem:[#allocation5 + $0x948] sm:$0xff]  ;;  %v740_v23 = vld [vmem:[#allocation5 + $0xcc0] sm:$0xff] }
 0x1b0   : > { %2088 = vmatmul.mubr.f32.gmra.mrb[22].mxu0 %v9092_v48  ;;  %7069 = vmatprep.subr.bf16.mxu1 %v7068_v35  ;;  %v6960_v35 = vpack.c.bf16 %v613_v27, %v597_v26  ;;  %v7088_v39 = vpack.c.bf16 %v615_v31, %v599_v30  ;;  %v742_v26 = vld [vmem:[#allocation5 + $0xcd0] sm:$0xff]  ;;  %v757_v27 = vld [vmem:[#allocation5 + $0xd48] sm:$0xff]  ;;  %v775_v30 = vld [vmem:[#allocation5 + $0xdd8] sm:$0xff]  ;;  %v6978_v31 = vpack.c.bf16 %v740_v23, %v724_v22 }
 0x1b1   : > { %2314 = vmatmul.mubr.f32.gmra.mrb[22].mxu1 %v9092_v48  ;;  %6943 = vmatpush1.bf16.msra.mxu0 %v6942_v38  ;;  %v598_v38 = vld [vmem:[#allocation5 + $0x850] sm:$0xff]  ;;  %v884_v18 = vld [vmem:[#allocation5 + $0x1140] sm:$0xff]  ;;  %v917_v23 = vld [vmem:[#allocation5 + $0x1248] sm:$0xff] }
 0x1b2   : > { %7071 = vmatpush1.bf16.msra.mxu1 %v7070_v42  ;;  %2093 = vmatprep.mubr.f32.mxu0 %v9093_v55  ;;  %v645_v42 = vld [vmem:[#allocation5 + $0x9c8] sm:$0xff]  ;;  %v7090_v47 = vpack.c.bf16 %v614_v40, %v598_v38  ;;  %v774_v38 = vld [vmem:[#allocation5 + $0xdd0] sm:$0xff] }
 0x1b3   : > { %2319 = vmatprep.mubr.f32.mxu1 %v9093_v55  ;;  %6945 = vmatprep.subr.bf16.mxu0 %v6944_v45  ;;  %v647_v45 = vld [vmem:[#allocation5 + $0x9d8] sm:$0xff]  ;;  %v6964_v48 = vpack.c.bf16 %v645_v42, %v629_v41  ;;  %v677_v55 = vld [vmem:[#allocation5 + $0xac8] sm:$0xff]  ;;  %v902_v22 = vld [vmem:[#allocation5 + $0x11d0] sm:$0xff] }
 0x1b4   : > { %2094 = vmatmul.mubr.f32.gmra.mrb[24].mxu0 %v9094_v62  ;;  %7073 = vmatprep.subr.bf16.mxu1 %v7072_v49  ;;  %v628_v49 = vld [vmem:[#allocation5 + $0x940] sm:$0xff]  ;;  %v6968_v61 = vpack.c.bf16 %v677_v55, %v661_v54  ;;  %v805_v40 = vld [vmem:[#allocation5 + $0xec8] sm:$0xff]  ;;  %v791_v41 = vld [vmem:[#allocation5 + $0xe58] sm:$0xff] }
 0x1b5   : > { %2320 = vmatmul.mubr.f32.gmra.mrb[24].mxu1 %v9094_v62  ;;  %6947 = vmatpush1.bf16.msra.mxu0 %v6946_v52  ;;  %v7092_v52 = vpack.c.bf16 %v647_v45, %v631_v44  ;;  %v660_v62 = vld [vmem:[#allocation5 + $0xa40] sm:$0xff]  ;;  %v807_v42 = vld [vmem:[#allocation5 + $0xed8] sm:$0xff]  ;;  %v7110_v44 = vpack.c.bf16 %v774_v38, %v758_v36  ;;  %v949_v36 = vld [vmem:[#allocation5 + $0x1348] sm:$0xff] }
 0x1b6   : > { %7075 = vmatpush1.bf16.msra.mxu1 %v7074_v56  ;;  %2099 = vmatprep.mubr.f32.mxu0 %v9095_v5  ;;  %v9101_v56 = vld [vmem:[%s9656_s6 + $0x8] sm:$0xff]  ;;  %v839_v54 = vld [vmem:[#allocation5 + $0xfd8] sm:$0xff] }
 0x1b7   : > { %2325 = vmatprep.mubr.f32.mxu1 %v9095_v5  ;;  %6949 = vmatprep.subr.bf16.mxu0 %v6948_v59  ;;  %v6966_v59 = vpack.c.bf16 %v644_v50, %v628_v49  ;;  %v695_v5 = vld [vmem:[#allocation5 + $0xb58] sm:$0xff]  ;;  %v7112_v49 = vpack.c.bf16 %v807_v42, %v791_v41  ;;  %v806_v50 = vld [vmem:[#allocation5 + $0xed0] sm:$0xff]  ;;  %v9103_v38 = vld [vmem:[%s9656_s6 + $0x28] sm:$0xff] }
 0x1b8   : > { %2100 = vmatmul.mubr.f32.gmra.mrb[26].mxu0 %v9096_v12  ;;  %7077 = vmatprep.subr.bf16.mxu1 %v7076_v63  ;;  %v676_v63 = vld [vmem:[#allocation5 + $0xac0] sm:$0xff] }
 0x1b9   : > { %2326 = vmatmul.mubr.f32.gmra.mrb[26].mxu1 %v9096_v12  ;;  %6951 = vmatpush1.bf16.msra.mxu0 %v6950_v2  ;;  %v678_v2 = vld [vmem:[#allocation5 + $0xad0] sm:$0xff]  ;;  %v6970_v7 = vpack.c.bf16 %v676_v63, %v660_v62  ;;  %v853_v63 = vld [vmem:[#allocation5 + $0x1048] sm:$0xff]  ;;  %v9104_v41 = vld [vmem:[%s9656_s6 + $0x20] sm:$0xff] }
 0x1ba   : > { %7079 = vmatpush1.bf16.msra.mxu1 %v7078_v6  ;;  %2105 = vmatprep.mubr.f32.mxu0 %v9097_v19  ;;  %v711_v6 = vld [vmem:[#allocation5 + $0xbd8] sm:$0xff]  ;;  %v7098_v8 = vpack.c.bf16 %v678_v2, %v662_v0  ;;  %v694_v12 = vld [vmem:[#allocation5 + $0xb50] sm:$0xff]  ;;  %v869_v0 = vld [vmem:[#allocation5 + $0x10c8] sm:$0xff] }
 0x1bb   : > { %2331 = vmatprep.mubr.f32.mxu1 %v9097_v19  ;;  %6953 = vmatprep.subr.bf16.mxu0 %v6952_v9  ;;  %v6972_v9 = vpack.c.bf16 %v709_v4, %v693_v3  ;;  %v6974_v19 = vpack.c.bf16 %v708_v11, %v692_v10  ;;  %v838_v62 = vld [vmem:[#allocation5 + $0xfd0] sm:$0xff]  ;;  %v871_v2 = vld [vmem:[#allocation5 + $0x10d8] sm:$0xff]  ;;  %v885_v11 = vld [vmem:[#allocation5 + $0x1148] sm:$0xff] }
 0x1bc   : > { %2106 = vmatmul.mubr.f32.gmra.mrb[28].mxu0 %v9098_v28  ;;  %7081 = vmatprep.subr.bf16.mxu1 %v7080_v13  ;;  %v7100_v13 = vpack.c.bf16 %v711_v6, %v695_v5  ;;  %v6992_v5 = vpack.c.bf16 %v869_v0, %v853_v63  ;;  %v852_v6 = vld [vmem:[#allocation5 + $0x1040] sm:$0xff]  ;;  %v870_v10 = vld [vmem:[#allocation5 + $0x10d0] sm:$0xff]  ;;  %v1013_v0 = vld [vmem:[#allocation5 + $0x1548] sm:$0xff] }
 0x1bd   : > { %2332 = vmatmul.mubr.f32.gmra.mrb[28].mxu1 %v9098_v28  ;;  %6955 = vmatpush1.bf16.msra.mxu0 %v6954_v16  ;;  %v741_v16 = vld [vmem:[#allocation5 + $0xcc8] sm:$0xff]  ;;  %v998_v63 = vld [vmem:[#allocation5 + $0x14d0] sm:$0xff] }
 0x1be   : > { %7083 = vmatpush1.bf16.msra.mxu1 %v7082_v20  ;;  %2111 = vmatprep.mubr.f32.mxu0 %v9099_v33  ;;  %v7102_v20 = vpack.c.bf16 %v710_v14, %v694_v12  ;;  %v6976_v21 = vpack.c.bf16 %v741_v16, %v725_v15  ;;  %v773_v28 = vld [vmem:[#allocation5 + $0xdc8] sm:$0xff]  ;;  %v903_v14 = vld [vmem:[#allocation5 + $0x11d8] sm:$0xff] }
 0x1bf   : > { %2337 = vmatprep.mubr.f32.mxu1 %v9099_v33  ;;  %6957 = vmatprep.subr.bf16.mxu0 %v6956_v24  ;;  %v726_v24 = vld [vmem:[#allocation5 + $0xc50] sm:$0xff]  ;;  %v6980_v33 = vpack.c.bf16 %v773_v28, %v757_v27  ;;  %v901_v12 = vld [vmem:[#allocation5 + $0x11c8] sm:$0xff]  ;;  %v935_v27 = vld [vmem:[#allocation5 + $0x12d8] sm:$0xff] }
 0x1c0   : > { %2112 = vmatmul.mubr.f32.gmra.mrb[30].mxu0 %v9100_v43  ;;  %7085 = vmatprep.subr.bf16.mxu1 %v7084_v29  ;;  %v759_v29 = vld [vmem:[#allocation5 + $0xd58] sm:$0xff]  ;;  %v6996_v17 = vpack.c.bf16 %v901_v12, %v885_v11  ;;  %v1014_v11 = vld [vmem:[#allocation5 + $0x1550] sm:$0xff] }
 0x1c1   : > { %2338 = vmatmul.mubr.f32.gmra.mrb[30].mxu1 %v9100_v43  ;;  %6959 = vmatpush1.bf16.msra.mxu0 %v6958_v32  ;;  %v7106_v32 = vpack.c.bf16 %v742_v26, %v726_v24  ;;  %v7108_v37 = vpack.c.bf16 %v775_v30, %v759_v29  ;;  %v933_v24 = vld [vmem:[#allocation5 + $0x12c8] sm:$0xff]  ;;  %v919_v26 = vld [vmem:[#allocation5 + $0x1258] sm:$0xff] }
 0x1c2   : > { %7087 = vmatpush1.bf16.msra.mxu1 %v7086_v34  ;;  %6961 = vmatprep.subr.bf16.mxu0 %v6960_v35  ;;  %v756_v34 = vld [vmem:[#allocation5 + $0xd40] sm:$0xff]  ;;  %v7000_v30 = vpack.c.bf16 %v933_v24, %v917_v23 }
 0x1c3   : > { %7089 = vmatprep.subr.bf16.mxu1 %v7088_v39  ;;  %2408 = vmatprep.mubr.f32.mxu0 %v9101_v56  ;;  %v772_v35 = vld [vmem:[#allocation5 + $0xdc0] sm:$0xff]  ;;  %v789_v39 = vld [vmem:[#allocation5 + $0xe48] sm:$0xff] }
 0x1c4   : > { %2634 = vmatprep.mubr.f32.mxu1 %v9101_v56  ;;  %v6982_v43 = vpack.c.bf16 %v772_v35, %v756_v34  ;;  %v6984_v45 = vpack.c.bf16 %v805_v40, %v789_v39  ;;  %v7128_v34 = vpack.c.bf16 %v935_v27, %v919_v26  ;;  %v934_v35 = vld [vmem:[#allocation5 + $0x12d0] sm:$0xff]  ;;  %v951_v39 = vld [vmem:[#allocation5 + $0x1358] sm:$0xff]  ;;  %v1044_v23 = vld [vmem:[#allocation5 + $0x1640] sm:$0xff] }
 0x1c5   : > { %6963 = vmatpush1.bf16.msra.mxu0 %v6962_v46  ;;  %v788_v46 = vld [vmem:[#allocation5 + $0xe40] sm:$0xff]  ;;  %v967_v40 = vld [vmem:[#allocation5 + $0x13d8] sm:$0xff] }
 0x1c6   : > { %7091 = vmatpush1.bf16.msra.mxu1 %v7090_v47  ;;  %6965 = vmatprep.subr.bf16.mxu0 %v6964_v48  ;;  %v804_v47 = vld [vmem:[#allocation5 + $0xec0] sm:$0xff]  ;;  %v790_v48 = vld [vmem:[#allocation5 + $0xe50] sm:$0xff] }
 0x1c7   : > { %7093 = vmatprep.subr.bf16.mxu1 %v7092_v52  ;;  %v837_v52 = vld [vmem:[#allocation5 + $0xfc8] sm:$0xff]  ;;  %v6986_v55 = vpack.c.bf16 %v804_v47, %v788_v46  ;;  %v7114_v56 = vpack.c.bf16 %v806_v50, %v790_v48  ;;  %v964_v46 = vld [vmem:[#allocation5 + $0x13c0] sm:$0xff]  ;;  %v950_v47 = vld [vmem:[#allocation5 + $0x1350] sm:$0xff]  ;;  %v7132_v48 = vpack.c.bf16 %v967_v40, %v951_v39 }
 0x1c8   : > { %v6988_v57 = vpack.c.bf16 %v837_v52, %v821_v51  ;;  %v981_v50 = vld [vmem:[#allocation5 + $0x1448] sm:$0xff]  ;;  %v1060_v24 = vld [vmem:[#allocation5 + $0x16c0] sm:$0xff] }
 0x1c9   : > { %6967 = vmatpush1.bf16.msra.mxu0 %v6966_v59  ;;  %v836_v59 = vld [vmem:[#allocation5 + $0xfc0] sm:$0xff]  ;;  %v997_v51 = vld [vmem:[#allocation5 + $0x14c8] sm:$0xff] }
 0x1ca   : > { %7095 = vmatpush1.bf16.msra.mxu1 %v7094_v60  ;;  %6969 = vmatprep.subr.bf16.mxu0 %v6968_v61  ;;  %v822_v60 = vld [vmem:[#allocation5 + $0xf50] sm:$0xff]  ;;  %v7116_v61 = vpack.c.bf16 %v839_v54, %v823_v53  ;;  %v6990_v3 = vpack.c.bf16 %v836_v59, %v820_v58  ;;  %v9105_v52 = vld [vmem:[%s9656_s6 + $0x48] sm:$0xff]  ;;  %v983_v53 = vld [vmem:[#allocation5 + $0x1458] sm:$0xff]  ;;  %v7008_v58 = vpack.c.bf16 %v997_v51, %v981_v50 }
 0x1cb   : > { %7097 = vmatprep.subr.bf16.mxu1 %v7096_v1  ;;  %v855_v1 = vld [vmem:[#allocation5 + $0x1058] sm:$0xff]  ;;  %v7118_v4 = vpack.c.bf16 %v838_v62, %v822_v60  ;;  %v980_v59 = vld [vmem:[#allocation5 + $0x1440] sm:$0xff] }
 0x1cc   : > { %v999_v54 = vld [vmem:[#allocation5 + $0x14d8] sm:$0xff]  ;;  %v996_v60 = vld [vmem:[#allocation5 + $0x14c0] sm:$0xff] }
 0x1cd   : > { %6971 = vmatpush1.bf16.msra.mxu0 %v6970_v7  ;;  %v868_v7 = vld [vmem:[#allocation5 + $0x10c0] sm:$0xff]  ;;  %v7136_v62 = vpack.c.bf16 %v999_v54, %v983_v53  ;;  %v1127_v53 = vld [vmem:[#allocation5 + $0x18d8] sm:$0xff] }
 0x1ce   : > { %7099 = vmatpush1.bf16.msra.mxu1 %v7098_v8  ;;  %6973 = vmatprep.subr.bf16.mxu0 %v6972_v9  ;;  %v854_v8 = vld [vmem:[#allocation5 + $0x1050] sm:$0xff]  ;;  %v7120_v9 = vpack.c.bf16 %v871_v2, %v855_v1  ;;  %v6994_v15 = vpack.c.bf16 %v868_v7, %v852_v6  ;;  %v1029_v1 = vld [vmem:[#allocation5 + $0x15c8] sm:$0xff]  ;;  %v7010_v6 = vpack.c.bf16 %v996_v60, %v980_v59  ;;  %v9114_v54 = vld [vmem:[%s9656_s6 + $0xc0] sm:$0xff] }
 0x1cf   : > { %7101 = vmatprep.subr.bf16.mxu1 %v7100_v13  ;;  %v887_v13 = vld [vmem:[#allocation5 + $0x1158] sm:$0xff]  ;;  %v7122_v16 = vpack.c.bf16 %v870_v10, %v854_v8  ;;  %v9107_v2 = vld [vmem:[%s9656_s6 + $0x68] sm:$0xff]  ;;  %v7012_v8 = vpack.c.bf16 %v1029_v1, %v1013_v0  ;;  %v1028_v10 = vld [vmem:[#allocation5 + $0x15c0] sm:$0xff] }
 0x1d0   : > { %v1108_v59 = vld [vmem:[#allocation5 + $0x1840] sm:$0xff]  ;;  %v1126_v0 = vld [vmem:[#allocation5 + $0x18d0] sm:$0xff]  ;;  %v1141_v1 = vld [vmem:[#allocation5 + $0x1948] sm:$0xff] }
 0x1d1   : > { %6975 = vmatpush1.bf16.msra.mxu0 %v6974_v19  ;;  %v900_v19 = vld [vmem:[#allocation5 + $0x11c0] sm:$0xff] }
 0x1d2   : > { %7103 = vmatpush1.bf16.msra.mxu1 %v7102_v20  ;;  %6977 = vmatprep.subr.bf16.mxu0 %v6976_v21  ;;  %v886_v20 = vld [vmem:[#allocation5 + $0x1150] sm:$0xff]  ;;  %v7124_v21 = vpack.c.bf16 %v903_v14, %v887_v13  ;;  %v6998_v28 = vpack.c.bf16 %v900_v19, %v884_v18  ;;  %v1045_v14 = vld [vmem:[#allocation5 + $0x1648] sm:$0xff]  ;;  %v1063_v18 = vld [vmem:[#allocation5 + $0x16d8] sm:$0xff] }
 0x1d3   : > { %7105 = vmatprep.subr.bf16.mxu1 %v7104_v25  ;;  %v9102_v25 = vld [vmem:[%s9656_s6] sm:$0xff]  ;;  %v7126_v29 = vpack.c.bf16 %v902_v22, %v886_v20  ;;  %v1030_v13 = vld [vmem:[#allocation5 + $0x15d0] sm:$0xff] }
 0x1d4   : > { %v9110_v19 = vld [vmem:[%s9656_s6 + $0x80] sm:$0xff] }
 0x1d5   : > { %6979 = vmatpush1.bf16.msra.mxu0 %v6978_v31  ;;  %v916_v31 = vld [vmem:[#allocation5 + $0x1240] sm:$0xff] }
 0x1d6   : > { %7107 = vmatpush1.bf16.msra.mxu1 %v7106_v32  ;;  %6981 = vmatprep.subr.bf16.mxu0 %v6980_v33  ;;  %v932_v32 = vld [vmem:[#allocation5 + $0x12c0] sm:$0xff]  ;;  %v918_v33 = vld [vmem:[#allocation5 + $0x1250] sm:$0xff] }
 0x1d7   : > { %7109 = vmatprep.subr.bf16.mxu1 %v7108_v37  ;;  %v965_v37 = vld [vmem:[#allocation5 + $0x13c8] sm:$0xff]  ;;  %v7002_v42 = vpack.c.bf16 %v932_v32, %v916_v31  ;;  %v1124_v60 = vld [vmem:[#allocation5 + $0x18c0] sm:$0xff] }
 0x1d8   : > { %v9111_v31 = vld [vmem:[%s9656_s6 + $0xa8] sm:$0xff] }
 0x1d9   : > { %6983 = vmatpush1.bf16.msra.mxu0 %v6982_v43  ;;  %v7130_v43 = vpack.c.bf16 %v934_v35, %v918_v33  ;;  %v1095_v35 = vld [vmem:[#allocation5 + $0x17d8] sm:$0xff] }
 0x1da   : > { %7111 = vmatpush1.bf16.msra.mxu1 %v7110_v44  ;;  %6985 = vmatprep.subr.bf16.mxu0 %v6984_v45  ;;  %v7004_v44 = vpack.c.bf16 %v965_v37, %v949_v36  ;;  %v948_v45 = vld [vmem:[#allocation5 + $0x1340] sm:$0xff] }
 0x1db   : > { %7113 = vmatprep.subr.bf16.mxu1 %v7112_v49  ;;  %v966_v49 = vld [vmem:[#allocation5 + $0x13d0] sm:$0xff]  ;;  %v9112_v36 = vld [vmem:[%s9656_s6 + $0xa0] sm:$0xff] }
 0x1dd   : > { %6987 = vmatpush1.bf16.msra.mxu0 %v6986_v55  ;;  %v9106_v55 = vld [vmem:[%s9656_s6 + $0x40] sm:$0xff] }
 0x1de   : > { %7115 = vmatpush1.bf16.msra.mxu1 %v7114_v56  ;;  %6989 = vmatprep.subr.bf16.mxu0 %v6988_v57  ;;  %v7006_v56 = vpack.c.bf16 %v964_v46, %v948_v45  ;;  %v7134_v57 = vpack.c.bf16 %v966_v49, %v950_v47  ;;  %v1094_v46 = vld [vmem:[#allocation5 + $0x17d0] sm:$0xff]  ;;  %v1109_v47 = vld [vmem:[#allocation5 + $0x1848] sm:$0xff] }
 0x1df   : > { %7117 = vmatprep.subr.bf16.mxu1 %v7116_v61  ;;  %v982_v61 = vld [vmem:[#allocation5 + $0x1450] sm:$0xff]  ;;  %v9113_v49 = vld [vmem:[%s9656_s6 + $0xc8] sm:$0xff] }
 0x1e0   : > { %v7138_v7 = vpack.c.bf16 %v998_v63, %v982_v61  ;;  %v1110_v61 = vld [vmem:[#allocation5 + $0x1850] sm:$0xff] }
 0x1e1   : > { %6991 = vmatpush1.bf16.msra.mxu0 %v6990_v3  ;;  %v1015_v3 = vld [vmem:[#allocation5 + $0x1558] sm:$0xff] }
 0x1e2   : > { %7119 = vmatpush1.bf16.msra.mxu1 %v7118_v4  ;;  %6993 = vmatprep.subr.bf16.mxu0 %v6992_v5  ;;  %v1031_v4 = vld [vmem:[#allocation5 + $0x15d8] sm:$0xff]  ;;  %v9108_v5 = vld [vmem:[%s9656_s6 + $0x60] sm:$0xff] }
 0x1e3   : > { %7121 = vmatprep.subr.bf16.mxu1 %v7120_v9  ;;  %v1012_v9 = vld [vmem:[#allocation5 + $0x1540] sm:$0xff]  ;;  %v7140_v12 = vpack.c.bf16 %v1031_v4, %v1015_v3  ;;  %v9115_v3 = vld [vmem:[%s9656_s6 + $0xe8] sm:$0xff] }
 0x1e4   : > { %2409 = vmatmul.mubr.f32.vlgmr.msra.gmra.mrb[32].mxu0 %v9102_v25  ;;  %v7014_v20 = vpack.c.bf16 %v1028_v10, %v1012_v9  ;;  %v7026_v10 = vpack.c.bf16 %v1124_v60, %v1108_v59  ;;  %v1222_v59 = vld [vmem:[#allocation5 + $0x1bd0] sm:$0xff]  ;;  %v1237_v60 = vld [vmem:[#allocation5 + $0x1c48] sm:$0xff] }
 0x1e5   : > { %6995 = vmatpush1.bf16.msra.mxu0 %v6994_v15  ;;  %2635 = vmatmul.mubr.f32.vlgmr.msra.gmra.mrb[32].mxu1 %v9102_v25  ;;  %v1061_v15 = vld [vmem:[#allocation5 + $0x16c8] sm:$0xff]  ;;  %v1046_v25 = vld [vmem:[#allocation5 + $0x1650] sm:$0xff] }
 0x1e6   : > { %7123 = vmatpush1.bf16.msra.mxu1 %v7122_v16  ;;  %6997 = vmatprep.subr.bf16.mxu0 %v6996_v17  ;;  %v9109_v16 = vld [vmem:[%s9656_s6 + $0x88] sm:$0xff]  ;;  %v1047_v17 = vld [vmem:[#allocation5 + $0x1658] sm:$0xff]  ;;  %v7016_v22 = vpack.c.bf16 %v1061_v15, %v1045_v14  ;;  %v1156_v14 = vld [vmem:[#allocation5 + $0x19c0] sm:$0xff] }
 0x1e7   : > { %7125 = vmatprep.subr.bf16.mxu1 %v7124_v21  ;;  %2414 = vmatprep.mubr.f32.mxu0 %v9103_v38  ;;  %v7142_v21 = vpack.c.bf16 %v1030_v13, %v1014_v11  ;;  %v7144_v27 = vpack.c.bf16 %v1063_v18, %v1047_v17  ;;  %v7154_v11 = vpack.c.bf16 %v1126_v0, %v1110_v61  ;;  %v1140_v13 = vld [vmem:[#allocation5 + $0x1940] sm:$0xff]  ;;  %v1142_v15 = vld [vmem:[#allocation5 + $0x1950] sm:$0xff]  ;;  %v1253_v61 = vld [vmem:[#allocation5 + $0x1cc8] sm:$0xff] }
 0x1e8   : > { %2640 = vmatprep.mubr.f32.mxu1 %v9103_v38  ;;  %2415 = vmatmul.mubr.f32.gmra.mrb[34].mxu0 %v9104_v41  ;;  %v7018_v38 = vpack.c.bf16 %v1060_v24, %v1044_v23  ;;  %v1158_v18 = vld [vmem:[#allocation5 + $0x19d0] sm:$0xff]  ;;  %v1175_v24 = vld [vmem:[#allocation5 + $0x1a58] sm:$0xff] }
 0x1e9   : > { %6999 = vmatpush1.bf16.msra.mxu0 %v6998_v28  ;;  %2641 = vmatmul.mubr.f32.gmra.mrb[34].mxu1 %v9104_v41  ;;  %v1062_v28 = vld [vmem:[#allocation5 + $0x16d0] sm:$0xff]  ;;  %v1076_v41 = vld [vmem:[#allocation5 + $0x1740] sm:$0xff] }
 0x1ea   : > { %7127 = vmatpush1.bf16.msra.mxu1 %v7126_v29  ;;  %7001 = vmatprep.subr.bf16.mxu0 %v7000_v30  ;;  %v1077_v29 = vld [vmem:[#allocation5 + $0x1748] sm:$0xff]  ;;  %v7146_v39 = vpack.c.bf16 %v1062_v28, %v1046_v25  ;;  %v1191_v25 = vld [vmem:[#allocation5 + $0x1ad8] sm:$0xff]  ;;  %v7030_v28 = vpack.c.bf16 %v1156_v14, %v1140_v13 }
 0x1eb   : > { %7129 = vmatprep.subr.bf16.mxu1 %v7128_v34  ;;  %2420 = vmatprep.mubr.f32.mxu0 %v9105_v52  ;;  %v1093_v30 = vld [vmem:[#allocation5 + $0x17c8] sm:$0xff]  ;;  %v1079_v34 = vld [vmem:[#allocation5 + $0x1758] sm:$0xff] }
 0x1ec   : > { %2646 = vmatprep.mubr.f32.mxu1 %v9105_v52  ;;  %2421 = vmatmul.mubr.f32.gmra.mrb[36].mxu0 %v9106_v55  ;;  %v7020_v40 = vpack.c.bf16 %v1093_v30, %v1077_v29  ;;  %v7148_v45 = vpack.c.bf16 %v1095_v35, %v1079_v34  ;;  %v1111_v52 = vld [vmem:[#allocation5 + $0x1858] sm:$0xff]  ;;  %v7158_v29 = vpack.c.bf16 %v1158_v18, %v1142_v15  ;;  %v1188_v34 = vld [vmem:[#allocation5 + $0x1ac0] sm:$0xff]  ;;  %v1174_v35 = vld [vmem:[#allocation5 + $0x1a50] sm:$0xff] }
 0x1ed   : > { %7003 = vmatpush1.bf16.msra.mxu0 %v7002_v42  ;;  %2647 = vmatmul.mubr.f32.gmra.mrb[36].mxu1 %v9106_v55  ;;  %v1092_v42 = vld [vmem:[#allocation5 + $0x17c0] sm:$0xff]  ;;  %v7152_v63 = vpack.c.bf16 %v1127_v53, %v1111_v52  ;;  %v1254_v15 = vld [vmem:[#allocation5 + $0x1cd0] sm:$0xff]  ;;  %v1285_v18 = vld [vmem:[#allocation5 + $0x1dc8] sm:$0xff] }
 0x1ee   : > { %7131 = vmatpush1.bf16.msra.mxu1 %v7130_v43  ;;  %7005 = vmatprep.subr.bf16.mxu0 %v7004_v44  ;;  %v1078_v43 = vld [vmem:[#allocation5 + $0x1750] sm:$0xff]  ;;  %v1204_v53 = vld [vmem:[#allocation5 + $0x1b40] sm:$0xff] }
 0x1ef   : > { %7133 = vmatprep.subr.bf16.mxu1 %v7132_v48  ;;  %2426 = vmatprep.mubr.f32.mxu0 %v9107_v2  ;;  %v1125_v48 = vld [vmem:[#allocation5 + $0x18c8] sm:$0xff] }
 0x1f0   : > { %2652 = vmatprep.mubr.f32.mxu1 %v9107_v2  ;;  %2427 = vmatmul.mubr.f32.gmra.mrb[38].mxu0 %v9108_v5  ;;  %v1157_v2 = vld [vmem:[#allocation5 + $0x19c8] sm:$0xff] }
 0x1f1   : > { %7007 = vmatpush1.bf16.msra.mxu0 %v7006_v56  ;;  %2653 = vmatmul.mubr.f32.gmra.mrb[38].mxu1 %v9108_v5  ;;  %v7022_v56 = vpack.c.bf16 %v1092_v42, %v1076_v41  ;;  %v1221_v41 = vld [vmem:[#allocation5 + $0x1bc8] sm:$0xff] }
 0x1f2   : > { %7135 = vmatpush1.bf16.msra.mxu1 %v7134_v57  ;;  %7009 = vmatprep.subr.bf16.mxu0 %v7008_v58  ;;  %v7150_v57 = vpack.c.bf16 %v1094_v46, %v1078_v43  ;;  %v7024_v58 = vpack.c.bf16 %v1125_v48, %v1109_v47  ;;  %v1223_v46 = vld [vmem:[#allocation5 + $0x1bd8] sm:$0xff] }
 0x1f3   : > { %7137 = vmatprep.subr.bf16.mxu1 %v7136_v62  ;;  %2432 = vmatprep.mubr.f32.mxu0 %v9109_v16 }
 0x1f4   : > { %2658 = vmatprep.mubr.f32.mxu1 %v9109_v16  ;;  %2433 = vmatmul.mubr.f32.gmra.mrb[40].mxu0 %v9110_v19 }
 0x1f5   : > { %7011 = vmatpush1.bf16.msra.mxu0 %v7010_v6  ;;  %2659 = vmatmul.mubr.f32.gmra.mrb[40].mxu1 %v9110_v19  ;;  %v1143_v6 = vld [vmem:[#allocation5 + $0x1958] sm:$0xff]  ;;  %v1173_v19 = vld [vmem:[#allocation5 + $0x1a48] sm:$0xff] }
 0x1f6   : > { %7139 = vmatpush1.bf16.msra.mxu1 %v7138_v7  ;;  %7013 = vmatprep.subr.bf16.mxu0 %v7012_v8  ;;  %v1159_v7 = vld [vmem:[#allocation5 + $0x19d8] sm:$0xff]  ;;  %v9116_v8 = vld [vmem:[%s9656_s6 + $0xe0] sm:$0xff] }
 0x1f7   : > { %v9744_v26 = vpop.f32.mrb[0].mxu0  ;;  %7141 = vmatprep.subr.bf16.mxu1 %v7140_v12  ;;  %2438 = vmatprep.mubr.f32.mxu0 %v9111_v31  ;;  %v7028_v12 = vpack.c.bf16 %v1157_v2, %v1141_v1  ;;  %v7156_v17 = vpack.c.bf16 %v1159_v7, %v1143_v6  ;;  %v1239_v1 = vld [vmem:[#allocation5 + $0x1c58] sm:$0xff] }
 0x1f8   : > { %v9747_v32 = vpop.f32.mrb[0].mxu1  ;;  %v9749_v33 = vpop.f32.mrb[1].mxu0  ;;  %2664 = vmatprep.mubr.f32.mxu1 %v9111_v31  ;;  %2439 = vmatmul.mubr.f32.gmra.mrb[42].mxu0 %v9112_v36  ;;  %v1172_v31 = vld [vmem:[#allocation5 + $0x1a40] sm:$0xff]  ;;  %v1255_v2 = vld [vmem:[#allocation5 + $0x1cd8] sm:$0xff] }
 0x1f9   : > { %v9752_v37 = vpop.f32.mrb[1].mxu1  ;;  %7015 = vmatpush1.bf16.msra.mxu0 %v7014_v20  ;;  %2665 = vmatmul.mubr.f32.gmra.mrb[42].mxu1 %v9112_v36  ;;  %v1189_v20 = vld [vmem:[#allocation5 + $0x1ac8] sm:$0xff]  ;;  %v7034_v48 = vpack.c.bf16 %v1188_v34, %v1172_v31  ;;  %v7168_v14 = vpack.c.bf16 %v1255_v2, %v1239_v1  ;;  %v1268_v31 = vld [vmem:[#allocation5 + $0x1d40] sm:$0xff]  ;;  %v1318_v2 = vld [vmem:[#allocation5 + $0x1ed0] sm:$0xff] }
 0x1fa   : > { %7143 = vmatpush1.bf16.msra.mxu1 %v7142_v21  ;;  %7017 = vmatprep.subr.bf16.mxu0 %v7016_v22  ;;  %v9117_v21 = vld [vmem:[%s9656_s6 + $0x18] sm:$0xff]  ;;  %v7032_v30 = vpack.c.bf16 %v1189_v20, %v1173_v19  ;;  %v1284_v34 = vld [vmem:[#allocation5 + $0x1dc0] sm:$0xff] }
 0x1fb   : > { %v9754_v44 = vpop.f32.mrb[2].mxu0  ;;  %7145 = vmatprep.subr.bf16.mxu1 %v7144_v27  ;;  %2444 = vmatprep.mubr.f32.mxu0 %v9113_v49 }
 0x1fc   : > { %v9757_v50 = vpop.f32.mrb[2].mxu1  ;;  %v9759_v51 = vpop.f32.mrb[3].mxu0  ;;  %2670 = vmatprep.mubr.f32.mxu1 %v9113_v49  ;;  %2445 = vmatmul.mubr.f32.gmra.mrb[44].mxu0 %v9114_v54 }
 0x1fd   : > { %v9762_v55 = vpop.f32.mrb[3].mxu1  ;;  %7019 = vmatpush1.bf16.msra.mxu0 %v7018_v38  ;;  %2671 = vmatmul.mubr.f32.gmra.mrb[44].mxu1 %v9114_v54  ;;  %v7160_v38 = vpack.c.bf16 %v1191_v25, %v1175_v24  ;;  %v1220_v54 = vld [vmem:[#allocation5 + $0x1bc0] sm:$0xff]  ;;  %v1287_v24 = vld [vmem:[#allocation5 + $0x1dd8] sm:$0xff] }
 0x1fe   : > { %7147 = vmatpush1.bf16.msra.mxu1 %v7146_v39  ;;  %7021 = vmatprep.subr.bf16.mxu0 %v7020_v40  ;;  %v1190_v39 = vld [vmem:[#allocation5 + $0x1ad0] sm:$0xff]  ;;  %v1205_v40 = vld [vmem:[#allocation5 + $0x1b48] sm:$0xff]  ;;  %v7038_v6 = vpack.c.bf16 %v1220_v54, %v1204_v53  ;;  %v7046_v54 = vpack.c.bf16 %v1284_v34, %v1268_v31  ;;  %v363_v31 = vld [vmem:[#allocation5 + $0xf8] sm:$0xff] }
 0x1ff   : > { %v9764_v62 = vpop.f32.mrb[4].mxu0  ;;  %7149 = vmatprep.subr.bf16.mxu1 %v7148_v45  ;;  %2450 = vmatprep.mubr.f32.mxu0 %v9115_v3  ;;  %v1207_v45 = vld [vmem:[#allocation5 + $0x1b58] sm:$0xff]  ;;  %v7162_v49 = vpack.c.bf16 %v1190_v39, %v1174_v35  ;;  %v7036_v52 = vpack.c.bf16 %v1221_v41, %v1205_v40  ;;  %v1270_v35 = vld [vmem:[#allocation5 + $0x1d50] sm:$0xff]  ;;  %v1301_v41 = vld [vmem:[#allocation5 + $0x1e48] sm:$0xff] }
 0x200   : > { %v9767_v4 = vpop.f32.mrb[4].mxu1  ;;  %v9769_v5 = vpop.f32.mrb[5].mxu0  ;;  %2676 = vmatprep.mubr.f32.mxu1 %v9115_v3  ;;  %2451 = vmatmul.mubr.f32.gmra.mrb[46].mxu0 %v9116_v8  ;;  %v1286_v40 = vld [vmem:[#allocation5 + $0x1dd0] sm:$0xff] }
 0x201   : > { %v9772_v9 = vpop.f32.mrb[5].mxu1  ;;  %7023 = vmatpush1.bf16.msra.mxu0 %v7022_v56  ;;  %2677 = vmatmul.mubr.f32.gmra.mrb[46].mxu1 %v9116_v8  ;;  %v1206_v56 = vld [vmem:[#allocation5 + $0x1b50] sm:$0xff]  ;;  %v7040_v8 = vpack.c.bf16 %v1253_v61, %v1237_v60  ;;  %v1316_v60 = vld [vmem:[#allocation5 + $0x1ec0] sm:$0xff] }
 0x202   : > { %7151 = vmatpush1.bf16.msra.mxu1 %v7150_v57  ;;  %7025 = vmatprep.subr.bf16.mxu0 %v7024_v58  ;;  %v7164_v58 = vpack.c.bf16 %v1223_v46, %v1207_v45  ;;  %v7166_v7 = vpack.c.bf16 %v1222_v59, %v1206_v56  ;;  %v1317_v45 = vld [vmem:[#allocation5 + $0x1ec8] sm:$0xff]  ;;  %v7174_v56 = vpack.c.bf16 %v1286_v40, %v1270_v35  ;;  %v1300_v59 = vld [vmem:[#allocation5 + $0x1e40] sm:$0xff]  ;;  %v1302_v61 = vld [vmem:[#allocation5 + $0x1e50] sm:$0xff] }
 0x203   : > { %v9774_v16 = vpop.f32.mrb[6].mxu0  ;;  %7153 = vmatprep.subr.bf16.mxu1 %v7152_v63  ;;  %2521 = vmatprep.mubr.f32.mxu0 %v9117_v21  ;;  %v344_v40 = vld [vmem:[#allocation5 + $0x60] sm:$0xff] }
 0x204   : > { %v9777_v22 = vpop.f32.mrb[6].mxu1  ;;  %v9779_v23 = vpop.f32.mrb[7].mxu0  ;;  %2747 = vmatprep.mubr.f32.mxu1 %v9117_v21  ;;  %v1271_v21 = vld [vmem:[#allocation5 + $0x1d58] sm:$0xff] }
 0x205   : > { %v9781_v27 = vpop.f32.mrb[7].mxu1  ;;  %7027 = vmatpush1.bf16.msra.mxu0 %v7026_v10  ;;  %v1236_v10 = vld [vmem:[#allocation5 + $0x1c40] sm:$0xff]  ;;  %v7172_v39 = vpack.c.bf16 %v1287_v24, %v1271_v21  ;;  %v1350_v24 = vld [vmem:[#allocation5 + $0x1fd0] sm:$0xff] }
 0x206   : > { %7155 = vmatpush1.bf16.msra.mxu1 %v7154_v11  ;;  %7029 = vmatprep.subr.bf16.mxu0 %v7028_v12  ;;  %v1252_v11 = vld [vmem:[#allocation5 + $0x1cc0] sm:$0xff]  ;;  %v1238_v12 = vld [vmem:[#allocation5 + $0x1c50] sm:$0xff] }
 0x207   : > { %v9783_v36 = vpop.f32.mrb[8].mxu0  ;;  %7157 = vmatprep.subr.bf16.mxu1 %v7156_v17  ;;  %v1269_v17 = vld [vmem:[#allocation5 + $0x1d48] sm:$0xff] }
 0x208   : > { %v9785_v42 = vpop.f32.mrb[8].mxu1  ;;  %v9787_v43 = vpop.f32.mrb[9].mxu0 }
 0x209   : > { %v9789_v47 = vpop.f32.mrb[9].mxu1  ;;  %7031 = vmatpush1.bf16.msra.mxu0 %v7030_v28  ;;  %v7042_v28 = vpack.c.bf16 %v1252_v11, %v1236_v10  ;;  %v1351_v10 = vld [vmem:[#allocation5 + $0x1fd8] sm:$0xff]  ;;  %v7050_v11 = vpack.c.bf16 %v1316_v60, %v1300_v59 }
 0x20a   : > { %7159 = vmatpush1.bf16.msra.mxu1 %v7158_v29  ;;  %7033 = vmatprep.subr.bf16.mxu0 %v7032_v30  ;;  %v7170_v29 = vpack.c.bf16 %v1254_v15, %v1238_v12  ;;  %v7044_v30 = vpack.c.bf16 %v1285_v18, %v1269_v17  ;;  %v7178_v12 = vpack.c.bf16 %v1318_v2, %v1302_v61  ;;  %v1332_v15 = vld [vmem:[#allocation5 + $0x1f40] sm:$0xff]  ;;  %v1334_v18 = vld [vmem:[#allocation5 + $0x1f50] sm:$0xff]  ;;  %v379_v59 = vld [vmem:[#allocation5 + $0x178] sm:$0xff] }
 0x20b   : > { %v9791_v57 = vpop.f32.mrb[10].mxu0  ;;  %7161 = vmatprep.subr.bf16.mxu1 %v7160_v38  ;;  %v1348_v17 = vld [vmem:[#allocation5 + $0x1fc0] sm:$0xff]  ;;  %v7182_v35 = vpack.c.bf16 %v1350_v24, %v1334_v18  ;;  %v395_v60 = vld [vmem:[#allocation5 + $0x1f8] sm:$0xff] }
 0x20c   : > { %v9793_v63 = vpop.f32.mrb[10].mxu1  ;;  %v9795_v0 = vpop.f32.mrb[11].mxu0  ;;  %v7054_v34 = vpack.c.bf16 %v1348_v17, %v1332_v15  ;;  %v392_v2 = vld [vmem:[#allocation5 + $0x1e0] sm:$0xff]  ;;  %v411_v17 = vld [vmem:[#allocation5 + $0x278] sm:$0xff] }
 0x20d   : > { %v9797_v3 = vpop.f32.mrb[11].mxu1  ;;  %7035 = vmatpush1.bf16.msra.mxu0 %v7034_v48  ;;  %v427_v18 = vld [vmem:[#allocation5 + $0x2f8] sm:$0xff] }
 0x20e   : > { %7163 = vmatpush1.bf16.msra.mxu1 %v7162_v49  ;;  %7037 = vmatprep.subr.bf16.mxu0 %v7036_v52  ;;  %v1303_v49 = vld [vmem:[#allocation5 + $0x1e58] sm:$0xff] }
 0x20f   : > { %v9799_v13 = vpop.f32.mrb[12].mxu0  ;;  %7165 = vmatprep.subr.bf16.mxu1 %v7164_v58  ;;  %v1319_v52 = vld [vmem:[#allocation5 + $0x1ed8] sm:$0xff]  ;;  %v7048_v58 = vpack.c.bf16 %v1317_v45, %v1301_v41  ;;  %v360_v41 = vld [vmem:[#allocation5 + $0xe0] sm:$0xff] }
 0x210   : > { %v9801_v19 = vpop.f32.mrb[12].mxu1  ;;  %v9803_v20 = vpop.f32.mrb[13].mxu0  ;;  %v7176_v1 = vpack.c.bf16 %v1319_v52, %v1303_v49  ;;  %v346_v49 = vld [vmem:[#allocation5 + $0x70] sm:$0xff] }
 0x211   : > { %v9805_v25 = vpop.f32.mrb[13].mxu1  ;;  %7039 = vmatpush1.bf16.msra.mxu0 %v7038_v6  ;;  %v1333_v6 = vld [vmem:[#allocation5 + $0x1f48] sm:$0xff]  ;;  %v362_v52 = vld [vmem:[#allocation5 + $0xf0] sm:$0xff] }
 0x212   : > { %7167 = vmatpush1.bf16.msra.mxu1 %v7166_v7  ;;  %7041 = vmatprep.subr.bf16.mxu0 %v7040_v8  ;;  %v1349_v7 = vld [vmem:[#allocation5 + $0x1fc8] sm:$0xff]  ;;  %v1335_v8 = vld [vmem:[#allocation5 + $0x1f58] sm:$0xff]  ;;  %v7314_v61 = vpack.c.bf16 %v362_v52, %v346_v49 }
 0x213   : > { %v9807_v38 = vpop.f32.mrb[14].mxu0  ;;  %7169 = vmatprep.subr.bf16.mxu1 %v7168_v14  ;;  %v7052_v14 = vpack.c.bf16 %v1349_v7, %v1333_v6  ;;  %v7180_v21 = vpack.c.bf16 %v1351_v10, %v1335_v8  ;;  %v378_v7 = vld [vmem:[#allocation5 + $0x170] sm:$0xff]  ;;  %v443_v49 = vld [vmem:[#allocation5 + $0x378] sm:$0xff] }
 0x214   : > { %v9809_v46 = vpop.f32.mrb[14].mxu1  ;;  %v9811_v48 = vpop.f32.mrb[15].mxu0  ;;  %v394_v8 = vld [vmem:[#allocation5 + $0x1f0] sm:$0xff]  ;;  %v459_v52 = vld [vmem:[#allocation5 + $0x3f8] sm:$0xff] }
 0x215   : > { %v9813_v53 = vpop.f32.mrb[15].mxu1  ;;  %7043 = vmatpush1.bf16.msra.mxu0 %v7042_v28  ;;  %v345_v28 = vld [vmem:[#allocation5 + $0x68] sm:$0xff]  ;;  %v9118_v10 = vld [vmem:[%s9656_s6 + $0x10] sm:$0xff]  ;;  %v7318_v24 = vpack.c.bf16 %v394_v8, %v378_v7 }
 0x216   : > { %7171 = vmatpush1.bf16.msra.mxu1 %v7170_v29  ;;  %7045 = vmatprep.subr.bf16.mxu0 %v7044_v30  ;;  %v361_v29 = vld [vmem:[#allocation5 + $0xe8] sm:$0xff]  ;;  %v347_v30 = vld [vmem:[#allocation5 + $0x78] sm:$0xff] }
 0x217   : > { %7173 = vmatprep.subr.bf16.mxu1 %v7172_v39  ;;  %v7184_v39 = vpack.c.bf16 %v361_v29, %v345_v28  ;;  %v7312_v45 = vpack.c.bf16 %v363_v31, %v347_v30  ;;  %v408_v28 = vld [vmem:[#allocation5 + $0x260] sm:$0xff]  ;;  %v410_v31 = vld [vmem:[#allocation5 + $0x270] sm:$0xff]  ;;  %v473_v7 = vld [vmem:[#allocation5 + $0x468] sm:$0xff] }
 0x218   : > { %v424_v29 = vld [vmem:[#allocation5 + $0x2e0] sm:$0xff]  ;;  %v489_v8 = vld [vmem:[#allocation5 + $0x4e8] sm:$0xff] }
 0x219   : > { %7047 = vmatpush1.bf16.msra.mxu0 %v7046_v54  ;;  %v377_v54 = vld [vmem:[#allocation5 + $0x168] sm:$0xff] }
 0x21a   : > { %7175 = vmatpush1.bf16.msra.mxu1 %v7174_v56  ;;  %7049 = vmatprep.subr.bf16.mxu0 %v7048_v58  ;;  %v393_v56 = vld [vmem:[#allocation5 + $0x1e8] sm:$0xff]  ;;  %v7186_v58 = vpack.c.bf16 %v360_v41, %v344_v40 }
 0x21b   : > { %7177 = vmatprep.subr.bf16.mxu1 %v7176_v1  ;;  %v376_v1 = vld [vmem:[#allocation5 + $0x160] sm:$0xff]  ;;  %v7188_v6 = vpack.c.bf16 %v393_v56, %v377_v54  ;;  %v441_v40 = vld [vmem:[#allocation5 + $0x368] sm:$0xff]  ;;  %v9121_v54 = vld [vmem:[%s9656_s6 + $0x58] sm:$0xff] }
 0x21c   : > { %v7190_v15 = vpack.c.bf16 %v392_v2, %v376_v1  ;;  %v457_v41 = vld [vmem:[#allocation5 + $0x3e8] sm:$0xff]  ;;  %v458_v1 = vld [vmem:[#allocation5 + $0x3f0] sm:$0xff] }
 0x21d   : > { %7051 = vmatpush1.bf16.msra.mxu0 %v7050_v11  ;;  %v7316_v11 = vpack.c.bf16 %v395_v60, %v379_v59  ;;  %v456_v59 = vld [vmem:[#allocation5 + $0x3e0] sm:$0xff]  ;;  %v7196_v60 = vpack.c.bf16 %v457_v41, %v441_v40  ;;  %v9122_v2 = vld [vmem:[%s9656_s6 + $0x50] sm:$0xff]  ;;  %v523_v40 = vld [vmem:[#allocation5 + $0x5f8] sm:$0xff] }
 0x21e   : > { %7179 = vmatpush1.bf16.msra.mxu1 %v7178_v12  ;;  %7053 = vmatprep.subr.bf16.mxu0 %v7052_v14  ;;  %v409_v12 = vld [vmem:[#allocation5 + $0x268] sm:$0xff]  ;;  %v9125_v41 = vld [vmem:[%s9656_s6 + $0x98] sm:$0xff] }
 0x21f   : > { %7181 = vmatprep.subr.bf16.mxu1 %v7180_v21  ;;  %v425_v14 = vld [vmem:[#allocation5 + $0x2e8] sm:$0xff]  ;;  %v9119_v21 = vld [vmem:[%s9656_s6 + $0x38] sm:$0xff] }
 0x220   : > { %v7192_v30 = vpack.c.bf16 %v425_v14, %v409_v12  ;;  %v491_v12 = vld [vmem:[#allocation5 + $0x4f8] sm:$0xff] }
 0x221   : > { %7055 = vmatpush1.bf16.msra.mxu0 %v7054_v34  ;;  %v426_v34 = vld [vmem:[#allocation5 + $0x2f0] sm:$0xff]  ;;  %v9123_v14 = vld [vmem:[%s9656_s6 + $0x78] sm:$0xff] }
 0x222   : > { %7183 = vmatpush1.bf16.msra.mxu1 %v7182_v35  ;;  %7185 = vmatprep.subr.bf16.mxu0 %v7184_v39  ;;  %v9120_v35 = vld [vmem:[%s9656_s6 + $0x30] sm:$0xff]  ;;  %v7320_v39 = vpack.c.bf16 %v427_v18, %v411_v17  ;;  %v7322_v56 = vpack.c.bf16 %v426_v34, %v410_v31  ;;  %v472_v17 = vld [vmem:[#allocation5 + $0x460] sm:$0xff]  ;;  %v505_v31 = vld [vmem:[#allocation5 + $0x568] sm:$0xff] }
 0x223   : > { %7313 = vmatprep.subr.bf16.mxu1 %v7312_v45  ;;  %v7194_v45 = vpack.c.bf16 %v424_v29, %v408_v28  ;;  %v488_v18 = vld [vmem:[#allocation5 + $0x4e0] sm:$0xff]  ;;  %v490_v28 = vld [vmem:[#allocation5 + $0x4f0] sm:$0xff]  ;;  %v521_v34 = vld [vmem:[#allocation5 + $0x5e8] sm:$0xff] }
 0x224   : > { %2522 = vmatmul.mubr.f32.vlgmr.msra.gmra.mrb[32].mxu0 %v9118_v10  ;;  %v9124_v29 = vld [vmem:[%s9656_s6 + $0x70] sm:$0xff] }
 0x225   : > { %2748 = vmatmul.mubr.f32.vlgmr.msra.gmra.mrb[32].mxu1 %v9118_v10  ;;  %7187 = vmatpush1.bf16.msra.mxu0 %v7186_v58  ;;  %v440_v58 = vld [vmem:[#allocation5 + $0x360] sm:$0xff] }
 0x226   : > { %7315 = vmatpush1.bf16.msra.mxu1 %v7314_v61  ;;  %2527 = vmatprep.mubr.f32.mxu0 %v9119_v21  ;;  %v442_v61 = vld [vmem:[#allocation5 + $0x370] sm:$0xff]  ;;  %v7198_v10 = vpack.c.bf16 %v456_v59, %v440_v58 }
 0x227   : > { %2753 = vmatprep.mubr.f32.mxu1 %v9119_v21  ;;  %7189 = vmatprep.subr.bf16.mxu0 %v7188_v6  ;;  %v7324_v6 = vpack.c.bf16 %v459_v52, %v443_v49  ;;  %v7200_v21 = vpack.c.bf16 %v489_v8, %v473_v7  ;;  %v504_v49 = vld [vmem:[#allocation5 + $0x560] sm:$0xff]  ;;  %v522_v58 = vld [vmem:[#allocation5 + $0x5f0] sm:$0xff]  ;;  %v555_v7 = vld [vmem:[#allocation5 + $0x6f8] sm:$0xff] }
 0x228   : > { %2528 = vmatmul.mubr.f32.gmra.mrb[34].mxu0 %v9120_v35  ;;  %7317 = vmatprep.subr.bf16.mxu1 %v7316_v11  ;;  %v475_v11 = vld [vmem:[#allocation5 + $0x478] sm:$0xff]  ;;  %v520_v52 = vld [vmem:[#allocation5 + $0x5e0] sm:$0xff]  ;;  %v9126_v59 = vld [vmem:[%s9656_s6 + $0x90] sm:$0xff] }
 0x229   : > { %2754 = vmatmul.mubr.f32.gmra.mrb[34].mxu1 %v9120_v35  ;;  %7191 = vmatpush1.bf16.msra.mxu0 %v7190_v15  ;;  %v7326_v15 = vpack.c.bf16 %v458_v1, %v442_v61  ;;  %v7202_v35 = vpack.c.bf16 %v488_v18, %v472_v17  ;;  %v537_v61 = vld [vmem:[#allocation5 + $0x668] sm:$0xff]  ;;  %v9127_v8 = vld [vmem:[%s9656_s6 + $0xb8] sm:$0xff]  ;;  %v554_v17 = vld [vmem:[#allocation5 + $0x6f0] sm:$0xff] }
 0x22a   : > { %7319 = vmatpush1.bf16.msra.mxu1 %v7318_v24  ;;  %2533 = vmatprep.mubr.f32.mxu0 %v9121_v54  ;;  %v474_v24 = vld [vmem:[#allocation5 + $0x470] sm:$0xff]  ;;  %v553_v1 = vld [vmem:[#allocation5 + $0x6e8] sm:$0xff] }
 0x22b   : > { %2759 = vmatprep.mubr.f32.mxu1 %v9121_v54  ;;  %7193 = vmatprep.subr.bf16.mxu0 %v7192_v30  ;;  %v7328_v30 = vpack.c.bf16 %v491_v12, %v475_v11  ;;  %v7204_v54 = vpack.c.bf16 %v521_v34, %v505_v31  ;;  %v536_v11 = vld [vmem:[#allocation5 + $0x660] sm:$0xff]  ;;  %v9128_v18 = vld [vmem:[%s9656_s6 + $0xb0] sm:$0xff]  ;;  %v587_v31 = vld [vmem:[#allocation5 + $0x7f8] sm:$0xff] }
 0x22c   : > { %2534 = vmatmul.mubr.f32.gmra.mrb[36].mxu0 %v9122_v2  ;;  %7321 = vmatprep.subr.bf16.mxu1 %v7320_v39  ;;  %v507_v39 = vld [vmem:[#allocation5 + $0x578] sm:$0xff]  ;;  %v552_v12 = vld [vmem:[#allocation5 + $0x6e0] sm:$0xff] }
 0x22d   : > { %2760 = vmatmul.mubr.f32.gmra.mrb[36].mxu1 %v9122_v2  ;;  %7195 = vmatpush1.bf16.msra.mxu0 %v7194_v45  ;;  %v7330_v45 = vpack.c.bf16 %v490_v28, %v474_v24  ;;  %v7206_v2 = vpack.c.bf16 %v520_v52, %v504_v49  ;;  %v569_v24 = vld [vmem:[#allocation5 + $0x768] sm:$0xff]  ;;  %v9129_v34 = vld [vmem:[%s9656_s6 + $0xd8] sm:$0xff]  ;;  %v586_v49 = vld [vmem:[#allocation5 + $0x7f0] sm:$0xff] }
 0x22e   : > { %7323 = vmatpush1.bf16.msra.mxu1 %v7322_v56  ;;  %2539 = vmatprep.mubr.f32.mxu0 %v9123_v14  ;;  %v506_v56 = vld [vmem:[#allocation5 + $0x570] sm:$0xff]  ;;  %v585_v28 = vld [vmem:[#allocation5 + $0x7e8] sm:$0xff] }
 0x22f   : > { %2765 = vmatprep.mubr.f32.mxu1 %v9123_v14  ;;  %7197 = vmatprep.subr.bf16.mxu0 %v7196_v60  ;;  %v7332_v60 = vpack.c.bf16 %v523_v40, %v507_v39  ;;  %v7208_v14 = vpack.c.bf16 %v553_v1, %v537_v61  ;;  %v568_v39 = vld [vmem:[#allocation5 + $0x760] sm:$0xff]  ;;  %v601_v52 = vld [vmem:[#allocation5 + $0x868] sm:$0xff]  ;;  %v9131_v1 = vld [vmem:[%s9656_s6 + $0xf8] sm:$0xff] }
 0x230   : > { %2540 = vmatmul.mubr.f32.gmra.mrb[38].mxu0 %v9124_v29  ;;  %7325 = vmatprep.subr.bf16.mxu1 %v7324_v6  ;;  %v539_v6 = vld [vmem:[#allocation5 + $0x678] sm:$0xff]  ;;  %v584_v40 = vld [vmem:[#allocation5 + $0x7e0] sm:$0xff] }
 0x231   : > { %2766 = vmatmul.mubr.f32.gmra.mrb[38].mxu1 %v9124_v29  ;;  %7199 = vmatpush1.bf16.msra.mxu0 %v7198_v10  ;;  %v7334_v10 = vpack.c.bf16 %v522_v58, %v506_v56  ;;  %v7210_v29 = vpack.c.bf16 %v552_v12, %v536_v11  ;;  %v9130_v56 = vld [vmem:[%s9656_s6 + $0xd0] sm:$0xff]  ;;  %v7214_v61 = vpack.c.bf16 %v584_v40, %v568_v39  ;;  %v665_v40 = vld [vmem:[#allocation5 + $0xa68] sm:$0xff] }
 0x232   : > { %7327 = vmatpush1.bf16.msra.mxu1 %v7326_v15  ;;  %2545 = vmatprep.mubr.f32.mxu0 %v9125_v41  ;;  %v538_v15 = vld [vmem:[#allocation5 + $0x670] sm:$0xff] }
 0x233   : > { %2771 = vmatprep.mubr.f32.mxu1 %v9125_v41  ;;  %7201 = vmatprep.subr.bf16.mxu0 %v7200_v21  ;;  %v7336_v21 = vpack.c.bf16 %v555_v7, %v539_v6  ;;  %v570_v41 = vld [vmem:[#allocation5 + $0x770] sm:$0xff]  ;;  %v600_v7 = vld [vmem:[#allocation5 + $0x860] sm:$0xff] }
 0x234   : > { %2546 = vmatmul.mubr.f32.gmra.mrb[40].mxu0 %v9126_v59  ;;  %7329 = vmatprep.subr.bf16.mxu1 %v7328_v30  ;;  %v571_v30 = vld [vmem:[#allocation5 + $0x778] sm:$0xff]  ;;  %v618_v12 = vld [vmem:[#allocation5 + $0x8f0] sm:$0xff] }
 0x235   : > { %2772 = vmatmul.mubr.f32.gmra.mrb[40].mxu1 %v9126_v59  ;;  %7203 = vmatpush1.bf16.msra.mxu0 %v7202_v35  ;;  %v7338_v35 = vpack.c.bf16 %v554_v17, %v538_v15  ;;  %v7340_v58 = vpack.c.bf16 %v587_v31, %v571_v30  ;;  %v603_v59 = vld [vmem:[#allocation5 + $0x878] sm:$0xff]  ;;  %v649_v15 = vld [vmem:[#allocation5 + $0x9e8] sm:$0xff]  ;;  %v9132_v17 = vld [vmem:[%s9656_s6 + $0xf0] sm:$0xff] }
 0x236   : > { %7331 = vmatpush1.bf16.msra.mxu1 %v7330_v45  ;;  %2551 = vmatprep.mubr.f32.mxu0 %v9127_v8  ;;  %v7212_v45 = vpack.c.bf16 %v585_v28, %v569_v24  ;;  %v632_v30 = vld [vmem:[#allocation5 + $0x960] sm:$0xff]  ;;  %v650_v39 = vld [vmem:[#allocation5 + $0x9f0] sm:$0xff] }
 0x237   : > { %2777 = vmatprep.mubr.f32.mxu1 %v9127_v8  ;;  %7205 = vmatprep.subr.bf16.mxu0 %v7204_v54  ;;  %v617_v54 = vld [vmem:[#allocation5 + $0x8e8] sm:$0xff]  ;;  %v616_v8 = vld [vmem:[#allocation5 + $0x8e0] sm:$0xff] }
 0x238   : > { %2552 = vmatmul.mubr.f32.gmra.mrb[42].mxu0 %v9128_v18  ;;  %7333 = vmatprep.subr.bf16.mxu1 %v7332_v60  ;;  %v619_v60 = vld [vmem:[#allocation5 + $0x8f8] sm:$0xff]  ;;  %v7216_v6 = vpack.c.bf16 %v617_v54, %v601_v52  ;;  %v7218_v24 = vpack.c.bf16 %v616_v8, %v600_v7  ;;  %v648_v31 = vld [vmem:[#allocation5 + $0x9e0] sm:$0xff]  ;;  %v713_v7 = vld [vmem:[#allocation5 + $0xbe8] sm:$0xff] }
 0x239   : > { %2778 = vmatmul.mubr.f32.gmra.mrb[42].mxu1 %v9128_v18  ;;  %7207 = vmatpush1.bf16.msra.mxu0 %v7206_v2  ;;  %v7342_v2 = vpack.c.bf16 %v586_v49, %v570_v41  ;;  %v7344_v11 = vpack.c.bf16 %v619_v60, %v603_v59  ;;  %v635_v18 = vld [vmem:[#allocation5 + $0x978] sm:$0xff]  ;;  %v681_v41 = vld [vmem:[#allocation5 + $0xae8] sm:$0xff]  ;;  %v7222_v54 = vpack.c.bf16 %v648_v31, %v632_v30  ;;  %v664_v59 = vld [vmem:[#allocation5 + $0xa60] sm:$0xff] }
 0x23a   : > { %7335 = vmatpush1.bf16.msra.mxu1 %v7334_v10  ;;  %2557 = vmatprep.mubr.f32.mxu0 %v9129_v34  ;;  %v602_v10 = vld [vmem:[#allocation5 + $0x870] sm:$0xff]  ;;  %v667_v49 = vld [vmem:[#allocation5 + $0xa78] sm:$0xff]  ;;  %v680_v60 = vld [vmem:[#allocation5 + $0xae0] sm:$0xff] }
 0x23b   : > { %2783 = vmatprep.mubr.f32.mxu1 %v9129_v34  ;;  %7209 = vmatprep.subr.bf16.mxu0 %v7208_v14  ;;  %v633_v14 = vld [vmem:[#allocation5 + $0x968] sm:$0xff]  ;;  %v7346_v28 = vpack.c.bf16 %v618_v12, %v602_v10  ;;  %v634_v34 = vld [vmem:[#allocation5 + $0x970] sm:$0xff]  ;;  %v683_v52 = vld [vmem:[#allocation5 + $0xaf8] sm:$0xff] }
 0x23c   : > { %2558 = vmatmul.mubr.f32.gmra.mrb[44].mxu0 %v9130_v56  ;;  %7337 = vmatprep.subr.bf16.mxu1 %v7336_v21  ;;  %v651_v21 = vld [vmem:[#allocation5 + $0x9f8] sm:$0xff] }
 0x23d   : > { %2784 = vmatmul.mubr.f32.gmra.mrb[44].mxu1 %v9130_v56  ;;  %7211 = vmatpush1.bf16.msra.mxu0 %v7210_v29  ;;  %v7220_v29 = vpack.c.bf16 %v649_v15, %v633_v14  ;;  %v7350_v56 = vpack.c.bf16 %v650_v39, %v634_v34  ;;  %v699_v8 = vld [vmem:[#allocation5 + $0xb78] sm:$0xff]  ;;  %v696_v15 = vld [vmem:[#allocation5 + $0xb60] sm:$0xff] }
 0x23e   : > { %7339 = vmatpush1.bf16.msra.mxu1 %v7338_v35  ;;  %2563 = vmatprep.mubr.f32.mxu0 %v9131_v1  ;;  %v7348_v35 = vpack.c.bf16 %v651_v21, %v635_v18  ;;  %v715_v10 = vld [vmem:[#allocation5 + $0xbf8] sm:$0xff]  ;;  %v698_v18 = vld [vmem:[#allocation5 + $0xb70] sm:$0xff] }
 0x23f   : > { %2789 = vmatprep.mubr.f32.mxu1 %v9131_v1  ;;  %7213 = vmatprep.subr.bf16.mxu0 %v7212_v45  ;;  %v9133_v45 = vld [vmem:[%s9656_s6 + $0x8] sm:$0xff]  ;;  %v7352_v1 = vpack.c.bf16 %v683_v52, %v667_v49  ;;  %v7356_v21 = vpack.c.bf16 %v715_v10, %v699_v8  ;;  %v731_v30 = vld [vmem:[#allocation5 + $0xc78] sm:$0xff]  ;;  %v746_v52 = vld [vmem:[#allocation5 + $0xcf0] sm:$0xff] }
 0x240   : > { %2564 = vmatmul.mubr.f32.gmra.mrb[46].mxu0 %v9132_v17  ;;  %7341 = vmatprep.subr.bf16.mxu1 %v7340_v58  ;;  %v7224_v58 = vpack.c.bf16 %v681_v41, %v665_v40  ;;  %v747_v31 = vld [vmem:[#allocation5 + $0xcf8] sm:$0xff]  ;;  %v728_v40 = vld [vmem:[#allocation5 + $0xc60] sm:$0xff]  ;;  %v778_v10 = vld [vmem:[#allocation5 + $0xdf0] sm:$0xff] }
 0x241   : > { %2790 = vmatmul.mubr.f32.gmra.mrb[46].mxu1 %v9132_v17  ;;  %7215 = vmatpush1.bf16.msra.mxu0 %v7214_v61  ;;  %v666_v61 = vld [vmem:[#allocation5 + $0xa70] sm:$0xff]  ;;  %v712_v17 = vld [vmem:[#allocation5 + $0xbe0] sm:$0xff]  ;;  %v7360_v49 = vpack.c.bf16 %v747_v31, %v731_v30 }
 0x242   : > { %7343 = vmatpush1.bf16.msra.mxu1 %v7342_v2  ;;  %7217 = vmatprep.subr.bf16.mxu0 %v7216_v6  ;;  %v682_v2 = vld [vmem:[#allocation5 + $0xaf0] sm:$0xff]  ;;  %v697_v6 = vld [vmem:[#allocation5 + $0xb68] sm:$0xff]  ;;  %v7230_v34 = vpack.c.bf16 %v712_v17, %v696_v15  ;;  %v744_v41 = vld [vmem:[#allocation5 + $0xce0] sm:$0xff] }
 0x243   : > { %7345 = vmatprep.subr.bf16.mxu1 %v7344_v11  ;;  %2860 = vmatprep.mubr.f32.mxu0 %v9133_v45  ;;  %v7226_v11 = vpack.c.bf16 %v680_v60, %v664_v59  ;;  %v7354_v12 = vpack.c.bf16 %v682_v2, %v666_v61  ;;  %v7228_v14 = vpack.c.bf16 %v713_v7, %v697_v6  ;;  %v779_v59 = vld [vmem:[#allocation5 + $0xdf8] sm:$0xff]  ;;  %v760_v2 = vld [vmem:[#allocation5 + $0xd60] sm:$0xff]  ;;  %v762_v7 = vld [vmem:[#allocation5 + $0xd70] sm:$0xff] }
 0x244   : > { %3086 = vmatprep.mubr.f32.mxu1 %v9133_v45  ;;  %v730_v45 = vld [vmem:[#allocation5 + $0xc70] sm:$0xff]  ;;  %v7234_v60 = vpack.c.bf16 %v744_v41, %v728_v40  ;;  %v776_v6 = vld [vmem:[#allocation5 + $0xde0] sm:$0xff]  ;;  %v811_v15 = vld [vmem:[#allocation5 + $0xef8] sm:$0xff] }
 0x245   : > { %7219 = vmatpush1.bf16.msra.mxu0 %v7218_v24  ;;  %v714_v24 = vld [vmem:[#allocation5 + $0xbf0] sm:$0xff]  ;;  %v7362_v61 = vpack.c.bf16 %v746_v52, %v730_v45  ;;  %v7238_v17 = vpack.c.bf16 %v776_v6, %v760_v2  ;;  %v843_v40 = vld [vmem:[#allocation5 + $0xff8] sm:$0xff]  ;;  %v824_v52 = vld [vmem:[#allocation5 + $0xf60] sm:$0xff] }
 0x246   : > { %7347 = vmatpush1.bf16.msra.mxu1 %v7346_v28  ;;  %7221 = vmatprep.subr.bf16.mxu0 %v7220_v29  ;;  %v729_v28 = vld [vmem:[#allocation5 + $0xc68] sm:$0xff]  ;;  %v810_v31 = vld [vmem:[#allocation5 + $0xef0] sm:$0xff]  ;;  %v875_v2 = vld [vmem:[#allocation5 + $0x10f8] sm:$0xff] }
 0x247   : > { %7349 = vmatprep.subr.bf16.mxu1 %v7348_v35  ;;  %v745_v29 = vld [vmem:[#allocation5 + $0xce8] sm:$0xff]  ;;  %v7358_v35 = vpack.c.bf16 %v714_v24, %v698_v18  ;;  %v7366_v18 = vpack.c.bf16 %v778_v10, %v762_v7  ;;  %v792_v24 = vld [vmem:[#allocation5 + $0xe60] sm:$0xff] }
 0x248   : > { %v7232_v39 = vpack.c.bf16 %v745_v29, %v729_v28  ;;  %v808_v28 = vld [vmem:[#allocation5 + $0xee0] sm:$0xff]  ;;  %v794_v29 = vld [vmem:[#allocation5 + $0xe70] sm:$0xff] }
 0x249   : > { %7223 = vmatpush1.bf16.msra.mxu0 %v7222_v54  ;;  %v761_v54 = vld [vmem:[#allocation5 + $0xd68] sm:$0xff]  ;;  %v7242_v41 = vpack.c.bf16 %v808_v28, %v792_v24  ;;  %v7370_v45 = vpack.c.bf16 %v810_v31, %v794_v29  ;;  %v856_v10 = vld [vmem:[#allocation5 + $0x1060] sm:$0xff]  ;;  %v907_v24 = vld [vmem:[#allocation5 + $0x11f8] sm:$0xff] }
 0x24a   : > { %7351 = vmatpush1.bf16.msra.mxu1 %v7350_v56  ;;  %7225 = vmatprep.subr.bf16.mxu0 %v7224_v58  ;;  %v777_v56 = vld [vmem:[#allocation5 + $0xde8] sm:$0xff]  ;;  %v763_v58 = vld [vmem:[#allocation5 + $0xd78] sm:$0xff]  ;;  %v888_v31 = vld [vmem:[#allocation5 + $0x1160] sm:$0xff] }
 0x24b   : > { %7353 = vmatprep.subr.bf16.mxu1 %v7352_v1  ;;  %v7236_v1 = vpack.c.bf16 %v777_v56, %v761_v54  ;;  %v7364_v8 = vpack.c.bf16 %v779_v59, %v763_v58  ;;  %v840_v54 = vld [vmem:[#allocation5 + $0xfe0] sm:$0xff]  ;;  %v826_v56 = vld [vmem:[#allocation5 + $0xf70] sm:$0xff] }
 0x24c   : > { %v842_v59 = vld [vmem:[#allocation5 + $0xff0] sm:$0xff]  ;;  %v7246_v6 = vpack.c.bf16 %v840_v54, %v824_v52  ;;  %v923_v52 = vld [vmem:[#allocation5 + $0x1278] sm:$0xff] }
 0x24d   : > { %7227 = vmatpush1.bf16.msra.mxu0 %v7226_v11  ;;  %v793_v11 = vld [vmem:[#allocation5 + $0xe68] sm:$0xff]  ;;  %v7374_v7 = vpack.c.bf16 %v842_v59, %v826_v56  ;;  %v939_v54 = vld [vmem:[#allocation5 + $0x12f8] sm:$0xff] }
 0x24e   : > { %7355 = vmatpush1.bf16.msra.mxu1 %v7354_v12  ;;  %7229 = vmatprep.subr.bf16.mxu0 %v7228_v14  ;;  %v809_v12 = vld [vmem:[#allocation5 + $0xee8] sm:$0xff]  ;;  %v795_v14 = vld [vmem:[#allocation5 + $0xe78] sm:$0xff] }
 0x24f   : > { %7357 = vmatprep.subr.bf16.mxu1 %v7356_v21  ;;  %v7240_v21 = vpack.c.bf16 %v809_v12, %v793_v11  ;;  %v7368_v30 = vpack.c.bf16 %v811_v15, %v795_v14  ;;  %v872_v11 = vld [vmem:[#allocation5 + $0x10e0] sm:$0xff]  ;;  %v858_v12 = vld [vmem:[#allocation5 + $0x1070] sm:$0xff] }
 0x250   : > { %v874_v15 = vld [vmem:[#allocation5 + $0x10f0] sm:$0xff]  ;;  %v7250_v28 = vpack.c.bf16 %v872_v11, %v856_v10  ;;  %v9135_v10 = vld [vmem:[%s9656_s6 + $0x28] sm:$0xff]  ;;  %v955_v11 = vld [vmem:[#allocation5 + $0x1378] sm:$0xff] }
 0x251   : > { %7231 = vmatpush1.bf16.msra.mxu0 %v7230_v34  ;;  %v825_v34 = vld [vmem:[#allocation5 + $0xf68] sm:$0xff]  ;;  %v7378_v29 = vpack.c.bf16 %v874_v15, %v858_v12  ;;  %v971_v12 = vld [vmem:[#allocation5 + $0x13f8] sm:$0xff] }
 0x252   : > { %7359 = vmatpush1.bf16.msra.mxu1 %v7358_v35  ;;  %7233 = vmatprep.subr.bf16.mxu0 %v7232_v39  ;;  %v841_v35 = vld [vmem:[#allocation5 + $0xfe8] sm:$0xff]  ;;  %v827_v39 = vld [vmem:[#allocation5 + $0xf78] sm:$0xff] }
 0x253   : > { %7361 = vmatprep.subr.bf16.mxu1 %v7360_v49  ;;  %v7244_v49 = vpack.c.bf16 %v841_v35, %v825_v34  ;;  %v7372_v58 = vpack.c.bf16 %v843_v40, %v827_v39  ;;  %v904_v34 = vld [vmem:[#allocation5 + $0x11e0] sm:$0xff]  ;;  %v890_v35 = vld [vmem:[#allocation5 + $0x1170] sm:$0xff] }
 0x254   : > { %v906_v40 = vld [vmem:[#allocation5 + $0x11f0] sm:$0xff]  ;;  %v7254_v56 = vpack.c.bf16 %v904_v34, %v888_v31  ;;  %v985_v31 = vld [vmem:[#allocation5 + $0x1468] sm:$0xff] }
 0x255   : > { %7235 = vmatpush1.bf16.msra.mxu0 %v7234_v60  ;;  %v857_v60 = vld [vmem:[#allocation5 + $0x1068] sm:$0xff] }
 0x256   : > { %7363 = vmatpush1.bf16.msra.mxu1 %v7362_v61  ;;  %7237 = vmatprep.subr.bf16.mxu0 %v7236_v1  ;;  %v873_v61 = vld [vmem:[#allocation5 + $0x10e8] sm:$0xff]  ;;  %v859_v1 = vld [vmem:[#allocation5 + $0x1078] sm:$0xff] }
 0x257   : > { %7365 = vmatprep.subr.bf16.mxu1 %v7364_v8  ;;  %v7248_v8 = vpack.c.bf16 %v873_v61, %v857_v60  ;;  %v7376_v14 = vpack.c.bf16 %v875_v2, %v859_v1  ;;  %v920_v60 = vld [vmem:[#allocation5 + $0x1260] sm:$0xff]  ;;  %v922_v1 = vld [vmem:[#allocation5 + $0x1270] sm:$0xff]  ;;  %v7384_v2 = vpack.c.bf16 %v939_v54, %v923_v52  ;;  %v1001_v34 = vld [vmem:[#allocation5 + $0x14e8] sm:$0xff] }
 0x258   : > { %v936_v61 = vld [vmem:[#allocation5 + $0x12e0] sm:$0xff]  ;;  %v7264_v52 = vpack.c.bf16 %v1001_v34, %v985_v31  ;;  %v1067_v31 = vld [vmem:[#allocation5 + $0x16f8] sm:$0xff] }
 0x259   : > { %7239 = vmatpush1.bf16.msra.mxu0 %v7238_v17  ;;  %v889_v17 = vld [vmem:[#allocation5 + $0x1168] sm:$0xff]  ;;  %v7258_v15 = vpack.c.bf16 %v936_v61, %v920_v60  ;;  %v984_v54 = vld [vmem:[#allocation5 + $0x1460] sm:$0xff]  ;;  %v1002_v60 = vld [vmem:[#allocation5 + $0x14f0] sm:$0xff] }
 0x25a   : > { %7367 = vmatpush1.bf16.msra.mxu1 %v7366_v18  ;;  %7241 = vmatprep.subr.bf16.mxu0 %v7240_v21  ;;  %v905_v18 = vld [vmem:[#allocation5 + $0x11e8] sm:$0xff]  ;;  %v891_v21 = vld [vmem:[#allocation5 + $0x1178] sm:$0xff]  ;;  %v9142_v34 = vld [vmem:[%s9656_s6 + $0x80] sm:$0xff] }
 0x25b   : > { %7369 = vmatprep.subr.bf16.mxu1 %v7368_v30  ;;  %v7252_v30 = vpack.c.bf16 %v905_v18, %v889_v17  ;;  %v7380_v39 = vpack.c.bf16 %v907_v24, %v891_v21  ;;  %v952_v21 = vld [vmem:[#allocation5 + $0x1360] sm:$0xff]  ;;  %v1017_v61 = vld [vmem:[#allocation5 + $0x1568] sm:$0xff] }
 0x25c   : > { %v968_v24 = vld [vmem:[#allocation5 + $0x13e0] sm:$0xff] }
 0x25d   : > { %7243 = vmatpush1.bf16.msra.mxu0 %v7242_v41  ;;  %v921_v41 = vld [vmem:[#allocation5 + $0x1268] sm:$0xff] }
 0x25e   : > { %7371 = vmatpush1.bf16.msra.mxu1 %v7370_v45  ;;  %7245 = vmatprep.subr.bf16.mxu0 %v7244_v49  ;;  %v937_v45 = vld [vmem:[#allocation5 + $0x12e8] sm:$0xff]  ;;  %v9134_v49 = vld [vmem:[%s9656_s6] sm:$0xff] }
 0x25f   : > { %7373 = vmatprep.subr.bf16.mxu1 %v7372_v58  ;;  %v7382_v58 = vpack.c.bf16 %v906_v40, %v890_v35  ;;  %v7256_v59 = vpack.c.bf16 %v937_v45, %v921_v41  ;;  %v9137_v35 = vld [vmem:[%s9656_s6 + $0x48] sm:$0xff]  ;;  %v1003_v40 = vld [vmem:[#allocation5 + $0x14f8] sm:$0xff]  ;;  %v9138_v41 = vld [vmem:[%s9656_s6 + $0x40] sm:$0xff]  ;;  %v7262_v45 = vpack.c.bf16 %v968_v24, %v952_v21 }
 0x260   : > { %v1034_v21 = vld [vmem:[#allocation5 + $0x15f0] sm:$0xff]  ;;  %v1049_v24 = vld [vmem:[#allocation5 + $0x1668] sm:$0xff] }
 0x261   : > { %7247 = vmatpush1.bf16.msra.mxu0 %v7246_v6  ;;  %v938_v6 = vld [vmem:[#allocation5 + $0x12f0] sm:$0xff] }
 0x262   : > { %7375 = vmatpush1.bf16.msra.mxu1 %v7374_v7  ;;  %7249 = vmatprep.subr.bf16.mxu0 %v7248_v8  ;;  %v953_v7 = vld [vmem:[#allocation5 + $0x1368] sm:$0xff]  ;;  %v7386_v17 = vpack.c.bf16 %v938_v6, %v922_v1  ;;  %v1019_v6 = vld [vmem:[#allocation5 + $0x1578] sm:$0xff] }
 0x263   : > { %7377 = vmatprep.subr.bf16.mxu1 %v7376_v14  ;;  %v969_v8 = vld [vmem:[#allocation5 + $0x13e8] sm:$0xff]  ;;  %v9136_v14 = vld [vmem:[%s9656_s6 + $0x20] sm:$0xff] }
 0x264   : > { %2861 = vmatmul.mubr.f32.vlgmr.msra.gmra.mrb[48].mxu0 %v9134_v49  ;;  %v7260_v18 = vpack.c.bf16 %v969_v8, %v953_v7  ;;  %v1033_v1 = vld [vmem:[#allocation5 + $0x15e8] sm:$0xff]  ;;  %v1035_v7 = vld [vmem:[#allocation5 + $0x15f8] sm:$0xff]  ;;  %v9140_v8 = vld [vmem:[%s9656_s6 + $0x60] sm:$0xff] }
 0x265   : > { %7251 = vmatpush1.bf16.msra.mxu0 %v7250_v28  ;;  %3087 = vmatmul.mubr.f32.vlgmr.msra.gmra.mrb[48].mxu1 %v9134_v49  ;;  %v954_v28 = vld [vmem:[#allocation5 + $0x1370] sm:$0xff] }
 0x266   : > { %7379 = vmatpush1.bf16.msra.mxu1 %v7378_v29  ;;  %7253 = vmatprep.subr.bf16.mxu0 %v7252_v30  ;;  %v7388_v29 = vpack.c.bf16 %v971_v12, %v955_v11  ;;  %v970_v30 = vld [vmem:[#allocation5 + $0x13f0] sm:$0xff]  ;;  %v7268_v12 = vpack.c.bf16 %v1033_v1, %v1017_v61 }
 0x267   : > { %7381 = vmatprep.subr.bf16.mxu1 %v7380_v39  ;;  %2866 = vmatprep.mubr.f32.mxu0 %v9135_v10  ;;  %v987_v39 = vld [vmem:[#allocation5 + $0x1478] sm:$0xff]  ;;  %v7390_v49 = vpack.c.bf16 %v970_v30, %v954_v28  ;;  %v1065_v28 = vld [vmem:[#allocation5 + $0x16e8] sm:$0xff] }
 0x268   : > { %3092 = vmatprep.mubr.f32.mxu1 %v9135_v10  ;;  %2867 = vmatmul.mubr.f32.gmra.mrb[50].mxu0 %v9136_v14  ;;  %v1051_v30 = vld [vmem:[#allocation5 + $0x1678] sm:$0xff] }
 0x269   : > { %7255 = vmatpush1.bf16.msra.mxu0 %v7254_v56  ;;  %3093 = vmatmul.mubr.f32.gmra.mrb[50].mxu1 %v9136_v14  ;;  %v1000_v56 = vld [vmem:[#allocation5 + $0x14e0] sm:$0xff] }
 0x26a   : > { %7383 = vmatpush1.bf16.msra.mxu1 %v7382_v58  ;;  %7257 = vmatprep.subr.bf16.mxu0 %v7256_v59  ;;  %v986_v58 = vld [vmem:[#allocation5 + $0x1470] sm:$0xff]  ;;  %v7392_v59 = vpack.c.bf16 %v1003_v40, %v987_v39  ;;  %v7266_v10 = vpack.c.bf16 %v1000_v56, %v984_v54  ;;  %v1016_v14 = vld [vmem:[#allocation5 + $0x1560] sm:$0xff]  ;;  %v7272_v40 = vpack.c.bf16 %v1065_v28, %v1049_v24  ;;  %v1113_v28 = vld [vmem:[#allocation5 + $0x1868] sm:$0xff] }
 0x26b   : > { %7385 = vmatprep.subr.bf16.mxu1 %v7384_v2  ;;  %2872 = vmatprep.mubr.f32.mxu0 %v9137_v35  ;;  %v9139_v2 = vld [vmem:[%s9656_s6 + $0x68] sm:$0xff]  ;;  %v7394_v11 = vpack.c.bf16 %v1002_v60, %v986_v58  ;;  %v7400_v54 = vpack.c.bf16 %v1067_v31, %v1051_v30  ;;  %v1066_v56 = vld [vmem:[#allocation5 + $0x16f0] sm:$0xff] }
 0x26c   : > { %3098 = vmatprep.mubr.f32.mxu1 %v9137_v35  ;;  %2873 = vmatmul.mubr.f32.gmra.mrb[52].mxu0 %v9138_v41  ;;  %v1081_v58 = vld [vmem:[#allocation5 + $0x1768] sm:$0xff]  ;;  %v1098_v24 = vld [vmem:[#allocation5 + $0x17f0] sm:$0xff] }
 0x26d   : > { %7259 = vmatpush1.bf16.msra.mxu0 %v7258_v15  ;;  %3099 = vmatmul.mubr.f32.gmra.mrb[52].mxu1 %v9138_v41  ;;  %v1032_v15 = vld [vmem:[#allocation5 + $0x15e0] sm:$0xff]  ;;  %v9143_v60 = vld [vmem:[%s9656_s6 + $0xa8] sm:$0xff] }
 0x26e   : > { %7387 = vmatpush1.bf16.msra.mxu1 %v7386_v17  ;;  %7261 = vmatprep.subr.bf16.mxu0 %v7260_v18  ;;  %v1018_v17 = vld [vmem:[#allocation5 + $0x1570] sm:$0xff]  ;;  %v7396_v18 = vpack.c.bf16 %v1035_v7, %v1019_v6  ;;  %v7270_v35 = vpack.c.bf16 %v1032_v15, %v1016_v14  ;;  %v1048_v41 = vld [vmem:[#allocation5 + $0x1660] sm:$0xff]  ;;  %v1099_v6 = vld [vmem:[#allocation5 + $0x17f8] sm:$0xff] }
 0x26f   : > { %7389 = vmatprep.subr.bf16.mxu1 %v7388_v29  ;;  %2878 = vmatprep.mubr.f32.mxu0 %v9139_v2  ;;  %v9141_v29 = vld [vmem:[%s9656_s6 + $0x88] sm:$0xff]  ;;  %v7398_v39 = vpack.c.bf16 %v1034_v21, %v1018_v17  ;;  %v9144_v7 = vld [vmem:[%s9656_s6 + $0xa0] sm:$0xff]  ;;  %v1082_v17 = vld [vmem:[#allocation5 + $0x1770] sm:$0xff] }
 0x270   : > { %3104 = vmatprep.mubr.f32.mxu1 %v9139_v2  ;;  %2879 = vmatmul.mubr.f32.gmra.mrb[54].mxu0 %v9140_v8  ;;  %v1083_v2 = vld [vmem:[#allocation5 + $0x1778] sm:$0xff]  ;;  %v1080_v14 = vld [vmem:[#allocation5 + $0x1760] sm:$0xff]  ;;  %v9145_v30 = vld [vmem:[%s9656_s6 + $0xc8] sm:$0xff] }
 0x271   : > { %7263 = vmatpush1.bf16.msra.mxu0 %v7262_v45  ;;  %3105 = vmatmul.mubr.f32.gmra.mrb[54].mxu1 %v9140_v8  ;;  %v1064_v45 = vld [vmem:[#allocation5 + $0x16e0] sm:$0xff]  ;;  %v7404_v21 = vpack.c.bf16 %v1099_v6, %v1083_v2  ;;  %v1130_v6 = vld [vmem:[#allocation5 + $0x18f0] sm:$0xff] }
 0x272   : > { %7391 = vmatpush1.bf16.msra.mxu1 %v7390_v49  ;;  %7265 = vmatprep.subr.bf16.mxu0 %v7264_v52  ;;  %v1050_v49 = vld [vmem:[#allocation5 + $0x1670] sm:$0xff]  ;;  %v1096_v15 = vld [vmem:[#allocation5 + $0x17e0] sm:$0xff] }
 0x273   : > { %7393 = vmatprep.subr.bf16.mxu1 %v7392_v59  ;;  %2884 = vmatprep.mubr.f32.mxu0 %v9141_v29  ;;  %v1097_v59 = vld [vmem:[#allocation5 + $0x17e8] sm:$0xff] }
 0x274   : > { %3110 = vmatprep.mubr.f32.mxu1 %v9141_v29  ;;  %2885 = vmatmul.mubr.f32.gmra.mrb[56].mxu0 %v9142_v34  ;;  %v1129_v29 = vld [vmem:[#allocation5 + $0x18e8] sm:$0xff] }
 0x275   : > { %7267 = vmatpush1.bf16.msra.mxu0 %v7266_v10  ;;  %3111 = vmatmul.mubr.f32.gmra.mrb[56].mxu1 %v9142_v34  ;;  %v7274_v10 = vpack.c.bf16 %v1064_v45, %v1048_v41  ;;  %v7278_v45 = vpack.c.bf16 %v1096_v15, %v1080_v14  ;;  %v9148_v15 = vld [vmem:[%s9656_s6 + $0xe0] sm:$0xff] }
 0x276   : > { %7395 = vmatpush1.bf16.msra.mxu1 %v7394_v11  ;;  %7269 = vmatprep.subr.bf16.mxu0 %v7268_v12  ;;  %v7402_v11 = vpack.c.bf16 %v1066_v56, %v1050_v49  ;;  %v7276_v12 = vpack.c.bf16 %v1097_v59, %v1081_v58  ;;  %v7406_v49 = vpack.c.bf16 %v1098_v24, %v1082_v17  ;;  %v1112_v56 = vld [vmem:[#allocation5 + $0x1860] sm:$0xff]  ;;  %v1114_v59 = vld [vmem:[#allocation5 + $0x1870] sm:$0xff] }
 0x277   : > { %v9840_v52 = vpop.f32.mrb[16].mxu0  ;;  %7397 = vmatprep.subr.bf16.mxu1 %v7396_v18  ;;  %2890 = vmatprep.mubr.f32.mxu0 %v9143_v60  ;;  %v1128_v58 = vld [vmem:[#allocation5 + $0x18e0] sm:$0xff]  ;;  %v7410_v24 = vpack.c.bf16 %v1130_v6, %v1114_v59 }
 0x278   : > { %v9843_v61 = vpop.f32.mrb[16].mxu1  ;;  %v9845_v1 = vpop.f32.mrb[17].mxu0  ;;  %3116 = vmatprep.mubr.f32.mxu1 %v9143_v60  ;;  %2891 = vmatmul.mubr.f32.gmra.mrb[58].mxu0 %v9144_v7 }
 0x279   : > { %10568 = vst [vmem:[#allocation16_spill] sm:$0xff] %v9843_v61  ;;  %v9848_v8 = vpop.f32.mrb[17].mxu1  ;;  %7271 = vmatpush1.bf16.msra.mxu0 %v7270_v35  ;;  %3117 = vmatmul.mubr.f32.gmra.mrb[58].mxu1 %v9144_v7  ;;  %v1115_v35 = vld [vmem:[#allocation5 + $0x1878] sm:$0xff]  ;;  %v1145_v7 = vld [vmem:[#allocation5 + $0x1968] sm:$0xff] }
 0x27a   : > { %10569 = vst [vmem:[#allocation17_spill] sm:$0xff] %v9848_v8  ;;  %7399 = vmatpush1.bf16.msra.mxu1 %v7398_v39  ;;  %7273 = vmatprep.subr.bf16.mxu0 %v7272_v40  ;;  %v1131_v39 = vld [vmem:[#allocation5 + $0x18f8] sm:$0xff]  ;;  %v9146_v40 = vld [vmem:[%s9656_s6 + $0xc0] sm:$0xff]  ;;  %v1193_v61 = vld [vmem:[#allocation5 + $0x1ae8] sm:$0xff] }
 0x27b   : > { %v9850_v18 = vpop.f32.mrb[18].mxu0  ;;  %7401 = vmatprep.subr.bf16.mxu1 %v7400_v54  ;;  %2896 = vmatprep.mubr.f32.mxu0 %v9145_v30  ;;  %v7280_v54 = vpack.c.bf16 %v1129_v29, %v1113_v28  ;;  %v7408_v2 = vpack.c.bf16 %v1131_v39, %v1115_v35  ;;  %v1144_v29 = vld [vmem:[#allocation5 + $0x1960] sm:$0xff]  ;;  %v1146_v39 = vld [vmem:[#allocation5 + $0x1970] sm:$0xff]  ;;  %v9149_v8 = vld [vmem:[%s9656_s6 + $0x18] sm:$0xff] }
 0x27c   : > { %10570 = vst [vmem:[#allocation18_spill] sm:$0xff] %v9850_v18  ;;  %v9853_v31 = vpop.f32.mrb[18].mxu1  ;;  %v9855_v34 = vpop.f32.mrb[19].mxu0  ;;  %3122 = vmatprep.mubr.f32.mxu1 %v9145_v30  ;;  %2897 = vmatmul.mubr.f32.gmra.mrb[60].mxu0 %v9146_v40  ;;  %v1161_v30 = vld [vmem:[#allocation5 + $0x19e8] sm:$0xff]  ;;  %v1160_v35 = vld [vmem:[#allocation5 + $0x19e0] sm:$0xff]  ;;  %v3461_v18 = vld [vmem:[#allocation8 + $0x2a8] sm:$0xff] }
 0x27d   : > { %10571 = vst [vmem:[#allocation19_spill] sm:$0xff] %v9853_v31  ;;  %v9858_v41 = vpop.f32.mrb[19].mxu1  ;;  %7275 = vmatpush1.bf16.msra.mxu0 %v7274_v10  ;;  %3123 = vmatmul.mubr.f32.gmra.mrb[60].mxu1 %v9146_v40  ;;  %v9147_v31 = vld [vmem:[%s9656_s6 + $0xe8] sm:$0xff]  ;;  %v7284_v28 = vpack.c.bf16 %v1161_v30, %v1145_v7  ;;  %v7286_v59 = vpack.c.bf16 %v1160_v35, %v1144_v29  ;;  %v1176_v7 = vld [vmem:[#allocation5 + $0x1a60] sm:$0xff]  ;;  %v1227_v29 = vld [vmem:[#allocation5 + $0x1bf8] sm:$0xff] }
 0x27e   : > { %10572 = vst [vmem:[#allocation20_spill] sm:$0xff] %v9858_v41  ;;  %7403 = vmatpush1.bf16.msra.mxu1 %v7402_v11  ;;  %7277 = vmatprep.subr.bf16.mxu0 %v7276_v12  ;;  %v1147_v11 = vld [vmem:[#allocation5 + $0x1978] sm:$0xff]  ;;  %v1177_v41 = vld [vmem:[#allocation5 + $0x1a68] sm:$0xff]  ;;  %v1192_v30 = vld [vmem:[#allocation5 + $0x1ae0] sm:$0xff] }
 0x27f   : > { %v9860_v60 = vpop.f32.mrb[20].mxu0  ;;  %7405 = vmatprep.subr.bf16.mxu1 %v7404_v21  ;;  %2902 = vmatprep.mubr.f32.mxu0 %v9147_v31  ;;  %v1163_v12 = vld [vmem:[#allocation5 + $0x19f8] sm:$0xff]  ;;  %v7282_v21 = vpack.c.bf16 %v1128_v58, %v1112_v56  ;;  %v7288_v6 = vpack.c.bf16 %v1193_v61, %v1177_v41  ;;  %v7290_v61 = vpack.c.bf16 %v1192_v30, %v1176_v7  ;;  %v1208_v35 = vld [vmem:[#allocation5 + $0x1b60] sm:$0xff] }
 0x280   : > { %10573 = vst [vmem:[#allocation21_spill] sm:$0xff] %v9860_v60  ;;  %v9863_v10 = vpop.f32.mrb[20].mxu1  ;;  %v9865_v14 = vpop.f32.mrb[21].mxu0  ;;  %3128 = vmatprep.mubr.f32.mxu1 %v9147_v31  ;;  %2903 = vmatmul.mubr.f32.gmra.mrb[62].mxu0 %v9148_v15  ;;  %v1162_v31 = vld [vmem:[#allocation5 + $0x19f0] sm:$0xff]  ;;  %v1259_v7 = vld [vmem:[#allocation5 + $0x1cf8] sm:$0xff]  ;;  %v1256_v30 = vld [vmem:[#allocation5 + $0x1ce0] sm:$0xff] }
 0x281   : > { %10574 = vst [vmem:[#allocation22_spill] sm:$0xff] %v9863_v10  ;;  %10575 = vst [vmem:[#allocation23_spill] sm:$0xff] %v9865_v14  ;;  %v9868_v17 = vpop.f32.mrb[21].mxu1  ;;  %7279 = vmatpush1.bf16.msra.mxu0 %v7278_v45  ;;  %3129 = vmatmul.mubr.f32.gmra.mrb[62].mxu1 %v9148_v15  ;;  %v7412_v10 = vpack.c.bf16 %v1163_v12, %v1147_v11  ;;  %v1178_v11 = vld [vmem:[#allocation5 + $0x1a70] sm:$0xff]  ;;  %v3457_v14 = vld [vmem:[#allocation8 + $0x288] sm:$0xff] }
 0x282   : > { %10576 = vst [vmem:[#allocation24_spill] sm:$0xff] %v9868_v17  ;;  %7407 = vmatpush1.bf16.msra.mxu1 %v7406_v49  ;;  %7281 = vmatprep.subr.bf16.mxu0 %v7280_v54  ;;  %v1179_v49 = vld [vmem:[#allocation5 + $0x1a78] sm:$0xff]  ;;  %v1209_v17 = vld [vmem:[#allocation5 + $0x1b68] sm:$0xff] }
 0x283   : > { %v9870_v40 = vpop.f32.mrb[22].mxu0  ;;  %7409 = vmatprep.subr.bf16.mxu1 %v7408_v2  ;;  %2973 = vmatprep.mubr.f32.mxu0 %v9149_v8  ;;  %v1195_v54 = vld [vmem:[#allocation5 + $0x1af8] sm:$0xff]  ;;  %v7414_v2 = vpack.c.bf16 %v1162_v31, %v1146_v39  ;;  %v1210_v39 = vld [vmem:[#allocation5 + $0x1b70] sm:$0xff] }
 0x284   : > { %10577 = vst [vmem:[#allocation25_spill] sm:$0xff] %v9870_v40  ;;  %v9873_v45 = vpop.f32.mrb[22].mxu1  ;;  %v9875_v56 = vpop.f32.mrb[23].mxu0  ;;  %3199 = vmatprep.mubr.f32.mxu1 %v9149_v8  ;;  %v7416_v15 = vpack.c.bf16 %v1195_v54, %v1179_v49  ;;  %v1225_v40 = vld [vmem:[#allocation5 + $0x1be8] sm:$0xff]  ;;  %v1226_v54 = vld [vmem:[#allocation5 + $0x1bf0] sm:$0xff] }
 0x285   : > { %10578 = vst [vmem:[#allocation26_spill] sm:$0xff] %v9873_v45  ;;  %10579 = vst [vmem:[#allocation27_spill] sm:$0xff] %v9875_v56  ;;  %v9877_v58 = vpop.f32.mrb[23].mxu1  ;;  %7283 = vmatpush1.bf16.msra.mxu0 %v7282_v21  ;;  %v1194_v45 = vld [vmem:[#allocation5 + $0x1af0] sm:$0xff]  ;;  %v1211_v21 = vld [vmem:[#allocation5 + $0x1b78] sm:$0xff] }
 0x286   : > { %10580 = vst [vmem:[#allocation28_spill] sm:$0xff] %v9877_v58  ;;  %7411 = vmatpush1.bf16.msra.mxu1 %v7410_v24  ;;  %7285 = vmatprep.subr.bf16.mxu0 %v7284_v28  ;;  %v7418_v41 = vpack.c.bf16 %v1194_v45, %v1178_v11  ;;  %v7292_v28 = vpack.c.bf16 %v1225_v40, %v1209_v17  ;;  %v1257_v58 = vld [vmem:[#allocation5 + $0x1ce8] sm:$0xff]  ;;  %v1242_v11 = vld [vmem:[#allocation5 + $0x1c70] sm:$0xff] }
 0x287   : > { %v9879_v12 = vpop.f32.mrb[24].mxu0  ;;  %7413 = vmatprep.subr.bf16.mxu1 %v7412_v10  ;;  %v1224_v10 = vld [vmem:[#allocation5 + $0x1be0] sm:$0xff]  ;;  %v7420_v49 = vpack.c.bf16 %v1227_v29, %v1211_v21  ;;  %v7422_v40 = vpack.c.bf16 %v1226_v54, %v1210_v39  ;;  %v1258_v29 = vld [vmem:[#allocation5 + $0x1cf0] sm:$0xff] }
 0x288   : > { %10581 = vst [vmem:[#allocation29_spill] sm:$0xff] %v9879_v12  ;;  %v9881_v56 = vpop.f32.mrb[24].mxu1  ;;  %v9883_v8 = vpop.f32.mrb[25].mxu0  ;;  %v7294_v17 = vpack.c.bf16 %v1224_v10, %v1208_v35  ;;  %v1291_v35 = vld [vmem:[#allocation5 + $0x1df8] sm:$0xff]  ;;  %v1272_v10 = vld [vmem:[#allocation5 + $0x1d60] sm:$0xff] }
 0x289   : > { %10582 = vst [vmem:[#allocation30_spill] sm:$0xff] %v9881_v56  ;;  %10583 = vst [vmem:[#allocation31_spill] sm:$0xff] %v9883_v8  ;;  %v9885_v24 = vpop.f32.mrb[25].mxu1  ;;  %7287 = vmatpush1.bf16.msra.mxu0 %v7286_v59  ;;  %v1241_v56 = vld [vmem:[#allocation5 + $0x1c68] sm:$0xff]  ;;  %v1243_v59 = vld [vmem:[#allocation5 + $0x1c78] sm:$0xff] }
 0x28a   : > { %10584 = vst [vmem:[#allocation32_spill] sm:$0xff] %v9885_v24  ;;  %7415 = vmatpush1.bf16.msra.mxu1 %v7414_v2  ;;  %7289 = vmatprep.subr.bf16.mxu0 %v7288_v6  ;;  %v7296_v45 = vpack.c.bf16 %v1257_v58, %v1241_v56  ;;  %v1240_v6 = vld [vmem:[#allocation5 + $0x1c60] sm:$0xff]  ;;  %v7424_v21 = vpack.c.bf16 %v1259_v7, %v1243_v59  ;;  %v1289_v24 = vld [vmem:[#allocation5 + $0x1de8] sm:$0xff]  ;;  %v1290_v7 = vld [vmem:[#allocation5 + $0x1df0] sm:$0xff] }
 0x28b   : > { %v9887_v31 = vpop.f32.mrb[26].mxu0  ;;  %7417 = vmatprep.subr.bf16.mxu1 %v7416_v15  ;;  %v7298_v56 = vpack.c.bf16 %v1256_v30, %v1240_v6  ;;  %v7426_v58 = vpack.c.bf16 %v1258_v29, %v1242_v11  ;;  %v1288_v39 = vld [vmem:[#allocation5 + $0x1de0] sm:$0xff]  ;;  %v1323_v6 = vld [vmem:[#allocation5 + $0x1ef8] sm:$0xff] }
 0x28c   : > { %10585 = vst [vmem:[#allocation33_spill] sm:$0xff] %v9887_v31  ;;  %v9889_v12 = vpop.f32.mrb[26].mxu1  ;;  %v9891_v8 = vpop.f32.mrb[27].mxu0  ;;  %v1304_v30 = vld [vmem:[#allocation5 + $0x1e60] sm:$0xff] }
 0x28d   : > { %10586 = vst [vmem:[#allocation34_spill] sm:$0xff] %v9889_v12  ;;  %10587 = vst [vmem:[#allocation35_spill] sm:$0xff] %v9891_v8  ;;  %v9893_v2 = vpop.f32.mrb[27].mxu1  ;;  %7291 = vmatpush1.bf16.msra.mxu0 %v7290_v61  ;;  %v1273_v12 = vld [vmem:[#allocation5 + $0x1d68] sm:$0xff]  ;;  %v1275_v61 = vld [vmem:[#allocation5 + $0x1d78] sm:$0xff] }
 0x28e   : > { %10588 = vst [vmem:[#allocation36_spill] sm:$0xff] %v9893_v2  ;;  %7419 = vmatpush1.bf16.msra.mxu1 %v7418_v41  ;;  %7293 = vmatprep.subr.bf16.mxu0 %v7292_v28  ;;  %v7300_v28 = vpack.c.bf16 %v1289_v24, %v1273_v12  ;;  %v7428_v59 = vpack.c.bf16 %v1291_v35, %v1275_v61  ;;  %v1321_v2 = vld [vmem:[#allocation5 + $0x1ee8] sm:$0xff]  ;;  %v1320_v11 = vld [vmem:[#allocation5 + $0x1ee0] sm:$0xff]  ;;  %v1322_v61 = vld [vmem:[#allocation5 + $0x1ef0] sm:$0xff] }
 0x28f   : > { %v9895_v15 = vpop.f32.mrb[28].mxu0  ;;  %7421 = vmatprep.subr.bf16.mxu1 %v7420_v49  ;;  %v1274_v49 = vld [vmem:[#allocation5 + $0x1d70] sm:$0xff]  ;;  %v7302_v12 = vpack.c.bf16 %v1288_v39, %v1272_v10  ;;  %v1337_v35 = vld [vmem:[#allocation5 + $0x1f68] sm:$0xff] }
 0x290   : > { %10589 = vst [vmem:[#allocation37_spill] sm:$0xff] %v9895_v15  ;;  %v9897_v31 = vpop.f32.mrb[28].mxu1  ;;  %v9899_v8 = vpop.f32.mrb[29].mxu0  ;;  %v7430_v24 = vpack.c.bf16 %v1290_v7, %v1274_v49  ;;  %v1338_v39 = vld [vmem:[#allocation5 + $0x1f70] sm:$0xff]  ;;  %v3377_v49 = vld [vmem:[#allocation8 + $0x8] sm:$0xff]  ;;  %v3379_v7 = vld [vmem:[#allocation8 + $0x18] sm:$0xff] }
 0x291   : > { %10590 = vst [vmem:[#allocation38_spill] sm:$0xff] %v9897_v31  ;;  %10591 = vst [vmem:[#allocation39_spill] sm:$0xff] %v9899_v8  ;;  %v9901_v41 = vpop.f32.mrb[29].mxu1  ;;  %7295 = vmatpush1.bf16.msra.mxu0 %v7294_v17  ;;  %v1305_v31 = vld [vmem:[#allocation5 + $0x1e68] sm:$0xff]  ;;  %v1307_v17 = vld [vmem:[#allocation5 + $0x1e78] sm:$0xff] }
 0x292   : > { %10592 = vst [vmem:[#allocation40_spill] sm:$0xff] %v9901_v41  ;;  %7423 = vmatpush1.bf16.msra.mxu1 %v7422_v40  ;;  %7297 = vmatprep.subr.bf16.mxu0 %v7296_v45  ;;  %v7304_v45 = vpack.c.bf16 %v1321_v2, %v1305_v31  ;;  %v7432_v29 = vpack.c.bf16 %v1323_v6, %v1307_v17  ;;  %v1339_v41 = vld [vmem:[#allocation5 + $0x1f78] sm:$0xff]  ;;  %v1354_v2 = vld [vmem:[#allocation5 + $0x1ff0] sm:$0xff]  ;;  %v3383_v17 = vld [vmem:[#allocation8 + $0x38] sm:$0xff] }
 0x293   : > { %v9903_v54 = vpop.f32.mrb[30].mxu0  ;;  %7425 = vmatprep.subr.bf16.mxu1 %v7424_v21  ;;  %v1306_v21 = vld [vmem:[#allocation5 + $0x1e70] sm:$0xff] }
 0x294   : > { %10593 = vst [vmem:[#allocation41_spill] sm:$0xff] %v9903_v54  ;;  %v9905_v15 = vpop.f32.mrb[30].mxu1  ;;  %v9907_v8 = vpop.f32.mrb[31].mxu0  ;;  %v1355_v54 = vld [vmem:[#allocation5 + $0x1ff8] sm:$0xff] }
 0x295   : > { %10594 = vst [vmem:[#allocation42_spill] sm:$0xff] %v9905_v15  ;;  %10595 = vst [vmem:[#allocation43_spill] sm:$0xff] %v9907_v8  ;;  %v9909_v40 = vpop.f32.mrb[31].mxu1  ;;  %7299 = vmatpush1.bf16.msra.mxu0 %v7298_v56  ;;  %v1353_v15 = vld [vmem:[#allocation5 + $0x1fe8] sm:$0xff]  ;;  %v7306_v8 = vpack.c.bf16 %v1320_v11, %v1304_v30  ;;  %v7434_v56 = vpack.c.bf16 %v1322_v61, %v1306_v21  ;;  %v7436_v31 = vpack.c.bf16 %v1355_v54, %v1339_v41  ;;  %v3378_v11 = vld [vmem:[#allocation8 + $0x10] sm:$0xff] }
 0x296   : > { %10596 = vst [vmem:[#allocation44_spill] sm:$0xff] %v9909_v40  ;;  %7427 = vmatpush1.bf16.msra.mxu1 %v7426_v58  ;;  %7301 = vmatprep.subr.bf16.mxu0 %v7300_v28  ;;  %v7308_v10 = vpack.c.bf16 %v1353_v15, %v1337_v35  ;;  %v1336_v58 = vld [vmem:[#allocation5 + $0x1f60] sm:$0xff]  ;;  %v7952_v15 = vpack.c.bf16 %v3383_v17, %v3379_v7  ;;  %v3389_v41 = vld [vmem:[#allocation8 + $0x68] sm:$0xff]  ;;  %v3387_v61 = vld [vmem:[#allocation8 + $0x58] sm:$0xff] }
 0x297   : > { %7429 = vmatprep.subr.bf16.mxu1 %v7428_v59  ;;  %v1352_v28 = vld [vmem:[#allocation5 + $0x1fe0] sm:$0xff]  ;;  %v3381_v59 = vld [vmem:[#allocation8 + $0x28] sm:$0xff]  ;;  %v3391_v35 = vld [vmem:[#allocation8 + $0x78] sm:$0xff] }
 0x298   : > { %v7310_v6 = vpack.c.bf16 %v1352_v28, %v1336_v58  ;;  %v7440_v30 = vpack.c.bf16 %v3381_v59, %v3377_v49  ;;  %v3382_v21 = vld [vmem:[#allocation8 + $0x30] sm:$0xff]  ;;  %v3393_v49 = vld [vmem:[#allocation8 + $0x88] sm:$0xff]  ;;  %v3395_v17 = vld [vmem:[#allocation8 + $0x98] sm:$0xff] }
 0x299   : > { %7303 = vmatpush1.bf16.msra.mxu0 %v7302_v12  ;;  %v7438_v12 = vpack.c.bf16 %v1354_v2, %v1338_v39  ;;  %v3386_v28 = vld [vmem:[#allocation8 + $0x50] sm:$0xff]  ;;  %v7956_v2 = vpack.c.bf16 %v3391_v35, %v3387_v61  ;;  %v3397_v59 = vld [vmem:[#allocation8 + $0xa8] sm:$0xff] }
 0x29a   : > { %7431 = vmatpush1.bf16.msra.mxu1 %v7430_v24  ;;  %7305 = vmatprep.subr.bf16.mxu0 %v7304_v45  ;;  %v3376_v24 = vld [vmem:[#allocation8] sm:$0xff]  ;;  %v3390_v39 = vld [vmem:[#allocation8 + $0x70] sm:$0xff]  ;;  %v3405_v61 = vld [vmem:[#allocation8 + $0xe8] sm:$0xff] }
 0x29b   : > { %7433 = vmatprep.subr.bf16.mxu1 %v7432_v29  ;;  %v3380_v45 = vld [vmem:[#allocation8 + $0x20] sm:$0xff]  ;;  %v3385_v29 = vld [vmem:[#allocation8 + $0x48] sm:$0xff] }
 0x29c   : > { %v7442_v54 = vpack.c.bf16 %v3380_v45, %v3376_v24  ;;  %v7444_v58 = vpack.c.bf16 %v3389_v41, %v3385_v29  ;;  %v3392_v24 = vld [vmem:[#allocation8 + $0x80] sm:$0xff] }
 0x29d   : > { %7307 = vmatpush1.bf16.msra.mxu0 %v7306_v8  ;;  %v7954_v8 = vpack.c.bf16 %v3382_v21, %v3378_v11  ;;  %v3396_v45 = vld [vmem:[#allocation8 + $0xa0] sm:$0xff]  ;;  %v3394_v11 = vld [vmem:[#allocation8 + $0x90] sm:$0xff] }
 0x29e   : > { %7435 = vmatpush1.bf16.msra.mxu1 %v7434_v56  ;;  %7309 = vmatprep.subr.bf16.mxu0 %v7308_v10  ;;  %v3384_v56 = vld [vmem:[#allocation8 + $0x40] sm:$0xff]  ;;  %v3398_v21 = vld [vmem:[#allocation8 + $0xb0] sm:$0xff]  ;;  %v7450_v35 = vpack.c.bf16 %v3396_v45, %v3392_v24  ;;  %v3411_v24 = vld [vmem:[#allocation8 + $0x118] sm:$0xff] }
 0x29f   : > { %7437 = vmatprep.subr.bf16.mxu1 %v7436_v31  ;;  %v3388_v10 = vld [vmem:[#allocation8 + $0x60] sm:$0xff]  ;;  %v3415_v45 = vld [vmem:[#allocation8 + $0x138] sm:$0xff] }
 0x2a0   : > { %v9150_v31 = vld [vmem:[%s9656_s6 + $0x10] sm:$0xff]  ;;  %v7446_v7 = vpack.c.bf16 %v3388_v10, %v3384_v56  ;;  %v3407_v56 = vld [vmem:[#allocation8 + $0xf8] sm:$0xff]  ;;  %v9153_v10 = vld [vmem:[%s9656_s6 + $0x58] sm:$0xff] }
 0x2a1   : > { %7311 = vmatpush1.bf16.msra.mxu0 %v7310_v6  ;;  %v3399_v6 = vld [vmem:[#allocation8 + $0xb8] sm:$0xff]  ;;  %v9152_v29 = vld [vmem:[%s9656_s6 + $0x30] sm:$0xff] }
 0x2a2   : > { %7439 = vmatpush1.bf16.msra.mxu1 %v7438_v12  ;;  %7441 = vmatprep.subr.bf16.mxu0 %v7440_v30  ;;  %v9151_v12 = vld [vmem:[%s9656_s6 + $0x38] sm:$0xff]  ;;  %v7958_v30 = vpack.c.bf16 %v3390_v39, %v3386_v28  ;;  %v7960_v41 = vpack.c.bf16 %v3399_v6, %v3395_v17  ;;  %v3400_v28 = vld [vmem:[#allocation8 + $0xc0] sm:$0xff] }
 0x2a3   : > { %7953 = vmatprep.subr.bf16.mxu1 %v7952_v15  ;;  %v7448_v15 = vpack.c.bf16 %v3397_v59, %v3393_v49  ;;  %v3404_v39 = vld [vmem:[#allocation8 + $0xe0] sm:$0xff]  ;;  %v3406_v49 = vld [vmem:[#allocation8 + $0xf0] sm:$0xff]  ;;  %v1360_v59 = vlaneseq  ;;  %v3409_v6 = vld [vmem:[#allocation8 + $0x108] sm:$0xff] }
 0x2a4   : > { %2974 = vmatmul.mubr.f32.vlgmr.msra.gmra.mrb[48].mxu0 %v9150_v31  ;;  %v9154_v17 = vld [vmem:[%s9656_s6 + $0x50] sm:$0xff] }
 0x2a5   : > { %3200 = vmatmul.mubr.f32.vlgmr.msra.gmra.mrb[48].mxu1 %v9150_v31  ;;  %7443 = vmatpush1.bf16.msra.mxu0 %v7442_v54  ;;  %v3401_v54 = vld [vmem:[#allocation8 + $0xc8] sm:$0xff] }
 0x2a6   : > { %7955 = vmatpush1.bf16.msra.mxu1 %v7954_v8  ;;  %2979 = vmatprep.mubr.f32.mxu0 %v9151_v12  ;;  %v3403_v8 = vld [vmem:[#allocation8 + $0xd8] sm:$0xff]  ;;  %v7452_v31 = vpack.c.bf16 %v3405_v61, %v3401_v54  ;;  %v3414_v61 = vld [vmem:[#allocation8 + $0x130] sm:$0xff] }
 0x2a7   : > { %3205 = vmatprep.mubr.f32.mxu1 %v9151_v12  ;;  %7445 = vmatprep.subr.bf16.mxu0 %v7444_v58  ;;  %v7962_v58 = vpack.c.bf16 %v3398_v21, %v3394_v11  ;;  %v3413_v12 = vld [vmem:[#allocation8 + $0x128] sm:$0xff]  ;;  %v3408_v21 = vld [vmem:[#allocation8 + $0x100] sm:$0xff] }
 0x2a8   : > { %2980 = vmatmul.mubr.f32.gmra.mrb[50].mxu0 %v9152_v29  ;;  %7957 = vmatprep.subr.bf16.mxu1 %v7956_v2  ;;  %v3402_v2 = vld [vmem:[#allocation8 + $0xd0] sm:$0xff]  ;;  %v9155_v11 = vld [vmem:[%s9656_s6 + $0x78] sm:$0xff]  ;;  %v7456_v54 = vpack.c.bf16 %v3413_v12, %v3409_v6  ;;  %v3420_v6 = vld [vmem:[#allocation8 + $0x160] sm:$0xff] }
 0x2a9   : > { %3206 = vmatmul.mubr.f32.gmra.mrb[50].mxu1 %v9152_v29  ;;  %7447 = vmatpush1.bf16.msra.mxu0 %v7446_v7  ;;  %v7964_v7 = vpack.c.bf16 %v3407_v56, %v3403_v8  ;;  %v3412_v29 = vld [vmem:[#allocation8 + $0x120] sm:$0xff]  ;;  %v9917_v8 = vshrl.u32 %v1360_v59, 7  ;;  %v3418_v12 = vld [vmem:[#allocation8 + $0x150] sm:$0xff] }
 0x2aa   : > { %7959 = vmatpush1.bf16.msra.mxu1 %v7958_v30  ;;  %2985 = vmatprep.mubr.f32.mxu0 %v9153_v10  ;;  %v7454_v30 = vpack.c.bf16 %v3404_v39, %v3400_v28  ;;  %v9156_v56 = vld [vmem:[%s9656_s6 + $0x70] sm:$0xff]  ;;  %v3421_v28 = vld [vmem:[#allocation8 + $0x168] sm:$0xff]  ;;  %v3419_v39 = vld [vmem:[#allocation8 + $0x158] sm:$0xff] }
 0x2ab   : > { %3211 = vmatprep.mubr.f32.mxu1 %v9153_v10  ;;  %7449 = vmatprep.subr.bf16.mxu0 %v7448_v15  ;;  %v7966_v15 = vpack.c.bf16 %v3406_v49, %v3402_v2  ;;  %v3417_v10 = vld [vmem:[#allocation8 + $0x148] sm:$0xff]  ;;  %v3423_v2 = vld [vmem:[#allocation8 + $0x178] sm:$0xff] }
 0x2ac   : > { %2986 = vmatmul.mubr.f32.gmra.mrb[52].mxu0 %v9154_v17  ;;  %7961 = vmatprep.subr.bf16.mxu1 %v7960_v41  ;;  %v3410_v41 = vld [vmem:[#allocation8 + $0x110] sm:$0xff]  ;;  %v7460_v59 = vpack.c.bf16 %v3421_v28, %v3417_v10  ;;  %v3424_v10 = vld [vmem:[#allocation8 + $0x180] sm:$0xff] }
 0x2ad   : > { %3212 = vmatmul.mubr.f32.gmra.mrb[52].mxu1 %v9154_v17  ;;  %7451 = vmatpush1.bf16.msra.mxu0 %v7450_v35  ;;  %v7968_v35 = vpack.c.bf16 %v3415_v45, %v3411_v24  ;;  %v7970_v49 = vpack.c.bf16 %v3414_v61, %v3410_v41  ;;  %v3416_v17 = vld [vmem:[#allocation8 + $0x140] sm:$0xff]  ;;  %v9922_v24 = vsub.s32 1, %v9917_v8  ;;  %v7972_v45 = vpack.c.bf16 %v3423_v2, %v3419_v39  ;;  %v3431_v41 = vld [vmem:[#allocation8 + $0x1b8] sm:$0xff]  ;;  %v9159_v61 = vld [vmem:[%s9656_s6 + $0xb8] sm:$0xff] }
 0x2ae   : > { %7963 = vmatpush1.bf16.msra.mxu1 %v7962_v58  ;;  %2991 = vmatprep.mubr.f32.mxu0 %v9155_v11  ;;  %v7458_v58 = vpack.c.bf16 %v3412_v29, %v3408_v21  ;;  %v9925_v21 = vld [vmem:[#allocation7] sm:$0xff]  ;;  %v7462_v29 = vpack.c.bf16 %v3420_v6, %v3416_v17  ;;  %v3428_v28 = vld [vmem:[#allocation8 + $0x1a0] sm:$0xff]  ;;  %v3437_v6 = vld [vmem:[#allocation8 + $0x1e8] sm:$0xff] }
 0x2af   : > { %3217 = vmatprep.mubr.f32.mxu1 %v9155_v11  ;;  %7453 = vmatprep.subr.bf16.mxu0 %v7452_v31  ;;  %v9157_v31 = vld [vmem:[%s9656_s6 + $0x98] sm:$0xff]  ;;  %10597 = vst [vmem:[#allocation45_spill] sm:$0xff] %v9922_v24  ;;  %v3426_v39 = vld [vmem:[#allocation8 + $0x190] sm:$0xff] }
 0x2b0   : > { %2992 = vmatmul.mubr.f32.gmra.mrb[54].mxu0 %v9156_v56  ;;  %7965 = vmatprep.subr.bf16.mxu1 %v7964_v7  ;;  %v3422_v7 = vld [vmem:[#allocation8 + $0x170] sm:$0xff]  ;;  %v3425_v11 = vld [vmem:[#allocation8 + $0x188] sm:$0xff] }
 0x2b1   : > { %3218 = vmatmul.mubr.f32.gmra.mrb[54].mxu1 %v9156_v56  ;;  %7455 = vmatpush1.bf16.msra.mxu0 %v7454_v30  ;;  %v9158_v30 = vld [vmem:[%s9656_s6 + $0x90] sm:$0xff]  ;;  %v7974_v56 = vpack.c.bf16 %v3422_v7, %v3418_v12  ;;  %v3430_v2 = vld [vmem:[#allocation8 + $0x1b0] sm:$0xff]  ;;  %v7466_v12 = vpack.c.bf16 %v3428_v28, %v3424_v10  ;;  %v3435_v7 = vld [vmem:[#allocation8 + $0x1d8] sm:$0xff] }
 0x2b2   : > { %7967 = vmatpush1.bf16.msra.mxu1 %v7966_v15  ;;  %2997 = vmatprep.mubr.f32.mxu0 %v9157_v31  ;;  %v3429_v15 = vld [vmem:[#allocation8 + $0x1a8] sm:$0xff] }
 0x2b3   : > { %3223 = vmatprep.mubr.f32.mxu1 %v9157_v31  ;;  %7457 = vmatprep.subr.bf16.mxu0 %v7456_v54  ;;  %v3427_v54 = vld [vmem:[#allocation8 + $0x198] sm:$0xff]  ;;  %v9930_v31 = vrot.slane %v9925_v21, %v9922_v24  ;;  %v3441_v28 = vld [vmem:[#allocation8 + $0x208] sm:$0xff]  ;;  %v3442_v24 = vld [vmem:[#allocation8 + $0x210] sm:$0xff] }
 0x2b4   : > { %2998 = vmatmul.mubr.f32.gmra.mrb[56].mxu0 %v9158_v30  ;;  %7969 = vmatprep.subr.bf16.mxu1 %v7968_v35  ;;  %v7464_v35 = vpack.c.bf16 %v3429_v15, %v3425_v11  ;;  %v7976_v17 = vpack.c.bf16 %v3431_v41, %v3427_v54  ;;  %v7978_v11 = vpack.c.bf16 %v3430_v2, %v3426_v39  ;;  %v3432_v15 = vld [vmem:[#allocation8 + $0x1c0] sm:$0xff]  ;;  %v3438_v54 = vld [vmem:[#allocation8 + $0x1f0] sm:$0xff]  ;;  %v3443_v2 = vld [vmem:[#allocation8 + $0x218] sm:$0xff] }
 0x2b5   : > { %3224 = vmatmul.mubr.f32.gmra.mrb[56].mxu1 %v9158_v30  ;;  %7459 = vmatpush1.bf16.msra.mxu0 %v7458_v58  ;;  %v9160_v58 = vld [vmem:[%s9656_s6 + $0xb0] sm:$0xff]  ;;  %v9161_v30 = vld [vmem:[%s9656_s6 + $0xd8] sm:$0xff]  ;;  %v8465_v41 = vadd.f32 %v9749_v33, %v9930_v31 }
 0x2b6   : > { %7971 = vmatpush1.bf16.msra.mxu1 %v7970_v49  ;;  %3003 = vmatprep.mubr.f32.mxu0 %v9159_v61  ;;  %v3433_v49 = vld [vmem:[#allocation8 + $0x1c8] sm:$0xff] }
 0x2b7   : > { %3229 = vmatprep.mubr.f32.mxu1 %v9159_v61  ;;  %7461 = vmatprep.subr.bf16.mxu0 %v7460_v59  ;;  %v3439_v59 = vld [vmem:[#allocation8 + $0x1f8] sm:$0xff]  ;;  %v3436_v61 = vld [vmem:[#allocation8 + $0x1e0] sm:$0xff]  ;;  %v7468_v40 = vpack.c.bf16 %v3437_v6, %v3433_v49  ;;  %v3249_v60 = vmax.f32 %v8465_v41, 0.0  ;;  %v3454_v41 = vld [vmem:[#allocation8 + $0x270] sm:$0xff] }
 0x2b8   : > { %3004 = vmatmul.mubr.f32.gmra.mrb[58].mxu0 %v9160_v58  ;;  %7973 = vmatprep.subr.bf16.mxu1 %v7972_v45  ;;  %v3434_v45 = vld [vmem:[#allocation8 + $0x1d0] sm:$0xff]  ;;  %v7980_v10 = vpack.c.bf16 %v3439_v59, %v3435_v7  ;;  %v7470_v39 = vpack.c.bf16 %v3436_v61, %v3432_v15  ;;  %v3440_v6 = vld [vmem:[#allocation8 + $0x200] sm:$0xff]  ;;  %v3449_v7 = vld [vmem:[#allocation8 + $0x248] sm:$0xff] }
 0x2b9   : > { %3230 = vmatmul.mubr.f32.gmra.mrb[58].mxu1 %v9160_v58  ;;  %7463 = vmatpush1.bf16.msra.mxu0 %v7462_v29  ;;  %v9162_v29 = vld [vmem:[%s9656_s6 + $0xd0] sm:$0xff]  ;;  %v3447_v58 = vld [vmem:[#allocation8 + $0x238] sm:$0xff]  ;;  %v7982_v49 = vpack.c.bf16 %v3438_v54, %v3434_v45  ;;  %v3453_v59 = vld [vmem:[#allocation8 + $0x268] sm:$0xff] }
 0x2ba   : > { %7975 = vmatpush1.bf16.msra.mxu1 %v7974_v56  ;;  %3009 = vmatprep.mubr.f32.mxu0 %v9161_v30  ;;  %v3445_v56 = vld [vmem:[#allocation8 + $0x228] sm:$0xff]  ;;  %v3451_v15 = vld [vmem:[#allocation8 + $0x258] sm:$0xff]  ;;  %v7476_v54 = vpack.c.bf16 %v3453_v59, %v3449_v7 }
 0x2bb   : > { %3235 = vmatprep.mubr.f32.mxu1 %v9161_v30  ;;  %7465 = vmatprep.subr.bf16.mxu0 %v7464_v35  ;;  %v9163_v35 = vld [vmem:[%s9656_s6 + $0xf8] sm:$0xff]  ;;  %v3444_v30 = vld [vmem:[#allocation8 + $0x220] sm:$0xff]  ;;  %v7472_v33 = vpack.c.bf16 %v3445_v56, %v3441_v28  ;;  %v3455_v61 = vld [vmem:[#allocation8 + $0x278] sm:$0xff] }
 0x2bc   : > { %3010 = vmatmul.mubr.f32.gmra.mrb[60].mxu0 %v9162_v29  ;;  %7977 = vmatprep.subr.bf16.mxu1 %v7976_v17  ;;  %v3446_v17 = vld [vmem:[#allocation8 + $0x230] sm:$0xff]  ;;  %v7988_v56 = vpack.c.bf16 %v3455_v61, %v3451_v15  ;;  %v3469_v7 = vld [vmem:[#allocation8 + $0x2e8] sm:$0xff]  ;;  %v3467_v59 = vld [vmem:[#allocation8 + $0x2d8] sm:$0xff] }
 0x2bd   : > { %3236 = vmatmul.mubr.f32.gmra.mrb[60].mxu1 %v9162_v29  ;;  %7467 = vmatpush1.bf16.msra.mxu0 %v7466_v12  ;;  %v9164_v29 = vld [vmem:[%s9656_s6 + $0xf0] sm:$0xff]  ;;  %v7984_v12 = vpack.c.bf16 %v3447_v58, %v3443_v2  ;;  %v7986_v45 = vpack.c.bf16 %v3446_v17, %v3442_v24  ;;  %v3450_v28 = vld [vmem:[#allocation8 + $0x250] sm:$0xff]  ;;  %v3463_v2 = vld [vmem:[#allocation8 + $0x2b8] sm:$0xff] }
 0x2be   : > { %7979 = vmatpush1.bf16.msra.mxu1 %v7978_v11  ;;  %3015 = vmatprep.mubr.f32.mxu0 %v9163_v35  ;;  %v7474_v11 = vpack.c.bf16 %v3444_v30, %v3440_v6  ;;  %v3456_v24 = vld [vmem:[#allocation8 + $0x280] sm:$0xff]  ;;  %v3458_v30 = vld [vmem:[#allocation8 + $0x290] sm:$0xff] }
 0x2bf   : > { %3241 = vmatprep.mubr.f32.mxu1 %v9163_v35  ;;  %7469 = vmatprep.subr.bf16.mxu0 %v7468_v40  ;;  %v3448_v35 = vld [vmem:[#allocation8 + $0x240] sm:$0xff] }
 0x2c0   : > { %3016 = vmatmul.mubr.f32.gmra.mrb[62].mxu0 %v9164_v29  ;;  %7981 = vmatprep.subr.bf16.mxu1 %v7980_v10  ;;  %v3452_v40 = vld [vmem:[#allocation8 + $0x260] sm:$0xff]  ;;  %v3459_v10 = vld [vmem:[#allocation8 + $0x298] sm:$0xff] }
 0x2c1   : > { %3242 = vmatmul.mubr.f32.gmra.mrb[62].mxu1 %v9164_v29  ;;  %7471 = vmatpush1.bf16.msra.mxu0 %v7470_v39  ;;  %v7478_v58 = vpack.c.bf16 %v3452_v40, %v3448_v35  ;;  %v7990_v39 = vpack.c.bf16 %v3454_v41, %v3450_v28  ;;  %v3460_v6 = vld [vmem:[#allocation8 + $0x2a0] sm:$0xff]  ;;  %v7992_v17 = vpack.c.bf16 %v3463_v2, %v3459_v10  ;;  %v3471_v29 = vld [vmem:[#allocation8 + $0x2f8] sm:$0xff]  ;;  %v3473_v35 = vld [vmem:[#allocation8 + $0x308] sm:$0xff] }
 0x2c2   : > { %4486 = vmatprep.mubr.f32.mxu0 %v3249_v60  ;;  %7983 = vmatpush1.bf16.msra.mxu1 %v7982_v49  ;;  %v7480_v49 = vpack.c.bf16 %v3461_v18, %v3457_v14  ;;  %v7996_v18 = vpack.c.bf16 %v3471_v29, %v3467_v59  ;;  %v3470_v14 = vld [vmem:[#allocation8 + $0x2f0] sm:$0xff]  ;;  %v3477_v40 = vld [vmem:[#allocation8 + $0x328] sm:$0xff]  ;;  %v3475_v28 = vld [vmem:[#allocation8 + $0x318] sm:$0xff] }
 0x2c3   : > { %5390 = vmatprep.mubr.f32.mxu1 %v3249_v60  ;;  %7473 = vmatprep.subr.bf16.mxu0 %v7472_v33  ;;  %v3462_v60 = vld [vmem:[#allocation8 + $0x2b0] sm:$0xff]  ;;  %v3465_v33 = vld [vmem:[#allocation8 + $0x2c8] sm:$0xff]  ;;  %v7488_v2 = vpack.c.bf16 %v3477_v40, %v3473_v35  ;;  %v3495_v35 = vld [vmem:[#allocation8 + $0x3b8] sm:$0xff] }
 0x2c4   : > { %7985 = vmatprep.subr.bf16.mxu1 %v7984_v12  ;;  %v7482_v12 = vpack.c.bf16 %v3460_v6, %v3456_v24  ;;  %v7994_v15 = vpack.c.bf16 %v3462_v60, %v3458_v30  ;;  %v7484_v61 = vpack.c.bf16 %v3469_v7, %v3465_v33  ;;  %v3478_v6 = vld [vmem:[#allocation8 + $0x330] sm:$0xff]  ;;  %v3481_v30 = vld [vmem:[#allocation8 + $0x348] sm:$0xff]  ;;  %v3483_v60 = vld [vmem:[#allocation8 + $0x358] sm:$0xff] }
 0x2c5   : > { %7475 = vmatpush1.bf16.msra.mxu0 %v7474_v11  ;;  %v3464_v11 = vld [vmem:[#allocation8 + $0x2c0] sm:$0xff]  ;;  %v3487_v33 = vld [vmem:[#allocation8 + $0x378] sm:$0xff] }
 0x2c6   : > { %7987 = vmatpush1.bf16.msra.mxu1 %v7986_v45  ;;  %7477 = vmatprep.subr.bf16.mxu0 %v7476_v54  ;;  %v3468_v45 = vld [vmem:[#allocation8 + $0x2e0] sm:$0xff]  ;;  %v3466_v54 = vld [vmem:[#allocation8 + $0x2d0] sm:$0xff] }
 0x2c7   : > { %7989 = vmatprep.subr.bf16.mxu1 %v7988_v56  ;;  %v3479_v56 = vld [vmem:[#allocation8 + $0x338] sm:$0xff]  ;;  %v7486_v41 = vpack.c.bf16 %v3468_v45, %v3464_v11  ;;  %v7998_v10 = vpack.c.bf16 %v3470_v14, %v3466_v54  ;;  %v8004_v11 = vpack.c.bf16 %v3487_v33, %v3483_v60  ;;  %v3486_v45 = vld [vmem:[#allocation8 + $0x370] sm:$0xff]  ;;  %v3489_v54 = vld [vmem:[#allocation8 + $0x388] sm:$0xff] }
 0x2c8   : > { %v8000_v24 = vpack.c.bf16 %v3479_v56, %v3475_v28  ;;  %v3491_v14 = vld [vmem:[#allocation8 + $0x398] sm:$0xff]  ;;  %v9940_v28 = vsub.s32 0, %v9917_v8 }
 0x2c9   : > { %7479 = vmatpush1.bf16.msra.mxu0 %v7478_v58  ;;  %v3472_v58 = vld [vmem:[#allocation8 + $0x300] sm:$0xff] }
 0x2ca   : > { %7991 = vmatpush1.bf16.msra.mxu1 %v7990_v39  ;;  %7481 = vmatprep.subr.bf16.mxu0 %v7480_v49  ;;  %v3476_v39 = vld [vmem:[#allocation8 + $0x320] sm:$0xff]  ;;  %v3474_v49 = vld [vmem:[#allocation8 + $0x310] sm:$0xff]  ;;  %v9944_v33 = vrot.slane %v9925_v21, %v9940_v28 }
 0x2cb   : > { %7993 = vmatprep.subr.bf16.mxu1 %v7992_v17  ;;  %v3485_v17 = vld [vmem:[#allocation8 + $0x368] sm:$0xff]  ;;  %v7490_v7 = vpack.c.bf16 %v3476_v39, %v3472_v58  ;;  %v8002_v59 = vpack.c.bf16 %v3478_v6, %v3474_v49  ;;  %v3490_v58 = vld [vmem:[#allocation8 + $0x390] sm:$0xff]  ;;  %v8008_v39 = vpack.c.bf16 %v3495_v35, %v3491_v14  ;;  %v3511_v14 = vld [vmem:[#allocation8 + $0x438] sm:$0xff] }
 0x2cc   : > { %v7492_v29 = vpack.c.bf16 %v3485_v17, %v3481_v30  ;;  %v3494_v49 = vld [vmem:[#allocation8 + $0x3b0] sm:$0xff]  ;;  %v3501_v6 = vld [vmem:[#allocation8 + $0x3e8] sm:$0xff]  ;;  %v3499_v30 = vld [vmem:[#allocation8 + $0x3d8] sm:$0xff] }
 0x2cd   : > { %7483 = vmatpush1.bf16.msra.mxu0 %v7482_v12  ;;  %v3480_v12 = vld [vmem:[#allocation8 + $0x340] sm:$0xff]  ;;  %v3503_v17 = vld [vmem:[#allocation8 + $0x3f8] sm:$0xff] }
 0x2ce   : > { %7995 = vmatpush1.bf16.msra.mxu1 %v7994_v15  ;;  %7485 = vmatprep.subr.bf16.mxu0 %v7484_v61  ;;  %v3484_v15 = vld [vmem:[#allocation8 + $0x360] sm:$0xff]  ;;  %v3482_v61 = vld [vmem:[#allocation8 + $0x350] sm:$0xff] }
 0x2cf   : > { %7997 = vmatprep.subr.bf16.mxu1 %v7996_v18  ;;  %v3493_v18 = vld [vmem:[#allocation8 + $0x3a8] sm:$0xff]  ;;  %v7494_v40 = vpack.c.bf16 %v3484_v15, %v3480_v12  ;;  %v8006_v56 = vpack.c.bf16 %v3486_v45, %v3482_v61  ;;  %v3500_v12 = vld [vmem:[#allocation8 + $0x3e0] sm:$0xff]  ;;  %v3498_v15 = vld [vmem:[#allocation8 + $0x3d0] sm:$0xff]  ;;  %v8012_v61 = vpack.c.bf16 %v3503_v17, %v3499_v30 }
 0x2d0   : > { %v3505_v45 = vld [vmem:[#allocation8 + $0x408] sm:$0xff]  ;;  %v3515_v17 = vld [vmem:[#allocation8 + $0x458] sm:$0xff] }
 0x2d1   : > { %7487 = vmatpush1.bf16.msra.mxu0 %v7486_v41  ;;  %v7496_v41 = vpack.c.bf16 %v3493_v18, %v3489_v54  ;;  %v3509_v54 = vld [vmem:[#allocation8 + $0x428] sm:$0xff]  ;;  %v3507_v18 = vld [vmem:[#allocation8 + $0x418] sm:$0xff] }
 0x2d2   : > { %7999 = vmatpush1.bf16.msra.mxu1 %v7998_v10  ;;  %7489 = vmatprep.subr.bf16.mxu0 %v7488_v2  ;;  %v3488_v10 = vld [vmem:[#allocation8 + $0x380] sm:$0xff]  ;;  %v3517_v30 = vld [vmem:[#allocation8 + $0x468] sm:$0xff] }
 0x2d3   : > { %8001 = vmatprep.subr.bf16.mxu1 %v8000_v24  ;;  %v3492_v2 = vld [vmem:[#allocation8 + $0x3a0] sm:$0xff]  ;;  %v3497_v24 = vld [vmem:[#allocation8 + $0x3c8] sm:$0xff] }
 0x2d4   : > { %v7498_v60 = vpack.c.bf16 %v3492_v2, %v3488_v10  ;;  %v8467_v10 = vadd.f32 %v9759_v51, %v9930_v31  ;;  %v8016_v2 = vpack.c.bf16 %v3511_v14, %v3507_v18  ;;  %v8469_v51 = vadd.f32 %v9769_v5, %v9930_v31  ;;  %v3518_v18 = vld [vmem:[#allocation8 + $0x470] sm:$0xff]  ;;  %v3521_v14 = vld [vmem:[#allocation8 + $0x488] sm:$0xff] }
 0x2d5   : > { %7491 = vmatpush1.bf16.msra.mxu0 %v7490_v7  ;;  %v8010_v7 = vpack.c.bf16 %v3494_v49, %v3490_v58  ;;  %v3504_v58 = vld [vmem:[#allocation8 + $0x400] sm:$0xff]  ;;  %v3506_v49 = vld [vmem:[#allocation8 + $0x410] sm:$0xff] }
 0x2d6   : > { %8003 = vmatpush1.bf16.msra.mxu1 %v8002_v59  ;;  %7493 = vmatprep.subr.bf16.mxu0 %v7492_v29  ;;  %v7500_v59 = vpack.c.bf16 %v3501_v6, %v3497_v24  ;;  %v3496_v29 = vld [vmem:[#allocation8 + $0x3c0] sm:$0xff]  ;;  %v3510_v24 = vld [vmem:[#allocation8 + $0x430] sm:$0xff]  ;;  %v3513_v6 = vld [vmem:[#allocation8 + $0x448] sm:$0xff] }
 0x2d7   : > { %8005 = vmatprep.subr.bf16.mxu1 %v8004_v11  ;;  %v3502_v11 = vld [vmem:[#allocation8 + $0x3f0] sm:$0xff]  ;;  %v7502_v35 = vpack.c.bf16 %v3500_v12, %v3496_v29  ;;  %v8018_v12 = vpack.c.bf16 %v3510_v24, %v3506_v49  ;;  %v3520_v49 = vld [vmem:[#allocation8 + $0x480] sm:$0xff] }
 0x2d8   : > { %v3524_v24 = vld [vmem:[#allocation8 + $0x4a0] sm:$0xff] }
 0x2d9   : > { %7495 = vmatpush1.bf16.msra.mxu0 %v7494_v40  ;;  %v8464_v40 = vadd.f32 %v9744_v26, %v9944_v33  ;;  %v8466_v26 = vadd.f32 %v9754_v44, %v9944_v33  ;;  %v3523_v44 = vld [vmem:[#allocation8 + $0x498] sm:$0xff] }
 0x2da   : > { %8007 = vmatpush1.bf16.msra.mxu1 %v8006_v56  ;;  %7497 = vmatprep.subr.bf16.mxu0 %v7496_v41  ;;  %v8014_v56 = vpack.c.bf16 %v3502_v11, %v3498_v15  ;;  %v7504_v41 = vpack.c.bf16 %v3509_v54, %v3505_v45  ;;  %v7508_v15 = vpack.c.bf16 %v3517_v30, %v3513_v6  ;;  %v3516_v11 = vld [vmem:[#allocation8 + $0x460] sm:$0xff]  ;;  %v3514_v45 = vld [vmem:[#allocation8 + $0x450] sm:$0xff] }
 0x2db   : > { %8009 = vmatprep.subr.bf16.mxu1 %v8008_v39  ;;  %v3508_v39 = vld [vmem:[#allocation8 + $0x420] sm:$0xff]  ;;  %v3248_v29 = vmax.f32 %v8464_v40, 0.0  ;;  %v3527_v40 = vld [vmem:[#allocation8 + $0x4b8] sm:$0xff]  ;;  %v3522_v6 = vld [vmem:[#allocation8 + $0x490] sm:$0xff] }
 0x2dc   : > { %v8024_v30 = vpack.c.bf16 %v3527_v40, %v3523_v44  ;;  %v3539_v44 = vld [vmem:[#allocation8 + $0x518] sm:$0xff] }
 0x2dd   : > { %7499 = vmatpush1.bf16.msra.mxu0 %v7498_v60  ;;  %v3519_v60 = vld [vmem:[#allocation8 + $0x478] sm:$0xff] }
 0x2de   : > { %8011 = vmatpush1.bf16.msra.mxu1 %v8010_v7  ;;  %7501 = vmatprep.subr.bf16.mxu0 %v7500_v59  ;;  %v7506_v7 = vpack.c.bf16 %v3508_v39, %v3504_v58  ;;  %v3265_v59 = vmax.f32 %v8467_v10, 0.0  ;;  %v8020_v54 = vpack.c.bf16 %v3519_v60, %v3515_v17  ;;  %v3281_v10 = vmax.f32 %v8469_v51, 0.0  ;;  %v3526_v17 = vld [vmem:[#allocation8 + $0x4b0] sm:$0xff]  ;;  %v3529_v60 = vld [vmem:[#allocation8 + $0x4c8] sm:$0xff]  ;;  %v3543_v40 = vld [vmem:[#allocation8 + $0x538] sm:$0xff] }
 0x2df   : > { %8013 = vmatprep.subr.bf16.mxu1 %v8012_v61  ;;  %v3512_v61 = vld [vmem:[#allocation8 + $0x440] sm:$0xff]  ;;  %v8022_v58 = vpack.c.bf16 %v3518_v18, %v3514_v45 }
 0x2e0   : > { %v7510_v5 = vpack.c.bf16 %v3516_v11, %v3512_v61  ;;  %v3528_v11 = vld [vmem:[#allocation8 + $0x4c0] sm:$0xff] }
 0x2e1   : > { %7503 = vmatpush1.bf16.msra.mxu0 %v7502_v35  ;;  %v3525_v35 = vld [vmem:[#allocation8 + $0x4a8] sm:$0xff]  ;;  %v3532_v45 = vld [vmem:[#allocation8 + $0x4e0] sm:$0xff] }
 0x2e2   : > { %8015 = vmatpush1.bf16.msra.mxu1 %v8014_v56  ;;  %7505 = vmatprep.subr.bf16.mxu0 %v7504_v41  ;;  %v3264_v56 = vmax.f32 %v8466_v26, 0.0  ;;  %v8468_v41 = vadd.f32 %v9764_v62, %v9944_v33  ;;  %v7512_v39 = vpack.c.bf16 %v3525_v35, %v3521_v14  ;;  %v3533_v62 = vld [vmem:[#allocation8 + $0x4e8] sm:$0xff]  ;;  %v3535_v26 = vld [vmem:[#allocation8 + $0x4f8] sm:$0xff]  ;;  %v3534_v14 = vld [vmem:[#allocation8 + $0x4f0] sm:$0xff] }
 0x2e3   : > { %8017 = vmatprep.subr.bf16.mxu1 %v8016_v2  ;;  %v8471_v2 = vadd.f32 %v9779_v23, %v9930_v31  ;;  %v8470_v23 = vadd.f32 %v9774_v16, %v9944_v33  ;;  %v7516_v61 = vpack.c.bf16 %v3533_v62, %v3529_v60  ;;  %v3537_v35 = vld [vmem:[#allocation8 + $0x508] sm:$0xff]  ;;  %v3547_v60 = vld [vmem:[#allocation8 + $0x558] sm:$0xff] }
 0x2e4   : > { %4487 = vmatmul.mubr.f32.vlgmr.msra.gmra.mrb[64].mxu0 %v3248_v29  ;;  %v3541_v16 = vld [vmem:[#allocation8 + $0x528] sm:$0xff]  ;;  %v3551_v62 = vld [vmem:[#allocation8 + $0x578] sm:$0xff] }
 0x2e5   : > { %5391 = vmatmul.mubr.f32.vlgmr.msra.gmra.mrb[64].mxu1 %v3248_v29  ;;  %4492 = vmatprep.mubr.f32.mxu0 %v3265_v59  ;;  %v3531_v29 = vld [vmem:[#allocation8 + $0x4d8] sm:$0xff]  ;;  %v3297_v51 = vmax.f32 %v8471_v2, 0.0 }
 0x2e6   : > { %7507 = vmatpush1.bf16.msra.mxu0 %v7506_v7  ;;  %5396 = vmatprep.mubr.f32.mxu1 %v3265_v59  ;;  %v3280_v7 = vmax.f32 %v8468_v41, 0.0  ;;  %v7514_v59 = vpack.c.bf16 %v3524_v24, %v3520_v49  ;;  %v8028_v18 = vpack.c.bf16 %v3535_v26, %v3531_v29  ;;  %v7518_v41 = vpack.c.bf16 %v3532_v45, %v3528_v11  ;;  %v3540_v49 = vld [vmem:[#allocation8 + $0x520] sm:$0xff]  ;;  %v3538_v24 = vld [vmem:[#allocation8 + $0x510] sm:$0xff] }
 0x2e7   : > { %8019 = vmatpush1.bf16.msra.mxu1 %v8018_v12  ;;  %7509 = vmatprep.subr.bf16.mxu0 %v7508_v15  ;;  %v8473_v12 = vadd.f32 %v9787_v43, %v9930_v31  ;;  %v8026_v15 = vpack.c.bf16 %v3526_v17, %v3522_v6  ;;  %v8472_v43 = vadd.f32 %v9783_v36, %v9944_v33  ;;  %v3545_v17 = vld [vmem:[#allocation8 + $0x548] sm:$0xff]  ;;  %v9967_v29 = vsub.s32 3, %v9917_v8  ;;  %v3546_v11 = vld [vmem:[#allocation8 + $0x550] sm:$0xff] }
 0x2e8   : > { %4493 = vmatmul.mubr.f32.gmra.mrb[66].mxu0 %v3264_v56  ;;  %8021 = vmatprep.subr.bf16.mxu1 %v8020_v54  ;;  %v3530_v54 = vld [vmem:[#allocation8 + $0x4d0] sm:$0xff]  ;;  %v8032_v6 = vpack.c.bf16 %v3543_v40, %v3539_v44  ;;  %v3549_v36 = vld [vmem:[#allocation8 + $0x568] sm:$0xff]  ;;  %v8474_v26 = vadd.f32 %v9791_v57, %v9944_v33  ;;  %v8036_v45 = vpack.c.bf16 %v3551_v62, %v3547_v60 }
 0x2e9   : > { %5397 = vmatmul.mubr.f32.gmra.mrb[66].mxu1 %v3264_v56  ;;  %4498 = vmatprep.mubr.f32.mxu0 %v3281_v10  ;;  %v3296_v56 = vmax.f32 %v8470_v23, 0.0  ;;  %v8030_v2 = vpack.c.bf16 %v3534_v14, %v3530_v54  ;;  %v3550_v54 = vld [vmem:[#allocation8 + $0x570] sm:$0xff]  ;;  %v3557_v57 = vld [vmem:[#allocation8 + $0x5a8] sm:$0xff]  ;;  %v3555_v14 = vld [vmem:[#allocation8 + $0x598] sm:$0xff]  ;;  %v8476_v44 = vadd.f32 %v9799_v13, %v9944_v33  ;;  %v8478_v60 = vadd.f32 %v9807_v38, %v9944_v33 }
 0x2ea   : > { %7511 = vmatpush1.bf16.msra.mxu0 %v7510_v5  ;;  %5402 = vmatprep.mubr.f32.mxu1 %v3281_v10  ;;  %v3313_v5 = vmax.f32 %v8473_v12, 0.0  ;;  %v8475_v10 = vadd.f32 %v9795_v0, %v9930_v31  ;;  %v3312_v0 = vmax.f32 %v8472_v43, 0.0  ;;  %v7524_v12 = vpack.c.bf16 %v3549_v36, %v3545_v17  ;;  %v3567_v17 = vld [vmem:[#allocation8 + $0x5f8] sm:$0xff]  ;;  %v3566_v33 = vld [vmem:[#allocation8 + $0x5f0] sm:$0xff] }
 0x2eb   : > { %8023 = vmatpush1.bf16.msra.mxu1 %v8022_v58  ;;  %7513 = vmatprep.subr.bf16.mxu0 %v7512_v39  ;;  %v7520_v58 = vpack.c.bf16 %v3541_v16, %v3537_v35  ;;  %v3536_v39 = vld [vmem:[#allocation8 + $0x500] sm:$0xff]  ;;  %v3559_v35 = vld [vmem:[#allocation8 + $0x5b8] sm:$0xff]  ;;  %v3328_v16 = vmax.f32 %v8474_v26, 0.0  ;;  %v8479_v43 = vadd.f32 %v9811_v48, %v9930_v31  ;;  %v3344_v36 = vmax.f32 %v8476_v44, 0.0 }
 0x2ec   : > { %4499 = vmatmul.mubr.f32.gmra.mrb[68].mxu0 %v3280_v7  ;;  %8025 = vmatprep.subr.bf16.mxu1 %v8024_v30  ;;  %v3542_v30 = vld [vmem:[#allocation8 + $0x530] sm:$0xff]  ;;  %v3329_v23 = vmax.f32 %v8475_v10, 0.0  ;;  %v8040_v13 = vpack.c.bf16 %v3559_v35, %v3555_v14  ;;  %v3360_v14 = vmax.f32 %v8478_v60, 0.0 }
 0x2ed   : > { %5403 = vmatmul.mubr.f32.gmra.mrb[68].mxu1 %v3280_v7  ;;  %4504 = vmatprep.mubr.f32.mxu0 %v3297_v51  ;;  %v7522_v7 = vpack.c.bf16 %v3540_v49, %v3536_v39  ;;  %v3361_v26 = vmax.f32 %v8479_v43, 0.0  ;;  %v3568_v43 = vld [vmem:[#allocation8 + $0x600] sm:$0xff] }
 0x2ee   : > { %7515 = vmatpush1.bf16.msra.mxu0 %v7514_v59  ;;  %5408 = vmatprep.mubr.f32.mxu1 %v3297_v51  ;;  %v8477_v59 = vadd.f32 %v9803_v20, %v9930_v31  ;;  %v8034_v51 = vpack.c.bf16 %v3542_v30, %v3538_v24  ;;  %v9975_v20 = vrot.slane %v9925_v21, %v9967_v29  ;;  %v3556_v21 = vld [vmem:[#allocation8 + $0x5a0] sm:$0xff]  ;;  %v3558_v24 = vld [vmem:[#allocation8 + $0x5b0] sm:$0xff]  ;;  %v3565_v30 = vld [vmem:[#allocation8 + $0x5e8] sm:$0xff] }
 0x2ef   : > { %8027 = vmatpush1.bf16.msra.mxu1 %v8026_v15  ;;  %7517 = vmatprep.subr.bf16.mxu0 %v7516_v61  ;;  %v3544_v15 = vld [vmem:[#allocation8 + $0x540] sm:$0xff]  ;;  %v3563_v31 = vld [vmem:[#allocation8 + $0x5d8] sm:$0xff] }
 0x2f0   : > { %4505 = vmatmul.mubr.f32.gmra.mrb[70].mxu0 %v3296_v56  ;;  %8029 = vmatprep.subr.bf16.mxu1 %v8028_v18  ;;  %v3548_v61 = vld [vmem:[#allocation8 + $0x560] sm:$0xff]  ;;  %v3553_v18 = vld [vmem:[#allocation8 + $0x588] sm:$0xff]  ;;  %v8044_v38 = vpack.c.bf16 %v3567_v17, %v3563_v31  ;;  %v3579_v31 = vld [vmem:[#allocation8 + $0x658] sm:$0xff] }
 0x2f1   : > { %5409 = vmatmul.mubr.f32.gmra.mrb[70].mxu1 %v3296_v56  ;;  %4510 = vmatprep.mubr.f32.mxu0 %v3313_v5  ;;  %v7526_v40 = vpack.c.bf16 %v3548_v61, %v3544_v15  ;;  %v3345_v56 = vmax.f32 %v8477_v59, 0.0  ;;  %v7528_v10 = vpack.c.bf16 %v3557_v57, %v3553_v18  ;;  %v3562_v15 = vld [vmem:[#allocation8 + $0x5d0] sm:$0xff]  ;;  %v3571_v18 = vld [vmem:[#allocation8 + $0x618] sm:$0xff] }
 0x2f2   : > { %7519 = vmatpush1.bf16.msra.mxu0 %v7518_v41  ;;  %5414 = vmatprep.mubr.f32.mxu1 %v3313_v5  ;;  %v8038_v5 = vpack.c.bf16 %v3550_v54, %v3546_v11  ;;  %v3575_v57 = vld [vmem:[#allocation8 + $0x638] sm:$0xff] }
 0x2f3   : > { %8031 = vmatpush1.bf16.msra.mxu1 %v8030_v2  ;;  %7521 = vmatprep.subr.bf16.mxu0 %v7520_v58  ;;  %v3552_v2 = vld [vmem:[#allocation8 + $0x580] sm:$0xff]  ;;  %v3554_v58 = vld [vmem:[#allocation8 + $0x590] sm:$0xff]  ;;  %v3583_v17 = vld [vmem:[#allocation8 + $0x678] sm:$0xff] }
 0x2f4   : > { %4511 = vmatmul.mubr.f32.gmra.mrb[72].mxu0 %v3312_v0  ;;  %8033 = vmatprep.subr.bf16.mxu1 %v8032_v6  ;;  %v3561_v6 = vld [vmem:[#allocation8 + $0x5c8] sm:$0xff]  ;;  %v7530_v62 = vpack.c.bf16 %v3556_v21, %v3552_v2 }
 0x2f5   : > { %5415 = vmatmul.mubr.f32.gmra.mrb[72].mxu1 %v3312_v0  ;;  %4516 = vmatprep.mubr.f32.mxu0 %v3329_v23  ;;  %v8481_v0 = vadd.f32 %v9752_v37, %v9975_v20  ;;  %v7532_v59 = vpack.c.bf16 %v3565_v30, %v3561_v6  ;;  %v3573_v37 = vld [vmem:[#allocation8 + $0x628] sm:$0xff] }
 0x2f6   : > { %7523 = vmatpush1.bf16.msra.mxu0 %v7522_v7  ;;  %5420 = vmatprep.mubr.f32.mxu1 %v3329_v23  ;;  %v8042_v23 = vpack.c.bf16 %v3558_v24, %v3554_v58  ;;  %v8048_v58 = vpack.c.bf16 %v3575_v57, %v3571_v18  ;;  %v3577_v24 = vld [vmem:[#allocation8 + $0x648] sm:$0xff]  ;;  %v3587_v18 = vld [vmem:[#allocation8 + $0x698] sm:$0xff] }
 0x2f7   : > { %8035 = vmatpush1.bf16.msra.mxu1 %v8034_v51  ;;  %v9981_v41 = vpop.f32.mrb[32].mxu0  ;;  %7525 = vmatprep.subr.bf16.mxu0 %v7524_v12  ;;  %v3560_v51 = vld [vmem:[#allocation8 + $0x5c0] sm:$0xff]  ;;  %v3581_v6 = vld [vmem:[#allocation8 + $0x668] sm:$0xff]  ;;  %v3591_v57 = vld [vmem:[#allocation8 + $0x6b8] sm:$0xff] }
 0x2f8   : > { %v9983_v39 = vpop.f32.mrb[32].mxu1  ;;  %v9985_v49 = vpop.f32.mrb[33].mxu0  ;;  %4517 = vmatmul.mubr.f32.gmra.mrb[74].mxu0 %v3328_v16  ;;  %8037 = vmatprep.subr.bf16.mxu1 %v8036_v45  ;;  %v3564_v12 = vld [vmem:[#allocation8 + $0x5e0] sm:$0xff]  ;;  %v3569_v45 = vld [vmem:[#allocation8 + $0x608] sm:$0xff] }
 0x2f9   : > { %10598 = vst [vmem:[#allocation46_spill] sm:$0xff] %v9983_v39  ;;  %v9987_v48 = vpop.f32.mrb[33].mxu1  ;;  %5421 = vmatmul.mubr.f32.gmra.mrb[74].mxu1 %v3328_v16  ;;  %4522 = vmatprep.mubr.f32.mxu0 %v3345_v56  ;;  %v7534_v35 = vpack.c.bf16 %v3564_v12, %v3560_v51  ;;  %v3251_v16 = vmax.f32 %v8481_v0, 0.0  ;;  %v7540_v0 = vpack.c.bf16 %v3581_v6, %v3577_v24  ;;  %v3590_v24 = vld [vmem:[#allocation8 + $0x6b0] sm:$0xff]  ;;  %v3593_v6 = vld [vmem:[#allocation8 + $0x6c8] sm:$0xff]  ;;  %v3631_v39 = vld [vmem:[#allocation8 + $0x7f8] sm:$0xff] }
 0x2fa   : > { %10599 = vst [vmem:[#allocation47_spill] sm:$0xff] %v9987_v48  ;;  %7527 = vmatpush1.bf16.msra.mxu0 %v7526_v40  ;;  %5426 = vmatprep.mubr.f32.mxu1 %v3345_v56  ;;  %v8046_v40 = vpack.c.bf16 %v3566_v33, %v3562_v15  ;;  %v7536_v56 = vpack.c.bf16 %v3573_v37, %v3569_v45  ;;  %v3585_v33 = vld [vmem:[#allocation8 + $0x688] sm:$0xff] }
 0x2fb   : > { %8039 = vmatpush1.bf16.msra.mxu1 %v8038_v5  ;;  %v9993_v7 = vpop.f32.mrb[34].mxu0  ;;  %7529 = vmatprep.subr.bf16.mxu0 %v7528_v10  ;;  %v3572_v5 = vld [vmem:[#allocation8 + $0x620] sm:$0xff]  ;;  %v3570_v10 = vld [vmem:[#allocation8 + $0x610] sm:$0xff]  ;;  %v8052_v15 = vpack.c.bf16 %v3583_v17, %v3579_v31  ;;  %v3589_v45 = vld [vmem:[#allocation8 + $0x6a8] sm:$0xff] }
 0x2fc   : > { %v9995_v61 = vpop.f32.mrb[34].mxu1  ;;  %v9997_v11 = vpop.f32.mrb[35].mxu0  ;;  %4523 = vmatmul.mubr.f32.gmra.mrb[76].mxu0 %v3344_v36  ;;  %8041 = vmatprep.subr.bf16.mxu1 %v8040_v13  ;;  %v3574_v13 = vld [vmem:[#allocation8 + $0x630] sm:$0xff]  ;;  %v3597_v31 = vld [vmem:[#allocation8 + $0x6e8] sm:$0xff] }
 0x2fd   : > { %10600 = vst [vmem:[#allocation48_spill] sm:$0xff] %v9995_v61  ;;  %v9999_v54 = vpop.f32.mrb[35].mxu1  ;;  %5427 = vmatmul.mubr.f32.gmra.mrb[76].mxu1 %v3344_v36  ;;  %4528 = vmatprep.mubr.f32.mxu0 %v3361_v26  ;;  %v7538_v36 = vpack.c.bf16 %v3572_v5, %v3568_v43  ;;  %v3588_v43 = vld [vmem:[#allocation8 + $0x6a0] sm:$0xff]  ;;  %v3586_v5 = vld [vmem:[#allocation8 + $0x690] sm:$0xff]  ;;  %v3621_v61 = vld [vmem:[#allocation8 + $0x7a8] sm:$0xff] }
 0x2fe   : > { %10601 = vst [vmem:[#allocation49_spill] sm:$0xff] %v9999_v54  ;;  %7531 = vmatpush1.bf16.msra.mxu0 %v7530_v62  ;;  %5432 = vmatprep.mubr.f32.mxu1 %v3361_v26  ;;  %v8050_v62 = vpack.c.bf16 %v3574_v13, %v3570_v10  ;;  %v3576_v26 = vld [vmem:[#allocation8 + $0x640] sm:$0xff]  ;;  %v8056_v13 = vpack.c.bf16 %v3591_v57, %v3587_v18  ;;  %v3629_v54 = vld [vmem:[#allocation8 + $0x7e8] sm:$0xff] }
 0x2ff   : > { %8043 = vmatpush1.bf16.msra.mxu1 %v8042_v23  ;;  %v10001_v44 = vpop.f32.mrb[36].mxu0  ;;  %7533 = vmatprep.subr.bf16.mxu0 %v7532_v59  ;;  %v3580_v23 = vld [vmem:[#allocation8 + $0x660] sm:$0xff]  ;;  %v3578_v59 = vld [vmem:[#allocation8 + $0x650] sm:$0xff]  ;;  %v3645_v48 = vld [vmem:[#allocation8 + $0x868] sm:$0xff] }
 0x300   : > { %v10003_v2 = vpop.f32.mrb[36].mxu1  ;;  %v10005_v21 = vpop.f32.mrb[37].mxu0  ;;  %4529 = vmatmul.mubr.f32.gmra.mrb[78].mxu0 %v3360_v14  ;;  %8045 = vmatprep.subr.bf16.mxu1 %v8044_v38  ;;  %v3582_v38 = vld [vmem:[#allocation8 + $0x670] sm:$0xff] }
 0x301   : > { %10602 = vst [vmem:[#allocation50_spill] sm:$0xff] %v10003_v2  ;;  %v10007_v30 = vpop.f32.mrb[37].mxu1  ;;  %5433 = vmatmul.mubr.f32.gmra.mrb[78].mxu1 %v3360_v14  ;;  %4599 = vmatprep.mubr.f32.mxu0 %v3251_v16  ;;  %v7542_v14 = vpack.c.bf16 %v3580_v23, %v3576_v26  ;;  %v8058_v23 = vpack.c.bf16 %v3590_v24, %v3586_v5  ;;  %v3613_v2 = vld [vmem:[#allocation8 + $0x768] sm:$0xff] }
 0x302   : > { %10603 = vst [vmem:[#allocation51_spill] sm:$0xff] %v10007_v30  ;;  %7535 = vmatpush1.bf16.msra.mxu0 %v7534_v35  ;;  %5503 = vmatprep.mubr.f32.mxu1 %v3251_v16  ;;  %v8054_v16 = vpack.c.bf16 %v3582_v38, %v3578_v59  ;;  %v7548_v59 = vpack.c.bf16 %v3597_v31, %v3593_v6  ;;  %v3592_v38 = vld [vmem:[#allocation8 + $0x6c0] sm:$0xff]  ;;  %v3617_v30 = vld [vmem:[#allocation8 + $0x788] sm:$0xff] }
 0x303   : > { %8047 = vmatpush1.bf16.msra.mxu1 %v8046_v40  ;;  %v10009_v60 = vpop.f32.mrb[38].mxu0  ;;  %7537 = vmatprep.subr.bf16.mxu0 %v7536_v56  ;;  %v7544_v40 = vpack.c.bf16 %v3589_v45, %v3585_v33  ;;  %v3584_v56 = vld [vmem:[#allocation8 + $0x680] sm:$0xff]  ;;  %v3594_v45 = vld [vmem:[#allocation8 + $0x6d0] sm:$0xff] }
 0x304   : > { %v10011_v51 = vpop.f32.mrb[38].mxu1  ;;  %v10013_v12 = vpop.f32.mrb[39].mxu0  ;;  %8049 = vmatprep.subr.bf16.mxu1 %v8048_v58  ;;  %v3596_v33 = vld [vmem:[#allocation8 + $0x6e0] sm:$0xff] }
 0x305   : > { %10604 = vst [vmem:[#allocation52_spill] sm:$0xff] %v10011_v51  ;;  %v10015_v37 = vpop.f32.mrb[39].mxu1  ;;  %v3605_v51 = vld [vmem:[#allocation8 + $0x728] sm:$0xff]  ;;  %v3600_v6 = vld [vmem:[#allocation8 + $0x700] sm:$0xff] }
 0x306   : > { %10605 = vst [vmem:[#allocation53_spill] sm:$0xff] %v10015_v37  ;;  %7539 = vmatpush1.bf16.msra.mxu0 %v7538_v36  ;;  %v3595_v36 = vld [vmem:[#allocation8 + $0x6d8] sm:$0xff]  ;;  %v3604_v31 = vld [vmem:[#allocation8 + $0x720] sm:$0xff]  ;;  %v3609_v37 = vld [vmem:[#allocation8 + $0x748] sm:$0xff] }
 0x307   : > { %8051 = vmatpush1.bf16.msra.mxu1 %v8050_v62  ;;  %v10017_v35 = vpop.f32.mrb[40].mxu0  ;;  %7541 = vmatprep.subr.bf16.mxu0 %v7540_v0  ;;  %v3599_v62 = vld [vmem:[#allocation8 + $0x6f8] sm:$0xff]  ;;  %v7546_v0 = vpack.c.bf16 %v3588_v43, %v3584_v56 }
 0x308   : > { %v10019_v10 = vpop.f32.mrb[40].mxu1  ;;  %v10021_v58 = vpop.f32.mrb[41].mxu0  ;;  %8053 = vmatprep.subr.bf16.mxu1 %v8052_v15  ;;  %v8060_v57 = vpack.c.bf16 %v3599_v62, %v3595_v36  ;;  %v3607_v56 = vld [vmem:[#allocation8 + $0x738] sm:$0xff] }
 0x309   : > { %10606 = vst [vmem:[#allocation54_spill] sm:$0xff] %v10019_v10  ;;  %v10023_v17 = vpop.f32.mrb[41].mxu1  ;;  %v3598_v10 = vld [vmem:[#allocation8 + $0x6f0] sm:$0xff] }
 0x30a   : > { %10607 = vst [vmem:[#allocation55_spill] sm:$0xff] %v10023_v17  ;;  %7543 = vmatpush1.bf16.msra.mxu0 %v7542_v14  ;;  %v3601_v17 = vld [vmem:[#allocation8 + $0x708] sm:$0xff]  ;;  %v8062_v5 = vpack.c.bf16 %v3598_v10, %v3594_v45  ;;  %v3612_v45 = vld [vmem:[#allocation8 + $0x760] sm:$0xff] }
 0x30b   : > { %8055 = vmatpush1.bf16.msra.mxu1 %v8054_v16  ;;  %v10025_v26 = vpop.f32.mrb[42].mxu0  ;;  %7545 = vmatprep.subr.bf16.mxu0 %v7544_v40  ;;  %v3603_v16 = vld [vmem:[#allocation8 + $0x718] sm:$0xff]  ;;  %v7550_v40 = vpack.c.bf16 %v3596_v33, %v3592_v38  ;;  %v7552_v24 = vpack.c.bf16 %v3605_v51, %v3601_v17  ;;  %v7556_v17 = vpack.c.bf16 %v3613_v2, %v3609_v37  ;;  %v3608_v33 = vld [vmem:[#allocation8 + $0x740] sm:$0xff]  ;;  %v10050_v2 = vsub.s32 2, %v9917_v8 }
 0x30c   : > { %v10027_v15 = vpop.f32.mrb[42].mxu1  ;;  %v10029_v18 = vpop.f32.mrb[43].mxu0  ;;  %8057 = vmatprep.subr.bf16.mxu1 %v8056_v13  ;;  %v8064_v62 = vpack.c.bf16 %v3607_v56, %v3603_v16  ;;  %v3615_v38 = vld [vmem:[#allocation8 + $0x778] sm:$0xff] }
 0x30d   : > { %10608 = vst [vmem:[#allocation56_spill] sm:$0xff] %v10027_v15  ;;  %v10031_v14 = vpop.f32.mrb[43].mxu1  ;;  %v3602_v15 = vld [vmem:[#allocation8 + $0x710] sm:$0xff]  ;;  %10614 = vst [vmem:[#allocation62_spill] sm:$0xff] %v10050_v2 }
 0x30e   : > { %10609 = vst [vmem:[#allocation57_spill] sm:$0xff] %v10031_v14  ;;  %7547 = vmatpush1.bf16.msra.mxu0 %v7546_v0  ;;  %v3606_v14 = vld [vmem:[#allocation8 + $0x730] sm:$0xff] }
 0x30f   : > { %8059 = vmatpush1.bf16.msra.mxu1 %v8058_v23  ;;  %v10033_v43 = vpop.f32.mrb[44].mxu0  ;;  %7549 = vmatprep.subr.bf16.mxu0 %v7548_v59  ;;  %v3611_v23 = vld [vmem:[#allocation8 + $0x758] sm:$0xff]  ;;  %v7554_v59 = vpack.c.bf16 %v3604_v31, %v3600_v6  ;;  %v8066_v10 = vpack.c.bf16 %v3606_v14, %v3602_v15  ;;  %v7560_v15 = vpack.c.bf16 %v3621_v61, %v3617_v30  ;;  %v3616_v14 = vld [vmem:[#allocation8 + $0x780] sm:$0xff] }
 0x310   : > { %v10035_v13 = vpop.f32.mrb[44].mxu1  ;;  %v10037_v36 = vpop.f32.mrb[45].mxu0  ;;  %8061 = vmatprep.subr.bf16.mxu1 %v8060_v57  ;;  %v8068_v56 = vpack.c.bf16 %v3615_v38, %v3611_v23  ;;  %v3623_v6 = vld [vmem:[#allocation8 + $0x7b8] sm:$0xff]  ;;  %v3620_v31 = vld [vmem:[#allocation8 + $0x7a0] sm:$0xff]  ;;  %v3622_v38 = vld [vmem:[#allocation8 + $0x7b0] sm:$0xff] }
 0x311   : > { %10610 = vst [vmem:[#allocation58_spill] sm:$0xff] %v10035_v13  ;;  %v10039_v0 = vpop.f32.mrb[45].mxu1  ;;  %v3610_v13 = vld [vmem:[#allocation8 + $0x750] sm:$0xff] }
 0x312   : > { %10611 = vst [vmem:[#allocation59_spill] sm:$0xff] %v10039_v0  ;;  %7551 = vmatpush1.bf16.msra.mxu0 %v7550_v40  ;;  %v3614_v0 = vld [vmem:[#allocation8 + $0x770] sm:$0xff] }
 0x313   : > { %8063 = vmatpush1.bf16.msra.mxu1 %v8062_v5  ;;  %v10041_v51 = vpop.f32.mrb[46].mxu0  ;;  %7553 = vmatprep.subr.bf16.mxu0 %v7552_v24  ;;  %v3619_v5 = vld [vmem:[#allocation8 + $0x798] sm:$0xff]  ;;  %v7558_v24 = vpack.c.bf16 %v3612_v45, %v3608_v33  ;;  %v8070_v37 = vpack.c.bf16 %v3614_v0, %v3610_v13  ;;  %v10052_v33 = vld [vmem:[#allocation7] sm:$0xff]  ;;  %v3624_v13 = vld [vmem:[#allocation8 + $0x7c0] sm:$0xff] }
 0x314   : > { %v10043_v57 = vpop.f32.mrb[46].mxu1  ;;  %v10045_v16 = vpop.f32.mrb[47].mxu0  ;;  %8065 = vmatprep.subr.bf16.mxu1 %v8064_v62  ;;  %v3618_v62 = vld [vmem:[#allocation8 + $0x790] sm:$0xff]  ;;  %v8072_v23 = vpack.c.bf16 %v3623_v6, %v3619_v5  ;;  %v3628_v0 = vld [vmem:[#allocation8 + $0x7e0] sm:$0xff]  ;;  %v3633_v5 = vld [vmem:[#allocation8 + $0x808] sm:$0xff] }
 0x315   : > { %10612 = vst [vmem:[#allocation60_spill] sm:$0xff] %v10043_v57  ;;  %v10047_v40 = vpop.f32.mrb[47].mxu1  ;;  %v3625_v57 = vld [vmem:[#allocation8 + $0x7c8] sm:$0xff]  ;;  %v8074_v61 = vpack.c.bf16 %v3622_v38, %v3618_v62  ;;  %v3634_v62 = vld [vmem:[#allocation8 + $0x810] sm:$0xff] }
 0x316   : > { %10613 = vst [vmem:[#allocation61_spill] sm:$0xff] %v10047_v40  ;;  %7555 = vmatpush1.bf16.msra.mxu0 %v7554_v59  ;;  %v3627_v40 = vld [vmem:[#allocation8 + $0x7d8] sm:$0xff]  ;;  %v7562_v59 = vpack.c.bf16 %v3620_v31, %v3616_v14  ;;  %v7564_v30 = vpack.c.bf16 %v3629_v54, %v3625_v57  ;;  %v3637_v6 = vld [vmem:[#allocation8 + $0x828] sm:$0xff]  ;;  %v7566_v31 = vpack.c.bf16 %v3628_v0, %v3624_v13 }
 0x317   : > { %8067 = vmatpush1.bf16.msra.mxu1 %v8066_v10  ;;  %7557 = vmatprep.subr.bf16.mxu0 %v7556_v17  ;;  %v10056_v10 = vrot.slane %v10052_v33, %v10050_v2  ;;  %v3626_v17 = vld [vmem:[#allocation8 + $0x7d0] sm:$0xff]  ;;  %v8076_v45 = vpack.c.bf16 %v3631_v39, %v3627_v40  ;;  %v3639_v14 = vld [vmem:[#allocation8 + $0x838] sm:$0xff]  ;;  %v8483_v54 = vadd.f32 %v9762_v55, %v9975_v20  ;;  %v3632_v39 = vld [vmem:[#allocation8 + $0x800] sm:$0xff] }
 0x318   : > { %8069 = vmatprep.subr.bf16.mxu1 %v8068_v56  ;;  %v3630_v56 = vld [vmem:[#allocation8 + $0x7f0] sm:$0xff]  ;;  %v3636_v40 = vld [vmem:[#allocation8 + $0x820] sm:$0xff]  ;;  %v3641_v38 = vld [vmem:[#allocation8 + $0x848] sm:$0xff]  ;;  %v8485_v55 = vadd.f32 %v9772_v9, %v9975_v20 }
 0x319   : > { %v8480_v2 = vadd.f32 %v9747_v32, %v10056_v10  ;;  %v3647_v13 = vld [vmem:[#allocation8 + $0x878] sm:$0xff]  ;;  %v8482_v32 = vadd.f32 %v9757_v50, %v10056_v10 }
 0x31a   : > { %7559 = vmatpush1.bf16.msra.mxu0 %v7558_v24  ;;  %v3635_v24 = vld [vmem:[#allocation8 + $0x818] sm:$0xff] }
 0x31b   : > { %8071 = vmatpush1.bf16.msra.mxu1 %v8070_v37  ;;  %7561 = vmatprep.subr.bf16.mxu0 %v7560_v15  ;;  %v8078_v37 = vpack.c.bf16 %v3630_v56, %v3626_v17  ;;  %v7568_v15 = vpack.c.bf16 %v3637_v6, %v3633_v5  ;;  %v8080_v57 = vpack.c.bf16 %v3639_v14, %v3635_v24  ;;  %v3250_v0 = vmax.f32 %v8480_v2, 0.0  ;;  %v3640_v56 = vld [vmem:[#allocation8 + $0x840] sm:$0xff]  ;;  %v3642_v6 = vld [vmem:[#allocation8 + $0x850] sm:$0xff]  ;;  %v3649_v2 = vld [vmem:[#allocation8 + $0x888] sm:$0xff] }
 0x31c   : > { %8073 = vmatprep.subr.bf16.mxu1 %v8072_v23  ;;  %v3638_v23 = vld [vmem:[#allocation8 + $0x830] sm:$0xff]  ;;  %v3644_v5 = vld [vmem:[#allocation8 + $0x860] sm:$0xff]  ;;  %v3651_v50 = vld [vmem:[#allocation8 + $0x898] sm:$0xff] }
 0x31d   : > { %v8082_v17 = vpack.c.bf16 %v3638_v23, %v3634_v62  ;;  %v3646_v14 = vld [vmem:[#allocation8 + $0x870] sm:$0xff]  ;;  %v7574_v9 = vpack.c.bf16 %v3644_v5, %v3640_v56  ;;  %v3648_v62 = vld [vmem:[#allocation8 + $0x880] sm:$0xff] }
 0x31e   : > { %7563 = vmatpush1.bf16.msra.mxu0 %v7562_v59  ;;  %v3643_v59 = vld [vmem:[#allocation8 + $0x858] sm:$0xff]  ;;  %v3652_v23 = vld [vmem:[#allocation8 + $0x8a0] sm:$0xff] }
 0x31f   : > { %8075 = vmatpush1.bf16.msra.mxu1 %v8074_v61  ;;  %7565 = vmatprep.subr.bf16.mxu0 %v7564_v30  ;;  %v7570_v61 = vpack.c.bf16 %v3636_v40, %v3632_v39  ;;  %v3267_v30 = vmax.f32 %v8483_v54, 0.0  ;;  %v8084_v24 = vpack.c.bf16 %v3647_v13, %v3643_v59  ;;  %v8484_v54 = vadd.f32 %v9767_v4, %v10056_v10  ;;  %v3654_v13 = vld [vmem:[#allocation8 + $0x8b0] sm:$0xff]  ;;  %v3661_v4 = vld [vmem:[#allocation8 + $0x8e8] sm:$0xff] }
 0x320   : > { %8077 = vmatprep.subr.bf16.mxu1 %v8076_v45  ;;  %v7572_v45 = vpack.c.bf16 %v3645_v48, %v3641_v38  ;;  %v3283_v48 = vmax.f32 %v8485_v55, 0.0  ;;  %v8086_v39 = vpack.c.bf16 %v3646_v14, %v3642_v6  ;;  %v3650_v38 = vld [vmem:[#allocation8 + $0x890] sm:$0xff]  ;;  %v7578_v55 = vpack.c.bf16 %v3652_v23, %v3648_v62  ;;  %v3656_v6 = vld [vmem:[#allocation8 + $0x8c0] sm:$0xff] }
 0x321   : > { %v8090_v56 = vpack.c.bf16 %v3654_v13, %v3650_v38  ;;  %v3658_v14 = vld [vmem:[#allocation8 + $0x8d0] sm:$0xff]  ;;  %v3664_v62 = vld [vmem:[#allocation8 + $0x900] sm:$0xff] }
 0x322   : > { %7567 = vmatpush1.bf16.msra.mxu0 %v7566_v31  ;;  %v3653_v31 = vld [vmem:[#allocation8 + $0x8a8] sm:$0xff]  ;;  %v3668_v23 = vld [vmem:[#allocation8 + $0x920] sm:$0xff]  ;;  %v3666_v38 = vld [vmem:[#allocation8 + $0x910] sm:$0xff] }
 0x323   : > { %8079 = vmatpush1.bf16.msra.mxu1 %v8078_v37  ;;  %7569 = vmatprep.subr.bf16.mxu0 %v7568_v15  ;;  %v3655_v37 = vld [vmem:[#allocation8 + $0x8b8] sm:$0xff]  ;;  %v3266_v15 = vmax.f32 %v8482_v32, 0.0  ;;  %v7576_v40 = vpack.c.bf16 %v3653_v31, %v3649_v2  ;;  %v3662_v31 = vld [vmem:[#allocation8 + $0x8f0] sm:$0xff] }
 0x324   : > { %8081 = vmatprep.subr.bf16.mxu1 %v8080_v57  ;;  %v8487_v57 = vadd.f32 %v9781_v27, %v9975_v20  ;;  %v8088_v59 = vpack.c.bf16 %v3655_v37, %v3651_v50  ;;  %v3659_v32 = vld [vmem:[#allocation8 + $0x8d8] sm:$0xff]  ;;  %v8486_v27 = vadd.f32 %v9777_v22, %v10056_v10  ;;  %v3665_v50 = vld [vmem:[#allocation8 + $0x908] sm:$0xff]  ;;  %v3670_v13 = vld [vmem:[#allocation8 + $0x930] sm:$0xff] }
 0x325   : > { %4600 = vmatmul.mubr.f32.vlgmr.msra.gmra.mrb[64].mxu0 %v3250_v0  ;;  %v3669_v22 = vld [vmem:[#allocation8 + $0x928] sm:$0xff]  ;;  %v3667_v37 = vld [vmem:[#allocation8 + $0x918] sm:$0xff] }
 0x326   : > { %5504 = vmatmul.mubr.f32.vlgmr.msra.gmra.mrb[64].mxu1 %v3250_v0  ;;  %4605 = vmatprep.mubr.f32.mxu0 %v3267_v30  ;;  %v3657_v0 = vld [vmem:[#allocation8 + $0x8c8] sm:$0xff] }
 0x327   : > { %7571 = vmatpush1.bf16.msra.mxu0 %v7570_v61  ;;  %5509 = vmatprep.mubr.f32.mxu1 %v3267_v30  ;;  %v3663_v61 = vld [vmem:[#allocation8 + $0x8f8] sm:$0xff]  ;;  %v3282_v30 = vmax.f32 %v8484_v54, 0.0  ;;  %v7580_v5 = vpack.c.bf16 %v3661_v4, %v3657_v0  ;;  %v3298_v54 = vmax.f32 %v8486_v27, 0.0  ;;  %v3673_v0 = vld [vmem:[#allocation8 + $0x948] sm:$0xff]  ;;  %v7586_v27 = vpack.c.bf16 %v3668_v23, %v3664_v62  ;;  %v3682_v62 = vld [vmem:[#allocation8 + $0x990] sm:$0xff] }
 0x328   : > { %8083 = vmatpush1.bf16.msra.mxu1 %v8082_v17  ;;  %7573 = vmatprep.subr.bf16.mxu0 %v7572_v45  ;;  %v3299_v17 = vmax.f32 %v8487_v57, 0.0  ;;  %v8489_v45 = vadd.f32 %v9789_v47, %v9975_v20  ;;  %v8092_v2 = vpack.c.bf16 %v3663_v61, %v3659_v32  ;;  %v8488_v47 = vadd.f32 %v9785_v42, %v10056_v10  ;;  %v3677_v42 = vld [vmem:[#allocation8 + $0x968] sm:$0xff]  ;;  %v3675_v4 = vld [vmem:[#allocation8 + $0x958] sm:$0xff]  ;;  %v3686_v23 = vld [vmem:[#allocation8 + $0x9b0] sm:$0xff] }
 0x329   : > { %4606 = vmatmul.mubr.f32.gmra.mrb[66].mxu0 %v3266_v15  ;;  %8085 = vmatprep.subr.bf16.mxu1 %v8084_v24  ;;  %v3660_v24 = vld [vmem:[#allocation8 + $0x8e0] sm:$0xff]  ;;  %v8491_v57 = vadd.f32 %v9797_v3, %v9975_v20  ;;  %v3679_v32 = vld [vmem:[#allocation8 + $0x978] sm:$0xff]  ;;  %v8490_v3 = vadd.f32 %v9793_v63, %v10056_v10  ;;  %v3678_v63 = vld [vmem:[#allocation8 + $0x970] sm:$0xff] }
 0x32a   : > { %5510 = vmatmul.mubr.f32.gmra.mrb[66].mxu1 %v3266_v15  ;;  %4611 = vmatprep.mubr.f32.mxu0 %v3283_v48  ;;  %v3671_v15 = vld [vmem:[#allocation8 + $0x938] sm:$0xff]  ;;  %v3314_v61 = vmax.f32 %v8488_v47, 0.0 }
 0x32b   : > { %7575 = vmatpush1.bf16.msra.mxu0 %v7574_v9  ;;  %5515 = vmatprep.mubr.f32.mxu1 %v3283_v48  ;;  %v7582_v9 = vpack.c.bf16 %v3660_v24, %v3656_v6  ;;  %v3315_v48 = vmax.f32 %v8489_v45, 0.0  ;;  %v8098_v45 = vpack.c.bf16 %v3670_v13, %v3666_v38  ;;  %v3676_v6 = vld [vmem:[#allocation8 + $0x960] sm:$0xff]  ;;  %v3674_v24 = vld [vmem:[#allocation8 + $0x950] sm:$0xff]  ;;  %v3689_v38 = vld [vmem:[#allocation8 + $0x9c8] sm:$0xff] }
 0x32c   : > { %8087 = vmatpush1.bf16.msra.mxu1 %v8086_v39  ;;  %7577 = vmatprep.subr.bf16.mxu0 %v7576_v40  ;;  %v8094_v39 = vpack.c.bf16 %v3662_v31, %v3658_v14  ;;  %v7584_v40 = vpack.c.bf16 %v3669_v22, %v3665_v50  ;;  %v8100_v14 = vpack.c.bf16 %v3679_v32, %v3675_v4  ;;  %v3685_v31 = vld [vmem:[#allocation8 + $0x9a8] sm:$0xff]  ;;  %v3683_v50 = vld [vmem:[#allocation8 + $0x998] sm:$0xff] }
 0x32d   : > { %4612 = vmatmul.mubr.f32.gmra.mrb[68].mxu0 %v3282_v30  ;;  %8089 = vmatprep.subr.bf16.mxu1 %v8088_v59  ;;  %v8096_v59 = vpack.c.bf16 %v3671_v15, %v3667_v37  ;;  %v3687_v22 = vld [vmem:[#allocation8 + $0x9b8] sm:$0xff]  ;;  %v3330_v37 = vmax.f32 %v8490_v3, 0.0 }
 0x32e   : > { %5516 = vmatmul.mubr.f32.gmra.mrb[68].mxu1 %v3282_v30  ;;  %4617 = vmatprep.mubr.f32.mxu0 %v3299_v17  ;;  %v10552_v30 = vsub.s32 5, %v9917_v8  ;;  %v3691_v13 = vld [vmem:[#allocation8 + $0x9d8] sm:$0xff] }
 0x32f   : > { %7579 = vmatpush1.bf16.msra.mxu0 %v7578_v55  ;;  %5521 = vmatprep.mubr.f32.mxu1 %v3299_v17  ;;  %v3331_v55 = vmax.f32 %v8491_v57, 0.0  ;;  %v8493_v17 = vadd.f32 %v9805_v25, %v9975_v20  ;;  %v8492_v25 = vadd.f32 %v9801_v19, %v10056_v10  ;;  %v8104_v19 = vpack.c.bf16 %v3687_v22, %v3683_v50  ;;  %v3700_v50 = vld [vmem:[#allocation8 + $0xa20] sm:$0xff]  ;;  %v3698_v22 = vld [vmem:[#allocation8 + $0xa10] sm:$0xff] }
 0x330   : > { %8091 = vmatpush1.bf16.msra.mxu1 %v8090_v56  ;;  %7581 = vmatprep.subr.bf16.mxu0 %v7580_v5  ;;  %v7588_v56 = vpack.c.bf16 %v3677_v42, %v3673_v0  ;;  %v3672_v5 = vld [vmem:[#allocation8 + $0x940] sm:$0xff]  ;;  %v10088_v15 = vrot.slane %v10052_v33, %v10552_v30  ;;  %v3695_v0 = vld [vmem:[#allocation8 + $0x9f8] sm:$0xff] }
 0x331   : > { %4618 = vmatmul.mubr.f32.gmra.mrb[70].mxu0 %v3298_v54  ;;  %8093 = vmatprep.subr.bf16.mxu1 %v8092_v2  ;;  %v3681_v2 = vld [vmem:[#allocation8 + $0x988] sm:$0xff]  ;;  %v3347_v47 = vmax.f32 %v8493_v17, 0.0  ;;  %v3346_v42 = vmax.f32 %v8492_v25, 0.0  ;;  %v3690_v17 = vld [vmem:[#allocation8 + $0x9d0] sm:$0xff]  ;;  %v3855_v30 = vld [vmem:[#allocation8 + $0xef8] sm:$0xff] }
 0x332   : > { %5522 = vmatmul.mubr.f32.gmra.mrb[70].mxu1 %v3298_v54  ;;  %4623 = vmatprep.mubr.f32.mxu0 %v3315_v48  ;;  %v7590_v54 = vpack.c.bf16 %v3676_v6, %v3672_v5  ;;  %v7592_v57 = vpack.c.bf16 %v3685_v31, %v3681_v2  ;;  %v8497_v32 = vadd.f32 %v9845_v1, %v10088_v15  ;;  %v3697_v5 = vld [vmem:[#allocation8 + $0xa08] sm:$0xff]  ;;  %v3703_v6 = vld [vmem:[#allocation8 + $0xa38] sm:$0xff]  ;;  %v3696_v31 = vld [vmem:[#allocation8 + $0xa00] sm:$0xff] }
 0x333   : > { %7583 = vmatpush1.bf16.msra.mxu0 %v7582_v9  ;;  %5527 = vmatprep.mubr.f32.mxu1 %v3315_v48  ;;  %v8495_v9 = vadd.f32 %v9813_v53, %v9975_v20  ;;  %v8102_v48 = vpack.c.bf16 %v3678_v63, %v3674_v24  ;;  %v8494_v53 = vadd.f32 %v9809_v46, %v10056_v10  ;;  %v3701_v46 = vld [vmem:[#allocation8 + $0xa28] sm:$0xff]  ;;  %v3699_v10 = vld [vmem:[#allocation8 + $0xa18] sm:$0xff]  ;;  %v3702_v25 = vld [vmem:[#allocation8 + $0xa30] sm:$0xff] }
 0x334   : > { %8095 = vmatpush1.bf16.msra.mxu1 %v8094_v39  ;;  %7585 = vmatprep.subr.bf16.mxu0 %v7584_v40  ;;  %v3680_v39 = vld [vmem:[#allocation8 + $0x980] sm:$0xff]  ;;  %v7600_v2 = vpack.c.bf16 %v3701_v46, %v3697_v5  ;;  %v3723_v5 = vld [vmem:[#allocation8 + $0xad8] sm:$0xff] }
 0x335   : > { %4624 = vmatmul.mubr.f32.gmra.mrb[72].mxu0 %v3314_v61  ;;  %8097 = vmatprep.subr.bf16.mxu1 %v8096_v59  ;;  %v3684_v40 = vld [vmem:[#allocation8 + $0x9a0] sm:$0xff]  ;;  %v3693_v59 = vld [vmem:[#allocation8 + $0x9e8] sm:$0xff]  ;;  %v3363_v4 = vmax.f32 %v8495_v9, 0.0  ;;  %v3362_v24 = vmax.f32 %v8494_v53, 0.0  ;;  %v3707_v9 = vld [vmem:[#allocation8 + $0xa58] sm:$0xff] }
 0x336   : > { %5528 = vmatmul.mubr.f32.gmra.mrb[72].mxu1 %v3314_v61  ;;  %4629 = vmatprep.mubr.f32.mxu0 %v3331_v55  ;;  %v7594_v20 = vpack.c.bf16 %v3684_v40, %v3680_v39  ;;  %v8106_v61 = vpack.c.bf16 %v3686_v23, %v3682_v62  ;;  %v7596_v3 = vpack.c.bf16 %v3693_v59, %v3689_v38  ;;  %v3704_v62 = vld [vmem:[#allocation8 + $0xa40] sm:$0xff]  ;;  %v3706_v23 = vld [vmem:[#allocation8 + $0xa50] sm:$0xff]  ;;  %v3719_v53 = vld [vmem:[#allocation8 + $0xab8] sm:$0xff] }
 0x337   : > { %7587 = vmatpush1.bf16.msra.mxu0 %v7586_v27  ;;  %5533 = vmatprep.mubr.f32.mxu1 %v3331_v55  ;;  %v3688_v27 = vld [vmem:[#allocation8 + $0x9c0] sm:$0xff]  ;;  %v8114_v39 = vpack.c.bf16 %v3702_v25, %v3698_v22  ;;  %v3710_v59 = vld [vmem:[#allocation8 + $0xa70] sm:$0xff]  ;;  %v3727_v46 = vld [vmem:[#allocation8 + $0xaf8] sm:$0xff] }
 0x338   : > { %8099 = vmatpush1.bf16.msra.mxu1 %v8098_v45  ;;  %7589 = vmatprep.subr.bf16.mxu0 %v7588_v56  ;;  %v3692_v55 = vld [vmem:[#allocation8 + $0x9e0] sm:$0xff]  ;;  %v8108_v45 = vpack.c.bf16 %v3695_v0, %v3691_v13  ;;  %v3694_v56 = vld [vmem:[#allocation8 + $0x9f0] sm:$0xff]  ;;  %v3713_v13 = vld [vmem:[#allocation8 + $0xa88] sm:$0xff] }
 0x339   : > { %4630 = vmatmul.mubr.f32.gmra.mrb[74].mxu0 %v3330_v37  ;;  %8101 = vmatprep.subr.bf16.mxu1 %v8100_v14  ;;  %v7598_v1 = vpack.c.bf16 %v3692_v55, %v3688_v27  ;;  %v3253_v14 = vmax.f32 %v8497_v32, 0.0  ;;  %v8110_v63 = vpack.c.bf16 %v3694_v56, %v3690_v17  ;;  %v3717_v0 = vld [vmem:[#allocation8 + $0xaa8] sm:$0xff]  ;;  %v3714_v27 = vld [vmem:[#allocation8 + $0xa90] sm:$0xff]  ;;  %v3735_v25 = vld [vmem:[#allocation8 + $0xb38] sm:$0xff] }
 0x33a   : > { %5534 = vmatmul.mubr.f32.gmra.mrb[74].mxu1 %v3330_v37  ;;  %4635 = vmatprep.mubr.f32.mxu0 %v3347_v47  ;;  %v8112_v37 = vpack.c.bf16 %v3703_v6, %v3699_v10  ;;  %v7608_v32 = vpack.c.bf16 %v3717_v0, %v3713_v13  ;;  %v3718_v17 = vld [vmem:[#allocation8 + $0xab0] sm:$0xff]  ;;  %v3725_v56 = vld [vmem:[#allocation8 + $0xae8] sm:$0xff] }
 0x33b   : > { %7591 = vmatpush1.bf16.msra.mxu0 %v7590_v54  ;;  %5539 = vmatprep.mubr.f32.mxu1 %v3347_v47  ;;  %v3705_v54 = vld [vmem:[#allocation8 + $0xa48] sm:$0xff]  ;;  %v8122_v6 = vpack.c.bf16 %v3718_v17, %v3714_v27  ;;  %v3751_v17 = vld [vmem:[#allocation8 + $0xbb8] sm:$0xff] }
 0x33c   : > { %8103 = vmatpush1.bf16.msra.mxu1 %v8102_v48  ;;  %7593 = vmatprep.subr.bf16.mxu0 %v7592_v57  ;;  %v3709_v47 = vld [vmem:[#allocation8 + $0xa68] sm:$0xff]  ;;  %v3711_v48 = vld [vmem:[#allocation8 + $0xa78] sm:$0xff]  ;;  %v7602_v57 = vpack.c.bf16 %v3700_v50, %v3696_v31  ;;  %v3726_v31 = vld [vmem:[#allocation8 + $0xaf0] sm:$0xff] }
 0x33d   : > { %4636 = vmatmul.mubr.f32.gmra.mrb[76].mxu0 %v3346_v42  ;;  %8105 = vmatprep.subr.bf16.mxu1 %v8104_v19  ;;  %v7604_v40 = vpack.c.bf16 %v3709_v47, %v3705_v54  ;;  %v3708_v19 = vld [vmem:[#allocation8 + $0xa60] sm:$0xff]  ;;  %v8116_v38 = vpack.c.bf16 %v3711_v48, %v3707_v9  ;;  %v3729_v50 = vld [vmem:[#allocation8 + $0xb08] sm:$0xff] }
 0x33e   : > { %5540 = vmatmul.mubr.f32.gmra.mrb[76].mxu1 %v3346_v42  ;;  %4641 = vmatprep.mubr.f32.mxu0 %v3363_v4  ;;  %v3715_v42 = vld [vmem:[#allocation8 + $0xa98] sm:$0xff]  ;;  %v3733_v22 = vld [vmem:[#allocation8 + $0xb28] sm:$0xff]  ;;  %v3728_v48 = vld [vmem:[#allocation8 + $0xb00] sm:$0xff] }
 0x33f   : > { %7595 = vmatpush1.bf16.msra.mxu0 %v7594_v20  ;;  %5545 = vmatprep.mubr.f32.mxu1 %v3363_v4  ;;  %v7606_v20 = vpack.c.bf16 %v3708_v19, %v3704_v62  ;;  %v8118_v4 = vpack.c.bf16 %v3710_v59, %v3706_v23  ;;  %v8120_v55 = vpack.c.bf16 %v3719_v53, %v3715_v42  ;;  %v3734_v62 = vld [vmem:[#allocation8 + $0xb30] sm:$0xff]  ;;  %v3737_v19 = vld [vmem:[#allocation8 + $0xb48] sm:$0xff]  ;;  %v3743_v59 = vld [vmem:[#allocation8 + $0xb78] sm:$0xff] }
 0x340   : > { %8107 = vmatpush1.bf16.msra.mxu1 %v8106_v61  ;;  %7597 = vmatprep.subr.bf16.mxu0 %v7596_v3  ;;  %v3712_v61 = vld [vmem:[#allocation8 + $0xa80] sm:$0xff]  ;;  %v7616_v9 = vpack.c.bf16 %v3733_v22, %v3729_v50  ;;  %v3741_v23 = vld [vmem:[#allocation8 + $0xb68] sm:$0xff]  ;;  %v3759_v50 = vld [vmem:[#allocation8 + $0xbf8] sm:$0xff] }
 0x341   : > { %4642 = vmatmul.mubr.f32.gmra.mrb[78].mxu0 %v3362_v24  ;;  %8109 = vmatprep.subr.bf16.mxu1 %v8108_v45  ;;  %v3716_v3 = vld [vmem:[#allocation8 + $0xaa0] sm:$0xff]  ;;  %v3721_v45 = vld [vmem:[#allocation8 + $0xac8] sm:$0xff]  ;;  %v7620_v42 = vpack.c.bf16 %v3741_v23, %v3737_v19  ;;  %v3763_v19 = vld [vmem:[#allocation8 + $0xc18] sm:$0xff] }
 0x342   : > { %5546 = vmatmul.mubr.f32.gmra.mrb[78].mxu1 %v3362_v24  ;;  %4712 = vmatprep.mubr.f32.mxu0 %v3253_v14  ;;  %v7610_v10 = vpack.c.bf16 %v3716_v3, %v3712_v61  ;;  %v7612_v24 = vpack.c.bf16 %v3725_v56, %v3721_v45  ;;  %v3736_v53 = vld [vmem:[#allocation8 + $0xb40] sm:$0xff]  ;;  %v3742_v61 = vld [vmem:[#allocation8 + $0xb70] sm:$0xff]  ;;  %v3745_v3 = vld [vmem:[#allocation8 + $0xb88] sm:$0xff]  ;;  %v10551_v56 = vsub.s32 4, %v9917_v8 }
 0x343   : > { %7599 = vmatpush1.bf16.msra.mxu0 %v7598_v1  ;;  %5616 = vmatprep.mubr.f32.mxu1 %v3253_v14  ;;  %v3720_v1 = vld [vmem:[#allocation8 + $0xac0] sm:$0xff]  ;;  %v3749_v27 = vld [vmem:[#allocation8 + $0xba8] sm:$0xff]  ;;  %v3767_v23 = vld [vmem:[#allocation8 + $0xc38] sm:$0xff] }
 0x344   : > { %8111 = vmatpush1.bf16.msra.mxu1 %v8110_v63  ;;  %7601 = vmatprep.subr.bf16.mxu0 %v7600_v2  ;;  %v3724_v14 = vld [vmem:[#allocation8 + $0xae0] sm:$0xff]  ;;  %v3722_v63 = vld [vmem:[#allocation8 + $0xad0] sm:$0xff]  ;;  %v8124_v2 = vpack.c.bf16 %v3727_v46, %v3723_v5  ;;  %v7624_v46 = vpack.c.bf16 %v3749_v27, %v3745_v3  ;;  %v3769_v3 = vld [vmem:[#allocation8 + $0xc48] sm:$0xff] }
 0x345   : > { %8113 = vmatprep.subr.bf16.mxu1 %v8112_v37  ;;  %v3731_v37 = vld [vmem:[#allocation8 + $0xb18] sm:$0xff]  ;;  %v7614_v54 = vpack.c.bf16 %v3724_v14, %v3720_v1  ;;  %v8126_v47 = vpack.c.bf16 %v3726_v31, %v3722_v63  ;;  %v3750_v14 = vld [vmem:[#allocation8 + $0xbb0] sm:$0xff]  ;;  %v3753_v63 = vld [vmem:[#allocation8 + $0xbc8] sm:$0xff] }
 0x346   : > { %v3755_v31 = vld [vmem:[#allocation8 + $0xbd8] sm:$0xff]  ;;  %v3773_v27 = vld [vmem:[#allocation8 + $0xc68] sm:$0xff] }
 0x347   : > { %7603 = vmatpush1.bf16.msra.mxu0 %v7602_v57  ;;  %v3732_v57 = vld [vmem:[#allocation8 + $0xb20] sm:$0xff] }
 0x348   : > { %8115 = vmatpush1.bf16.msra.mxu1 %v8114_v39  ;;  %7605 = vmatprep.subr.bf16.mxu0 %v7604_v40  ;;  %v3730_v39 = vld [vmem:[#allocation8 + $0xb10] sm:$0xff]  ;;  %v8128_v40 = vpack.c.bf16 %v3735_v25, %v3731_v37  ;;  %v7618_v13 = vpack.c.bf16 %v3732_v57, %v3728_v48  ;;  %v10100_v37 = vrot.slane %v10052_v33, %v10551_v56  ;;  %v3851_v56 = vld [vmem:[#allocation8 + $0xed8] sm:$0xff] }
 0x349   : > { %8117 = vmatprep.subr.bf16.mxu1 %v8116_v38  ;;  %v3739_v38 = vld [vmem:[#allocation8 + $0xb58] sm:$0xff]  ;;  %v8130_v0 = vpack.c.bf16 %v3734_v62, %v3730_v39  ;;  %v3754_v48 = vld [vmem:[#allocation8 + $0xbd0] sm:$0xff]  ;;  %v8140_v57 = vpack.c.bf16 %v3759_v50, %v3755_v31  ;;  %v3765_v62 = vld [vmem:[#allocation8 + $0xc28] sm:$0xff] }
 0x34a   : > { %v3758_v39 = vld [vmem:[#allocation8 + $0xbf0] sm:$0xff] }
 0x34b   : > { %7607 = vmatpush1.bf16.msra.mxu0 %v7606_v20  ;;  %v3740_v20 = vld [vmem:[#allocation8 + $0xb60] sm:$0xff]  ;;  %v3774_v50 = vld [vmem:[#allocation8 + $0xc70] sm:$0xff] }
 0x34c   : > { %8119 = vmatpush1.bf16.msra.mxu1 %v8118_v4  ;;  %7609 = vmatprep.subr.bf16.mxu0 %v7608_v32  ;;  %v3738_v4 = vld [vmem:[#allocation8 + $0xb50] sm:$0xff]  ;;  %v8132_v32 = vpack.c.bf16 %v3743_v59, %v3739_v38  ;;  %v7622_v45 = vpack.c.bf16 %v3740_v20, %v3736_v53  ;;  %v8496_v59 = vadd.f32 %v9840_v52, %v10100_v37  ;;  %v3760_v20 = vld [vmem:[#allocation8 + $0xc00] sm:$0xff] }
 0x34d   : > { %8121 = vmatprep.subr.bf16.mxu1 %v8120_v55  ;;  %v3747_v55 = vld [vmem:[#allocation8 + $0xb98] sm:$0xff]  ;;  %v8134_v5 = vpack.c.bf16 %v3742_v61, %v3738_v4  ;;  %v8144_v53 = vpack.c.bf16 %v3767_v23, %v3763_v19  ;;  %v3764_v4 = vld [vmem:[#allocation8 + $0xc20] sm:$0xff]  ;;  %v3766_v61 = vld [vmem:[#allocation8 + $0xc30] sm:$0xff] }
 0x34e   : > { %v8136_v1 = vpack.c.bf16 %v3751_v17, %v3747_v55  ;;  %v3771_v55 = vld [vmem:[#allocation8 + $0xc58] sm:$0xff] }
 0x34f   : > { %7611 = vmatpush1.bf16.msra.mxu0 %v7610_v10  ;;  %v3744_v10 = vld [vmem:[#allocation8 + $0xb80] sm:$0xff]  ;;  %v3775_v17 = vld [vmem:[#allocation8 + $0xc78] sm:$0xff] }
 0x350   : > { %8123 = vmatpush1.bf16.msra.mxu1 %v8122_v6  ;;  %7613 = vmatprep.subr.bf16.mxu0 %v7612_v24  ;;  %v3748_v6 = vld [vmem:[#allocation8 + $0xba0] sm:$0xff]  ;;  %v3746_v24 = vld [vmem:[#allocation8 + $0xb90] sm:$0xff]  ;;  %v8148_v31 = vpack.c.bf16 %v3775_v17, %v3771_v55 }
 0x351   : > { %8125 = vmatprep.subr.bf16.mxu1 %v8124_v2  ;;  %v3757_v2 = vld [vmem:[#allocation8 + $0xbe8] sm:$0xff]  ;;  %v7626_v22 = vpack.c.bf16 %v3748_v6, %v3744_v10  ;;  %v8138_v25 = vpack.c.bf16 %v3750_v14, %v3746_v24  ;;  %v10615_v52 = vld [vmem:[#allocation18_spill] sm:$0xff]  ;;  %v3768_v14 = vld [vmem:[#allocation8 + $0xc40] sm:$0xff] }
 0x353   : > { %7615 = vmatpush1.bf16.msra.mxu0 %v7614_v54  ;;  %v7628_v54 = vpack.c.bf16 %v3757_v2, %v3753_v63  ;;  %v3772_v63 = vld [vmem:[#allocation8 + $0xc60] sm:$0xff]  ;;  %v3770_v2 = vld [vmem:[#allocation8 + $0xc50] sm:$0xff] }
 0x354   : > { %8127 = vmatpush1.bf16.msra.mxu1 %v8126_v47  ;;  %7617 = vmatprep.subr.bf16.mxu0 %v7616_v9  ;;  %v3752_v47 = vld [vmem:[#allocation8 + $0xbc0] sm:$0xff]  ;;  %v8150_v23 = vpack.c.bf16 %v3774_v50, %v3770_v2  ;;  %v3797_v2 = vld [vmem:[#allocation8 + $0xd28] sm:$0xff]  ;;  %v3799_v50 = vld [vmem:[#allocation8 + $0xd38] sm:$0xff] }
 0x355   : > { %8129 = vmatprep.subr.bf16.mxu1 %v8128_v40  ;;  %v3756_v9 = vld [vmem:[#allocation8 + $0xbe0] sm:$0xff]  ;;  %v3761_v40 = vld [vmem:[#allocation8 + $0xc08] sm:$0xff] }
 0x356   : > { %v7630_v38 = vpack.c.bf16 %v3756_v9, %v3752_v47  ;;  %v3783_v47 = vld [vmem:[#allocation8 + $0xcb8] sm:$0xff] }
 0x357   : > { %7619 = vmatpush1.bf16.msra.mxu0 %v7618_v13  ;;  %v8142_v13 = vpack.c.bf16 %v3758_v39, %v3754_v48  ;;  %v10617_v48 = vld [vmem:[#allocation21_spill] sm:$0xff]  ;;  %v7638_v39 = vpack.c.bf16 %v3772_v63, %v3768_v14 }
 0x358   : > { %8131 = vmatpush1.bf16.msra.mxu1 %v8130_v0  ;;  %7621 = vmatprep.subr.bf16.mxu0 %v7620_v42  ;;  %v7632_v0 = vpack.c.bf16 %v3765_v62, %v3761_v40  ;;  %v8499_v42 = vadd.f32 %v9855_v34, %v10088_v15  ;;  %v10616_v34 = vld [vmem:[#allocation23_spill] sm:$0xff]  ;;  %v3790_v14 = vld [vmem:[#allocation8 + $0xcf0] sm:$0xff]  ;;  %v3793_v63 = vld [vmem:[#allocation8 + $0xd08] sm:$0xff] }
 0x359   : > { %8133 = vmatprep.subr.bf16.mxu1 %v8132_v32  ;;  %v3762_v32 = vld [vmem:[#allocation8 + $0xc10] sm:$0xff]  ;;  %v8501_v6 = vadd.f32 %v10616_v34, %v10088_v15  ;;  %v10618_v62 = vld [vmem:[#allocation27_spill] sm:$0xff] }
 0x35a   : > { %v3269_v10 = vmax.f32 %v8499_v42, 0.0  ;;  %v8146_v24 = vpack.c.bf16 %v3766_v61, %v3762_v32  ;;  %v8503_v19 = vadd.f32 %v10618_v62, %v10088_v15  ;;  %v3787_v32 = vld [vmem:[#allocation8 + $0xcd8] sm:$0xff]  ;;  %v3784_v34 = vld [vmem:[#allocation8 + $0xcc0] sm:$0xff] }
 0x35b   : > { %7623 = vmatpush1.bf16.msra.mxu0 %v7622_v45  ;;  %v3252_v45 = vmax.f32 %v8496_v59, 0.0  ;;  %v3285_v40 = vmax.f32 %v8501_v6, 0.0  ;;  %v3776_v59 = vld [vmem:[#allocation8 + $0xc80] sm:$0xff]  ;;  %v3791_v61 = vld [vmem:[#allocation8 + $0xcf8] sm:$0xff] }
 0x35c   : > { %8135 = vmatpush1.bf16.msra.mxu1 %v8134_v5  ;;  %7625 = vmatprep.subr.bf16.mxu0 %v7624_v46  ;;  %v8498_v5 = vadd.f32 %v10615_v52, %v10100_v37  ;;  %v7634_v46 = vpack.c.bf16 %v3764_v4, %v3760_v20  ;;  %v3785_v20 = vld [vmem:[#allocation8 + $0xcc8] sm:$0xff]  ;;  %v10620_v52 = vld [vmem:[#allocation31_spill] sm:$0xff] }
 0x35d   : > { %8137 = vmatprep.subr.bf16.mxu1 %v8136_v1  ;;  %v7636_v1 = vpack.c.bf16 %v3773_v27, %v3769_v3  ;;  %v3789_v4 = vld [vmem:[#allocation8 + $0xce8] sm:$0xff]  ;;  %v3788_v6 = vld [vmem:[#allocation8 + $0xce0] sm:$0xff] }
 0x35e   : > { %v3268_v9 = vmax.f32 %v8498_v5, 0.0  ;;  %v10619_v27 = vld [vmem:[#allocation25_spill] sm:$0xff]  ;;  %v8505_v5 = vadd.f32 %v10620_v52, %v10088_v15  ;;  %v3792_v62 = vld [vmem:[#allocation8 + $0xd00] sm:$0xff] }
 0x35f   : > { %7627 = vmatpush1.bf16.msra.mxu0 %v7626_v22  ;;  %v3777_v22 = vld [vmem:[#allocation8 + $0xc88] sm:$0xff]  ;;  %v8502_v55 = vadd.f32 %v10619_v27, %v10100_v37 }
 0x360   : > { %8139 = vmatpush1.bf16.msra.mxu1 %v8138_v25  ;;  %7629 = vmatprep.subr.bf16.mxu0 %v7628_v54  ;;  %v3781_v25 = vld [vmem:[#allocation8 + $0xca8] sm:$0xff]  ;;  %v3779_v54 = vld [vmem:[#allocation8 + $0xc98] sm:$0xff] }
 0x361   : > { %8141 = vmatprep.subr.bf16.mxu1 %v8140_v57  ;;  %v8500_v57 = vadd.f32 %v10617_v48, %v10100_v37  ;;  %v8152_v42 = vpack.c.bf16 %v3783_v47, %v3779_v54  ;;  %v7646_v47 = vpack.c.bf16 %v3788_v6, %v3784_v34  ;;  %v10622_v48 = vld [vmem:[#allocation35_spill] sm:$0xff]  ;;  %v3806_v6 = vld [vmem:[#allocation8 + $0xd70] sm:$0xff] }
 0x363   : > { %7631 = vmatpush1.bf16.msra.mxu0 %v7630_v38  ;;  %v7640_v38 = vpack.c.bf16 %v3781_v25, %v3777_v22  ;;  %v3284_v3 = vmax.f32 %v8500_v57, 0.0  ;;  %v3300_v22 = vmax.f32 %v8502_v55, 0.0  ;;  %v10621_v25 = vld [vmem:[#allocation29_spill] sm:$0xff]  ;;  %v8507_v57 = vadd.f32 %v10622_v48, %v10088_v15  ;;  %v10624_v55 = vld [vmem:[#allocation39_spill] sm:$0xff] }
 0x364   : > { %8143 = vmatpush1.bf16.msra.mxu1 %v8142_v13  ;;  %7633 = vmatprep.subr.bf16.mxu0 %v7632_v0  ;;  %v3780_v13 = vld [vmem:[#allocation8 + $0xca0] sm:$0xff]  ;;  %v3778_v0 = vld [vmem:[#allocation8 + $0xc90] sm:$0xff]  ;;  %v8504_v54 = vadd.f32 %v10621_v25, %v10100_v37 }
 0x365   : > { %8145 = vmatprep.subr.bf16.mxu1 %v8144_v53  ;;  %v3782_v53 = vld [vmem:[#allocation8 + $0xcb0] sm:$0xff]  ;;  %v7642_v17 = vpack.c.bf16 %v3780_v13, %v3776_v59  ;;  %v3801_v13 = vld [vmem:[#allocation8 + $0xd48] sm:$0xff]  ;;  %v3333_v27 = vmax.f32 %v8507_v57, 0.0  ;;  %v10627_v57 = vld [vmem:[#allocation43_spill] sm:$0xff] }
 0x366   : > { %4713 = vmatmul.mubr.f32.vlgmr.msra.gmra.mrb[64].mxu0 %v3252_v45  ;;  %v3798_v59 = vld [vmem:[#allocation8 + $0xd30] sm:$0xff] }
 0x367   : > { %5617 = vmatmul.mubr.f32.vlgmr.msra.gmra.mrb[64].mxu1 %v3252_v45  ;;  %4718 = vmatprep.mubr.f32.mxu0 %v3269_v10  ;;  %v3301_v45 = vmax.f32 %v8503_v19, 0.0  ;;  %v3796_v19 = vld [vmem:[#allocation8 + $0xd20] sm:$0xff] }
 0x368   : > { %7635 = vmatpush1.bf16.msra.mxu0 %v7634_v46  ;;  %5622 = vmatprep.mubr.f32.mxu1 %v3269_v10  ;;  %v8154_v46 = vpack.c.bf16 %v3782_v53, %v3778_v0  ;;  %v7644_v10 = vpack.c.bf16 %v3789_v4, %v3785_v20  ;;  %v3805_v0 = vld [vmem:[#allocation8 + $0xd68] sm:$0xff]  ;;  %v3807_v53 = vld [vmem:[#allocation8 + $0xd78] sm:$0xff]  ;;  %v10550_v20 = vsub.s32 7, %v9917_v8  ;;  %v3316_v4 = vmax.f32 %v8504_v54, 0.0 }
 0x369   : > { %8147 = vmatpush1.bf16.msra.mxu1 %v8146_v24  ;;  %7637 = vmatprep.subr.bf16.mxu0 %v7636_v1  ;;  %v3786_v24 = vld [vmem:[#allocation8 + $0xcd0] sm:$0xff]  ;;  %v8156_v1 = vpack.c.bf16 %v3791_v61, %v3787_v32  ;;  %v7652_v52 = vpack.c.bf16 %v3805_v0, %v3801_v13  ;;  %v3817_v0 = vld [vmem:[#allocation8 + $0xdc8] sm:$0xff] }
 0x36a   : > { %4719 = vmatmul.mubr.f32.gmra.mrb[66].mxu0 %v3268_v9  ;;  %8149 = vmatprep.subr.bf16.mxu1 %v8148_v31  ;;  %v3795_v31 = vld [vmem:[#allocation8 + $0xd18] sm:$0xff]  ;;  %v10623_v32 = vld [vmem:[#allocation33_spill] sm:$0xff] }
 0x36b   : > { %5623 = vmatmul.mubr.f32.gmra.mrb[66].mxu1 %v3268_v9  ;;  %4724 = vmatprep.mubr.f32.mxu0 %v3285_v40  ;;  %v3317_v9 = vmax.f32 %v8505_v5, 0.0  ;;  %v8506_v61 = vadd.f32 %v10623_v32, %v10100_v37  ;;  %v3800_v5 = vld [vmem:[#allocation8 + $0xd40] sm:$0xff]  ;;  %v3814_v13 = vld [vmem:[#allocation8 + $0xdb0] sm:$0xff] }
 0x36c   : > { %7639 = vmatpush1.bf16.msra.mxu0 %v7638_v39  ;;  %5628 = vmatprep.mubr.f32.mxu1 %v3285_v40  ;;  %v8158_v39 = vpack.c.bf16 %v3790_v14, %v3786_v24  ;;  %v7648_v40 = vpack.c.bf16 %v3797_v2, %v3793_v63  ;;  %v3809_v24 = vld [vmem:[#allocation8 + $0xd88] sm:$0xff]  ;;  %v3811_v63 = vld [vmem:[#allocation8 + $0xd98] sm:$0xff] }
 0x36d   : > { %8151 = vmatpush1.bf16.msra.mxu1 %v8150_v23  ;;  %7641 = vmatprep.subr.bf16.mxu0 %v7640_v38  ;;  %v3794_v23 = vld [vmem:[#allocation8 + $0xd10] sm:$0xff]  ;;  %v8160_v38 = vpack.c.bf16 %v3799_v50, %v3795_v31  ;;  %v3815_v2 = vld [vmem:[#allocation8 + $0xdb8] sm:$0xff]  ;;  %v10132_v31 = vrot.slane %v10052_v33, %v10550_v20  ;;  %v3332_v50 = vmax.f32 %v8506_v61, 0.0  ;;  %v3853_v20 = vld [vmem:[#allocation8 + $0xee8] sm:$0xff] }
 0x36e   : > { %4725 = vmatmul.mubr.f32.gmra.mrb[68].mxu0 %v3284_v3  ;;  %8153 = vmatprep.subr.bf16.mxu1 %v8152_v42  ;;  %v3803_v42 = vld [vmem:[#allocation8 + $0xd58] sm:$0xff]  ;;  %v10629_v61 = vld [vmem:[#allocation41_spill] sm:$0xff] }
 0x36f   : > { %5629 = vmatmul.mubr.f32.gmra.mrb[68].mxu1 %v3284_v3  ;;  %4730 = vmatprep.mubr.f32.mxu0 %v3301_v45  ;;  %v7650_v3 = vpack.c.bf16 %v3796_v19, %v3792_v62  ;;  %v8164_v34 = vpack.c.bf16 %v3807_v53, %v3803_v42  ;;  %v3808_v19 = vld [vmem:[#allocation8 + $0xd80] sm:$0xff]  ;;  %v3821_v42 = vld [vmem:[#allocation8 + $0xde8] sm:$0xff] }
 0x370   : > { %7643 = vmatpush1.bf16.msra.mxu0 %v7642_v17  ;;  %5634 = vmatprep.mubr.f32.mxu1 %v3301_v45  ;;  %v8509_v17 = vadd.f32 %v10624_v55, %v10088_v15  ;;  %v8162_v45 = vpack.c.bf16 %v3798_v59, %v3794_v23  ;;  %v3812_v23 = vld [vmem:[#allocation8 + $0xda0] sm:$0xff]  ;;  %v8168_v59 = vpack.c.bf16 %v3815_v2, %v3811_v63  ;;  %v3822_v63 = vld [vmem:[#allocation8 + $0xdf0] sm:$0xff]  ;;  %v3825_v2 = vld [vmem:[#allocation8 + $0xe08] sm:$0xff] }
 0x371   : > { %8155 = vmatpush1.bf16.msra.mxu1 %v8154_v46  ;;  %7645 = vmatprep.subr.bf16.mxu0 %v7644_v10  ;;  %v3804_v46 = vld [vmem:[#allocation8 + $0xd60] sm:$0xff]  ;;  %v3802_v10 = vld [vmem:[#allocation8 + $0xd50] sm:$0xff] }
 0x372   : > { %4731 = vmatmul.mubr.f32.gmra.mrb[70].mxu0 %v3300_v22  ;;  %8157 = vmatprep.subr.bf16.mxu1 %v8156_v1  ;;  %v3813_v1 = vld [vmem:[#allocation8 + $0xda8] sm:$0xff]  ;;  %v3349_v48 = vmax.f32 %v8509_v17, 0.0  ;;  %v8166_v33 = vpack.c.bf16 %v3806_v6, %v3802_v10  ;;  %v7658_v17 = vpack.c.bf16 %v3812_v23, %v3808_v19  ;;  %v3816_v6 = vld [vmem:[#allocation8 + $0xdc0] sm:$0xff] }
 0x373   : > { %5635 = vmatmul.mubr.f32.gmra.mrb[70].mxu1 %v3300_v22  ;;  %4736 = vmatprep.mubr.f32.mxu0 %v3317_v9  ;;  %v10625_v22 = vld [vmem:[#allocation37_spill] sm:$0xff]  ;;  %v7656_v62 = vpack.c.bf16 %v3813_v1, %v3809_v24  ;;  %v3820_v24 = vld [vmem:[#allocation8 + $0xde0] sm:$0xff] }
 0x374   : > { %7647 = vmatpush1.bf16.msra.mxu0 %v7646_v47  ;;  %5640 = vmatprep.mubr.f32.mxu1 %v3317_v9  ;;  %v8508_v25 = vadd.f32 %v10625_v22, %v10100_v37  ;;  %v7654_v9 = vpack.c.bf16 %v3804_v46, %v3800_v5 }
 0x375   : > { %8159 = vmatpush1.bf16.msra.mxu1 %v8158_v39  ;;  %7649 = vmatprep.subr.bf16.mxu0 %v7648_v40  ;;  %v8511_v39 = vadd.f32 %v10627_v57, %v10088_v15  ;;  %v3819_v15 = vld [vmem:[#allocation8 + $0xdd8] sm:$0xff] }
 0x376   : > { %4737 = vmatmul.mubr.f32.gmra.mrb[72].mxu0 %v3316_v4  ;;  %8161 = vmatprep.subr.bf16.mxu1 %v8160_v38  ;;  %v3810_v38 = vld [vmem:[#allocation8 + $0xd90] sm:$0xff]  ;;  %v3348_v32 = vmax.f32 %v8508_v25, 0.0  ;;  %v3827_v25 = vld [vmem:[#allocation8 + $0xe18] sm:$0xff] }
 0x377   : > { %5641 = vmatmul.mubr.f32.gmra.mrb[72].mxu1 %v3316_v4  ;;  %4742 = vmatprep.mubr.f32.mxu0 %v3333_v27  ;;  %v10127_v14 = vpop.f32.mrb[48].mxu0  ;;  %v3823_v4 = vld [vmem:[#allocation8 + $0xdf8] sm:$0xff]  ;;  %v3365_v5 = vmax.f32 %v8511_v39, 0.0  ;;  %v8170_v10 = vpack.c.bf16 %v3814_v13, %v3810_v38  ;;  %v3828_v13 = vld [vmem:[#allocation8 + $0xe20] sm:$0xff] }
 0x378   : > { %7651 = vmatpush1.bf16.msra.mxu0 %v7650_v3  ;;  %5646 = vmatprep.mubr.f32.mxu1 %v3333_v27  ;;  %v10136_v54 = vpop.f32.mrb[48].mxu1  ;;  %v10138_v47 = vpop.f32.mrb[49].mxu0  ;;  %v8510_v3 = vadd.f32 %v10629_v61, %v10100_v37  ;;  %v3818_v37 = vld [vmem:[#allocation8 + $0xdd0] sm:$0xff]  ;;  %v8172_v1 = vpack.c.bf16 %v3823_v4, %v3819_v15  ;;  %v3833_v4 = vld [vmem:[#allocation8 + $0xe48] sm:$0xff] }
 0x379   : > { %10626 = vst [vmem:[#allocation18_spill] sm:$0xff] %v10136_v54  ;;  %8163 = vmatpush1.bf16.msra.mxu1 %v8162_v45  ;;  %v10142_v40 = vpop.f32.mrb[49].mxu1  ;;  %7653 = vmatprep.subr.bf16.mxu0 %v7652_v52  ;;  %v10631_v45 = vld [vmem:[#allocation17_spill] sm:$0xff]  ;;  %v8174_v23 = vpack.c.bf16 %v3822_v63, %v3818_v37  ;;  %v3836_v37 = vld [vmem:[#allocation8 + $0xe60] sm:$0xff] }
 0x37a   : > { %10628 = vst [vmem:[#allocation23_spill] sm:$0xff] %v10142_v40  ;;  %4743 = vmatmul.mubr.f32.gmra.mrb[74].mxu0 %v3332_v50  ;;  %8165 = vmatprep.subr.bf16.mxu1 %v8164_v34  ;;  %v8513_v52 = vadd.f32 %v10631_v45, %v10132_v31  ;;  %v7660_v34 = vpack.c.bf16 %v3821_v42, %v3817_v0  ;;  %v3826_v0 = vld [vmem:[#allocation8 + $0xe10] sm:$0xff]  ;;  %v3901_v54 = vld [vmem:[#allocation8 + $0x1068] sm:$0xff] }
 0x37b   : > { %5647 = vmatmul.mubr.f32.gmra.mrb[74].mxu1 %v3332_v50  ;;  %4748 = vmatprep.mubr.f32.mxu0 %v3349_v48  ;;  %v10144_v53 = vpop.f32.mrb[50].mxu0  ;;  %v3829_v50 = vld [vmem:[#allocation8 + $0xe28] sm:$0xff]  ;;  %v3830_v15 = vld [vmem:[#allocation8 + $0xe30] sm:$0xff] }
 0x37c   : > { %7655 = vmatpush1.bf16.msra.mxu0 %v7654_v9  ;;  %5652 = vmatprep.mubr.f32.mxu1 %v3349_v48  ;;  %v10148_v27 = vpop.f32.mrb[50].mxu1  ;;  %v10150_v55 = vpop.f32.mrb[51].mxu0  ;;  %v3831_v9 = vld [vmem:[#allocation8 + $0xe38] sm:$0xff]  ;;  %v3364_v48 = vmax.f32 %v8510_v3, 0.0  ;;  %v7664_v38 = vpack.c.bf16 %v3829_v50, %v3825_v2  ;;  %v3838_v2 = vld [vmem:[#allocation8 + $0xe70] sm:$0xff]  ;;  %v3841_v50 = vld [vmem:[#allocation8 + $0xe88] sm:$0xff] }
 0x37d   : > { %10630 = vst [vmem:[#allocation21_spill] sm:$0xff] %v10148_v27  ;;  %8167 = vmatpush1.bf16.msra.mxu1 %v8166_v33  ;;  %v10154_v46 = vpop.f32.mrb[51].mxu1  ;;  %7657 = vmatprep.subr.bf16.mxu0 %v7656_v62  ;;  %v7662_v33 = vpack.c.bf16 %v3820_v24, %v3816_v6  ;;  %v3255_v62 = vmax.f32 %v8513_v52, 0.0  ;;  %v8176_v42 = vpack.c.bf16 %v3831_v9, %v3827_v25  ;;  %v3835_v3 = vld [vmem:[#allocation8 + $0xe58] sm:$0xff]  ;;  %v3832_v24 = vld [vmem:[#allocation8 + $0xe40] sm:$0xff]  ;;  %v3845_v25 = vld [vmem:[#allocation8 + $0xea8] sm:$0xff] }
 0x37e   : > { %10632 = vst [vmem:[#allocation27_spill] sm:$0xff] %v10154_v46  ;;  %4749 = vmatmul.mubr.f32.gmra.mrb[76].mxu0 %v3348_v32  ;;  %8169 = vmatprep.subr.bf16.mxu1 %v8168_v59  ;;  %v3824_v59 = vld [vmem:[#allocation8 + $0xe00] sm:$0xff]  ;;  %v3879_v27 = vld [vmem:[#allocation8 + $0xfb8] sm:$0xff]  ;;  %v3902_v40 = vld [vmem:[#allocation8 + $0x1070] sm:$0xff] }
 0x37f   : > { %5653 = vmatmul.mubr.f32.gmra.mrb[76].mxu1 %v3348_v32  ;;  %4754 = vmatprep.mubr.f32.mxu0 %v3365_v5  ;;  %v10156_v22 = vpop.f32.mrb[52].mxu0  ;;  %v3837_v32 = vld [vmem:[#allocation8 + $0xe68] sm:$0xff] }
 0x380   : > { %7659 = vmatpush1.bf16.msra.mxu0 %v7658_v17  ;;  %5658 = vmatprep.mubr.f32.mxu1 %v3365_v5  ;;  %v10158_v57 = vpop.f32.mrb[52].mxu1  ;;  %v10160_v39 = vpop.f32.mrb[53].mxu0  ;;  %v3839_v17 = vld [vmem:[#allocation8 + $0xe78] sm:$0xff]  ;;  %v7666_v5 = vpack.c.bf16 %v3828_v13, %v3824_v59  ;;  %v7668_v6 = vpack.c.bf16 %v3837_v32, %v3833_v4  ;;  %v3842_v4 = vld [vmem:[#allocation8 + $0xe90] sm:$0xff] }
 0x381   : > { %10633 = vst [vmem:[#allocation25_spill] sm:$0xff] %v10158_v57  ;;  %8171 = vmatpush1.bf16.msra.mxu1 %v8170_v10  ;;  %v10162_v19 = vpop.f32.mrb[53].mxu1  ;;  %7661 = vmatprep.subr.bf16.mxu0 %v7660_v34  ;;  %v8178_v34 = vpack.c.bf16 %v3830_v15, %v3826_v0  ;;  %v8180_v63 = vpack.c.bf16 %v3839_v17, %v3835_v3  ;;  %v3844_v15 = vld [vmem:[#allocation8 + $0xea0] sm:$0xff]  ;;  %v3846_v3 = vld [vmem:[#allocation8 + $0xeb0] sm:$0xff]  ;;  %v3849_v17 = vld [vmem:[#allocation8 + $0xec8] sm:$0xff] }
 0x382   : > { %10634 = vst [vmem:[#allocation31_spill] sm:$0xff] %v10162_v19  ;;  %4755 = vmatmul.mubr.f32.gmra.mrb[78].mxu0 %v3364_v48  ;;  %8173 = vmatprep.subr.bf16.mxu1 %v8172_v1  ;;  %v3834_v1 = vld [vmem:[#allocation8 + $0xe50] sm:$0xff]  ;;  %v7672_v0 = vpack.c.bf16 %v3845_v25, %v3841_v50  ;;  %v3852_v50 = vld [vmem:[#allocation8 + $0xee0] sm:$0xff]  ;;  %v3871_v57 = vld [vmem:[#allocation8 + $0xf78] sm:$0xff] }
 0x383   : > { %5659 = vmatmul.mubr.f32.gmra.mrb[78].mxu1 %v3364_v48  ;;  %4825 = vmatprep.mubr.f32.mxu0 %v3255_v62  ;;  %v10164_v61 = vpop.f32.mrb[54].mxu0  ;;  %v3843_v48 = vld [vmem:[#allocation8 + $0xe98] sm:$0xff]  ;;  %v8182_v13 = vpack.c.bf16 %v3838_v2, %v3834_v1  ;;  %v8186_v1 = vpack.c.bf16 %v3846_v3, %v3842_v4  ;;  %v3848_v2 = vld [vmem:[#allocation8 + $0xec0] sm:$0xff]  ;;  %v3850_v25 = vld [vmem:[#allocation8 + $0xed0] sm:$0xff] }
 0x384   : > { %7663 = vmatpush1.bf16.msra.mxu0 %v7662_v33  ;;  %5729 = vmatprep.mubr.f32.mxu1 %v3255_v62  ;;  %v10166_v45 = vpop.f32.mrb[54].mxu1  ;;  %v10168_v52 = vpop.f32.mrb[55].mxu0  ;;  %v3847_v33 = vld [vmem:[#allocation8 + $0xeb8] sm:$0xff]  ;;  %v3877_v19 = vld [vmem:[#allocation8 + $0xfa8] sm:$0xff] }
 0x385   : > { %10635 = vst [vmem:[#allocation29_spill] sm:$0xff] %v10166_v45  ;;  %8175 = vmatpush1.bf16.msra.mxu1 %v8174_v23  ;;  %v10170_v10 = vpop.f32.mrb[55].mxu1  ;;  %7665 = vmatprep.subr.bf16.mxu0 %v7664_v38  ;;  %v7670_v38 = vpack.c.bf16 %v3836_v37, %v3832_v24  ;;  %v8184_v32 = vpack.c.bf16 %v3847_v33, %v3843_v48  ;;  %v3854_v33 = vld [vmem:[#allocation8 + $0xef0] sm:$0xff]  ;;  %v3863_v45 = vld [vmem:[#allocation8 + $0xf38] sm:$0xff] }
 0x386   : > { %10636 = vst [vmem:[#allocation35_spill] sm:$0xff] %v10170_v10  ;;  %8177 = vmatprep.subr.bf16.mxu1 %v8176_v42  ;;  %v3840_v42 = vld [vmem:[#allocation8 + $0xe80] sm:$0xff]  ;;  %v8188_v48 = vpack.c.bf16 %v3855_v30, %v3851_v56  ;;  %v3869_v10 = vld [vmem:[#allocation8 + $0xf68] sm:$0xff] }
 0x387   : > { %v10172_v9 = vpop.f32.mrb[56].mxu0  ;;  %v3856_v30 = vld [vmem:[#allocation8 + $0xf00] sm:$0xff] }
 0x388   : > { %7667 = vmatpush1.bf16.msra.mxu0 %v7666_v5  ;;  %v10174_v62 = vpop.f32.mrb[56].mxu1  ;;  %v10176_v23 = vpop.f32.mrb[57].mxu0  ;;  %v3860_v56 = vld [vmem:[#allocation8 + $0xf20] sm:$0xff] }
 0x389   : > { %10637 = vst [vmem:[#allocation33_spill] sm:$0xff] %v10174_v62  ;;  %8179 = vmatpush1.bf16.msra.mxu1 %v8178_v34  ;;  %v10178_v59 = vpop.f32.mrb[57].mxu1  ;;  %7669 = vmatprep.subr.bf16.mxu0 %v7668_v6  ;;  %v7674_v6 = vpack.c.bf16 %v3844_v15, %v3840_v42  ;;  %v3857_v62 = vld [vmem:[#allocation8 + $0xf08] sm:$0xff]  ;;  %v8190_v15 = vpack.c.bf16 %v3854_v33, %v3850_v25  ;;  %v3866_v25 = vld [vmem:[#allocation8 + $0xf50] sm:$0xff] }
 0x38a   : > { %10638 = vst [vmem:[#allocation39_spill] sm:$0xff] %v10178_v59  ;;  %8181 = vmatprep.subr.bf16.mxu1 %v8180_v63  ;;  %v7676_v63 = vpack.c.bf16 %v3853_v20, %v3849_v17  ;;  %v3861_v59 = vld [vmem:[#allocation8 + $0xf28] sm:$0xff]  ;;  %v3862_v17 = vld [vmem:[#allocation8 + $0xf30] sm:$0xff] }
 0x38b   : > { %v10180_v5 = vpop.f32.mrb[58].mxu0  ;;  %v7680_v4 = vpack.c.bf16 %v3861_v59, %v3857_v62  ;;  %v3870_v33 = vld [vmem:[#allocation8 + $0xf70] sm:$0xff] }
 0x38c   : > { %7671 = vmatpush1.bf16.msra.mxu0 %v7670_v38  ;;  %v10182_v24 = vpop.f32.mrb[58].mxu1  ;;  %v10184_v34 = vpop.f32.mrb[59].mxu0 }
 0x38d   : > { %10639 = vst [vmem:[#allocation37_spill] sm:$0xff] %v10182_v24  ;;  %8183 = vmatpush1.bf16.msra.mxu1 %v8182_v13  ;;  %v10186_v37 = vpop.f32.mrb[59].mxu1  ;;  %7673 = vmatprep.subr.bf16.mxu0 %v7672_v0  ;;  %v3859_v24 = vld [vmem:[#allocation8 + $0xf18] sm:$0xff]  ;;  %v7678_v0 = vpack.c.bf16 %v3852_v50, %v3848_v2 }
 0x38e   : > { %10640 = vst [vmem:[#allocation43_spill] sm:$0xff] %v10186_v37  ;;  %8185 = vmatprep.subr.bf16.mxu1 %v8184_v32  ;;  %v3858_v32 = vld [vmem:[#allocation8 + $0xf10] sm:$0xff]  ;;  %v8192_v3 = vpack.c.bf16 %v3863_v45, %v3859_v24  ;;  %v3865_v37 = vld [vmem:[#allocation8 + $0xf48] sm:$0xff]  ;;  %v3864_v45 = vld [vmem:[#allocation8 + $0xf40] sm:$0xff] }
 0x38f   : > { %v10188_v38 = vpop.f32.mrb[60].mxu0  ;;  %v8194_v59 = vpack.c.bf16 %v3862_v17, %v3858_v32  ;;  %v7684_v50 = vpack.c.bf16 %v3869_v10, %v3865_v37  ;;  %v3868_v24 = vld [vmem:[#allocation8 + $0xf60] sm:$0xff]  ;;  %v3874_v37 = vld [vmem:[#allocation8 + $0xf90] sm:$0xff]  ;;  %v3883_v17 = vld [vmem:[#allocation8 + $0xfd8] sm:$0xff] }
 0x390   : > { %10641 = vst [vmem:[#allocation41_spill] sm:$0xff] %v10188_v38  ;;  %7675 = vmatpush1.bf16.msra.mxu0 %v7674_v6  ;;  %v10190_v42 = vpop.f32.mrb[60].mxu1  ;;  %v10192_v13 = vpop.f32.mrb[61].mxu0  ;;  %v3876_v10 = vld [vmem:[#allocation8 + $0xfa0] sm:$0xff]  ;;  %v3941_v38 = vld [vmem:[#allocation8 + $0x11a8] sm:$0xff] }
 0x391   : > { %10642 = vst [vmem:[#allocation17_spill] sm:$0xff] %v10190_v42  ;;  %10643 = vst [vmem:[#allocation63_spill] sm:$0xff] %v10192_v13  ;;  %8187 = vmatpush1.bf16.msra.mxu1 %v8186_v1  ;;  %v10194_v20 = vpop.f32.mrb[61].mxu1  ;;  %7677 = vmatprep.subr.bf16.mxu0 %v7676_v63  ;;  %v3867_v42 = vld [vmem:[#allocation8 + $0xf58] sm:$0xff]  ;;  %v7682_v63 = vpack.c.bf16 %v3860_v56, %v3856_v30  ;;  %v10553_v30 = vsub.s32 6, %v9917_v8  ;;  %v3872_v56 = vld [vmem:[#allocation8 + $0xf80] sm:$0xff] }
 0x392   : > { %10644 = vst [vmem:[#allocation64_spill] sm:$0xff] %v10194_v20  ;;  %8189 = vmatprep.subr.bf16.mxu1 %v8188_v48  ;;  %v8196_v48 = vpack.c.bf16 %v3871_v57, %v3867_v42  ;;  %v3873_v20 = vld [vmem:[#allocation8 + $0xf88] sm:$0xff]  ;;  %v7690_v46 = vpack.c.bf16 %v3876_v10, %v3872_v56 }
 0x393   : > { %v10196_v6 = vpop.f32.mrb[62].mxu0  ;;  %v3881_v57 = vld [vmem:[#allocation8 + $0xfc8] sm:$0xff] }
 0x394   : > { %10645 = vst [vmem:[#allocation65_spill] sm:$0xff] %v10196_v6  ;;  %7679 = vmatpush1.bf16.msra.mxu0 %v7678_v0  ;;  %v10198_v2 = vpop.f32.mrb[62].mxu1  ;;  %v10200_v1 = vpop.f32.mrb[63].mxu0  ;;  %v3875_v0 = vld [vmem:[#allocation8 + $0xf98] sm:$0xff]  ;;  %v3885_v42 = vld [vmem:[#allocation8 + $0xfe8] sm:$0xff] }
 0x395   : > { %10646 = vst [vmem:[#allocation66_spill] sm:$0xff] %v10198_v2  ;;  %10647 = vst [vmem:[#allocation67_spill] sm:$0xff] %v10200_v1  ;;  %8191 = vmatpush1.bf16.msra.mxu1 %v8190_v15  ;;  %v10202_v62 = vpop.f32.mrb[63].mxu1  ;;  %7681 = vmatprep.subr.bf16.mxu0 %v7680_v4  ;;  %v7686_v2 = vpack.c.bf16 %v3868_v24, %v3864_v45  ;;  %v8198_v15 = vpack.c.bf16 %v3870_v33, %v3866_v25  ;;  %v3882_v24 = vld [vmem:[#allocation8 + $0xfd0] sm:$0xff]  ;;  %v3893_v33 = vld [vmem:[#allocation8 + $0x1028] sm:$0xff] }
 0x396   : > { %10648 = vst [vmem:[#allocation68_spill] sm:$0xff] %v10202_v62  ;;  %8193 = vmatprep.subr.bf16.mxu1 %v8192_v3  ;;  %v7688_v4 = vpack.c.bf16 %v3877_v19, %v3873_v20  ;;  %v8200_v32 = vpack.c.bf16 %v3879_v27, %v3875_v0  ;;  %v3878_v3 = vld [vmem:[#allocation8 + $0xfb0] sm:$0xff]  ;;  %v3887_v62 = vld [vmem:[#allocation8 + $0xff8] sm:$0xff]  ;;  %v7692_v20 = vpack.c.bf16 %v3885_v42, %v3881_v57  ;;  %v10649_v10 = vld [vmem:[#allocation16_spill] sm:$0xff] }
 0x397   : > { %v8202_v19 = vpack.c.bf16 %v3878_v3, %v3874_v37  ;;  %v8204_v27 = vpack.c.bf16 %v3887_v62, %v3883_v17  ;;  %v3886_v25 = vld [vmem:[#allocation8 + $0xff0] sm:$0xff]  ;;  %v3891_v0 = vld [vmem:[#allocation8 + $0x1018] sm:$0xff]  ;;  %v10650_v37 = vld [vmem:[#allocation20_spill] sm:$0xff] }
 0x398   : > { %7683 = vmatpush1.bf16.msra.mxu0 %v7682_v63  ;;  %v9166_v63 = vld [vmem:[#allocation7] sm:$0xff]  ;;  %v8515_v3 = vadd.f32 %v10650_v37, %v10132_v31  ;;  %v3888_v62 = vld [vmem:[#allocation8 + $0x1000] sm:$0xff]  ;;  %v3909_v6 = vld [vmem:[#allocation8 + $0x10a8] sm:$0xff] }
 0x399   : > { %8195 = vmatpush1.bf16.msra.mxu1 %v8194_v59  ;;  %7685 = vmatprep.subr.bf16.mxu0 %v7684_v50  ;;  %v10207_v45 = vrot.slane %v9166_v63, %v10553_v30  ;;  %v3880_v59 = vld [vmem:[#allocation8 + $0xfc0] sm:$0xff]  ;;  %v3890_v42 = vld [vmem:[#allocation8 + $0x1010] sm:$0xff]  ;;  %v3897_v30 = vld [vmem:[#allocation8 + $0x1048] sm:$0xff] }
 0x39a   : > { %8197 = vmatprep.subr.bf16.mxu1 %v8196_v48  ;;  %v3884_v50 = vld [vmem:[#allocation8 + $0xfe0] sm:$0xff]  ;;  %v3889_v48 = vld [vmem:[#allocation8 + $0x1008] sm:$0xff]  ;;  %v3894_v17 = vld [vmem:[#allocation8 + $0x1030] sm:$0xff] }
 0x39b   : > { %v7694_v56 = vpack.c.bf16 %v3884_v50, %v3880_v59  ;;  %v8512_v63 = vadd.f32 %v10649_v10, %v10207_v45  ;;  %v3892_v57 = vld [vmem:[#allocation8 + $0x1020] sm:$0xff]  ;;  %v3903_v59 = vld [vmem:[#allocation8 + $0x1078] sm:$0xff]  ;;  %v3898_v37 = vld [vmem:[#allocation8 + $0x1050] sm:$0xff] }
 0x39c   : > { %7687 = vmatpush1.bf16.msra.mxu0 %v7686_v2  ;;  %v3895_v2 = vld [vmem:[#allocation8 + $0x1038] sm:$0xff]  ;;  %v3900_v10 = vld [vmem:[#allocation8 + $0x1060] sm:$0xff]  ;;  %v3913_v1 = vld [vmem:[#allocation8 + $0x10c8] sm:$0xff] }
 0x39d   : > { %8199 = vmatpush1.bf16.msra.mxu1 %v8198_v15  ;;  %7689 = vmatprep.subr.bf16.mxu0 %v7688_v4  ;;  %v8206_v15 = vpack.c.bf16 %v3886_v25, %v3882_v24  ;;  %v7696_v4 = vpack.c.bf16 %v3893_v33, %v3889_v48  ;;  %v3254_v50 = vmax.f32 %v8512_v63, 0.0  ;;  %v7698_v24 = vpack.c.bf16 %v3892_v57, %v3888_v62  ;;  %v3905_v63 = vld [vmem:[#allocation8 + $0x1088] sm:$0xff] }
 0x39e   : > { %8201 = vmatprep.subr.bf16.mxu1 %v8200_v32  ;;  %v8208_v32 = vpack.c.bf16 %v3895_v2, %v3891_v0  ;;  %v3271_v25 = vmax.f32 %v8515_v3, 0.0  ;;  %v8210_v33 = vpack.c.bf16 %v3894_v17, %v3890_v42  ;;  %v7700_v0 = vpack.c.bf16 %v3901_v54, %v3897_v30  ;;  %v3896_v2 = vld [vmem:[#allocation8 + $0x1040] sm:$0xff]  ;;  %v10653_v3 = vld [vmem:[#allocation22_spill] sm:$0xff]  ;;  %v3949_v13 = vld [vmem:[#allocation8 + $0x11e8] sm:$0xff] }
 0x39f   : > { %v8516_v57 = vadd.f32 %v10653_v3, %v10207_v45  ;;  %v10654_v30 = vld [vmem:[#allocation28_spill] sm:$0xff]  ;;  %v8214_v17 = vpack.c.bf16 %v3902_v40, %v3898_v37 }
 0x3a0   : > { %7691 = vmatpush1.bf16.msra.mxu0 %v7690_v46  ;;  %v3899_v46 = vld [vmem:[#allocation8 + $0x1058] sm:$0xff]  ;;  %v8519_v42 = vadd.f32 %v10654_v30, %v10132_v31  ;;  %v3917_v3 = vld [vmem:[#allocation8 + $0x10e8] sm:$0xff] }
 0x3a1   : > { %8203 = vmatpush1.bf16.msra.mxu1 %v8202_v19  ;;  %7693 = vmatprep.subr.bf16.mxu0 %v7692_v20  ;;  %v10651_v19 = vld [vmem:[#allocation19_spill] sm:$0xff]  ;;  %v3921_v30 = vld [vmem:[#allocation8 + $0x1108] sm:$0xff] }
 0x3a2   : > { %8205 = vmatprep.subr.bf16.mxu1 %v8204_v27  ;;  %v8514_v20 = vadd.f32 %v10651_v19, %v10207_v45  ;;  %v10652_v27 = vld [vmem:[#allocation24_spill] sm:$0xff]  ;;  %v3906_v19 = vld [vmem:[#allocation8 + $0x1090] sm:$0xff] }
 0x3a3   : > { %v8517_v48 = vadd.f32 %v10652_v27, %v10132_v31  ;;  %v3910_v27 = vld [vmem:[#allocation8 + $0x10b0] sm:$0xff] }
 0x3a4   : > { %7695 = vmatpush1.bf16.msra.mxu0 %v7694_v56  ;;  %v8212_v56 = vpack.c.bf16 %v3903_v59, %v3899_v46  ;;  %v3270_v62 = vmax.f32 %v8514_v20, 0.0  ;;  %v7704_v46 = vpack.c.bf16 %v3909_v6, %v3905_v63  ;;  %v3904_v59 = vld [vmem:[#allocation8 + $0x1080] sm:$0xff]  ;;  %v3303_v6 = vmax.f32 %v8519_v42, 0.0 }
 0x3a5   : > { %8207 = vmatpush1.bf16.msra.mxu1 %v8206_v15  ;;  %7697 = vmatprep.subr.bf16.mxu0 %v7696_v4  ;;  %v3907_v15 = vld [vmem:[#allocation8 + $0x1098] sm:$0xff]  ;;  %v3287_v54 = vmax.f32 %v8517_v48, 0.0  ;;  %v3286_v48 = vmax.f32 %v8516_v57, 0.0  ;;  %v8218_v37 = vpack.c.bf16 %v3910_v27, %v3906_v19  ;;  %v3912_v63 = vld [vmem:[#allocation8 + $0x10c0] sm:$0xff]  ;;  %v3918_v57 = vld [vmem:[#allocation8 + $0x10f0] sm:$0xff] }
 0x3a6   : > { %8209 = vmatprep.subr.bf16.mxu1 %v8208_v32  ;;  %v3911_v4 = vld [vmem:[#allocation8 + $0x10b8] sm:$0xff]  ;;  %v7702_v32 = vpack.c.bf16 %v3900_v10, %v3896_v2 }
 0x3a7   : > { %4826 = vmatmul.mubr.f32.vlgmr.msra.gmra.mrb[64].mxu0 %v3254_v50  ;;  %v8216_v20 = vpack.c.bf16 %v3911_v4, %v3907_v15  ;;  %v10655_v2 = vld [vmem:[#allocation26_spill] sm:$0xff]  ;;  %v3916_v15 = vld [vmem:[#allocation8 + $0x10e0] sm:$0xff] }
 0x3a8   : > { %5730 = vmatmul.mubr.f32.vlgmr.msra.gmra.mrb[64].mxu1 %v3254_v50  ;;  %4831 = vmatprep.mubr.f32.mxu0 %v3271_v25  ;;  %v3908_v50 = vld [vmem:[#allocation8 + $0x10a0] sm:$0xff]  ;;  %v3914_v4 = vld [vmem:[#allocation8 + $0x10d0] sm:$0xff] }
 0x3a9   : > { %7699 = vmatpush1.bf16.msra.mxu0 %v7698_v24  ;;  %5735 = vmatprep.mubr.f32.mxu1 %v3271_v25  ;;  %v3915_v24 = vld [vmem:[#allocation8 + $0x10d8] sm:$0xff]  ;;  %v7706_v40 = vpack.c.bf16 %v3908_v50, %v3904_v59  ;;  %v10658_v50 = vld [vmem:[#allocation36_spill] sm:$0xff] }
 0x3aa   : > { %8211 = vmatpush1.bf16.msra.mxu1 %v8210_v33  ;;  %7701 = vmatprep.subr.bf16.mxu0 %v7700_v0  ;;  %v3919_v25 = vld [vmem:[#allocation8 + $0x10f8] sm:$0xff]  ;;  %v8518_v33 = vadd.f32 %v10655_v2, %v10207_v45  ;;  %v10656_v0 = vld [vmem:[#allocation32_spill] sm:$0xff]  ;;  %v8523_v19 = vadd.f32 %v10658_v50, %v10132_v31  ;;  %v3934_v50 = vld [vmem:[#allocation8 + $0x1170] sm:$0xff] }
 0x3ab   : > { %4832 = vmatmul.mubr.f32.gmra.mrb[66].mxu0 %v3270_v62  ;;  %8213 = vmatprep.subr.bf16.mxu1 %v8212_v56  ;;  %v8521_v10 = vadd.f32 %v10656_v0, %v10132_v31  ;;  %v7708_v56 = vpack.c.bf16 %v3917_v3, %v3913_v1  ;;  %v3925_v2 = vld [vmem:[#allocation8 + $0x1128] sm:$0xff]  ;;  %v10657_v59 = vld [vmem:[#allocation30_spill] sm:$0xff]  ;;  %v7710_v1 = vpack.c.bf16 %v3916_v15, %v3912_v63  ;;  %v3920_v3 = vld [vmem:[#allocation8 + $0x1100] sm:$0xff] }
 0x3ac   : > { %5736 = vmatmul.mubr.f32.gmra.mrb[66].mxu1 %v3270_v62  ;;  %4837 = vmatprep.mubr.f32.mxu0 %v3287_v54  ;;  %v8220_v62 = vpack.c.bf16 %v3919_v25, %v3915_v24  ;;  %v3302_v42 = vmax.f32 %v8518_v33, 0.0  ;;  %v7712_v27 = vpack.c.bf16 %v3925_v2, %v3921_v30  ;;  %v3924_v24 = vld [vmem:[#allocation8 + $0x1120] sm:$0xff]  ;;  %v3922_v25 = vld [vmem:[#allocation8 + $0x1110] sm:$0xff]  ;;  %v3929_v0 = vld [vmem:[#allocation8 + $0x1148] sm:$0xff] }
 0x3ad   : > { %7703 = vmatpush1.bf16.msra.mxu0 %v7702_v32  ;;  %5741 = vmatprep.mubr.f32.mxu1 %v3287_v54  ;;  %v3923_v32 = vld [vmem:[#allocation8 + $0x1118] sm:$0xff]  ;;  %v3926_v33 = vld [vmem:[#allocation8 + $0x1130] sm:$0xff]  ;;  %v7714_v15 = vpack.c.bf16 %v3924_v24, %v3920_v3 }
 0x3ae   : > { %8215 = vmatpush1.bf16.msra.mxu1 %v8214_v17  ;;  %7705 = vmatprep.subr.bf16.mxu0 %v7704_v46  ;;  %v3927_v54 = vld [vmem:[#allocation8 + $0x1138] sm:$0xff]  ;;  %v8520_v17 = vadd.f32 %v10657_v59, %v10207_v45  ;;  %v3319_v46 = vmax.f32 %v8521_v10, 0.0  ;;  %v3933_v59 = vld [vmem:[#allocation8 + $0x1168] sm:$0xff]  ;;  %v8226_v30 = vpack.c.bf16 %v3926_v33, %v3922_v25 }
 0x3af   : > { %4838 = vmatmul.mubr.f32.gmra.mrb[68].mxu0 %v3286_v48  ;;  %8217 = vmatprep.subr.bf16.mxu1 %v8216_v20  ;;  %v8222_v20 = vpack.c.bf16 %v3918_v57, %v3914_v4  ;;  %v10659_v63 = vld [vmem:[#allocation34_spill] sm:$0xff]  ;;  %v3335_v4 = vmax.f32 %v8523_v19, 0.0  ;;  %v7716_v2 = vpack.c.bf16 %v3933_v59, %v3929_v0  ;;  %v10663_v33 = vld [vmem:[#allocation44_spill] sm:$0xff] }
 0x3b0   : > { %5742 = vmatmul.mubr.f32.gmra.mrb[68].mxu1 %v3286_v48  ;;  %4843 = vmatprep.mubr.f32.mxu0 %v3303_v6  ;;  %v8224_v48 = vpack.c.bf16 %v3927_v54, %v3923_v32  ;;  %v3318_v10 = vmax.f32 %v8520_v17, 0.0  ;;  %v3928_v32 = vld [vmem:[#allocation8 + $0x1140] sm:$0xff]  ;;  %v10661_v3 = vld [vmem:[#allocation38_spill] sm:$0xff]  ;;  %v8527_v0 = vadd.f32 %v10663_v33, %v10132_v31 }
 0x3b1   : > { %7707 = vmatpush1.bf16.msra.mxu0 %v7706_v40  ;;  %5747 = vmatprep.mubr.f32.mxu1 %v3303_v6  ;;  %v3931_v40 = vld [vmem:[#allocation8 + $0x1158] sm:$0xff]  ;;  %v3932_v54 = vld [vmem:[#allocation8 + $0x1160] sm:$0xff] }
 0x3b2   : > { %8219 = vmatpush1.bf16.msra.mxu1 %v8218_v37  ;;  %7709 = vmatprep.subr.bf16.mxu0 %v7708_v56  ;;  %v3935_v6 = vld [vmem:[#allocation8 + $0x1178] sm:$0xff]  ;;  %v8522_v37 = vadd.f32 %v10659_v63, %v10207_v45  ;;  %v3937_v63 = vld [vmem:[#allocation8 + $0x1188] sm:$0xff]  ;;  %v7718_v25 = vpack.c.bf16 %v3932_v54, %v3928_v32 }
 0x3b3   : > { %4844 = vmatmul.mubr.f32.gmra.mrb[70].mxu0 %v3302_v42  ;;  %8221 = vmatprep.subr.bf16.mxu1 %v8220_v62  ;;  %v10231_v56 = vld [vmem:[#allocation7 + $0x8] sm:$0xff]  ;;  %v10660_v62 = vld [vmem:[#allocation40_spill] sm:$0xff]  ;;  %v8228_v17 = vpack.c.bf16 %v3935_v6, %v3931_v40  ;;  %v7720_v40 = vpack.c.bf16 %v3941_v38, %v3937_v63  ;;  %v3946_v63 = vld [vmem:[#allocation8 + $0x11d0] sm:$0xff] }
 0x3b4   : > { %5748 = vmatmul.mubr.f32.gmra.mrb[70].mxu1 %v3302_v42  ;;  %4849 = vmatprep.mubr.f32.mxu0 %v3319_v46  ;;  %v8525_v57 = vadd.f32 %v10660_v62, %v10132_v31  ;;  %v3930_v42 = vld [vmem:[#allocation8 + $0x1150] sm:$0xff]  ;;  %v3334_v19 = vmax.f32 %v8522_v37, 0.0  ;;  %v3936_v6 = vld [vmem:[#allocation8 + $0x1180] sm:$0xff] }
 0x3b5   : > { %7711 = vmatpush1.bf16.msra.mxu0 %v7710_v1  ;;  %5753 = vmatprep.mubr.f32.mxu1 %v3319_v46  ;;  %v3939_v1 = vld [vmem:[#allocation8 + $0x1198] sm:$0xff]  ;;  %v8230_v59 = vpack.c.bf16 %v3934_v50, %v3930_v42  ;;  %v3938_v37 = vld [vmem:[#allocation8 + $0x1190] sm:$0xff]  ;;  %v3948_v50 = vld [vmem:[#allocation8 + $0x11e0] sm:$0xff] }
 0x3b6   : > { %8223 = vmatpush1.bf16.msra.mxu1 %v8222_v20  ;;  %7713 = vmatprep.subr.bf16.mxu0 %v7712_v27  ;;  %v3943_v46 = vld [vmem:[#allocation8 + $0x11b8] sm:$0xff]  ;;  %v8524_v20 = vadd.f32 %v10661_v3, %v10207_v45  ;;  %v10662_v27 = vld [vmem:[#allocation45_spill] sm:$0xff] }
 0x3b7   : > { %4850 = vmatmul.mubr.f32.gmra.mrb[72].mxu0 %v3318_v10  ;;  %8225 = vmatprep.subr.bf16.mxu1 %v8224_v48  ;;  %v10239_v24 = vrot.slane %v10231_v56, %v10662_v27  ;;  %v3351_v48 = vmax.f32 %v8525_v57, 0.0  ;;  %v8232_v62 = vpack.c.bf16 %v3943_v46, %v3939_v1  ;;  %v3942_v3 = vld [vmem:[#allocation8 + $0x11b0] sm:$0xff]  ;;  %v3945_v27 = vld [vmem:[#allocation8 + $0x11c8] sm:$0xff] }
 0x3b8   : > { %5754 = vmatmul.mubr.f32.gmra.mrb[72].mxu1 %v3318_v10  ;;  %4855 = vmatprep.mubr.f32.mxu0 %v3335_v4  ;;  %v3940_v10 = vld [vmem:[#allocation8 + $0x11a0] sm:$0xff]  ;;  %v3350_v57 = vmax.f32 %v8524_v20, 0.0  ;;  %v10664_v31 = vld [vmem:[#allocation42_spill] sm:$0xff]  ;;  %v8234_v54 = vpack.c.bf16 %v3942_v3, %v3938_v37  ;;  %v7724_v42 = vpack.c.bf16 %v3949_v13, %v3945_v27  ;;  %v3961_v37 = vld [vmem:[#allocation8 + $0x1248] sm:$0xff] }
 0x3b9   : > { %7715 = vmatpush1.bf16.msra.mxu0 %v7714_v15  ;;  %5759 = vmatprep.mubr.f32.mxu1 %v3335_v4  ;;  %v3947_v15 = vld [vmem:[#allocation8 + $0x11d8] sm:$0xff]  ;;  %v7722_v38 = vpack.c.bf16 %v3940_v10, %v3936_v6  ;;  %v8529_v32 = vadd.f32 %v9985_v49, %v10239_v24  ;;  %v3950_v46 = vld [vmem:[#allocation8 + $0x11f0] sm:$0xff] }
 0x3ba   : > { %8227 = vmatpush1.bf16.msra.mxu1 %v8226_v30  ;;  %7717 = vmatprep.subr.bf16.mxu0 %v7716_v2  ;;  %v3951_v4 = vld [vmem:[#allocation8 + $0x11f8] sm:$0xff]  ;;  %v8526_v30 = vadd.f32 %v10664_v31, %v10207_v45  ;;  %v3367_v2 = vmax.f32 %v8527_v0, 0.0  ;;  %v3957_v45 = vld [vmem:[#allocation8 + $0x1228] sm:$0xff]  ;;  %v8238_v13 = vpack.c.bf16 %v3950_v46, %v3946_v63  ;;  %v3952_v0 = vld [vmem:[#allocation8 + $0x1200] sm:$0xff] }
 0x3bb   : > { %4856 = vmatmul.mubr.f32.gmra.mrb[74].mxu0 %v3334_v19  ;;  %8229 = vmatprep.subr.bf16.mxu1 %v8228_v17  ;;  %v3944_v17 = vld [vmem:[#allocation8 + $0x11c0] sm:$0xff]  ;;  %v8236_v1 = vpack.c.bf16 %v3951_v4, %v3947_v15  ;;  %v3955_v20 = vld [vmem:[#allocation8 + $0x1218] sm:$0xff]  ;;  %v3257_v33 = vmax.f32 %v8529_v32, 0.0  ;;  %v3958_v10 = vld [vmem:[#allocation8 + $0x1230] sm:$0xff] }
 0x3bc   : > { %5760 = vmatmul.mubr.f32.gmra.mrb[74].mxu1 %v3334_v19  ;;  %4861 = vmatprep.mubr.f32.mxu0 %v3351_v48  ;;  %v3953_v19 = vld [vmem:[#allocation8 + $0x1208] sm:$0xff]  ;;  %v7726_v49 = vpack.c.bf16 %v3948_v50, %v3944_v17  ;;  %v3963_v3 = vld [vmem:[#allocation8 + $0x1258] sm:$0xff] }
 0x3bd   : > { %7719 = vmatpush1.bf16.msra.mxu0 %v7718_v25  ;;  %5765 = vmatprep.mubr.f32.mxu1 %v3351_v48  ;;  %v3959_v25 = vld [vmem:[#allocation8 + $0x1238] sm:$0xff]  ;;  %v3366_v48 = vmax.f32 %v8526_v30, 0.0  ;;  %v7728_v27 = vpack.c.bf16 %v3957_v45, %v3953_v19  ;;  %v3960_v30 = vld [vmem:[#allocation8 + $0x1240] sm:$0xff]  ;;  %v3973_v17 = vld [vmem:[#allocation8 + $0x12a8] sm:$0xff] }
 0x3be   : > { %8231 = vmatpush1.bf16.msra.mxu1 %v8230_v59  ;;  %7721 = vmatprep.subr.bf16.mxu0 %v7720_v40  ;;  %v3956_v59 = vld [vmem:[#allocation8 + $0x1220] sm:$0xff]  ;;  %v3954_v40 = vld [vmem:[#allocation8 + $0x1210] sm:$0xff]  ;;  %v8240_v6 = vpack.c.bf16 %v3959_v25, %v3955_v20  ;;  %v3967_v15 = vld [vmem:[#allocation8 + $0x1278] sm:$0xff] }
 0x3bf   : > { %4862 = vmatmul.mubr.f32.gmra.mrb[76].mxu0 %v3350_v57  ;;  %8233 = vmatprep.subr.bf16.mxu1 %v8232_v62  ;;  %v3965_v62 = vld [vmem:[#allocation8 + $0x1268] sm:$0xff]  ;;  %v7730_v4 = vpack.c.bf16 %v3956_v59, %v3952_v0  ;;  %v8244_v32 = vpack.c.bf16 %v3967_v15, %v3963_v3  ;;  %v3971_v50 = vld [vmem:[#allocation8 + $0x1298] sm:$0xff]  ;;  %v3968_v45 = vld [vmem:[#allocation8 + $0x1280] sm:$0xff] }
 0x3c0   : > { %5766 = vmatmul.mubr.f32.gmra.mrb[76].mxu1 %v3350_v57  ;;  %4867 = vmatprep.mubr.f32.mxu0 %v3367_v2  ;;  %v8242_v57 = vpack.c.bf16 %v3958_v10, %v3954_v40  ;;  %v7732_v31 = vpack.c.bf16 %v3965_v62, %v3961_v37  ;;  %v3975_v63 = vld [vmem:[#allocation8 + $0x12b8] sm:$0xff]  ;;  %v3972_v20 = vld [vmem:[#allocation8 + $0x12a0] sm:$0xff]  ;;  %v3970_v25 = vld [vmem:[#allocation8 + $0x1290] sm:$0xff] }
 0x3c1   : > { %7723 = vmatpush1.bf16.msra.mxu0 %v7722_v38  ;;  %5771 = vmatprep.mubr.f32.mxu1 %v3367_v2  ;;  %v3964_v38 = vld [vmem:[#allocation8 + $0x1260] sm:$0xff]  ;;  %v3962_v2 = vld [vmem:[#allocation8 + $0x1250] sm:$0xff]  ;;  %v3983_v0 = vld [vmem:[#allocation8 + $0x12f8] sm:$0xff]  ;;  %v7738_v59 = vpack.c.bf16 %v3972_v20, %v3968_v45 }
 0x3c2   : > { %8235 = vmatpush1.bf16.msra.mxu1 %v8234_v54  ;;  %7725 = vmatprep.subr.bf16.mxu0 %v7724_v42  ;;  %v3966_v54 = vld [vmem:[#allocation8 + $0x1270] sm:$0xff]  ;;  %v3969_v42 = vld [vmem:[#allocation8 + $0x1288] sm:$0xff]  ;;  %v3976_v10 = vld [vmem:[#allocation8 + $0x12c0] sm:$0xff] }
 0x3c3   : > { %4868 = vmatmul.mubr.f32.gmra.mrb[78].mxu0 %v3366_v48  ;;  %8237 = vmatprep.subr.bf16.mxu1 %v8236_v1  ;;  %v7734_v1 = vpack.c.bf16 %v3964_v38, %v3960_v30  ;;  %v8246_v46 = vpack.c.bf16 %v3966_v54, %v3962_v2  ;;  %v7736_v19 = vpack.c.bf16 %v3973_v17, %v3969_v42  ;;  %v3980_v37 = vld [vmem:[#allocation8 + $0x12e0] sm:$0xff]  ;;  %v3978_v62 = vld [vmem:[#allocation8 + $0x12d0] sm:$0xff]  ;;  %v3991_v30 = vld [vmem:[#allocation8 + $0x1338] sm:$0xff] }
 0x3c4   : > { %5772 = vmatmul.mubr.f32.gmra.mrb[78].mxu1 %v3366_v48  ;;  %4938 = vmatprep.mubr.f32.mxu0 %v3257_v33  ;;  %v8248_v48 = vpack.c.bf16 %v3975_v63, %v3971_v50  ;;  %v3982_v15 = vld [vmem:[#allocation8 + $0x12f0] sm:$0xff]  ;;  %v7742_v38 = vpack.c.bf16 %v3980_v37, %v3976_v10  ;;  %v3984_v54 = vld [vmem:[#allocation8 + $0x1300] sm:$0xff]  ;;  %v3999_v45 = vld [vmem:[#allocation8 + $0x1378] sm:$0xff] }
 0x3c5   : > { %7727 = vmatpush1.bf16.msra.mxu0 %v7726_v49  ;;  %5842 = vmatprep.mubr.f32.mxu1 %v3257_v33  ;;  %v3974_v49 = vld [vmem:[#allocation8 + $0x12b0] sm:$0xff]  ;;  %v3977_v33 = vld [vmem:[#allocation8 + $0x12c8] sm:$0xff]  ;;  %v8254_v2 = vpack.c.bf16 %v3982_v15, %v3978_v62  ;;  %v3988_v42 = vld [vmem:[#allocation8 + $0x1320] sm:$0xff] }
 0x3c6   : > { %8239 = vmatpush1.bf16.msra.mxu1 %v8238_v13  ;;  %7729 = vmatprep.subr.bf16.mxu0 %v7728_v27  ;;  %v3981_v13 = vld [vmem:[#allocation8 + $0x12e8] sm:$0xff]  ;;  %v3979_v27 = vld [vmem:[#allocation8 + $0x12d8] sm:$0xff]  ;;  %v8250_v40 = vpack.c.bf16 %v3974_v49, %v3970_v25  ;;  %v3986_v17 = vld [vmem:[#allocation8 + $0x1310] sm:$0xff]  ;;  %v7746_v20 = vpack.c.bf16 %v3988_v42, %v3984_v54 }
 0x3c7   : > { %8241 = vmatprep.subr.bf16.mxu1 %v8240_v6  ;;  %v7740_v6 = vpack.c.bf16 %v3981_v13, %v3977_v33  ;;  %v8252_v3 = vpack.c.bf16 %v3983_v0, %v3979_v27  ;;  %v3990_v63 = vld [vmem:[#allocation8 + $0x1330] sm:$0xff]  ;;  %v3992_v49 = vld [vmem:[#allocation8 + $0x1340] sm:$0xff]  ;;  %v4007_v10 = vld [vmem:[#allocation8 + $0x13b8] sm:$0xff] }
 0x3c8   : > { %v8258_v25 = vpack.c.bf16 %v3990_v63, %v3986_v17  ;;  %v3996_v33 = vld [vmem:[#allocation8 + $0x1360] sm:$0xff]  ;;  %v3994_v13 = vld [vmem:[#allocation8 + $0x1350] sm:$0xff]  ;;  %v4015_v54 = vld [vmem:[#allocation8 + $0x13f8] sm:$0xff]  ;;  %v10249_v17 = vrot.slane %v10231_v56, %v9940_v28 }
 0x3c9   : > { %7731 = vmatpush1.bf16.msra.mxu0 %v7730_v4  ;;  %v3985_v4 = vld [vmem:[#allocation8 + $0x1308] sm:$0xff]  ;;  %v3998_v0 = vld [vmem:[#allocation8 + $0x1370] sm:$0xff]  ;;  %v7750_v37 = vpack.c.bf16 %v3996_v33, %v3992_v49  ;;  %v4000_v15 = vld [vmem:[#allocation8 + $0x1380] sm:$0xff] }
 0x3ca   : > { %8243 = vmatpush1.bf16.msra.mxu1 %v8242_v57  ;;  %7733 = vmatprep.subr.bf16.mxu0 %v7732_v31  ;;  %v3989_v57 = vld [vmem:[#allocation8 + $0x1328] sm:$0xff]  ;;  %v3987_v31 = vld [vmem:[#allocation8 + $0x1318] sm:$0xff]  ;;  %v8262_v62 = vpack.c.bf16 %v3998_v0, %v3994_v13 }
 0x3cb   : > { %8245 = vmatprep.subr.bf16.mxu1 %v8244_v32  ;;  %v7744_v32 = vpack.c.bf16 %v3989_v57, %v3985_v4  ;;  %v8256_v50 = vpack.c.bf16 %v3991_v30, %v3987_v31  ;;  %v4004_v4 = vld [vmem:[#allocation8 + $0x13a0] sm:$0xff]  ;;  %v4002_v57 = vld [vmem:[#allocation8 + $0x1390] sm:$0xff]  ;;  %v4019_v49 = vld [vmem:[#allocation8 + $0x1418] sm:$0xff] }
 0x3cc   : > { %v4006_v30 = vld [vmem:[#allocation8 + $0x13b0] sm:$0xff]  ;;  %v7754_v42 = vpack.c.bf16 %v4004_v4, %v4000_v15  ;;  %v4023_v33 = vld [vmem:[#allocation8 + $0x1438] sm:$0xff]  ;;  %v4025_v15 = vld [vmem:[#allocation8 + $0x1448] sm:$0xff] }
 0x3cd   : > { %7735 = vmatpush1.bf16.msra.mxu0 %v7734_v1  ;;  %v3993_v1 = vld [vmem:[#allocation8 + $0x1348] sm:$0xff] }
 0x3ce   : > { %8247 = vmatpush1.bf16.msra.mxu1 %v8246_v46  ;;  %7737 = vmatprep.subr.bf16.mxu0 %v7736_v19  ;;  %v3997_v46 = vld [vmem:[#allocation8 + $0x1368] sm:$0xff]  ;;  %v3995_v19 = vld [vmem:[#allocation8 + $0x1358] sm:$0xff] }
 0x3cf   : > { %8249 = vmatprep.subr.bf16.mxu1 %v8248_v48  ;;  %v7748_v48 = vpack.c.bf16 %v3997_v46, %v3993_v1  ;;  %v8260_v27 = vpack.c.bf16 %v3999_v45, %v3995_v19  ;;  %v4008_v1 = vld [vmem:[#allocation8 + $0x13c0] sm:$0xff]  ;;  %v4010_v19 = vld [vmem:[#allocation8 + $0x13d0] sm:$0xff]  ;;  %v4029_v4 = vld [vmem:[#allocation8 + $0x1468] sm:$0xff] }
 0x3d0   : > { %v4012_v46 = vld [vmem:[#allocation8 + $0x13e0] sm:$0xff] }
 0x3d1   : > { %7739 = vmatpush1.bf16.msra.mxu0 %v7738_v59  ;;  %v4001_v59 = vld [vmem:[#allocation8 + $0x1388] sm:$0xff]  ;;  %v7758_v13 = vpack.c.bf16 %v4012_v46, %v4008_v1  ;;  %v4030_v46 = vld [vmem:[#allocation8 + $0x1470] sm:$0xff] }
 0x3d2   : > { %8251 = vmatpush1.bf16.msra.mxu1 %v8250_v40  ;;  %7741 = vmatprep.subr.bf16.mxu0 %v7740_v6  ;;  %v4005_v40 = vld [vmem:[#allocation8 + $0x13a8] sm:$0xff]  ;;  %v4003_v6 = vld [vmem:[#allocation8 + $0x1398] sm:$0xff] }
 0x3d3   : > { %8253 = vmatprep.subr.bf16.mxu1 %v8252_v3  ;;  %v7752_v3 = vpack.c.bf16 %v4005_v40, %v4001_v59  ;;  %v8264_v31 = vpack.c.bf16 %v4007_v10, %v4003_v6  ;;  %v8531_v40 = vadd.f32 %v9997_v11, %v10239_v24  ;;  %v8272_v6 = vpack.c.bf16 %v4023_v33, %v4019_v49  ;;  %v4016_v10 = vld [vmem:[#allocation8 + $0x1400] sm:$0xff] }
 0x3d4   : > { %v8533_v11 = vadd.f32 %v10005_v21, %v10239_v24  ;;  %v8535_v33 = vadd.f32 %v10013_v12, %v10239_v24  ;;  %v8534_v12 = vadd.f32 %v10009_v60, %v10249_v17  ;;  %v4053_v60 = vld [vmem:[#allocation8 + $0x1528] sm:$0xff] }
 0x3d5   : > { %7743 = vmatpush1.bf16.msra.mxu0 %v7742_v38  ;;  %v4009_v38 = vld [vmem:[#allocation8 + $0x13c8] sm:$0xff] }
 0x3d6   : > { %8255 = vmatpush1.bf16.msra.mxu1 %v8254_v2  ;;  %7745 = vmatprep.subr.bf16.mxu0 %v7744_v32  ;;  %v4013_v2 = vld [vmem:[#allocation8 + $0x13e8] sm:$0xff]  ;;  %v4011_v32 = vld [vmem:[#allocation8 + $0x13d8] sm:$0xff]  ;;  %v3289_v49 = vmax.f32 %v8533_v11, 0.0  ;;  %v4042_v11 = vld [vmem:[#allocation8 + $0x14d0] sm:$0xff] }
 0x3d7   : > { %8257 = vmatprep.subr.bf16.mxu1 %v8256_v50  ;;  %v8266_v50 = vpack.c.bf16 %v4006_v30, %v4002_v57  ;;  %v7756_v63 = vpack.c.bf16 %v4013_v2, %v4009_v38  ;;  %v8268_v45 = vpack.c.bf16 %v4015_v54, %v4011_v32  ;;  %v4027_v57 = vld [vmem:[#allocation8 + $0x1458] sm:$0xff]  ;;  %v3273_v2 = vmax.f32 %v8531_v40, 0.0  ;;  %v4034_v40 = vld [vmem:[#allocation8 + $0x1490] sm:$0xff] }
 0x3d8   : > { %v7764_v54 = vpack.c.bf16 %v4029_v4, %v4025_v15 }
 0x3d9   : > { %7747 = vmatpush1.bf16.msra.mxu0 %v7746_v20  ;;  %v4014_v20 = vld [vmem:[#allocation8 + $0x13f0] sm:$0xff] }
 0x3da   : > { %8259 = vmatpush1.bf16.msra.mxu1 %v8258_v25  ;;  %7749 = vmatprep.subr.bf16.mxu0 %v7748_v48  ;;  %v4017_v25 = vld [vmem:[#allocation8 + $0x1408] sm:$0xff]  ;;  %v8270_v0 = vpack.c.bf16 %v4014_v20, %v4010_v19  ;;  %v4039_v20 = vld [vmem:[#allocation8 + $0x14b8] sm:$0xff] }
 0x3db   : > { %8261 = vmatprep.subr.bf16.mxu1 %v8260_v27  ;;  %v4021_v48 = vld [vmem:[#allocation8 + $0x1428] sm:$0xff]  ;;  %v8528_v27 = vadd.f32 %v9981_v41, %v10249_v17  ;;  %v8530_v41 = vadd.f32 %v9993_v7, %v10249_v17  ;;  %v4035_v7 = vld [vmem:[#allocation8 + $0x1498] sm:$0xff] }
 0x3dc   : > { %v7760_v59 = vpack.c.bf16 %v4021_v48, %v4017_v25  ;;  %v4033_v19 = vld [vmem:[#allocation8 + $0x1488] sm:$0xff]  ;;  %v8532_v48 = vadd.f32 %v10001_v44, %v10249_v17 }
 0x3dd   : > { %7751 = vmatpush1.bf16.msra.mxu0 %v7750_v37  ;;  %v4020_v37 = vld [vmem:[#allocation8 + $0x1420] sm:$0xff]  ;;  %v3256_v30 = vmax.f32 %v8528_v27, 0.0  ;;  %v3272_v25 = vmax.f32 %v8530_v41, 0.0  ;;  %v4045_v44 = vld [vmem:[#allocation8 + $0x14e8] sm:$0xff] }
 0x3de   : > { %8263 = vmatpush1.bf16.msra.mxu1 %v8262_v62  ;;  %7753 = vmatprep.subr.bf16.mxu0 %v7752_v3  ;;  %v4018_v62 = vld [vmem:[#allocation8 + $0x1410] sm:$0xff]  ;;  %v7762_v38 = vpack.c.bf16 %v4020_v37, %v4016_v10  ;;  %v4041_v37 = vld [vmem:[#allocation8 + $0x14c8] sm:$0xff]  ;;  %v3288_v15 = vmax.f32 %v8532_v48, 0.0  ;;  %v4052_v48 = vld [vmem:[#allocation8 + $0x1520] sm:$0xff] }
 0x3df   : > { %8265 = vmatprep.subr.bf16.mxu1 %v8264_v31  ;;  %v4022_v3 = vld [vmem:[#allocation8 + $0x1430] sm:$0xff]  ;;  %v4031_v31 = vld [vmem:[#allocation8 + $0x1478] sm:$0xff]  ;;  %v7772_v41 = vpack.c.bf16 %v4045_v44, %v4041_v37 }
 0x3e0   : > { %v8274_v32 = vpack.c.bf16 %v4022_v3, %v4018_v62  ;;  %v8276_v1 = vpack.c.bf16 %v4031_v31, %v4027_v57  ;;  %v4038_v10 = vld [vmem:[#allocation8 + $0x14b0] sm:$0xff]  ;;  %v4043_v62 = vld [vmem:[#allocation8 + $0x14d8] sm:$0xff]  ;;  %v3305_v57 = vmax.f32 %v8535_v33, 0.0  ;;  %v8537_v31 = vadd.f32 %v10021_v58, %v10239_v24 }
 0x3e1   : > { %7755 = vmatpush1.bf16.msra.mxu0 %v7754_v42  ;;  %v4024_v42 = vld [vmem:[#allocation8 + $0x1440] sm:$0xff]  ;;  %v4047_v3 = vld [vmem:[#allocation8 + $0x14f8] sm:$0xff]  ;;  %v8536_v58 = vadd.f32 %v10017_v35, %v10249_v17  ;;  %v4054_v33 = vld [vmem:[#allocation8 + $0x1530] sm:$0xff] }
 0x3e2   : > { %8267 = vmatpush1.bf16.msra.mxu1 %v8266_v50  ;;  %7757 = vmatprep.subr.bf16.mxu0 %v7756_v63  ;;  %v4028_v50 = vld [vmem:[#allocation8 + $0x1460] sm:$0xff]  ;;  %v4026_v63 = vld [vmem:[#allocation8 + $0x1450] sm:$0xff]  ;;  %v4061_v35 = vld [vmem:[#allocation8 + $0x1568] sm:$0xff] }
 0x3e3   : > { %8269 = vmatprep.subr.bf16.mxu1 %v8268_v45  ;;  %v4037_v45 = vld [vmem:[#allocation8 + $0x14a8] sm:$0xff]  ;;  %v7766_v21 = vpack.c.bf16 %v4028_v50, %v4024_v42  ;;  %v4051_v50 = vld [vmem:[#allocation8 + $0x1518] sm:$0xff] }
 0x3e4   : > { %v7768_v27 = vpack.c.bf16 %v4037_v45, %v4033_v19  ;;  %v4049_v42 = vld [vmem:[#allocation8 + $0x1508] sm:$0xff]  ;;  %v3321_v19 = vmax.f32 %v8537_v31, 0.0  ;;  %v8539_v45 = vadd.f32 %v10029_v18, %v10239_v24  ;;  %v8538_v18 = vadd.f32 %v10025_v26, %v10249_v17  ;;  %v4067_v31 = vld [vmem:[#allocation8 + $0x1598] sm:$0xff] }
 0x3e5   : > { %7759 = vmatpush1.bf16.msra.mxu0 %v7758_v13  ;;  %v8278_v13 = vpack.c.bf16 %v4030_v46, %v4026_v63  ;;  %v4055_v63 = vld [vmem:[#allocation8 + $0x1538] sm:$0xff]  ;;  %v4069_v26 = vld [vmem:[#allocation8 + $0x15a8] sm:$0xff] }
 0x3e6   : > { %8271 = vmatpush1.bf16.msra.mxu1 %v8270_v0  ;;  %7761 = vmatprep.subr.bf16.mxu0 %v7760_v59  ;;  %v4032_v0 = vld [vmem:[#allocation8 + $0x1480] sm:$0xff] }
 0x3e7   : > { %8273 = vmatprep.subr.bf16.mxu1 %v8272_v6  ;;  %v4036_v59 = vld [vmem:[#allocation8 + $0x14a0] sm:$0xff]  ;;  %v8280_v6 = vpack.c.bf16 %v4039_v20, %v4035_v7  ;;  %v7776_v20 = vpack.c.bf16 %v4053_v60, %v4049_v42 }
 0x3e8   : > { %4939 = vmatmul.mubr.f32.vlgmr.msra.gmra.mrb[64].mxu0 %v3256_v30  ;;  %v7770_v4 = vpack.c.bf16 %v4036_v59, %v4032_v0  ;;  %v4063_v0 = vld [vmem:[#allocation8 + $0x1578] sm:$0xff]  ;;  %v3320_v59 = vmax.f32 %v8536_v58, 0.0  ;;  %v4064_v60 = vld [vmem:[#allocation8 + $0x1580] sm:$0xff]  ;;  %v4073_v58 = vld [vmem:[#allocation8 + $0x15c8] sm:$0xff] }
 0x3e9   : > { %5843 = vmatmul.mubr.f32.vlgmr.msra.gmra.mrb[64].mxu1 %v3256_v30  ;;  %4944 = vmatprep.mubr.f32.mxu0 %v3273_v2  ;;  %v8282_v30 = vpack.c.bf16 %v4038_v10, %v4034_v40  ;;  %v8541_v10 = vadd.f32 %v10037_v36, %v10239_v24  ;;  %v10277_v36 = vrot.slane %v10231_v56, %v9967_v29 }
 0x3ea   : > { %7763 = vmatpush1.bf16.msra.mxu0 %v7762_v38  ;;  %5848 = vmatprep.mubr.f32.mxu1 %v3273_v2  ;;  %v4040_v38 = vld [vmem:[#allocation8 + $0x14c0] sm:$0xff] }
 0x3eb   : > { %8275 = vmatpush1.bf16.msra.mxu1 %v8274_v32  ;;  %7765 = vmatprep.subr.bf16.mxu0 %v7764_v54  ;;  %v4044_v2 = vld [vmem:[#allocation8 + $0x14e0] sm:$0xff]  ;;  %v8284_v32 = vpack.c.bf16 %v4047_v3, %v4043_v62  ;;  %v4046_v54 = vld [vmem:[#allocation8 + $0x14f0] sm:$0xff] }
 0x3ec   : > { %4945 = vmatmul.mubr.f32.gmra.mrb[66].mxu0 %v3272_v25  ;;  %8277 = vmatprep.subr.bf16.mxu1 %v8276_v1  ;;  %v3304_v1 = vmax.f32 %v8534_v12, 0.0  ;;  %v7774_v46 = vpack.c.bf16 %v4044_v2, %v4040_v38  ;;  %v8286_v7 = vpack.c.bf16 %v4046_v54, %v4042_v11  ;;  %v4056_v62 = vld [vmem:[#allocation8 + $0x1540] sm:$0xff]  ;;  %v8540_v38 = vadd.f32 %v10033_v43, %v10249_v17  ;;  %v4077_v43 = vld [vmem:[#allocation8 + $0x15e8] sm:$0xff] }
 0x3ed   : > { %5849 = vmatmul.mubr.f32.gmra.mrb[66].mxu1 %v3272_v25  ;;  %4950 = vmatprep.mubr.f32.mxu0 %v3289_v49  ;;  %v4048_v25 = vld [vmem:[#allocation8 + $0x1500] sm:$0xff]  ;;  %v3353_v11 = vmax.f32 %v8541_v10, 0.0 }
 0x3ee   : > { %7767 = vmatpush1.bf16.msra.mxu0 %v7766_v21  ;;  %5854 = vmatprep.mubr.f32.mxu1 %v3289_v49  ;;  %v4050_v21 = vld [vmem:[#allocation8 + $0x1510] sm:$0xff]  ;;  %v8288_v49 = vpack.c.bf16 %v4055_v63, %v4051_v50  ;;  %v7778_v40 = vpack.c.bf16 %v4052_v48, %v4048_v25  ;;  %v4060_v3 = vld [vmem:[#allocation8 + $0x1560] sm:$0xff] }
 0x3ef   : > { %8279 = vmatpush1.bf16.msra.mxu1 %v8278_v13  ;;  %7769 = vmatprep.subr.bf16.mxu0 %v7768_v27  ;;  %v4057_v13 = vld [vmem:[#allocation8 + $0x1548] sm:$0xff]  ;;  %v4059_v27 = vld [vmem:[#allocation8 + $0x1558] sm:$0xff]  ;;  %v8290_v37 = vpack.c.bf16 %v4054_v33, %v4050_v21  ;;  %v7782_v2 = vpack.c.bf16 %v4060_v3, %v4056_v62  ;;  %v4068_v50 = vld [vmem:[#allocation8 + $0x15a0] sm:$0xff]  ;;  %v7788_v21 = vpack.c.bf16 %v4077_v43, %v4073_v58 }
 0x3f0   : > { %4951 = vmatmul.mubr.f32.gmra.mrb[68].mxu0 %v3288_v15  ;;  %8281 = vmatprep.subr.bf16.mxu1 %v8280_v6  ;;  %v3337_v6 = vmax.f32 %v8539_v45, 0.0  ;;  %v7780_v44 = vpack.c.bf16 %v4061_v35, %v4057_v13  ;;  %v8292_v12 = vpack.c.bf16 %v4063_v0, %v4059_v27  ;;  %v4066_v63 = vld [vmem:[#allocation8 + $0x1590] sm:$0xff]  ;;  %v3352_v45 = vmax.f32 %v8540_v38, 0.0  ;;  %v4076_v33 = vld [vmem:[#allocation8 + $0x15e0] sm:$0xff]  ;;  %v4081_v0 = vld [vmem:[#allocation8 + $0x1608] sm:$0xff] }
 0x3f1   : > { %5855 = vmatmul.mubr.f32.gmra.mrb[68].mxu1 %v3288_v15  ;;  %4956 = vmatprep.mubr.f32.mxu0 %v3305_v57  ;;  %v4058_v15 = vld [vmem:[#allocation8 + $0x1550] sm:$0xff]  ;;  %v4084_v62 = vld [vmem:[#allocation8 + $0x1620] sm:$0xff] }
 0x3f2   : > { %7771 = vmatpush1.bf16.msra.mxu0 %v7770_v4  ;;  %5860 = vmatprep.mubr.f32.mxu1 %v3305_v57  ;;  %v4062_v4 = vld [vmem:[#allocation8 + $0x1570] sm:$0xff]  ;;  %v4065_v57 = vld [vmem:[#allocation8 + $0x1588] sm:$0xff] }
 0x3f3   : > { %8283 = vmatpush1.bf16.msra.mxu1 %v8282_v30  ;;  %7773 = vmatprep.subr.bf16.mxu0 %v7772_v41  ;;  %v4071_v30 = vld [vmem:[#allocation8 + $0x15b8] sm:$0xff]  ;;  %v3336_v41 = vmax.f32 %v8538_v18, 0.0  ;;  %v8294_v54 = vpack.c.bf16 %v4062_v4, %v4058_v15  ;;  %v7784_v42 = vpack.c.bf16 %v4069_v26, %v4065_v57  ;;  %v4074_v13 = vld [vmem:[#allocation8 + $0x15d0] sm:$0xff]  ;;  %v4089_v4 = vld [vmem:[#allocation8 + $0x1648] sm:$0xff] }
 0x3f4   : > { %4957 = vmatmul.mubr.f32.gmra.mrb[70].mxu0 %v3304_v1  ;;  %8285 = vmatprep.subr.bf16.mxu1 %v8284_v32  ;;  %v8543_v32 = vadd.f32 %v10045_v16, %v10239_v24  ;;  %v8296_v56 = vpack.c.bf16 %v4071_v30, %v4067_v31  ;;  %v8542_v16 = vadd.f32 %v10041_v51, %v10249_v17  ;;  %v4078_v27 = vld [vmem:[#allocation8 + $0x15f0] sm:$0xff]  ;;  %v4085_v51 = vld [vmem:[#allocation8 + $0x1628] sm:$0xff]  ;;  %v4083_v17 = vld [vmem:[#allocation8 + $0x1618] sm:$0xff] }
 0x3f5   : > { %5861 = vmatmul.mubr.f32.gmra.mrb[70].mxu1 %v3304_v1  ;;  %4962 = vmatprep.mubr.f32.mxu0 %v3321_v19  ;;  %v4070_v1 = vld [vmem:[#allocation8 + $0x15b0] sm:$0xff]  ;;  %v7786_v24 = vpack.c.bf16 %v4068_v50, %v4064_v60  ;;  %v8302_v10 = vpack.c.bf16 %v4078_v27, %v4074_v13  ;;  %v4093_v57 = vld [vmem:[#allocation8 + $0x1668] sm:$0xff]  ;;  %v4091_v26 = vld [vmem:[#allocation8 + $0x1658] sm:$0xff] }
 0x3f6   : > { %7775 = vmatpush1.bf16.msra.mxu0 %v7774_v46  ;;  %5866 = vmatprep.mubr.f32.mxu1 %v3321_v19  ;;  %v4075_v46 = vld [vmem:[#allocation8 + $0x15d8] sm:$0xff]  ;;  %v3369_v25 = vmax.f32 %v8543_v32, 0.0  ;;  %v8298_v48 = vpack.c.bf16 %v4070_v1, %v4066_v63  ;;  %v3368_v18 = vmax.f32 %v8542_v16, 0.0  ;;  %v4082_v3 = vld [vmem:[#allocation8 + $0x1610] sm:$0xff]  ;;  %v7796_v38 = vpack.c.bf16 %v4093_v57, %v4089_v4  ;;  %v4097_v60 = vld [vmem:[#allocation8 + $0x1688] sm:$0xff] }
 0x3f7   : > { %8287 = vmatpush1.bf16.msra.mxu1 %v8286_v7  ;;  %7777 = vmatprep.subr.bf16.mxu0 %v7776_v20  ;;  %v4079_v19 = vld [vmem:[#allocation8 + $0x15f8] sm:$0xff]  ;;  %v4090_v32 = vld [vmem:[#allocation8 + $0x1650] sm:$0xff]  ;;  %v4101_v50 = vld [vmem:[#allocation8 + $0x16a8] sm:$0xff] }
 0x3f8   : > { %4963 = vmatmul.mubr.f32.gmra.mrb[72].mxu0 %v3320_v59  ;;  %8289 = vmatprep.subr.bf16.mxu1 %v8288_v49  ;;  %v10665_v7 = vld [vmem:[#allocation47_spill] sm:$0xff]  ;;  %v8300_v35 = vpack.c.bf16 %v4079_v19, %v4075_v46  ;;  %v7800_v43 = vpack.c.bf16 %v4101_v50, %v4097_v60  ;;  %v4106_v27 = vld [vmem:[#allocation8 + $0x16d0] sm:$0xff]  ;;  %v4121_v4 = vld [vmem:[#allocation8 + $0x1748] sm:$0xff] }
 0x3f9   : > { %5867 = vmatmul.mubr.f32.gmra.mrb[72].mxu1 %v3320_v59  ;;  %4968 = vmatprep.mubr.f32.mxu0 %v3337_v6  ;;  %v8545_v20 = vadd.f32 %v10665_v7, %v10277_v36  ;;  %v4072_v49 = vld [vmem:[#allocation8 + $0x15c0] sm:$0xff]  ;;  %v4087_v59 = vld [vmem:[#allocation8 + $0x1638] sm:$0xff]  ;;  %v4105_v7 = vld [vmem:[#allocation8 + $0x16c8] sm:$0xff] }
 0x3fa   : > { %7779 = vmatpush1.bf16.msra.mxu0 %v7778_v40  ;;  %5872 = vmatprep.mubr.f32.mxu1 %v3337_v6  ;;  %v7790_v40 = vpack.c.bf16 %v4076_v33, %v4072_v49  ;;  %v8304_v15 = vpack.c.bf16 %v4087_v59, %v4083_v17  ;;  %v4095_v31 = vld [vmem:[#allocation8 + $0x1678] sm:$0xff]  ;;  %v4096_v46 = vld [vmem:[#allocation8 + $0x1680] sm:$0xff]  ;;  %v4113_v17 = vld [vmem:[#allocation8 + $0x1708] sm:$0xff] }
 0x3fb   : > { %8291 = vmatpush1.bf16.msra.mxu1 %v8290_v37  ;;  %7781 = vmatprep.subr.bf16.mxu0 %v7780_v44  ;;  %v3259_v6 = vmax.f32 %v8545_v20, 0.0  ;;  %v7792_v37 = vpack.c.bf16 %v4085_v51, %v4081_v0  ;;  %v4080_v44 = vld [vmem:[#allocation8 + $0x1600] sm:$0xff]  ;;  %v4099_v63 = vld [vmem:[#allocation8 + $0x1698] sm:$0xff]  ;;  %v4109_v20 = vld [vmem:[#allocation8 + $0x16e8] sm:$0xff] }
 0x3fc   : > { %4969 = vmatmul.mubr.f32.gmra.mrb[74].mxu0 %v3336_v41  ;;  %8293 = vmatprep.subr.bf16.mxu1 %v8292_v12  ;;  %v4086_v12 = vld [vmem:[#allocation8 + $0x1630] sm:$0xff]  ;;  %v7794_v30 = vpack.c.bf16 %v4084_v62, %v4080_v44  ;;  %v4100_v19 = vld [vmem:[#allocation8 + $0x16a0] sm:$0xff]  ;;  %v7804_v33 = vpack.c.bf16 %v4109_v20, %v4105_v7  ;;  %v4117_v59 = vld [vmem:[#allocation8 + $0x1728] sm:$0xff] }
 0x3fd   : > { %5873 = vmatmul.mubr.f32.gmra.mrb[74].mxu1 %v3336_v41  ;;  %4974 = vmatprep.mubr.f32.mxu0 %v3353_v11  ;;  %v8306_v41 = vpack.c.bf16 %v4086_v12, %v4082_v3  ;;  %v4104_v13 = vld [vmem:[#allocation8 + $0x16c0] sm:$0xff]  ;;  %v4110_v51 = vld [vmem:[#allocation8 + $0x16f0] sm:$0xff]  ;;  %v4125_v57 = vld [vmem:[#allocation8 + $0x1768] sm:$0xff] }
 0x3fe   : > { %7783 = vmatpush1.bf16.msra.mxu0 %v7782_v2  ;;  %5878 = vmatprep.mubr.f32.mxu1 %v3353_v11  ;;  %v4088_v2 = vld [vmem:[#allocation8 + $0x1640] sm:$0xff]  ;;  %v4114_v3 = vld [vmem:[#allocation8 + $0x1710] sm:$0xff]  ;;  %v4129_v60 = vld [vmem:[#allocation8 + $0x1788] sm:$0xff] }
 0x3ff   : > { %8295 = vmatpush1.bf16.msra.mxu1 %v8294_v54  ;;  %7785 = vmatprep.subr.bf16.mxu0 %v7784_v42  ;;  %v4092_v11 = vld [vmem:[#allocation8 + $0x1660] sm:$0xff]  ;;  %v8308_v54 = vpack.c.bf16 %v4095_v31, %v4091_v26  ;;  %v4094_v42 = vld [vmem:[#allocation8 + $0x1670] sm:$0xff]  ;;  %v4123_v26 = vld [vmem:[#allocation8 + $0x1758] sm:$0xff] }
 0x400   : > { %4975 = vmatmul.mubr.f32.gmra.mrb[76].mxu0 %v3352_v45  ;;  %8297 = vmatprep.subr.bf16.mxu1 %v8296_v56  ;;  %v4103_v56 = vld [vmem:[#allocation8 + $0x16b8] sm:$0xff]  ;;  %v7798_v1 = vpack.c.bf16 %v4092_v11, %v4088_v2  ;;  %v8310_v58 = vpack.c.bf16 %v4094_v42, %v4090_v32  ;;  %v4112_v44 = vld [vmem:[#allocation8 + $0x1700] sm:$0xff]  ;;  %v4118_v12 = vld [vmem:[#allocation8 + $0x1730] sm:$0xff] }
 0x401   : > { %5879 = vmatmul.mubr.f32.gmra.mrb[76].mxu1 %v3352_v45  ;;  %4980 = vmatprep.mubr.f32.mxu0 %v3369_v25  ;;  %v4098_v45 = vld [vmem:[#allocation8 + $0x1690] sm:$0xff]  ;;  %v8312_v16 = vpack.c.bf16 %v4103_v56, %v4099_v63  ;;  %v4116_v62 = vld [vmem:[#allocation8 + $0x1720] sm:$0xff]  ;;  %v4127_v31 = vld [vmem:[#allocation8 + $0x1778] sm:$0xff] }
 0x402   : > { %7787 = vmatpush1.bf16.msra.mxu0 %v7786_v24  ;;  %5884 = vmatprep.mubr.f32.mxu1 %v3369_v25  ;;  %v4102_v24 = vld [vmem:[#allocation8 + $0x16b0] sm:$0xff]  ;;  %v4107_v25 = vld [vmem:[#allocation8 + $0x16d8] sm:$0xff]  ;;  %v4120_v2 = vld [vmem:[#allocation8 + $0x1740] sm:$0xff] }
 0x403   : > { %8299 = vmatpush1.bf16.msra.mxu1 %v8298_v48  ;;  %7789 = vmatprep.subr.bf16.mxu0 %v7788_v21  ;;  %v4111_v48 = vld [vmem:[#allocation8 + $0x16f8] sm:$0xff]  ;;  %v7802_v21 = vpack.c.bf16 %v4100_v19, %v4096_v46  ;;  %v8314_v49 = vpack.c.bf16 %v4102_v24, %v4098_v45  ;;  %v4124_v11 = vld [vmem:[#allocation8 + $0x1760] sm:$0xff]  ;;  %v4122_v32 = vld [vmem:[#allocation8 + $0x1750] sm:$0xff] }
 0x404   : > { %4981 = vmatmul.mubr.f32.gmra.mrb[78].mxu0 %v3368_v18  ;;  %8301 = vmatprep.subr.bf16.mxu1 %v8300_v35  ;;  %v4108_v35 = vld [vmem:[#allocation8 + $0x16e0] sm:$0xff]  ;;  %v8316_v0 = vpack.c.bf16 %v4111_v48, %v4107_v25  ;;  %v4126_v42 = vld [vmem:[#allocation8 + $0x1770] sm:$0xff]  ;;  %v4133_v50 = vld [vmem:[#allocation8 + $0x17a8] sm:$0xff] }
 0x405   : > { %5885 = vmatmul.mubr.f32.gmra.mrb[78].mxu1 %v3368_v18  ;;  %5051 = vmatprep.mubr.f32.mxu0 %v3259_v6  ;;  %v4115_v18 = vld [vmem:[#allocation8 + $0x1718] sm:$0xff]  ;;  %v4128_v46 = vld [vmem:[#allocation8 + $0x1780] sm:$0xff]  ;;  %v4130_v45 = vld [vmem:[#allocation8 + $0x1790] sm:$0xff] }
 0x406   : > { %7791 = vmatpush1.bf16.msra.mxu0 %v7790_v40  ;;  %5955 = vmatprep.mubr.f32.mxu1 %v3259_v6  ;;  %v4119_v40 = vld [vmem:[#allocation8 + $0x1738] sm:$0xff]  ;;  %v7806_v6 = vpack.c.bf16 %v4108_v35, %v4104_v13  ;;  %v4132_v19 = vld [vmem:[#allocation8 + $0x17a0] sm:$0xff]  ;;  %v4134_v24 = vld [vmem:[#allocation8 + $0x17b0] sm:$0xff] }
 0x407   : > { %8303 = vmatpush1.bf16.msra.mxu1 %v8302_v10  ;;  %7793 = vmatprep.subr.bf16.mxu0 %v7792_v37  ;;  %v8318_v10 = vpack.c.bf16 %v4110_v51, %v4106_v27  ;;  %v7808_v37 = vpack.c.bf16 %v4117_v59, %v4113_v17  ;;  %v4131_v63 = vld [vmem:[#allocation8 + $0x1798] sm:$0xff]  ;;  %v4137_v7 = vld [vmem:[#allocation8 + $0x17c8] sm:$0xff]  ;;  %v8330_v35 = vpack.c.bf16 %v4134_v24, %v4130_v45  ;;  %v4140_v51 = vld [vmem:[#allocation8 + $0x17e0] sm:$0xff] }
 0x408   : > { %8305 = vmatprep.subr.bf16.mxu1 %v8304_v15  ;;  %v8320_v15 = vpack.c.bf16 %v4119_v40, %v4115_v18  ;;  %v4135_v56 = vld [vmem:[#allocation8 + $0x17b8] sm:$0xff]  ;;  %v4141_v20 = vld [vmem:[#allocation8 + $0x17e8] sm:$0xff]  ;;  %v4138_v17 = vld [vmem:[#allocation8 + $0x17d0] sm:$0xff] }
 0x409   : > { %v4139_v25 = vld [vmem:[#allocation8 + $0x17d8] sm:$0xff]  ;;  %v7820_v27 = vpack.c.bf16 %v4141_v20, %v4137_v7  ;;  %v4142_v18 = vld [vmem:[#allocation8 + $0x17f0] sm:$0xff]  ;;  %v4145_v40 = vld [vmem:[#allocation8 + $0x1808] sm:$0xff] }
 0x40a   : > { %7795 = vmatpush1.bf16.msra.mxu0 %v7794_v30  ;;  %v7810_v30 = vpack.c.bf16 %v4116_v62, %v4112_v44  ;;  %v4143_v48 = vld [vmem:[#allocation8 + $0x17f8] sm:$0xff]  ;;  %v4156_v45 = vld [vmem:[#allocation8 + $0x1860] sm:$0xff]  ;;  %v4158_v7 = vld [vmem:[#allocation8 + $0x1870] sm:$0xff] }
 0x40b   : > { %8307 = vmatpush1.bf16.msra.mxu1 %v8306_v41  ;;  %7797 = vmatprep.subr.bf16.mxu0 %v7796_v38  ;;  %v8322_v41 = vpack.c.bf16 %v4118_v12, %v4114_v3  ;;  %v7812_v38 = vpack.c.bf16 %v4125_v57, %v4121_v4  ;;  %v8332_v59 = vpack.c.bf16 %v4143_v48, %v4139_v25  ;;  %v10667_v62 = vld [vmem:[#allocation46_spill] sm:$0xff]  ;;  %v10668_v4 = vld [vmem:[#allocation49_spill] sm:$0xff] }
 0x40c   : > { %8309 = vmatprep.subr.bf16.mxu1 %v8308_v54  ;;  %v8324_v54 = vpack.c.bf16 %v4127_v31, %v4123_v26  ;;  %v8547_v57 = vadd.f32 %v10668_v4, %v10277_v36  ;;  %v4144_v31 = vld [vmem:[#allocation8 + $0x1800] sm:$0xff]  ;;  %v4161_v20 = vld [vmem:[#allocation8 + $0x1888] sm:$0xff]  ;;  %v4163_v48 = vld [vmem:[#allocation8 + $0x1898] sm:$0xff] }
 0x40d   : > { %v4165_v25 = vld [vmem:[#allocation8 + $0x18a8] sm:$0xff]  ;;  %v4171_v4 = vld [vmem:[#allocation8 + $0x18d8] sm:$0xff] }
 0x40e   : > { %7799 = vmatpush1.bf16.msra.mxu0 %v7798_v1  ;;  %v7814_v1 = vpack.c.bf16 %v4124_v11, %v4120_v2  ;;  %v4153_v2 = vld [vmem:[#allocation8 + $0x1848] sm:$0xff] }
 0x40f   : > { %8311 = vmatpush1.bf16.msra.mxu1 %v8310_v58  ;;  %7801 = vmatprep.subr.bf16.mxu0 %v7800_v43  ;;  %v8326_v58 = vpack.c.bf16 %v4126_v42, %v4122_v32  ;;  %v7816_v43 = vpack.c.bf16 %v4133_v50, %v4129_v60  ;;  %v4157_v11 = vld [vmem:[#allocation8 + $0x1868] sm:$0xff]  ;;  %v4155_v32 = vld [vmem:[#allocation8 + $0x1858] sm:$0xff] }
 0x410   : > { %8313 = vmatprep.subr.bf16.mxu1 %v8312_v16  ;;  %v8328_v16 = vpack.c.bf16 %v4135_v56, %v4131_v63  ;;  %v10669_v60 = vld [vmem:[#allocation48_spill] sm:$0xff]  ;;  %v3275_v56 = vmax.f32 %v8547_v57, 0.0  ;;  %v4175_v57 = vld [vmem:[#allocation8 + $0x18f8] sm:$0xff] }
 0x412   : > { %7803 = vmatpush1.bf16.msra.mxu0 %v7802_v21  ;;  %v7818_v21 = vpack.c.bf16 %v4132_v19, %v4128_v46  ;;  %v7828_v46 = vpack.c.bf16 %v4157_v11, %v4153_v2  ;;  %v4152_v19 = vld [vmem:[#allocation8 + $0x1840] sm:$0xff] }
 0x413   : > { %8315 = vmatpush1.bf16.msra.mxu1 %v8314_v49  ;;  %7805 = vmatprep.subr.bf16.mxu0 %v7804_v33  ;;  %v10287_v49 = vld [vmem:[#allocation7 + $0x8] sm:$0xff] }
 0x414   : > { %8317 = vmatprep.subr.bf16.mxu1 %v8316_v0  ;;  %v10666_v33 = vld [vmem:[#allocation62_spill] sm:$0xff]  ;;  %v4136_v0 = vld [vmem:[#allocation8 + $0x17c0] sm:$0xff] }
 0x415   : > { %v10291_v13 = vrot.slane %v10287_v49, %v10666_v33  ;;  %v7822_v44 = vpack.c.bf16 %v4140_v51, %v4136_v0  ;;  %v7830_v51 = vpack.c.bf16 %v4156_v45, %v4152_v19  ;;  %v10674_v2 = vld [vmem:[#allocation55_spill] sm:$0xff]  ;;  %v10675_v45 = vld [vmem:[#allocation54_spill] sm:$0xff] }
 0x416   : > { %7807 = vmatpush1.bf16.msra.mxu0 %v7806_v6  ;;  %v4149_v6 = vld [vmem:[#allocation8 + $0x1828] sm:$0xff]  ;;  %v8553_v11 = vadd.f32 %v10674_v2, %v10277_v36 }
 0x417   : > { %8319 = vmatpush1.bf16.msra.mxu1 %v8318_v10  ;;  %7809 = vmatprep.subr.bf16.mxu0 %v7808_v37  ;;  %v4147_v10 = vld [vmem:[#allocation8 + $0x1818] sm:$0xff]  ;;  %v8544_v3 = vadd.f32 %v10667_v62, %v10291_v13  ;;  %v7824_v12 = vpack.c.bf16 %v4149_v6, %v4145_v40  ;;  %v8546_v50 = vadd.f32 %v10669_v60, %v10291_v13  ;;  %v4172_v60 = vld [vmem:[#allocation8 + $0x18e0] sm:$0xff]  ;;  %v4193_v2 = vld [vmem:[#allocation8 + $0x1988] sm:$0xff] }
 0x418   : > { %8321 = vmatprep.subr.bf16.mxu1 %v8320_v15  ;;  %v4151_v37 = vld [vmem:[#allocation8 + $0x1838] sm:$0xff]  ;;  %v8334_v15 = vpack.c.bf16 %v4142_v18, %v4138_v17  ;;  %v7832_v6 = vpack.c.bf16 %v4165_v25, %v4161_v20  ;;  %v10676_v20 = vld [vmem:[#allocation57_spill] sm:$0xff] }
 0x419   : > { %v8336_v26 = vpack.c.bf16 %v4151_v37, %v4147_v10  ;;  %v3258_v42 = vmax.f32 %v8544_v3, 0.0  ;;  %v4160_v10 = vld [vmem:[#allocation8 + $0x1880] sm:$0xff]  ;;  %v4166_v3 = vld [vmem:[#allocation8 + $0x18b0] sm:$0xff]  ;;  %v8555_v25 = vadd.f32 %v10676_v20, %v10277_v36 }
 0x41a   : > { %7811 = vmatpush1.bf16.msra.mxu0 %v7810_v30  ;;  %v4148_v30 = vld [vmem:[#allocation8 + $0x1820] sm:$0xff] }
 0x41b   : > { %8323 = vmatpush1.bf16.msra.mxu1 %v8322_v41  ;;  %7813 = vmatprep.subr.bf16.mxu0 %v7812_v38  ;;  %v4146_v41 = vld [vmem:[#allocation8 + $0x1810] sm:$0xff]  ;;  %v7826_v63 = vpack.c.bf16 %v4148_v30, %v4144_v31  ;;  %v4164_v37 = vld [vmem:[#allocation8 + $0x18a0] sm:$0xff] }
 0x41c   : > { %8325 = vmatprep.subr.bf16.mxu1 %v8324_v54  ;;  %v4150_v38 = vld [vmem:[#allocation8 + $0x1830] sm:$0xff]  ;;  %v4159_v54 = vld [vmem:[#allocation8 + $0x1878] sm:$0xff]  ;;  %v10673_v31 = vld [vmem:[#allocation52_spill] sm:$0xff] }
 0x41d   : > { %v8340_v24 = vpack.c.bf16 %v4159_v54, %v4155_v32  ;;  %v8550_v30 = vadd.f32 %v10673_v31, %v10291_v13  ;;  %v4188_v31 = vld [vmem:[#allocation8 + $0x1960] sm:$0xff] }
 0x41e   : > { %7815 = vmatpush1.bf16.msra.mxu0 %v7814_v1  ;;  %v10670_v1 = vld [vmem:[#allocation51_spill] sm:$0xff] }
 0x41f   : > { %8327 = vmatpush1.bf16.msra.mxu1 %v8326_v58  ;;  %7817 = vmatprep.subr.bf16.mxu0 %v7816_v43  ;;  %v8549_v58 = vadd.f32 %v10670_v1, %v10277_v36  ;;  %v8338_v43 = vpack.c.bf16 %v4150_v38, %v4146_v41  ;;  %v7834_v41 = vpack.c.bf16 %v4164_v37, %v4160_v10  ;;  %v4177_v1 = vld [vmem:[#allocation8 + $0x1908] sm:$0xff]  ;;  %v3306_v19 = vmax.f32 %v8550_v30, 0.0  ;;  %v4186_v30 = vld [vmem:[#allocation8 + $0x1950] sm:$0xff] }
 0x420   : > { %8329 = vmatprep.subr.bf16.mxu1 %v8328_v16  ;;  %v4154_v16 = vld [vmem:[#allocation8 + $0x1850] sm:$0xff]  ;;  %v10677_v37 = vld [vmem:[#allocation56_spill] sm:$0xff] }
 0x421   : > { %v3291_v17 = vmax.f32 %v8549_v58, 0.0  ;;  %v8342_v40 = vpack.c.bf16 %v4158_v7, %v4154_v16  ;;  %v4181_v58 = vld [vmem:[#allocation8 + $0x1928] sm:$0xff]  ;;  %v8552_v16 = vadd.f32 %v10675_v45, %v10291_v13  ;;  %v3323_v7 = vmax.f32 %v8553_v11, 0.0 }
 0x422   : > { %7819 = vmatpush1.bf16.msra.mxu0 %v7818_v21  ;;  %v4167_v21 = vld [vmem:[#allocation8 + $0x18b8] sm:$0xff]  ;;  %v4197_v11 = vld [vmem:[#allocation8 + $0x19a8] sm:$0xff] }
 0x423   : > { %8331 = vmatpush1.bf16.msra.mxu1 %v8330_v35  ;;  %7821 = vmatprep.subr.bf16.mxu0 %v7820_v27  ;;  %v3274_v35 = vmax.f32 %v8546_v50, 0.0  ;;  %v10671_v27 = vld [vmem:[#allocation50_spill] sm:$0xff]  ;;  %v8344_v62 = vpack.c.bf16 %v4167_v21, %v4163_v48  ;;  %v7840_v21 = vpack.c.bf16 %v4181_v58, %v4177_v1  ;;  %v3322_v10 = vmax.f32 %v8552_v16, 0.0  ;;  %v4192_v16 = vld [vmem:[#allocation8 + $0x1980] sm:$0xff] }
 0x424   : > { %8333 = vmatprep.subr.bf16.mxu1 %v8332_v59  ;;  %v8548_v0 = vadd.f32 %v10671_v27, %v10291_v13  ;;  %v10672_v59 = vld [vmem:[#allocation53_spill] sm:$0xff]  ;;  %v4180_v27 = vld [vmem:[#allocation8 + $0x1920] sm:$0xff]  ;;  %v7848_v45 = vpack.c.bf16 %v4197_v11, %v4193_v2 }
 0x425   : > { %v8551_v18 = vadd.f32 %v10672_v59, %v10277_v36  ;;  %v4170_v50 = vld [vmem:[#allocation8 + $0x18d0] sm:$0xff]  ;;  %v4185_v59 = vld [vmem:[#allocation8 + $0x1948] sm:$0xff] }
 0x426   : > { %7823 = vmatpush1.bf16.msra.mxu0 %v7822_v44  ;;  %v4162_v44 = vld [vmem:[#allocation8 + $0x1890] sm:$0xff] }
 0x427   : > { %8335 = vmatpush1.bf16.msra.mxu1 %v8334_v15  ;;  %7825 = vmatprep.subr.bf16.mxu0 %v7824_v12  ;;  %v4169_v15 = vld [vmem:[#allocation8 + $0x18c8] sm:$0xff]  ;;  %v3307_v38 = vmax.f32 %v8551_v18, 0.0  ;;  %v8346_v32 = vpack.c.bf16 %v4166_v3, %v4162_v44  ;;  %v8554_v44 = vadd.f32 %v10677_v37, %v10291_v13  ;;  %v3339_v3 = vmax.f32 %v8555_v25, 0.0  ;;  %v4198_v25 = vld [vmem:[#allocation8 + $0x19b0] sm:$0xff]  ;;  %v4204_v37 = vld [vmem:[#allocation8 + $0x19e0] sm:$0xff] }
 0x428   : > { %8337 = vmatprep.subr.bf16.mxu1 %v8336_v26  ;;  %v4173_v12 = vld [vmem:[#allocation8 + $0x18e8] sm:$0xff]  ;;  %v3290_v26 = vmax.f32 %v8548_v0, 0.0  ;;  %v4178_v0 = vld [vmem:[#allocation8 + $0x1910] sm:$0xff] }
 0x429   : > { %5052 = vmatmul.mubr.f32.vlgmr.msra.gmra.mrb[64].mxu0 %v3258_v42  ;;  %v7836_v54 = vpack.c.bf16 %v4173_v12, %v4169_v15  ;;  %v4189_v18 = vld [vmem:[#allocation8 + $0x1968] sm:$0xff]  ;;  %v10678_v15 = vld [vmem:[#allocation59_spill] sm:$0xff]  ;;  %v4210_v2 = vld [vmem:[#allocation8 + $0x1a10] sm:$0xff] }
 0x42a   : > { %5956 = vmatmul.mubr.f32.vlgmr.msra.gmra.mrb[64].mxu1 %v3258_v42  ;;  %5057 = vmatprep.mubr.f32.mxu0 %v3275_v56  ;;  %v4168_v42 = vld [vmem:[#allocation8 + $0x18c0] sm:$0xff]  ;;  %v8557_v12 = vadd.f32 %v10678_v15, %v10277_v36  ;;  %v4209_v15 = vld [vmem:[#allocation8 + $0x1a08] sm:$0xff] }
 0x42b   : > { %7827 = vmatpush1.bf16.msra.mxu0 %v7826_v63  ;;  %5961 = vmatprep.mubr.f32.mxu1 %v3275_v56  ;;  %v8348_v63 = vpack.c.bf16 %v4175_v57, %v4171_v4  ;;  %v4174_v56 = vld [vmem:[#allocation8 + $0x18f0] sm:$0xff]  ;;  %v7844_v57 = vpack.c.bf16 %v4189_v18, %v4185_v59 }
 0x42c   : > { %8339 = vmatpush1.bf16.msra.mxu1 %v8338_v43  ;;  %7829 = vmatprep.subr.bf16.mxu0 %v7828_v46  ;;  %v4179_v43 = vld [vmem:[#allocation8 + $0x1918] sm:$0xff]  ;;  %v8350_v48 = vpack.c.bf16 %v4174_v56, %v4170_v50  ;;  %v3355_v58 = vmax.f32 %v8557_v12, 0.0 }
 0x42d   : > { %5058 = vmatmul.mubr.f32.gmra.mrb[66].mxu0 %v3274_v35  ;;  %8341 = vmatprep.subr.bf16.mxu1 %v8340_v24  ;;  %v4183_v46 = vld [vmem:[#allocation8 + $0x1938] sm:$0xff]  ;;  %v7838_v24 = vpack.c.bf16 %v4172_v60, %v4168_v42  ;;  %v3338_v42 = vmax.f32 %v8554_v44, 0.0  ;;  %v4202_v44 = vld [vmem:[#allocation8 + $0x19d0] sm:$0xff] }
 0x42e   : > { %5962 = vmatmul.mubr.f32.gmra.mrb[66].mxu1 %v3274_v35  ;;  %5063 = vmatprep.mubr.f32.mxu0 %v3291_v17  ;;  %v4176_v35 = vld [vmem:[#allocation8 + $0x1900] sm:$0xff]  ;;  %v10679_v60 = vld [vmem:[#allocation58_spill] sm:$0xff] }
 0x42f   : > { %7831 = vmatpush1.bf16.msra.mxu0 %v7830_v51  ;;  %5967 = vmatprep.mubr.f32.mxu1 %v3291_v17  ;;  %v8352_v51 = vpack.c.bf16 %v4183_v46, %v4179_v43  ;;  %v4182_v17 = vld [vmem:[#allocation8 + $0x1930] sm:$0xff]  ;;  %v8556_v50 = vadd.f32 %v10679_v60, %v10291_v13  ;;  %v4211_v12 = vld [vmem:[#allocation8 + $0x1a18] sm:$0xff] }
 0x430   : > { %8343 = vmatpush1.bf16.msra.mxu1 %v8342_v40  ;;  %7833 = vmatprep.subr.bf16.mxu0 %v7832_v6  ;;  %v4187_v40 = vld [vmem:[#allocation8 + $0x1958] sm:$0xff]  ;;  %v8354_v4 = vpack.c.bf16 %v4182_v17, %v4178_v0  ;;  %v10681_v43 = vld [vmem:[#allocation61_spill] sm:$0xff] }
 0x431   : > { %5064 = vmatmul.mubr.f32.gmra.mrb[68].mxu0 %v3290_v26  ;;  %8345 = vmatprep.subr.bf16.mxu1 %v8344_v62  ;;  %v4191_v6 = vld [vmem:[#allocation8 + $0x1978] sm:$0xff]  ;;  %v7842_v62 = vpack.c.bf16 %v4180_v27, %v4176_v35  ;;  %v8559_v46 = vadd.f32 %v10681_v43, %v10277_v36  ;;  %v3354_v0 = vmax.f32 %v8556_v50, 0.0  ;;  %v10682_v36 = vld [vmem:[#allocation60_spill] sm:$0xff] }
 0x432   : > { %5968 = vmatmul.mubr.f32.gmra.mrb[68].mxu1 %v3290_v26  ;;  %5069 = vmatprep.mubr.f32.mxu0 %v3307_v38  ;;  %v4184_v26 = vld [vmem:[#allocation8 + $0x1940] sm:$0xff]  ;;  %v4203_v35 = vld [vmem:[#allocation8 + $0x19d8] sm:$0xff] }
 0x433   : > { %7835 = vmatpush1.bf16.msra.mxu0 %v7834_v41  ;;  %5973 = vmatprep.mubr.f32.mxu1 %v3307_v38  ;;  %v8356_v41 = vpack.c.bf16 %v4191_v6, %v4187_v40  ;;  %v4190_v38 = vld [vmem:[#allocation8 + $0x1970] sm:$0xff]  ;;  %v7846_v1 = vpack.c.bf16 %v4188_v31, %v4184_v26  ;;  %v4207_v27 = vld [vmem:[#allocation8 + $0x19f8] sm:$0xff]  ;;  %v3371_v59 = vmax.f32 %v8559_v46, 0.0  ;;  %v4216_v43 = vld [vmem:[#allocation8 + $0x1a40] sm:$0xff] }
 0x434   : > { %8347 = vmatpush1.bf16.msra.mxu1 %v8346_v32  ;;  %7837 = vmatprep.subr.bf16.mxu0 %v7836_v54  ;;  %v4195_v32 = vld [vmem:[#allocation8 + $0x1998] sm:$0xff]  ;;  %v4220_v46 = vld [vmem:[#allocation8 + $0x1a60] sm:$0xff] }
 0x435   : > { %5070 = vmatmul.mubr.f32.gmra.mrb[70].mxu0 %v3306_v19  ;;  %8349 = vmatprep.subr.bf16.mxu1 %v8348_v63  ;;  %v4199_v54 = vld [vmem:[#allocation8 + $0x19b8] sm:$0xff]  ;;  %v10680_v63 = vsub.s32 5, %v9917_v8 }
 0x436   : > { %5974 = vmatmul.mubr.f32.gmra.mrb[70].mxu1 %v3306_v19  ;;  %5075 = vmatprep.mubr.f32.mxu0 %v3323_v7  ;;  %v8358_v19 = vpack.c.bf16 %v4190_v38, %v4186_v30  ;;  %v8360_v20 = vpack.c.bf16 %v4199_v54, %v4195_v32  ;;  %v4212_v38 = vld [vmem:[#allocation8 + $0x1a20] sm:$0xff]  ;;  %v4214_v32 = vld [vmem:[#allocation8 + $0x1a30] sm:$0xff]  ;;  %v4217_v54 = vld [vmem:[#allocation8 + $0x1a48] sm:$0xff] }
 0x437   : > { %7839 = vmatpush1.bf16.msra.mxu0 %v7838_v24  ;;  %5979 = vmatprep.mubr.f32.mxu1 %v3323_v7  ;;  %v10322_v56 = vrot.slane %v10287_v49, %v10680_v63  ;;  %v4196_v24 = vld [vmem:[#allocation8 + $0x19a0] sm:$0xff]  ;;  %v4194_v7 = vld [vmem:[#allocation8 + $0x1990] sm:$0xff]  ;;  %v4219_v60 = vld [vmem:[#allocation8 + $0x1a58] sm:$0xff] }
 0x438   : > { %8351 = vmatpush1.bf16.msra.mxu1 %v8350_v48  ;;  %7841 = vmatprep.subr.bf16.mxu0 %v7840_v21  ;;  %v4201_v48 = vld [vmem:[#allocation8 + $0x19c8] sm:$0xff]  ;;  %v7850_v17 = vpack.c.bf16 %v4196_v24, %v4192_v16  ;;  %v8362_v40 = vpack.c.bf16 %v4198_v25, %v4194_v7  ;;  %v4223_v50 = vld [vmem:[#allocation8 + $0x1a78] sm:$0xff]  ;;  %v4222_v16 = vld [vmem:[#allocation8 + $0x1a70] sm:$0xff] }
 0x439   : > { %5076 = vmatmul.mubr.f32.gmra.mrb[72].mxu0 %v3322_v10  ;;  %8353 = vmatprep.subr.bf16.mxu1 %v8352_v51  ;;  %v4205_v21 = vld [vmem:[#allocation8 + $0x19e8] sm:$0xff]  ;;  %v8558_v51 = vadd.f32 %v10682_v36, %v10291_v13  ;;  %v8561_v18 = vadd.f32 %v10138_v47, %v10322_v56  ;;  %v4231_v25 = vld [vmem:[#allocation8 + $0x1ab8] sm:$0xff]  ;;  %v4226_v36 = vld [vmem:[#allocation8 + $0x1a90] sm:$0xff] }
 0x43a   : > { %5980 = vmatmul.mubr.f32.gmra.mrb[72].mxu1 %v3322_v10  ;;  %5081 = vmatprep.mubr.f32.mxu0 %v3339_v3  ;;  %v7852_v6 = vpack.c.bf16 %v4205_v21, %v4201_v48  ;;  %v4200_v10 = vld [vmem:[#allocation8 + $0x19c0] sm:$0xff]  ;;  %v4213_v13 = vld [vmem:[#allocation8 + $0x1a28] sm:$0xff]  ;;  %v7862_v48 = vpack.c.bf16 %v4220_v46, %v4216_v43 }
 0x43b   : > { %7843 = vmatpush1.bf16.msra.mxu0 %v7842_v62  ;;  %5985 = vmatprep.mubr.f32.mxu1 %v3339_v3  ;;  %v8364_v62 = vpack.c.bf16 %v4207_v27, %v4203_v35  ;;  %v4206_v3 = vld [vmem:[#allocation8 + $0x19f0] sm:$0xff]  ;;  %v7854_v47 = vpack.c.bf16 %v4204_v37, %v4200_v10  ;;  %v3261_v26 = vmax.f32 %v8561_v18, 0.0  ;;  %v7856_v30 = vpack.c.bf16 %v4213_v13, %v4209_v15  ;;  %v4225_v24 = vld [vmem:[#allocation8 + $0x1a88] sm:$0xff]  ;;  %v4224_v27 = vld [vmem:[#allocation8 + $0x1a80] sm:$0xff] }
 0x43c   : > { %8355 = vmatpush1.bf16.msra.mxu1 %v8354_v4  ;;  %7845 = vmatprep.subr.bf16.mxu0 %v7844_v57  ;;  %v4215_v4 = vld [vmem:[#allocation8 + $0x1a38] sm:$0xff]  ;;  %v3370_v57 = vmax.f32 %v8558_v51, 0.0  ;;  %v8366_v31 = vpack.c.bf16 %v4206_v3, %v4202_v44  ;;  %v4229_v7 = vld [vmem:[#allocation8 + $0x1aa8] sm:$0xff]  ;;  %v4236_v3 = vld [vmem:[#allocation8 + $0x1ae0] sm:$0xff] }
 0x43d   : > { %5082 = vmatmul.mubr.f32.gmra.mrb[74].mxu0 %v3338_v42  ;;  %8357 = vmatprep.subr.bf16.mxu1 %v8356_v41  ;;  %v4208_v41 = vld [vmem:[#allocation8 + $0x1a00] sm:$0xff]  ;;  %v8368_v11 = vpack.c.bf16 %v4215_v4, %v4211_v12  ;;  %v7864_v35 = vpack.c.bf16 %v4229_v7, %v4225_v24  ;;  %v4237_v18 = vld [vmem:[#allocation8 + $0x1ae8] sm:$0xff]  ;;  %v4234_v15 = vld [vmem:[#allocation8 + $0x1ad0] sm:$0xff] }
 0x43e   : > { %5986 = vmatmul.mubr.f32.gmra.mrb[74].mxu1 %v3338_v42  ;;  %5087 = vmatprep.mubr.f32.mxu0 %v3355_v58  ;;  %v4221_v42 = vld [vmem:[#allocation8 + $0x1a68] sm:$0xff]  ;;  %v7858_v63 = vpack.c.bf16 %v4212_v38, %v4208_v41  ;;  %v4238_v12 = vld [vmem:[#allocation8 + $0x1af0] sm:$0xff]  ;;  %v4240_v38 = vld [vmem:[#allocation8 + $0x1b00] sm:$0xff] }
 0x43f   : > { %7847 = vmatpush1.bf16.msra.mxu0 %v7846_v1  ;;  %5991 = vmatprep.mubr.f32.mxu1 %v3355_v58  ;;  %v8370_v1 = vpack.c.bf16 %v4214_v32, %v4210_v2  ;;  %v7860_v58 = vpack.c.bf16 %v4221_v42, %v4217_v54  ;;  %v4241_v4 = vld [vmem:[#allocation8 + $0x1b08] sm:$0xff]  ;;  %v4244_v2 = vld [vmem:[#allocation8 + $0x1b20] sm:$0xff]  ;;  %v4246_v54 = vld [vmem:[#allocation8 + $0x1b30] sm:$0xff] }
 0x440   : > { %8359 = vmatpush1.bf16.msra.mxu1 %v8358_v19  ;;  %7849 = vmatprep.subr.bf16.mxu0 %v7848_v45  ;;  %v4218_v19 = vld [vmem:[#allocation8 + $0x1a50] sm:$0xff]  ;;  %v8372_v45 = vpack.c.bf16 %v4223_v50, %v4219_v60  ;;  %v4249_v42 = vld [vmem:[#allocation8 + $0x1b48] sm:$0xff]  ;;  %v4251_v50 = vld [vmem:[#allocation8 + $0x1b58] sm:$0xff] }
 0x441   : > { %5088 = vmatmul.mubr.f32.gmra.mrb[76].mxu0 %v3354_v0  ;;  %8361 = vmatprep.subr.bf16.mxu1 %v8360_v20  ;;  %v4227_v20 = vld [vmem:[#allocation8 + $0x1a98] sm:$0xff]  ;;  %v8374_v21 = vpack.c.bf16 %v4222_v16, %v4218_v19  ;;  %v4253_v60 = vld [vmem:[#allocation8 + $0x1b68] sm:$0xff]  ;;  %v4248_v46 = vld [vmem:[#allocation8 + $0x1b40] sm:$0xff] }
 0x442   : > { %5992 = vmatmul.mubr.f32.gmra.mrb[76].mxu1 %v3354_v0  ;;  %5093 = vmatprep.mubr.f32.mxu0 %v3371_v59  ;;  %v4228_v0 = vld [vmem:[#allocation8 + $0x1aa0] sm:$0xff]  ;;  %v8376_v51 = vpack.c.bf16 %v4231_v25, %v4227_v20  ;;  %v7876_v43 = vpack.c.bf16 %v4253_v60, %v4249_v42  ;;  %v4254_v24 = vld [vmem:[#allocation8 + $0x1b70] sm:$0xff]  ;;  %v4257_v7 = vld [vmem:[#allocation8 + $0x1b88] sm:$0xff] }
 0x443   : > { %7851 = vmatpush1.bf16.msra.mxu0 %v7850_v17  ;;  %5997 = vmatprep.mubr.f32.mxu1 %v3371_v59  ;;  %v4230_v17 = vld [vmem:[#allocation8 + $0x1ab0] sm:$0xff]  ;;  %v4233_v59 = vld [vmem:[#allocation8 + $0x1ac8] sm:$0xff]  ;;  %v7866_v10 = vpack.c.bf16 %v4228_v0, %v4224_v27  ;;  %v4252_v19 = vld [vmem:[#allocation8 + $0x1b60] sm:$0xff] }
 0x444   : > { %8363 = vmatpush1.bf16.msra.mxu1 %v8362_v40  ;;  %7853 = vmatprep.subr.bf16.mxu0 %v7852_v6  ;;  %v4235_v40 = vld [vmem:[#allocation8 + $0x1ad8] sm:$0xff]  ;;  %v8378_v37 = vpack.c.bf16 %v4230_v17, %v4226_v36  ;;  %v7868_v44 = vpack.c.bf16 %v4237_v18, %v4233_v59  ;;  %v4261_v20 = vld [vmem:[#allocation8 + $0x1ba8] sm:$0xff]  ;;  %v4256_v0 = vld [vmem:[#allocation8 + $0x1b80] sm:$0xff] }
 0x445   : > { %5094 = vmatmul.mubr.f32.gmra.mrb[78].mxu0 %v3370_v57  ;;  %8365 = vmatprep.subr.bf16.mxu1 %v8364_v62  ;;  %v4239_v6 = vld [vmem:[#allocation8 + $0x1af8] sm:$0xff]  ;;  %v4232_v62 = vld [vmem:[#allocation8 + $0x1ac0] sm:$0xff]  ;;  %v7880_v27 = vpack.c.bf16 %v4261_v20, %v4257_v7  ;;  %v4262_v59 = vld [vmem:[#allocation8 + $0x1bb0] sm:$0xff] }
 0x446   : > { %5998 = vmatmul.mubr.f32.gmra.mrb[78].mxu1 %v3370_v57  ;;  %5164 = vmatprep.mubr.f32.mxu0 %v3261_v26  ;;  %v8380_v13 = vpack.c.bf16 %v4239_v6, %v4235_v40  ;;  %v4245_v57 = vld [vmem:[#allocation8 + $0x1b28] sm:$0xff]  ;;  %v4259_v25 = vld [vmem:[#allocation8 + $0x1b98] sm:$0xff]  ;;  %v4260_v36 = vld [vmem:[#allocation8 + $0x1ba0] sm:$0xff] }
 0x447   : > { %7855 = vmatpush1.bf16.msra.mxu0 %v7854_v47  ;;  %6068 = vmatprep.mubr.f32.mxu1 %v3261_v26  ;;  %v4243_v47 = vld [vmem:[#allocation8 + $0x1b18] sm:$0xff]  ;;  %v7872_v41 = vpack.c.bf16 %v4245_v57, %v4241_v4  ;;  %v4265_v18 = vld [vmem:[#allocation8 + $0x1bc8] sm:$0xff]  ;;  %v4266_v4 = vld [vmem:[#allocation8 + $0x1bd0] sm:$0xff] }
 0x448   : > { %8367 = vmatpush1.bf16.msra.mxu1 %v8366_v31  ;;  %7857 = vmatprep.subr.bf16.mxu0 %v7856_v30  ;;  %v4247_v26 = vld [vmem:[#allocation8 + $0x1b38] sm:$0xff]  ;;  %v7870_v31 = vpack.c.bf16 %v4236_v3, %v4232_v62  ;;  %v8382_v30 = vpack.c.bf16 %v4238_v12, %v4234_v15  ;;  %v4269_v40 = vld [vmem:[#allocation8 + $0x1be8] sm:$0xff]  ;;  %v4268_v12 = vld [vmem:[#allocation8 + $0x1be0] sm:$0xff] }
 0x449   : > { %8369 = vmatprep.subr.bf16.mxu1 %v8368_v11  ;;  %v4242_v11 = vld [vmem:[#allocation8 + $0x1b10] sm:$0xff]  ;;  %v8384_v32 = vpack.c.bf16 %v4247_v26, %v4243_v47  ;;  %v4267_v6 = vld [vmem:[#allocation8 + $0x1bd8] sm:$0xff]  ;;  %v7884_v15 = vpack.c.bf16 %v4269_v40, %v4265_v18  ;;  %v4273_v26 = vld [vmem:[#allocation8 + $0x1c08] sm:$0xff]  ;;  %v8567_v40 = vadd.f32 %v10168_v52, %v10322_v56 }
 0x44a   : > { %v4270_v47 = vld [vmem:[#allocation8 + $0x1bf0] sm:$0xff]  ;;  %v4272_v60 = vld [vmem:[#allocation8 + $0x1c00] sm:$0xff] }
 0x44b   : > { %7859 = vmatpush1.bf16.msra.mxu0 %v7858_v63  ;;  %v4255_v63 = vld [vmem:[#allocation8 + $0x1b78] sm:$0xff] }
 0x44c   : > { %8371 = vmatpush1.bf16.msra.mxu1 %v8370_v1  ;;  %7861 = vmatprep.subr.bf16.mxu0 %v7860_v58  ;;  %v7874_v1 = vpack.c.bf16 %v4244_v2, %v4240_v38  ;;  %v8386_v58 = vpack.c.bf16 %v4246_v54, %v4242_v11  ;;  %v8388_v16 = vpack.c.bf16 %v4255_v63, %v4251_v50  ;;  %v4276_v50 = vld [vmem:[#allocation8 + $0x1c20] sm:$0xff]  ;;  %v4274_v63 = vld [vmem:[#allocation8 + $0x1c10] sm:$0xff] }
 0x44d   : > { %8373 = vmatprep.subr.bf16.mxu1 %v8372_v45  ;;  %v4250_v45 = vld [vmem:[#allocation8 + $0x1b50] sm:$0xff]  ;;  %v8398_v11 = vpack.c.bf16 %v4270_v47, %v4266_v4  ;;  %v8563_v54 = vadd.f32 %v10150_v55, %v10322_v56  ;;  %v8565_v55 = vadd.f32 %v10160_v39, %v10322_v56  ;;  %v4299_v4 = vld [vmem:[#allocation8 + $0x1cd8] sm:$0xff] }
 0x44f   : > { %7863 = vmatpush1.bf16.msra.mxu0 %v7862_v48  ;;  %v4263_v48 = vld [vmem:[#allocation8 + $0x1bb8] sm:$0xff]  ;;  %v3293_v18 = vmax.f32 %v8565_v55, 0.0 }
 0x450   : > { %8375 = vmatpush1.bf16.msra.mxu1 %v8374_v21  ;;  %7865 = vmatprep.subr.bf16.mxu0 %v7864_v35  ;;  %v7878_v21 = vpack.c.bf16 %v4252_v19, %v4248_v46  ;;  %v8390_v35 = vpack.c.bf16 %v4254_v24, %v4250_v45  ;;  %v8392_v17 = vpack.c.bf16 %v4263_v48, %v4259_v25  ;;  %v4283_v46 = vld [vmem:[#allocation8 + $0x1c58] sm:$0xff]  ;;  %v3277_v24 = vmax.f32 %v8563_v54, 0.0  ;;  %v4280_v25 = vld [vmem:[#allocation8 + $0x1c40] sm:$0xff] }
 0x451   : > { %8377 = vmatprep.subr.bf16.mxu1 %v8376_v51  ;;  %v4258_v51 = vld [vmem:[#allocation8 + $0x1b90] sm:$0xff]  ;;  %v4287_v19 = vld [vmem:[#allocation8 + $0x1c78] sm:$0xff]  ;;  %v4284_v48 = vld [vmem:[#allocation8 + $0x1c60] sm:$0xff] }
 0x452   : > { %v8394_v3 = vpack.c.bf16 %v4262_v59, %v4258_v51  ;;  %v4295_v51 = vld [vmem:[#allocation8 + $0x1cb8] sm:$0xff]  ;;  %v7894_v39 = vpack.c.bf16 %v4284_v48, %v4280_v25 }
 0x453   : > { %7867 = vmatpush1.bf16.msra.mxu0 %v7866_v10  ;;  %v4271_v10 = vld [vmem:[#allocation8 + $0x1bf8] sm:$0xff] }
 0x454   : > { %8379 = vmatpush1.bf16.msra.mxu1 %v8378_v37  ;;  %7869 = vmatprep.subr.bf16.mxu0 %v7868_v44  ;;  %v7882_v37 = vpack.c.bf16 %v4260_v36, %v4256_v0  ;;  %v10683_v44 = vsub.s32 4, %v9917_v8  ;;  %v8396_v57 = vpack.c.bf16 %v4271_v10, %v4267_v6  ;;  %v4289_v0 = vld [vmem:[#allocation8 + $0x1c88] sm:$0xff]  ;;  %v4315_v25 = vld [vmem:[#allocation8 + $0x1d58] sm:$0xff] }
 0x455   : > { %8381 = vmatprep.subr.bf16.mxu1 %v8380_v13  ;;  %v4264_v13 = vld [vmem:[#allocation8 + $0x1bc0] sm:$0xff]  ;;  %v4293_v36 = vld [vmem:[#allocation8 + $0x1ca8] sm:$0xff]  ;;  %v4319_v48 = vld [vmem:[#allocation8 + $0x1d78] sm:$0xff] }
 0x456   : > { %v10333_v62 = vrot.slane %v10287_v49, %v10683_v44  ;;  %v7886_v38 = vpack.c.bf16 %v4268_v12, %v4264_v13  ;;  %v7896_v10 = vpack.c.bf16 %v4293_v36, %v4289_v0  ;;  %v4292_v44 = vld [vmem:[#allocation8 + $0x1ca0] sm:$0xff]  ;;  %v4294_v13 = vld [vmem:[#allocation8 + $0x1cb0] sm:$0xff]  ;;  %v4297_v12 = vld [vmem:[#allocation8 + $0x1cc8] sm:$0xff] }
 0x457   : > { %7871 = vmatpush1.bf16.msra.mxu0 %v7870_v31  ;;  %v4277_v31 = vld [vmem:[#allocation8 + $0x1c28] sm:$0xff]  ;;  %v10684_v0 = vld [vmem:[#allocation63_spill] sm:$0xff] }
 0x458   : > { %8383 = vmatpush1.bf16.msra.mxu1 %v8382_v30  ;;  %7873 = vmatprep.subr.bf16.mxu0 %v7872_v41  ;;  %v4275_v30 = vld [vmem:[#allocation8 + $0x1c18] sm:$0xff]  ;;  %v8560_v2 = vadd.f32 %v10127_v14, %v10333_v62  ;;  %v8562_v14 = vadd.f32 %v10144_v53, %v10333_v62  ;;  %v8564_v59 = vadd.f32 %v10156_v22, %v10333_v62  ;;  %v4301_v22 = vld [vmem:[#allocation8 + $0x1ce8] sm:$0xff] }
 0x459   : > { %8385 = vmatprep.subr.bf16.mxu1 %v8384_v32  ;;  %v4279_v41 = vld [vmem:[#allocation8 + $0x1c38] sm:$0xff]  ;;  %v7888_v32 = vpack.c.bf16 %v4277_v31, %v4273_v26  ;;  %v8566_v52 = vadd.f32 %v10164_v61, %v10333_v62  ;;  %v3309_v31 = vmax.f32 %v8567_v40, 0.0  ;;  %v4309_v61 = vld [vmem:[#allocation8 + $0x1d28] sm:$0xff]  ;;  %v8573_v36 = vadd.f32 %v10684_v0, %v10322_v56  ;;  %v4318_v40 = vld [vmem:[#allocation8 + $0x1d70] sm:$0xff] }
 0x45a   : > { %v8400_v42 = vpack.c.bf16 %v4279_v41, %v4275_v30  ;;  %v3260_v45 = vmax.f32 %v8560_v2, 0.0  ;;  %v4291_v53 = vld [vmem:[#allocation8 + $0x1c98] sm:$0xff]  ;;  %v3292_v47 = vmax.f32 %v8564_v59, 0.0  ;;  %v8569_v30 = vadd.f32 %v10176_v23, %v10322_v56  ;;  %v4296_v2 = vld [vmem:[#allocation8 + $0x1cc0] sm:$0xff]  ;;  %v4342_v0 = vld [vmem:[#allocation8 + $0x1e30] sm:$0xff] }
 0x45b   : > { %7875 = vmatpush1.bf16.msra.mxu0 %v7874_v1  ;;  %v4278_v1 = vld [vmem:[#allocation8 + $0x1c30] sm:$0xff]  ;;  %v8568_v23 = vadd.f32 %v10172_v9, %v10333_v62  ;;  %v4317_v9 = vld [vmem:[#allocation8 + $0x1d68] sm:$0xff]  ;;  %v4316_v59 = vld [vmem:[#allocation8 + $0x1d60] sm:$0xff] }
 0x45c   : > { %8387 = vmatpush1.bf16.msra.mxu1 %v8386_v58  ;;  %7877 = vmatprep.subr.bf16.mxu0 %v7876_v43  ;;  %v4281_v58 = vld [vmem:[#allocation8 + $0x1c48] sm:$0xff]  ;;  %v8402_v7 = vpack.c.bf16 %v4278_v1, %v4274_v63  ;;  %v4311_v63 = vld [vmem:[#allocation8 + $0x1d38] sm:$0xff]  ;;  %v3308_v1 = vmax.f32 %v8566_v52, 0.0 }
 0x45d   : > { %8389 = vmatprep.subr.bf16.mxu1 %v8388_v16  ;;  %v4285_v43 = vld [vmem:[#allocation8 + $0x1c68] sm:$0xff]  ;;  %v7890_v16 = vpack.c.bf16 %v4276_v50, %v4272_v60  ;;  %v4307_v50 = vld [vmem:[#allocation8 + $0x1d18] sm:$0xff] }
 0x45e   : > { %v7892_v20 = vpack.c.bf16 %v4285_v43, %v4281_v58  ;;  %v4305_v60 = vld [vmem:[#allocation8 + $0x1d08] sm:$0xff]  ;;  %v3325_v43 = vmax.f32 %v8569_v30, 0.0  ;;  %v8416_v55 = vpack.c.bf16 %v4311_v63, %v4307_v50  ;;  %v4324_v30 = vld [vmem:[#allocation8 + $0x1da0] sm:$0xff] }
 0x45f   : > { %7879 = vmatpush1.bf16.msra.mxu0 %v7878_v21  ;;  %v4282_v21 = vld [vmem:[#allocation8 + $0x1c50] sm:$0xff]  ;;  %v10689_v50 = vld [vmem:[#allocation23_spill] sm:$0xff] }
 0x460   : > { %8391 = vmatpush1.bf16.msra.mxu1 %v8390_v35  ;;  %7881 = vmatprep.subr.bf16.mxu0 %v7880_v27  ;;  %v8404_v35 = vpack.c.bf16 %v4287_v19, %v4283_v46  ;;  %v4286_v27 = vld [vmem:[#allocation8 + $0x1c70] sm:$0xff]  ;;  %v8571_v46 = vadd.f32 %v10184_v34, %v10322_v56  ;;  %v8570_v34 = vadd.f32 %v10180_v5, %v10333_v62  ;;  %v4325_v5 = vld [vmem:[#allocation8 + $0x1da8] sm:$0xff] }
 0x461   : > { %8393 = vmatprep.subr.bf16.mxu1 %v8392_v17  ;;  %v3276_v17 = vmax.f32 %v8562_v14, 0.0  ;;  %v8406_v6 = vpack.c.bf16 %v4286_v27, %v4282_v21  ;;  %v4304_v14 = vld [vmem:[#allocation8 + $0x1d00] sm:$0xff]  ;;  %v3324_v21 = vmax.f32 %v8568_v23, 0.0 }
 0x462   : > { %v3341_v27 = vmax.f32 %v8571_v46, 0.0  ;;  %v4332_v46 = vld [vmem:[#allocation8 + $0x1de0] sm:$0xff] }
 0x463   : > { %7883 = vmatpush1.bf16.msra.mxu0 %v7882_v37  ;;  %v4288_v37 = vld [vmem:[#allocation8 + $0x1c80] sm:$0xff] }
 0x464   : > { %8395 = vmatpush1.bf16.msra.mxu1 %v8394_v3  ;;  %7885 = vmatprep.subr.bf16.mxu0 %v7884_v15  ;;  %v4290_v3 = vld [vmem:[#allocation8 + $0x1c90] sm:$0xff]  ;;  %v8408_v15 = vpack.c.bf16 %v4295_v51, %v4291_v53  ;;  %v7898_v26 = vpack.c.bf16 %v4292_v44, %v4288_v37  ;;  %v4327_v37 = vld [vmem:[#allocation8 + $0x1db8] sm:$0xff]  ;;  %v10685_v44 = vsub.s32 7, %v9917_v8 }
 0x465   : > { %8397 = vmatprep.subr.bf16.mxu1 %v8396_v57  ;;  %v4303_v57 = vld [vmem:[#allocation8 + $0x1cf8] sm:$0xff]  ;;  %v8410_v41 = vpack.c.bf16 %v4294_v13, %v4290_v3  ;;  %v10686_v13 = vld [vmem:[#allocation41_spill] sm:$0xff] }
 0x466   : > { %v8412_v54 = vpack.c.bf16 %v4303_v57, %v4299_v4  ;;  %v10362_v3 = vrot.slane %v10287_v49, %v10685_v44  ;;  %v3357_v4 = vmax.f32 %v8573_v36, 0.0  ;;  %v10687_v57 = vld [vmem:[#allocation67_spill] sm:$0xff]  ;;  %v4345_v36 = vld [vmem:[#allocation8 + $0x1e48] sm:$0xff] }
 0x467   : > { %7887 = vmatpush1.bf16.msra.mxu0 %v7886_v38  ;;  %v7900_v38 = vpack.c.bf16 %v4301_v22, %v4297_v12  ;;  %v8572_v12 = vadd.f32 %v10686_v13, %v10333_v62  ;;  %v4353_v44 = vld [vmem:[#allocation8 + $0x1e88] sm:$0xff]  ;;  %v4355_v13 = vld [vmem:[#allocation8 + $0x1e98] sm:$0xff] }
 0x468   : > { %8399 = vmatpush1.bf16.msra.mxu1 %v8398_v11  ;;  %7889 = vmatprep.subr.bf16.mxu0 %v7888_v32  ;;  %v4300_v11 = vld [vmem:[#allocation8 + $0x1ce0] sm:$0xff]  ;;  %v4298_v32 = vld [vmem:[#allocation8 + $0x1cd0] sm:$0xff]  ;;  %v8577_v63 = vadd.f32 %v10689_v50, %v10362_v3 }
 0x469   : > { %8401 = vmatprep.subr.bf16.mxu1 %v8400_v42  ;;  %v4302_v42 = vld [vmem:[#allocation8 + $0x1cf0] sm:$0xff]  ;;  %v7902_v58 = vpack.c.bf16 %v4300_v11, %v4296_v2  ;;  %v4329_v2 = vld [vmem:[#allocation8 + $0x1dc8] sm:$0xff] }
 0x46a   : > { %5165 = vmatmul.mubr.f32.vlgmr.msra.gmra.mrb[64].mxu0 %v3260_v45  ;;  %v8414_v19 = vpack.c.bf16 %v4302_v42, %v4298_v32  ;;  %v4333_v11 = vld [vmem:[#allocation8 + $0x1de8] sm:$0xff]  ;;  %v4331_v32 = vld [vmem:[#allocation8 + $0x1dd8] sm:$0xff]  ;;  %v3356_v42 = vmax.f32 %v8572_v12, 0.0  ;;  %v4366_v50 = vld [vmem:[#allocation8 + $0x1ef0] sm:$0xff] }
 0x46b   : > { %6069 = vmatmul.mubr.f32.vlgmr.msra.gmra.mrb[64].mxu1 %v3260_v45  ;;  %5170 = vmatprep.mubr.f32.mxu0 %v3277_v24  ;;  %v7904_v45 = vpack.c.bf16 %v4309_v61, %v4305_v60  ;;  %v4359_v12 = vld [vmem:[#allocation8 + $0x1eb8] sm:$0xff] }
 0x46c   : > { %7891 = vmatpush1.bf16.msra.mxu0 %v7890_v16  ;;  %6074 = vmatprep.mubr.f32.mxu1 %v3277_v24  ;;  %v4308_v16 = vld [vmem:[#allocation8 + $0x1d20] sm:$0xff]  ;;  %v4306_v24 = vld [vmem:[#allocation8 + $0x1d10] sm:$0xff] }
 0x46d   : > { %8403 = vmatpush1.bf16.msra.mxu1 %v8402_v7  ;;  %7893 = vmatprep.subr.bf16.mxu0 %v7892_v20  ;;  %v4310_v7 = vld [vmem:[#allocation8 + $0x1d30] sm:$0xff]  ;;  %v4313_v20 = vld [vmem:[#allocation8 + $0x1d48] sm:$0xff] }
 0x46e   : > { %5171 = vmatmul.mubr.f32.gmra.mrb[66].mxu0 %v3276_v17  ;;  %8405 = vmatprep.subr.bf16.mxu1 %v8404_v35  ;;  %v7906_v35 = vpack.c.bf16 %v4308_v16, %v4304_v14  ;;  %v8418_v53 = vpack.c.bf16 %v4310_v7, %v4306_v24  ;;  %v7908_v51 = vpack.c.bf16 %v4317_v9, %v4313_v20  ;;  %v4334_v14 = vld [vmem:[#allocation8 + $0x1df0] sm:$0xff]  ;;  %v4337_v16 = vld [vmem:[#allocation8 + $0x1e08] sm:$0xff]  ;;  %v4339_v24 = vld [vmem:[#allocation8 + $0x1e18] sm:$0xff]  ;;  %v3263_v9 = vmax.f32 %v8577_v63, 0.0 }
 0x46f   : > { %6075 = vmatmul.mubr.f32.gmra.mrb[66].mxu1 %v3276_v17  ;;  %5176 = vmatprep.mubr.f32.mxu0 %v3293_v18  ;;  %v4312_v17 = vld [vmem:[#allocation8 + $0x1d40] sm:$0xff]  ;;  %v4369_v63 = vld [vmem:[#allocation8 + $0x1f08] sm:$0xff] }
 0x470   : > { %7895 = vmatpush1.bf16.msra.mxu0 %v7894_v39  ;;  %6080 = vmatprep.mubr.f32.mxu1 %v3293_v18  ;;  %v4314_v39 = vld [vmem:[#allocation8 + $0x1d50] sm:$0xff]  ;;  %v8420_v18 = vpack.c.bf16 %v4319_v48, %v4315_v25  ;;  %v7910_v22 = vpack.c.bf16 %v4316_v59, %v4312_v17  ;;  %v4351_v17 = vld [vmem:[#allocation8 + $0x1e78] sm:$0xff] }
 0x471   : > { %8407 = vmatpush1.bf16.msra.mxu1 %v8406_v6  ;;  %7897 = vmatprep.subr.bf16.mxu0 %v7896_v10  ;;  %v4321_v6 = vld [vmem:[#allocation8 + $0x1d88] sm:$0xff]  ;;  %v4323_v10 = vld [vmem:[#allocation8 + $0x1d98] sm:$0xff]  ;;  %v8422_v52 = vpack.c.bf16 %v4318_v40, %v4314_v39  ;;  %v4344_v40 = vld [vmem:[#allocation8 + $0x1e40] sm:$0xff] }
 0x472   : > { %5177 = vmatmul.mubr.f32.gmra.mrb[68].mxu0 %v3292_v47  ;;  %8409 = vmatprep.subr.bf16.mxu1 %v8408_v15  ;;  %v3340_v15 = vmax.f32 %v8570_v34, 0.0  ;;  %v8424_v49 = vpack.c.bf16 %v4327_v37, %v4323_v10  ;;  %v4340_v34 = vld [vmem:[#allocation8 + $0x1e20] sm:$0xff]  ;;  %v4350_v37 = vld [vmem:[#allocation8 + $0x1e70] sm:$0xff] }
 0x473   : > { %6081 = vmatmul.mubr.f32.gmra.mrb[68].mxu1 %v3292_v47  ;;  %5182 = vmatprep.mubr.f32.mxu0 %v3309_v31  ;;  %v8575_v47 = vadd.f32 %v10687_v57, %v10322_v56  ;;  %v10688_v56 = vld [vmem:[#allocation65_spill] sm:$0xff] }
 0x474   : > { %7899 = vmatpush1.bf16.msra.mxu0 %v7898_v26  ;;  %6086 = vmatprep.mubr.f32.mxu1 %v3309_v31  ;;  %v7912_v26 = vpack.c.bf16 %v4325_v5, %v4321_v6  ;;  %v4320_v31 = vld [vmem:[#allocation8 + $0x1d80] sm:$0xff]  ;;  %v8574_v60 = vadd.f32 %v10688_v56, %v10333_v62  ;;  %v4341_v62 = vld [vmem:[#allocation8 + $0x1e28] sm:$0xff]  ;;  %v4346_v5 = vld [vmem:[#allocation8 + $0x1e50] sm:$0xff] }
 0x475   : > { %8411 = vmatpush1.bf16.msra.mxu1 %v8410_v41  ;;  %7901 = vmatprep.subr.bf16.mxu0 %v7900_v38  ;;  %v4322_v41 = vld [vmem:[#allocation8 + $0x1d90] sm:$0xff]  ;;  %v7914_v61 = vpack.c.bf16 %v4324_v30, %v4320_v31  ;;  %v7920_v48 = vpack.c.bf16 %v4341_v62, %v4337_v16  ;;  %v4348_v6 = vld [vmem:[#allocation8 + $0x1e60] sm:$0xff]  ;;  %v8440_v31 = vpack.c.bf16 %v4359_v12, %v4355_v13  ;;  %v4397_v13 = vld [vmem:[#allocation8 + $0x1fe8] sm:$0xff] }
 0x476   : > { %5183 = vmatmul.mubr.f32.gmra.mrb[70].mxu0 %v3308_v1  ;;  %8413 = vmatprep.subr.bf16.mxu1 %v8412_v54  ;;  %v4326_v38 = vld [vmem:[#allocation8 + $0x1db0] sm:$0xff]  ;;  %v4335_v54 = vld [vmem:[#allocation8 + $0x1df8] sm:$0xff]  ;;  %v3372_v7 = vmax.f32 %v8574_v60, 0.0  ;;  %v4364_v56 = vld [vmem:[#allocation8 + $0x1ee0] sm:$0xff] }
 0x477   : > { %6087 = vmatmul.mubr.f32.gmra.mrb[70].mxu1 %v3308_v1  ;;  %5188 = vmatprep.mubr.f32.mxu0 %v3325_v43  ;;  %v3373_v1 = vmax.f32 %v8575_v47, 0.0  ;;  %v8426_v23 = vpack.c.bf16 %v4326_v38, %v4322_v41  ;;  %v4352_v47 = vld [vmem:[#allocation8 + $0x1e80] sm:$0xff]  ;;  %v4358_v30 = vld [vmem:[#allocation8 + $0x1eb0] sm:$0xff]  ;;  %v4361_v41 = vld [vmem:[#allocation8 + $0x1ec8] sm:$0xff] }
 0x478   : > { %7903 = vmatpush1.bf16.msra.mxu0 %v7902_v58  ;;  %6092 = vmatprep.mubr.f32.mxu1 %v3325_v43  ;;  %v7916_v58 = vpack.c.bf16 %v4333_v11, %v4329_v2  ;;  %v4328_v43 = vld [vmem:[#allocation8 + $0x1dc0] sm:$0xff]  ;;  %v4363_v38 = vld [vmem:[#allocation8 + $0x1ed8] sm:$0xff]  ;;  %v4362_v60 = vld [vmem:[#allocation8 + $0x1ed0] sm:$0xff] }
 0x479   : > { %8415 = vmatpush1.bf16.msra.mxu1 %v8414_v19  ;;  %7905 = vmatprep.subr.bf16.mxu0 %v7904_v45  ;;  %v4330_v19 = vld [vmem:[#allocation8 + $0x1dd0] sm:$0xff]  ;;  %v8428_v45 = vpack.c.bf16 %v4335_v54, %v4331_v32  ;;  %v7918_v20 = vpack.c.bf16 %v4332_v46, %v4328_v43  ;;  %v4367_v2 = vld [vmem:[#allocation8 + $0x1ef8] sm:$0xff]  ;;  %v8446_v46 = vpack.c.bf16 %v4366_v50, %v4362_v60 }
 0x47a   : > { %5189 = vmatmul.mubr.f32.gmra.mrb[72].mxu0 %v3324_v21  ;;  %8417 = vmatprep.subr.bf16.mxu1 %v8416_v55  ;;  %v4343_v55 = vld [vmem:[#allocation8 + $0x1e38] sm:$0xff]  ;;  %v8430_v25 = vpack.c.bf16 %v4334_v14, %v4330_v19  ;;  %v4372_v14 = vld [vmem:[#allocation8 + $0x1f20] sm:$0xff]  ;;  %v4370_v16 = vld [vmem:[#allocation8 + $0x1f10] sm:$0xff] }
 0x47b   : > { %6093 = vmatmul.mubr.f32.gmra.mrb[72].mxu1 %v3324_v21  ;;  %5194 = vmatprep.mubr.f32.mxu0 %v3341_v27  ;;  %v4336_v21 = vld [vmem:[#allocation8 + $0x1e00] sm:$0xff]  ;;  %v4395_v12 = vld [vmem:[#allocation8 + $0x1fd8] sm:$0xff] }
 0x47c   : > { %7907 = vmatpush1.bf16.msra.mxu0 %v7906_v35  ;;  %6098 = vmatprep.mubr.f32.mxu1 %v3341_v27  ;;  %v4338_v35 = vld [vmem:[#allocation8 + $0x1e10] sm:$0xff]  ;;  %v8432_v27 = vpack.c.bf16 %v4343_v55, %v4339_v24  ;;  %v7922_v59 = vpack.c.bf16 %v4340_v34, %v4336_v21  ;;  %v4377_v55 = vld [vmem:[#allocation8 + $0x1f48] sm:$0xff]  ;;  %v4376_v34 = vld [vmem:[#allocation8 + $0x1f40] sm:$0xff] }
 0x47d   : > { %8419 = vmatpush1.bf16.msra.mxu1 %v8418_v53  ;;  %7909 = vmatprep.subr.bf16.mxu0 %v7908_v51  ;;  %v4349_v53 = vld [vmem:[#allocation8 + $0x1e68] sm:$0xff]  ;;  %v4347_v51 = vld [vmem:[#allocation8 + $0x1e58] sm:$0xff]  ;;  %v8434_v39 = vpack.c.bf16 %v4342_v0, %v4338_v35  ;;  %v4374_v24 = vld [vmem:[#allocation8 + $0x1f30] sm:$0xff] }
 0x47e   : > { %5195 = vmatmul.mubr.f32.gmra.mrb[74].mxu0 %v3340_v15  ;;  %8421 = vmatprep.subr.bf16.mxu1 %v8420_v18  ;;  %v7924_v18 = vpack.c.bf16 %v4349_v53, %v4345_v36  ;;  %v8436_v10 = vpack.c.bf16 %v4351_v17, %v4347_v51  ;;  %v4380_v35 = vld [vmem:[#allocation8 + $0x1f60] sm:$0xff]  ;;  %v4382_v36 = vld [vmem:[#allocation8 + $0x1f70] sm:$0xff]  ;;  %v4385_v53 = vld [vmem:[#allocation8 + $0x1f88] sm:$0xff] }
 0x47f   : > { %6099 = vmatmul.mubr.f32.gmra.mrb[74].mxu1 %v3340_v15  ;;  %5200 = vmatprep.mubr.f32.mxu0 %v3357_v4  ;;  %v4357_v15 = vld [vmem:[#allocation8 + $0x1ea8] sm:$0xff]  ;;  %v4387_v17 = vld [vmem:[#allocation8 + $0x1f98] sm:$0xff] }
 0x480   : > { %7911 = vmatpush1.bf16.msra.mxu0 %v7910_v22  ;;  %6104 = vmatprep.mubr.f32.mxu1 %v3357_v4  ;;  %v7926_v22 = vpack.c.bf16 %v4348_v6, %v4344_v40  ;;  %v8438_v4 = vpack.c.bf16 %v4350_v37, %v4346_v5  ;;  %v7928_v57 = vpack.c.bf16 %v4357_v15, %v4353_v44  ;;  %v4389_v51 = vld [vmem:[#allocation8 + $0x1fa8] sm:$0xff]  ;;  %v4384_v6 = vld [vmem:[#allocation8 + $0x1f80] sm:$0xff]  ;;  %v4390_v44 = vld [vmem:[#allocation8 + $0x1fb0] sm:$0xff] }
 0x481   : > { %8423 = vmatpush1.bf16.msra.mxu1 %v8422_v52  ;;  %7913 = vmatprep.subr.bf16.mxu0 %v7912_v26  ;;  %v4356_v52 = vld [vmem:[#allocation8 + $0x1ea0] sm:$0xff]  ;;  %v4354_v26 = vld [vmem:[#allocation8 + $0x1e90] sm:$0xff]  ;;  %v7944_v40 = vpack.c.bf16 %v4389_v51, %v4385_v53  ;;  %v4393_v15 = vld [vmem:[#allocation8 + $0x1fc8] sm:$0xff] }
 0x482   : > { %5201 = vmatmul.mubr.f32.gmra.mrb[76].mxu0 %v3356_v42  ;;  %8425 = vmatprep.subr.bf16.mxu1 %v8424_v49  ;;  %v4365_v49 = vld [vmem:[#allocation8 + $0x1ee8] sm:$0xff]  ;;  %v7930_v11 = vpack.c.bf16 %v4356_v52, %v4352_v47  ;;  %v8442_v32 = vpack.c.bf16 %v4358_v30, %v4354_v26  ;;  %v4388_v5 = vld [vmem:[#allocation8 + $0x1fa0] sm:$0xff]  ;;  %v10690_v47 = vsub.s32 6, %v9917_v8 }
 0x483   : > { %6105 = vmatmul.mubr.f32.gmra.mrb[76].mxu1 %v3356_v42  ;;  %5206 = vmatprep.mubr.f32.mxu0 %v3373_v1  ;;  %v7932_v54 = vpack.c.bf16 %v4365_v49, %v4361_v41  ;;  %v4360_v42 = vld [vmem:[#allocation8 + $0x1ec0] sm:$0xff] }
 0x484   : > { %7915 = vmatpush1.bf16.msra.mxu0 %v7914_v61  ;;  %6110 = vmatprep.mubr.f32.mxu1 %v3373_v1  ;;  %v8444_v61 = vpack.c.bf16 %v4367_v2, %v4363_v38  ;;  %v4373_v1 = vld [vmem:[#allocation8 + $0x1f28] sm:$0xff]  ;;  %v7934_v43 = vpack.c.bf16 %v4364_v56, %v4360_v42  ;;  %v4392_v30 = vld [vmem:[#allocation8 + $0x1fc0] sm:$0xff]  ;;  %v4394_v38 = vld [vmem:[#allocation8 + $0x1fd0] sm:$0xff] }
 0x485   : > { %8427 = vmatpush1.bf16.msra.mxu1 %v8426_v23  ;;  %7917 = vmatprep.subr.bf16.mxu0 %v7916_v58  ;;  %v4371_v23 = vld [vmem:[#allocation8 + $0x1f18] sm:$0xff]  ;;  %v7936_v19 = vpack.c.bf16 %v4373_v1, %v4369_v63  ;;  %v4396_v41 = vld [vmem:[#allocation8 + $0x1fe0] sm:$0xff]  ;;  %v4398_v2 = vld [vmem:[#allocation8 + $0x1ff0] sm:$0xff] }
 0x486   : > { %5207 = vmatmul.mubr.f32.gmra.mrb[78].mxu0 %v3372_v7  ;;  %8429 = vmatprep.subr.bf16.mxu1 %v8428_v45  ;;  %v4375_v58 = vld [vmem:[#allocation8 + $0x1f38] sm:$0xff]  ;;  %v4368_v45 = vld [vmem:[#allocation8 + $0x1f00] sm:$0xff]  ;;  %v8462_v8 = vpack.c.bf16 %v4398_v2, %v4394_v38 }
 0x487   : > { %6111 = vmatmul.mubr.f32.gmra.mrb[78].mxu1 %v3372_v7  ;;  %5277 = vmatprep.mubr.f32.mxu0 %v3263_v9  ;;  %v8448_v62 = vpack.c.bf16 %v4375_v58, %v4371_v23  ;;  %v4381_v7 = vld [vmem:[#allocation8 + $0x1f68] sm:$0xff]  ;;  %v10692_v42 = vld [vmem:[#allocation27_spill] sm:$0xff] }
 0x488   : > { %7919 = vmatpush1.bf16.msra.mxu0 %v7918_v20  ;;  %6181 = vmatprep.mubr.f32.mxu1 %v3263_v9  ;;  %v4379_v20 = vld [vmem:[#allocation8 + $0x1f58] sm:$0xff]  ;;  %v7940_v21 = vpack.c.bf16 %v4381_v7, %v4377_v55  ;;  %v8579_v56 = vadd.f32 %v10692_v42, %v10362_v3  ;;  %v10702_v51 = vld [vmem:[#allocation64_spill] sm:$0xff] }
 0x489   : > { %8431 = vmatpush1.bf16.msra.mxu1 %v8430_v25  ;;  %7921 = vmatprep.subr.bf16.mxu0 %v7920_v48  ;;  %v4383_v9 = vld [vmem:[#allocation8 + $0x1f78] sm:$0xff]  ;;  %v7938_v25 = vpack.c.bf16 %v4372_v14, %v4368_v45  ;;  %v8450_v48 = vpack.c.bf16 %v4374_v24, %v4370_v16 }
 0x48a   : > { %8433 = vmatprep.subr.bf16.mxu1 %v8432_v27  ;;  %v4378_v27 = vld [vmem:[#allocation8 + $0x1f50] sm:$0xff]  ;;  %v8452_v0 = vpack.c.bf16 %v4383_v9, %v4379_v20  ;;  %v3279_v63 = vmax.f32 %v8579_v56, 0.0  ;;  %v10694_v1 = vld [vmem:[#allocation31_spill] sm:$0xff] }
 0x48b   : > { %v8581_v23 = vadd.f32 %v10694_v1, %v10362_v3  ;;  %v10696_v45 = vld [vmem:[#allocation35_spill] sm:$0xff] }
 0x48c   : > { %7923 = vmatpush1.bf16.msra.mxu0 %v7922_v59  ;;  %v4391_v59 = vld [vmem:[#allocation8 + $0x1fb8] sm:$0xff]  ;;  %v8583_v14 = vadd.f32 %v10696_v45, %v10362_v3 }
 0x48d   : > { %8435 = vmatpush1.bf16.msra.mxu1 %v8434_v39  ;;  %7925 = vmatprep.subr.bf16.mxu0 %v7924_v18  ;;  %v7942_v39 = vpack.c.bf16 %v4380_v35, %v4376_v34  ;;  %v8454_v18 = vpack.c.bf16 %v4382_v36, %v4378_v27  ;;  %v8456_v37 = vpack.c.bf16 %v4391_v59, %v4387_v17  ;;  %v10698_v7 = vld [vmem:[#allocation39_spill] sm:$0xff] }
 0x48e   : > { %8437 = vmatprep.subr.bf16.mxu1 %v8436_v10  ;;  %v4386_v10 = vld [vmem:[#allocation8 + $0x1f90] sm:$0xff]  ;;  %v3311_v55 = vmax.f32 %v8583_v14, 0.0  ;;  %v8585_v20 = vadd.f32 %v10698_v7, %v10362_v3  ;;  %v10700_v34 = vld [vmem:[#allocation43_spill] sm:$0xff]  ;;  %v8589_v17 = vadd.f32 %v10702_v51, %v10362_v3 }
 0x48f   : > { %v8458_v26 = vpack.c.bf16 %v4390_v44, %v4386_v10  ;;  %v8587_v35 = vadd.f32 %v10700_v34, %v10362_v3 }
 0x490   : > { %7927 = vmatpush1.bf16.msra.mxu0 %v7926_v22  ;;  %v4399_v22 = vld [vmem:[#allocation8 + $0x1ff8] sm:$0xff] }
 0x491   : > { %8439 = vmatpush1.bf16.msra.mxu1 %v8438_v4  ;;  %7929 = vmatprep.subr.bf16.mxu0 %v7928_v57  ;;  %v7946_v4 = vpack.c.bf16 %v4388_v5, %v4384_v6  ;;  %v9168_v57 = vld [vmem:[#allocation7 + $0x8] sm:$0xff]  ;;  %v8460_v49 = vpack.c.bf16 %v4399_v22, %v4395_v12  ;;  %v3343_v53 = vmax.f32 %v8587_v35, 0.0  ;;  %v10704_v6 = vld [vmem:[#allocation68_spill] sm:$0xff]  ;;  %v4400_v12 = vld [vmem:[#allocation10] sm:$0xf] }
 0x492   : > { %8441 = vmatprep.subr.bf16.mxu1 %v8440_v31  ;;  %v10374_v52 = vrot.slane %v9168_v57, %v10690_v47  ;;  %v7948_v31 = vpack.c.bf16 %v4397_v13, %v4393_v15  ;;  %v8591_v5 = vadd.f32 %v10704_v6, %v10362_v3  ;;  %v10407_v3 = vrot.slane %v4400_v12, %v9940_v28 }
 0x493   : > { %v10410_v22 = vrot.slane %v4400_v12, %v10666_v33  ;;  %v10416_v47 = vrot.slane %v4400_v12, %v9967_v29 }
 0x494   : > { %7931 = vmatpush1.bf16.msra.mxu0 %v7930_v11  ;;  %v7950_v11 = vpack.c.bf16 %v4396_v41, %v4392_v30  ;;  %v3375_v15 = vmax.f32 %v8591_v5, 0.0 }
 0x495   : > { %8443 = vmatpush1.bf16.msra.mxu1 %v8442_v32  ;;  %7933 = vmatprep.subr.bf16.mxu0 %v7932_v54  ;;  %v10691_v32 = vld [vmem:[#allocation18_spill] sm:$0xff] }
 0x496   : > { %8445 = vmatprep.subr.bf16.mxu1 %v8444_v61  ;;  %v8576_v54 = vadd.f32 %v10691_v32, %v10374_v52  ;;  %v10693_v61 = vld [vmem:[#allocation21_spill] sm:$0xff] }
 0x497   : > { %v8578_v50 = vadd.f32 %v10693_v61, %v10374_v52 }
 0x498   : > { %7935 = vmatpush1.bf16.msra.mxu0 %v7934_v43  ;;  %v3262_v60 = vmax.f32 %v8576_v54, 0.0  ;;  %v10695_v43 = vld [vmem:[#allocation25_spill] sm:$0xff] }
 0x499   : > { %8447 = vmatpush1.bf16.msra.mxu1 %v8446_v46  ;;  %7937 = vmatprep.subr.bf16.mxu0 %v7936_v19  ;;  %v3278_v58 = vmax.f32 %v8578_v50, 0.0  ;;  %v8580_v46 = vadd.f32 %v10695_v43, %v10374_v52  ;;  %v3295_v19 = vmax.f32 %v8581_v23, 0.0 }
 0x49a   : > { %8449 = vmatprep.subr.bf16.mxu1 %v8448_v62  ;;  %v10697_v62 = vld [vmem:[#allocation29_spill] sm:$0xff] }
 0x49b   : > { %v3294_v16 = vmax.f32 %v8580_v46, 0.0  ;;  %v8582_v24 = vadd.f32 %v10697_v62, %v10374_v52 }
 0x49c   : > { %7939 = vmatpush1.bf16.msra.mxu0 %v7938_v25  ;;  %v10699_v25 = vld [vmem:[#allocation33_spill] sm:$0xff] }
 0x49d   : > { %8451 = vmatpush1.bf16.msra.mxu1 %v8450_v48  ;;  %7941 = vmatprep.subr.bf16.mxu0 %v7940_v21  ;;  %v3310_v9 = vmax.f32 %v8582_v24, 0.0  ;;  %v8584_v48 = vadd.f32 %v10699_v25, %v10374_v52  ;;  %v3327_v21 = vmax.f32 %v8585_v20, 0.0 }
 0x49e   : > { %8453 = vmatprep.subr.bf16.mxu1 %v8452_v0  ;;  %v10701_v0 = vld [vmem:[#allocation37_spill] sm:$0xff] }
 0x49f   : > { %v3326_v27 = vmax.f32 %v8584_v48, 0.0  ;;  %v8586_v36 = vadd.f32 %v10701_v0, %v10374_v52 }
 0x4a0   : > { %7943 = vmatpush1.bf16.msra.mxu0 %v7942_v39  ;;  %v10703_v39 = vld [vmem:[#allocation17_spill] sm:$0xff] }
 0x4a1   : > { %8455 = vmatpush1.bf16.msra.mxu1 %v8454_v18  ;;  %7945 = vmatprep.subr.bf16.mxu0 %v7944_v40  ;;  %v3342_v59 = vmax.f32 %v8586_v36, 0.0  ;;  %v8588_v18 = vadd.f32 %v10703_v39, %v10374_v52  ;;  %v3359_v40 = vmax.f32 %v8589_v17, 0.0 }
 0x4a2   : > { %8457 = vmatprep.subr.bf16.mxu1 %v8456_v37  ;;  %v10705_v37 = vld [vmem:[#allocation66_spill] sm:$0xff] }
 0x4a3   : > { %v3358_v10 = vmax.f32 %v8588_v18, 0.0  ;;  %v8590_v44 = vadd.f32 %v10705_v37, %v10374_v52 }
 0x4a4   : > { %7947 = vmatpush1.bf16.msra.mxu0 %v7946_v4  ;;  %v10706_v4 = vld [vmem:[#allocation45_spill] sm:$0xff] }
 0x4a5   : > { %8459 = vmatpush1.bf16.msra.mxu1 %v8458_v26  ;;  %7949 = vmatprep.subr.bf16.mxu0 %v7948_v31  ;;  %v3374_v13 = vmax.f32 %v8590_v44, 0.0  ;;  %v10413_v57 = vrot.slane %v4400_v12, %v10706_v4 }
 0x4a6   : > { %8461 = vmatprep.subr.bf16.mxu1 %v8460_v49 }
 0x4a8   : > { %7951 = vmatpush1.bf16.msra.mxu0 %v7950_v11 }
 0x4a9   : > { %8463 = vmatpush1.bf16.msra.mxu1 %v8462_v8 }
 0x4ab   : > { %5278 = vmatmul.mubr.f32.vlgmr.msra.gmra.mrb[64].mxu0 %v3262_v60 }
 0x4ac   : > { %6182 = vmatmul.mubr.f32.vlgmr.msra.gmra.mrb[64].mxu1 %v3262_v60  ;;  %5283 = vmatprep.mubr.f32.mxu0 %v3279_v63 }
 0x4ad   : > { %6187 = vmatprep.mubr.f32.mxu1 %v3279_v63 }
 0x4af   : > { %5284 = vmatmul.mubr.f32.gmra.mrb[66].mxu0 %v3278_v58 }
 0x4b0   : > { %6188 = vmatmul.mubr.f32.gmra.mrb[66].mxu1 %v3278_v58  ;;  %5289 = vmatprep.mubr.f32.mxu0 %v3295_v19 }
 0x4b1   : > { %6193 = vmatprep.mubr.f32.mxu1 %v3295_v19 }
 0x4b3   : > { %5290 = vmatmul.mubr.f32.gmra.mrb[68].mxu0 %v3294_v16 }
 0x4b4   : > { %6194 = vmatmul.mubr.f32.gmra.mrb[68].mxu1 %v3294_v16  ;;  %5295 = vmatprep.mubr.f32.mxu0 %v3311_v55 }
 0x4b5   : > { %6199 = vmatprep.mubr.f32.mxu1 %v3311_v55 }
 0x4b7   : > { %5296 = vmatmul.mubr.f32.gmra.mrb[70].mxu0 %v3310_v9 }
 0x4b8   : > { %6200 = vmatmul.mubr.f32.gmra.mrb[70].mxu1 %v3310_v9  ;;  %5301 = vmatprep.mubr.f32.mxu0 %v3327_v21 }
 0x4b9   : > { %6205 = vmatprep.mubr.f32.mxu1 %v3327_v21 }
 0x4bb   : > { %5302 = vmatmul.mubr.f32.gmra.mrb[72].mxu0 %v3326_v27 }
 0x4bc   : > { %6206 = vmatmul.mubr.f32.gmra.mrb[72].mxu1 %v3326_v27  ;;  %5307 = vmatprep.mubr.f32.mxu0 %v3343_v53 }
 0x4bd   : > { %6211 = vmatprep.mubr.f32.mxu1 %v3343_v53 }
 0x4bf   : > { %5308 = vmatmul.mubr.f32.gmra.mrb[74].mxu0 %v3342_v59 }
 0x4c0   : > { %6212 = vmatmul.mubr.f32.gmra.mrb[74].mxu1 %v3342_v59  ;;  %5313 = vmatprep.mubr.f32.mxu0 %v3359_v40 }
 0x4c1   : > { %6217 = vmatprep.mubr.f32.mxu1 %v3359_v40 }
 0x4c3   : > { %5314 = vmatmul.mubr.f32.gmra.mrb[76].mxu0 %v3358_v10 }
 0x4c4   : > { %6218 = vmatmul.mubr.f32.gmra.mrb[76].mxu1 %v3358_v10  ;;  %5319 = vmatprep.mubr.f32.mxu0 %v3375_v15 }
 0x4c5   : > { %6223 = vmatprep.mubr.f32.mxu1 %v3375_v15 }
 0x4c7   : > { %5320 = vmatmul.mubr.f32.gmra.mrb[78].mxu0 %v3374_v13 }
 0x4c8   : > { %6224 = vmatmul.mubr.f32.gmra.mrb[78].mxu1 %v3374_v13 }
 0x57e   : > { %v5279_v52 = vpop.f32.mrb[64].mxu0 }
 0x57f   : > { %v8592_v26 = vadd.f32 %v5279_v52, %v10407_v3  ;;  %v6183_v31 = vpop.f32.mrb[64].mxu1  ;;  %v5281_v30 = vpop.f32.mrb[65].mxu0 }
 0x580   : > { %v8608_v41 = vadd.f32 %v6183_v31, %v10410_v22  ;;  %v8593_v49 = vadd.f32 %v5281_v30, %v10413_v57  ;;  %v6185_v28 = vpop.f32.mrb[65].mxu1 }
 0x581   : > { %6230 = vst [vmem:[%s10423_s24] sm:$0xff] %v8592_v26  ;;  %v8609_v29 = vadd.f32 %v6185_v28, %v10416_v47 }
 0x582   : > { %6232 = vst [vmem:[%s10423_s24 + $0x10] sm:$0xff] %v8608_v41  ;;  %6231 = vst [vmem:[%s10423_s24 + $0x8] sm:$0xff] %v8593_v49  ;;  %v5285_v33 = vpop.f32.mrb[66].mxu0 }
 0x583   : > { %6233 = vst [vmem:[%s10423_s24 + $0x18] sm:$0xff] %v8609_v29  ;;  %v8594_v38 = vadd.f32 %v5285_v33, %v10407_v3  ;;  %v6189_v2 = vpop.f32.mrb[66].mxu1  ;;  %v5287_v11 = vpop.f32.mrb[67].mxu0 }
 0x584   : > { %v8610_v32 = vadd.f32 %v6189_v2, %v10410_v22  ;;  %v8595_v54 = vadd.f32 %v5287_v11, %v10413_v57  ;;  %v6191_v8 = vpop.f32.mrb[67].mxu1 }
 0x585   : > { %6234 = vst [vmem:[%s10423_s24 + $0x20] sm:$0xff] %v8594_v38  ;;  %v8611_v42 = vadd.f32 %v6191_v8, %v10416_v47 }
 0x586   : > { %6236 = vst [vmem:[%s10423_s24 + $0x30] sm:$0xff] %v8610_v32  ;;  %6235 = vst [vmem:[%s10423_s24 + $0x28] sm:$0xff] %v8595_v54  ;;  %v5291_v56 = vpop.f32.mrb[68].mxu0 }
 0x587   : > { %6237 = vst [vmem:[%s10423_s24 + $0x38] sm:$0xff] %v8611_v42  ;;  %v8596_v60 = vadd.f32 %v5291_v56, %v10407_v3  ;;  %v6195_v61 = vpop.f32.mrb[68].mxu1  ;;  %v5293_v50 = vpop.f32.mrb[69].mxu0 }
 0x588   : > { %v8612_v63 = vadd.f32 %v6195_v61, %v10410_v22  ;;  %v8597_v1 = vadd.f32 %v5293_v50, %v10413_v57  ;;  %v6197_v23 = vpop.f32.mrb[69].mxu1 }
 0x589   : > { %6238 = vst [vmem:[%s10423_s24 + $0x40] sm:$0xff] %v8596_v60  ;;  %v8613_v58 = vadd.f32 %v6197_v23, %v10416_v47 }
 0x58a   : > { %6240 = vst [vmem:[%s10423_s24 + $0x50] sm:$0xff] %v8612_v63  ;;  %6239 = vst [vmem:[%s10423_s24 + $0x48] sm:$0xff] %v8597_v1  ;;  %v5297_v43 = vpop.f32.mrb[70].mxu0 }
 0x58b   : > { %6241 = vst [vmem:[%s10423_s24 + $0x58] sm:$0xff] %v8613_v58  ;;  %v8598_v46 = vadd.f32 %v5297_v43, %v10407_v3  ;;  %v6201_v19 = vpop.f32.mrb[70].mxu1  ;;  %v5299_v45 = vpop.f32.mrb[71].mxu0 }
 0x58c   : > { %v8614_v14 = vadd.f32 %v6201_v19, %v10410_v22  ;;  %v8599_v16 = vadd.f32 %v5299_v45, %v10413_v57  ;;  %v6203_v62 = vpop.f32.mrb[71].mxu1 }
 0x58d   : > { %6242 = vst [vmem:[%s10423_s24 + $0x60] sm:$0xff] %v8598_v46  ;;  %v8615_v24 = vadd.f32 %v6203_v62, %v10416_v47 }
 0x58e   : > { %6244 = vst [vmem:[%s10423_s24 + $0x70] sm:$0xff] %v8614_v14  ;;  %6243 = vst [vmem:[%s10423_s24 + $0x68] sm:$0xff] %v8599_v16  ;;  %v5303_v55 = vpop.f32.mrb[72].mxu0 }
 0x58f   : > { %6245 = vst [vmem:[%s10423_s24 + $0x78] sm:$0xff] %v8615_v24  ;;  %v8600_v7 = vadd.f32 %v5303_v55, %v10407_v3  ;;  %v6207_v20 = vpop.f32.mrb[72].mxu1  ;;  %v5305_v9 = vpop.f32.mrb[73].mxu0 }
 0x590   : > { %v8616_v25 = vadd.f32 %v6207_v20, %v10410_v22  ;;  %v8601_v48 = vadd.f32 %v5305_v9, %v10413_v57  ;;  %v6209_v21 = vpop.f32.mrb[73].mxu1 }
 0x591   : > { %6246 = vst [vmem:[%s10423_s24 + $0x80] sm:$0xff] %v8600_v7  ;;  %v8617_v34 = vadd.f32 %v6209_v21, %v10416_v47 }
 0x592   : > { %6248 = vst [vmem:[%s10423_s24 + $0x90] sm:$0xff] %v8616_v25  ;;  %6247 = vst [vmem:[%s10423_s24 + $0x88] sm:$0xff] %v8601_v48  ;;  %v5309_v35 = vpop.f32.mrb[74].mxu0 }
 0x593   : > { %6249 = vst [vmem:[%s10423_s24 + $0x98] sm:$0xff] %v8617_v34  ;;  %v8602_v27 = vadd.f32 %v5309_v35, %v10407_v3  ;;  %v6213_v0 = vpop.f32.mrb[74].mxu1  ;;  %v5311_v36 = vpop.f32.mrb[75].mxu0 }
 0x594   : > { %v8618_v53 = vadd.f32 %v6213_v0, %v10410_v22  ;;  %v8603_v51 = vadd.f32 %v5311_v36, %v10413_v57  ;;  %v6215_v17 = vpop.f32.mrb[75].mxu1 }
 0x595   : > { %6250 = vst [vmem:[%s10423_s24 + $0xa0] sm:$0xff] %v8602_v27  ;;  %v8619_v59 = vadd.f32 %v6215_v17, %v10416_v47 }
 0x596   : > { %6252 = vst [vmem:[%s10423_s24 + $0xb0] sm:$0xff] %v8618_v53  ;;  %6251 = vst [vmem:[%s10423_s24 + $0xa8] sm:$0xff] %v8603_v51  ;;  %v5315_v39 = vpop.f32.mrb[76].mxu0 }
 0x597   : > { %6253 = vst [vmem:[%s10423_s24 + $0xb8] sm:$0xff] %v8619_v59  ;;  %v8604_v18 = vadd.f32 %v5315_v39, %v10407_v3  ;;  %v6219_v40 = vpop.f32.mrb[76].mxu1  ;;  %v5317_v6 = vpop.f32.mrb[77].mxu0 }
 0x598   : > { %v8620_v5 = vadd.f32 %v6219_v40, %v10410_v22  ;;  %v8605_v10 = vadd.f32 %v5317_v6, %v10413_v57  ;;  %v6221_v37 = vpop.f32.mrb[77].mxu1 }
 0x599   : > { %6254 = vst [vmem:[%s10423_s24 + $0xc0] sm:$0xff] %v8604_v18  ;;  %v8621_v44 = vadd.f32 %v6221_v37, %v10416_v47 }
 0x59a   : > { %6256 = vst [vmem:[%s10423_s24 + $0xd0] sm:$0xff] %v8620_v5  ;;  %6255 = vst [vmem:[%s10423_s24 + $0xc8] sm:$0xff] %v8605_v10  ;;  %v5321_v15 = vpop.f32.mrb[78].mxu0 }
 0x59b   : > { %6257 = vst [vmem:[%s10423_s24 + $0xd8] sm:$0xff] %v8621_v44  ;;  %v8606_v13 = vadd.f32 %v5321_v15, %v10407_v3  ;;  %v6225_v12 = vpop.f32.mrb[78].mxu1  ;;  %v5323_v4 = vpop.f32.mrb[79].mxu0 }
 0x59c   : > { %v8622_v52 = vadd.f32 %v6225_v12, %v10410_v22  ;;  %v8607_v26 = vadd.f32 %v5323_v4, %v10413_v57  ;;  %v6227_v31 = vpop.f32.mrb[79].mxu1 }
 0x59d   : > { %6258 = vst [vmem:[%s10423_s24 + $0xe0] sm:$0xff] %v8606_v13  ;;  %v8623_v3 = vadd.f32 %v6227_v31, %v10416_v47 }
 0x59e   : > { %6260 = vst [vmem:[%s10423_s24 + $0xf0] sm:$0xff] %v8622_v52  ;;  %6259 = vst [vmem:[%s10423_s24 + $0xe8] sm:$0xff] %v8607_v26 }
 0x59f   : > { %6261 = vst [vmem:[%s10423_s24 + $0xf8] sm:$0xff] %v8623_v3 }
 0x5a0   : > { %9324 = shalt.err (!%p9321_p13)
}
 0x5a1   : > { %s9325_s17 = scalar_lea.hbm %s10486_s13, 4096  ;;  %s9329_s10 = scalar_lea.hbm %s10542_s5, 8192 }
 0x5a2   : > { %p9326_p9 = scmp.ne.s32.totalorder %s10486_s13, %s9325_s17  ;;  %p9330_p6 = scmp.lt.u32.totalorder %s10486_s13, %s10542_s5 }
 0x5a3   : > { %p9331_p10 = scmp.lt.u32.totalorder %s9329_s10, %s9325_s17  ;;  %p9333_p4 = scmp.lt.u32.totalorder %s9325_s17, %s10486_s13 }
 0x5a4   : > { %p9327_p0 = pnand %p9326_p9, %p9598_p8 }
 0x5a5   : > { %p9332_p3 = por %p9331_p10, %p9330_p6 }
 0x5a6   : > { %p9328_p11 = pneg %p9327_p0 }
 0x5a7   : > { %p9334_p5 = por %p9333_p4, %p9332_p3 }
 0x5a9   : > { %p9335_p7 = pnand %p9334_p5, %p9328_p11 }
 0x5ab   : > { %9338 = shalt.err (!%p9335_p7)
}
 0x5ac   : > { %s9397_s26 = smov 512   ;;  %s9398_s22 = smov 32  }
 0x5ad   : > { %8994 = dma.vmem_to_hbm [thread:$0]  (%p9598_p8), %s10488_s14, 4096, %s10486_s13, %s6263_s27, %s9397_s26, %s9397_s26, %s9398_s22  }
 0x5ae PF: > { %s6292_s15 = sand.u32 1, %s9373_s18   ;;  %p10707_p12 = scmp.ne.s32.totalorder %s10555_s25, 0 }
 0x5af   : > { %p10708_p2 = scmp.ge.s32.totalorder %s9385_s21, 2  ;;  %s6293_s16 = scalar_lea.sflag [#allocation4], %s6292_s15 }
 0x5b1   : > { %p9014_p1 = pnand %p10708_p2, %p10707_p12 }
 0x5b3   : > { %9368 = dma.done.wait (!%p9014_p1), %s6293_s16, 4096  }
 0x5b4   : > { %9370 = vsyncadd (!%p9014_p1), %s6293_s16, 4294963200  ;;  %p20_p13 = scmp.ge.s32.totalorder %s9585_s12, 4   ;;  %s10709_s18 = smov %s9377_s19 }
 0x5b5   : > { %s10710_s19 = smov %s9381_s20  ;;  %s10711_s20 = smov %s9594_s23 }
 0x5b6   : > { %s10712_s21 = smov %s9585_s12  ;;  %22 = sbr.rel (!%p20_p13) target bundleno = 7 (0x7), region = 101 }
 0x5bd   :  { %6298 = vsyncpa [#allocation3], 1 }
 0x5be   :  { %6300 = vsyncpa [#allocation3 + $0x1], 1 }
 0x5bf   :  { %6301 = vsyncpa [#allocation6], 1 }
 0x5c0   :  { %6302 = vsyncpa [#allocation9], 1 }
 0x5c1   :  { %6303 = vsyncpa [#allocation4], 1 }
 0x5c2   :  { %6305 = vsyncpa [#allocation4 + $0x1], 1 }

</bundles_post_ra>
